<compile_context>
chip_gen: v7x
topology: tpu7x:2x2x1
jax: 0.10.0
libtpu: 0.0.40
codegen_flags: <defaults>
</compile_context>

<pallas_src>
import math
import functools

import jax
import jax.numpy as jnp
from jax import lax
from jax.experimental import pallas as pl
from jax.experimental.pallas import tpu as pltpu


# -----------------------------------------------------------------------------
# Kernel 1: ConvTranspose2d(k=2, s=2) of the bottleneck as a single GEMM (+ bias)
# (pixel shuffle of the (dy,dx) quadrants is a tiny XLA reshape/transpose outside)
# -----------------------------------------------------------------------------
def _upsample_gemm_kernel(x_ref, w_ref, b_ref, o_ref):
    x = x_ref[0].astype(jnp.bfloat16)                        # (H*W, Cin)
    y = jnp.dot(x, w_ref[...], preferred_element_type=jnp.float32)
    o_ref[0] = y + b_ref[...]                                # (H*W, 4*Cup)


def pallas_upsample_gemm(x, w, b):
    """x:(N,H,W,Cin), w:(2,2,Cin,Cup) HWIO, b:(Cup,) -> (N,H*W,4*Cup), cols (dy,dx,C)."""
    N, H, W, Cin = x.shape
    Cup = w.shape[-1]
    x2 = x.reshape(N, H * W, Cin)
    wf = jnp.transpose(w, (2, 0, 1, 3)).reshape(Cin, 4 * Cup).astype(jnp.bfloat16)
    bf = jnp.tile(b, 4).reshape(1, 4 * Cup).astype(jnp.float32)
    return pl.pallas_call(
        _upsample_gemm_kernel,
        out_shape=jax.ShapeDtypeStruct((N, H * W, 4 * Cup), jnp.float32),
        grid=(N,),
        in_specs=[
            pl.BlockSpec((1, H * W, Cin), lambda n: (n, 0, 0)),
            pl.BlockSpec((Cin, 4 * Cup), lambda n: (0, 0)),
            pl.BlockSpec((1, 4 * Cup), lambda n: (0, 0)),
        ],
        out_specs=pl.BlockSpec((1, H * W, 4 * Cup), lambda n: (n, 0, 0)),
        compiler_params=pltpu.CompilerParams(dimension_semantics=("parallel",)),
    )(x2, wf, bf)


def _pixel_shuffle(y, H, W, Cup):
    """(N, H*W, 4*Cup) with cols (dy,dx,C) -> (N, 2H, 2W, Cup). Tiny XLA op."""
    N = y.shape[0]
    y = y.reshape(N, H, W, 2, 2, Cup).transpose(0, 1, 3, 2, 4, 5)
    return y.reshape(N, 2 * H, 2 * W, Cup)


# -----------------------------------------------------------------------------
# Kernel 2: fused decoder block
#   (concat|add skip) -> conv3x3+BN+ReLU -> conv3x3+BN+ReLU -> tail
#   tail = next block's ConvTranspose GEMM  (tail_out=False)
#        | final out_block 3x3 conv         (tail_out=True)
#
# Flat padded-row conv scheme:
#   scratch f has ROWS = (HH+4)*WW rows, C lanes (bf16); the image is stored at
#   rows [2*WW, 2*WW + HH*WW) in (i,j) row-major order, rows [0, 2*WW) and
#   [2*WW+M, ROWS) are the zero halo.  Output pixel b = i*WW + j for tap (ky,kx)
#   reads flat row b + (ky+1)*WW + kx - 1, a contiguous slice of M rows.  The
#   horizontal wrap (j-1 at j=0, j+1 at j=WW-1) is zeroed with two column masks.
# -----------------------------------------------------------------------------
def _block_kernel(xu_ref, h_ref, w1_ref, a1_ref, w2_ref, a2_ref,
                  tw_ref, ta_ref, o_ref, *scratch,
                  HH, WW, concat, tail_out):
    M = HH * WW
    OFF = 2 * WW                      # first interior row of the flat scratch

    if tail_out:
        f1, f2, f3 = scratch
    else:
        f1, f2 = scratch

    # column-edge masks for the left/right wrap of the flat layout
    col = lax.broadcasted_iota(jnp.int32, (M, 1), 0) % WW
    left_ok = col != 0
    right_ok = col != (WW - 1)

    def zero_halo(f):
        c = f.shape[-1]
        f[pl.ds(0, OFF), :] = jnp.zeros((OFF, c), f.dtype)
        f[pl.ds(OFF + M, 2 * WW), :] = jnp.zeros((2 * WW, c), f.dtype)

    def conv3x3(f, w_ref):
        cout = w_ref.shape[-1]
        acc = jnp.zeros((M, cout), jnp.float32)
        for ky in range(3):
            for kx in range(3):
                start = (ky + 1) * WW + (kx - 1)          # contiguous row slice
                d = jnp.dot(f[pl.ds(start, M), :], w_ref[ky * 3 + kx],
                            preferred_element_type=jnp.float32)
                if kx == 0:
                    d = jnp.where(left_ok, d, 0.0)
                elif kx == 2:
                    d = jnp.where(right_ok, d, 0.0)
                acc = acc + d
        return acc

    # --- stage 0: conv1 source = concat(xu, h) or (xu + h), written once as bf16 ---
    xu = xu_ref[0].reshape(M, xu_ref.shape[-1])
    hh = h_ref[0].reshape(M, h_ref.shape[-1])
    zero_halo(f1)
    if concat:
        src1 = jnp.concatenate([xu.astype(f1.dtype), hh.astype(f1.dtype)], axis=-1)
    else:
        src1 = (xu + hh).astype(f1.dtype)                 # add in f32, cast once
    f1[pl.ds(OFF, M), :] = src1

    # --- conv1 + BN + ReLU ---
    y1 = conv3x3(f1, w1_ref)
    y1 = jnp.maximum(y1 * a1_ref[0:1, :] + a1_ref[1:2, :], 0.0)

    # --- conv2 + BN + ReLU (conv1 output never leaves VMEM) ---
    zero_halo(f2)
    f2[pl.ds(OFF, M), :] = y1.astype(f2.dtype)
    y2 = conv3x3(f2, w2_ref)
    y2 = jnp.maximum(y2 * a2_ref[0:1, :] + a2_ref[1:2, :], 0.0)

    if tail_out:
        # tail = out_block: Conv2d(k=3, pad=1), bias, no ReLU
        zero_halo(f3)
        f3[pl.ds(OFF, M), :] = y2.astype(f3.dtype)
        y3 = conv3x3(f3, tw_ref)
        o_ref[0] = y3 * ta_ref[0:1, :] + ta_ref[1:2, :]
    else:
        # tail = next block's ConvTranspose2d(2,2,s=2) as one GEMM (+ bias);
        # the (dy,dx) pixel shuffle happens in the XLA wrapper.
        up = jnp.dot(y2.astype(jnp.bfloat16), tw_ref[...],
                     preferred_element_type=jnp.float32)
        o_ref[0] = up + ta_ref[...]


def _affine(bias, bn_scale, bn_shift, C):
    """Pack fused epilogue y = acc*scale + shift as a (2, C) f32 array."""
    if bn_scale is None:
        scale = jnp.ones((C,), jnp.float32)
        shift = bias.astype(jnp.float32)
    else:
        scale = bn_scale.astype(jnp.float32)
        shift = (bias * bn_scale + bn_shift).astype(jnp.float32)
    return jnp.stack([scale, shift], axis=0)


def pallas_fused_block(xu, h, blk, tail_kind, tail_w, tail_a, *, concat_hidden):
    """One fused decoder block. xu,h:(N,HH,WW,C*); tail_kind in {"up","out"}."""
    N, HH, WW, Cx = xu.shape
    Ch = h.shape[-1]
    w1 = blk["c1_w"]                       # (3,3,Cin1,Cmid) HWIO
    Cmid = w1.shape[-1]
    w2 = blk["c2_w"]                       # (3,3,Cmid,Cout)
    Cout = w2.shape[-1]

    Cs = Cx + Ch if concat_hidden else Cx  # conv1 input channels
    w1f = w1.reshape(9, Cs, Cmid)          # (tap, Cin1, Cmid); concat order = [xu, h]
    a1 = _affine(blk["c1_b"], blk["bn1_scale"], blk["bn1_shift"], Cmid)
    a2 = _affine(blk["c2_b"], blk["bn2_scale"], blk["bn2_shift"], Cout)

    ROWS = (HH + 4) * WW
    tail_out = tail_kind == "out"
    Ctail = tail_w.shape[-1]
    if tail_out:
        tw_spec = pl.BlockSpec((9, Cout, Ctail), lambda n: (0, 0, 0))
        ta_spec = pl.BlockSpec((2, Ctail), lambda n: (0, 0))
        scratch = [pltpu.VMEM((ROWS, Cs), jnp.bfloat16),
                   pltpu.VMEM((ROWS, Cmid), jnp.bfloat16),
                   pltpu.VMEM((ROWS, Cout), jnp.bfloat16)]
    else:
        tw_spec = pl.BlockSpec((Cout, Ctail), lambda n: (0, 0))
        ta_spec = pl.BlockSpec((1, Ctail), lambda n: (0, 0))
        scratch = [pltpu.VMEM((ROWS, Cs), jnp.bfloat16),
                   pltpu.VMEM((ROWS, Cmid), jnp.bfloat16)]

    kernel = functools.partial(_block_kernel, HH=HH, WW=WW,
                               concat=concat_hidden, tail_out=tail_out)
    return pl.pallas_call(
        kernel,
        out_shape=jax.ShapeDtypeStruct((N, HH * WW, Ctail), jnp.float32),
        grid=(N,),
        in_specs=[
            pl.BlockSpec((1, HH, WW, Cx), lambda n: (n, 0, 0, 0)),
            pl.BlockSpec((1, HH, WW, Ch), lambda n: (n, 0, 0, 0)),
            pl.BlockSpec((9, Cs, Cmid), lambda n: (0, 0, 0)),
            pl.BlockSpec((2, Cmid), lambda n: (0, 0)),
            pl.BlockSpec((9, Cmid, Cout), lambda n: (0, 0, 0)),
            pl.BlockSpec((2, Cout), lambda n: (0, 0)),
            tw_spec, ta_spec,
        ],
        out_specs=pl.BlockSpec((1, HH * WW, Ctail), lambda n: (n, 0, 0)),
        scratch_shapes=scratch,
        compiler_params=pltpu.CompilerParams(dimension_semantics=("parallel",)),
    )(xu, h, w1f.astype(jnp.bfloat16), a1,
      w2.reshape(9, Cmid, Cout).astype(jnp.bfloat16), a2,
      tail_w.astype(jnp.bfloat16), tail_a)


# -----------------------------------------------------------------------------
# center_pad (same semantics as the torch helper, offset=0), on H/W of NHWC
# -----------------------------------------------------------------------------
def center_pad_hw(x, size_hw):
    out = x
    for axis, target in zip((1, 2), size_hw):
        cur = out.shape[axis]
        diff = target - cur
        lo = math.floor(diff / 2)
        hi = diff - lo  # == ceil(diff / 2)
        start = -lo if lo < 0 else 0
        stop = cur + hi if hi < 0 else cur
        out = lax.slice_in_dim(out, start, stop, axis=axis)
        pad_lo, pad_hi = max(lo, 0), max(hi, 0)
        if pad_lo or pad_hi:
            cfg = [(0, 0)] * out.ndim
            cfg[axis] = (pad_lo, pad_hi)
            out = jnp.pad(out, cfg)
    return out


# -----------------------------------------------------------------------------
# Pure-JAX reference (same bf16-operand / f32-accumulate numerics as the kernels)
# -----------------------------------------------------------------------------
def ref_upsample2x(x, w, b):
    N, H, W, Cin = x.shape
    Cup = w.shape[-1]
    y = jnp.einsum("nhwc,ijcd->nhiwjd",
                   x.astype(jnp.bfloat16), w.astype(jnp.bfloat16),
                   preferred_element_type=jnp.float32)
    return y.reshape(N, 2 * H, 2 * W, Cup) + b


def ref_conv3x3(x, w, bias, bn_scale=None, bn_shift=None, *, relu=False):
    y = lax.conv_general_dilated(
        x.astype(jnp.bfloat16), w.astype(jnp.bfloat16),
        window_strides=(1, 1), padding="SAME",
        dimension_numbers=("NHWC", "HWIO", "NHWC"),
        preferred_element_type=jnp.float32) + bias
    if bn_scale is not None:
        y = y * bn_scale + bn_shift
    if relu:
        y = jnp.maximum(y, 0.0)
    return y


def ref_block(xu, h, blk, *, concat_hidden):
    x = jnp.concatenate([xu, h], axis=-1) if concat_hidden else xu + h
    x = ref_conv3x3(x, blk["c1_w"], blk["c1_b"], blk["bn1_scale"], blk["bn1_shift"], relu=True)
    x = ref_conv3x3(x, blk["c2_w"], blk["c2_b"], blk["bn2_scale"], blk["bn2_shift"], relu=True)
    return x


# -----------------------------------------------------------------------------
# Decoder forward (mirrors UNetDecoder.forward)
# -----------------------------------------------------------------------------
def unet_decoder_forward(params, x_nchw, hidden_states_nchw, *,
                         concat_hidden=True, use_pallas=True):
    x = jnp.transpose(x_nchw, (0, 2, 3, 1)).astype(jnp.float32)
    hiddens = [jnp.transpose(h, (0, 2, 3, 1)).astype(jnp.float32)
               for h in hidden_states_nchw]
    blocks = params["blocks"]
    hs = list(reversed(hiddens))

    if not use_pallas:
        out = x
        for blk, h in zip(blocks, hs):
            xu = ref_upsample2x(out, blk["up_w"], blk["up_b"])
            hh = center_pad_hw(h, (xu.shape[1], xu.shape[2]))
            out = ref_block(xu, hh, blk, concat_hidden=concat_hidden)
        out = ref_conv3x3(out, params["out_w"], params["out_b"], None, None, relu=False)
        return jnp.transpose(out, (0, 3, 1, 2))

    nb = len(blocks)
    assert nb >= 1  # TODO(synk): zero-block (out_block only) Pallas path not implemented.

    # Head: first block's ConvTranspose as one GEMM kernel + tiny XLA pixel shuffle.
    up = pallas_upsample_gemm(x, blocks[0]["up_w"], blocks[0]["up_b"])
    xu = _pixel_shuffle(up, x.shape[1], x.shape[2], blocks[0]["up_w"].shape[-1])

    out = None
    for bi, blk in enumerate(blocks):
        HH, WW = xu.shape[1], xu.shape[2]
        hh = center_pad_hw(hs[bi], (HH, WW))                  # center_pad(h, x.shape[2:])
        if bi == nb - 1:
            # last block: fuse out_block's 3x3 conv as the kernel tail
            cin_out, ncls = params["out_w"].shape[2], params["out_w"].shape[3]
            tail_w = params["out_w"].reshape(9, cin_out, ncls)
            tail_a = _affine(params["out_b"], None, None, ncls)
            res = pallas_fused_block(xu, hh, blk, "out", tail_w, tail_a,
                                     concat_hidden=concat_hidden)
            out = res.reshape(res.shape[0], HH, WW, ncls)
        else:
            # fuse the NEXT block's ConvTranspose GEMM as the kernel tail
            nxt = blocks[bi + 1]
            cinn, cupn = nxt["up_w"].shape[2], nxt["up_w"].shape[3]
            tail_w = jnp.transpose(nxt["up_w"], (2, 0, 1, 3)).reshape(cinn, 4 * cupn)
            tail_a = jnp.tile(nxt["up_b"], 4).reshape(1, 4 * cupn).astype(jnp.float32)
            res = pallas_fused_block(xu, hh, blk, "up", tail_w, tail_a,
                                     concat_hidden=concat_hidden)
            xu = _pixel_shuffle(res, HH, WW, cupn)

    return jnp.transpose(out, (0, 3, 1, 2))


# -----------------------------------------------------------------------------
# Deterministic parameter construction
# -----------------------------------------------------------------------------
def init_params(key, block_dims, out_channels, *, batch_norm=True,
                concat_hidden=True, eps=1e-5):
    def nrm(k, shape, s):
        return (s * jax.random.normal(k, shape)).astype(jnp.float32)

    def bn_affine(k, ch):
        kg, kb, km, kv = jax.random.split(k, 4)
        gamma = 1.0 + 0.1 * jax.random.normal(kg, (ch,))
        beta = 0.1 * jax.random.normal(kb, (ch,))
        mean = 0.1 * jax.random.normal(km, (ch,))
        var = 1.0 + 0.5 * jax.random.uniform(kv, (ch,))
        scale = gamma / jnp.sqrt(var + eps)
        shift = beta - mean * scale
        return scale.astype(jnp.float32), shift.astype(jnp.float32)

    params = {"blocks": []}
    for channels in block_dims[1:]:
        cin, cmid, cout = channels
        up_out = cin // 2
        conv_in = 2 * up_out if concat_hidden else up_out
        key, k0, k1, k2, k3, k4, k5, k6, k7 = jax.random.split(key, 9)
        blk = {
            "up_w": nrm(k0, (2, 2, cin, up_out), 0.2),   # ConvTranspose2d weight (HWIO)
            "up_b": nrm(k1, (up_out,), 0.1),
            "c1_w": nrm(k2, (3, 3, conv_in, cmid), 0.15),
            "c1_b": nrm(k3, (cmid,), 0.1),
            "c2_w": nrm(k4, (3, 3, cmid, cout), 0.15),
            "c2_b": nrm(k5, (cout,), 0.1),
        }
        if batch_norm:
            blk["bn1_scale"], blk["bn1_shift"] = bn_affine(k6, cmid)
            blk["bn2_scale"], blk["bn2_shift"] = bn_affine(k7, cout)
        else:
            blk["bn1_scale"] = blk["bn1_shift"] = None
            blk["bn2_scale"] = blk["bn2_shift"] = None
        params["blocks"].append(blk)

    key, kw, kb = jax.random.split(key, 3)
    params["out_w"] = nrm(kw, (3, 3, block_dims[-1][-1], out_channels), 0.15)
    params["out_b"] = nrm(kb, (out_channels,), 0.1)
    return params


if __name__ == "__main__":
    key = jax.random.PRNGKey(0)
    kp, kx, kh0, kh1 = jax.random.split(key, 4)

    # Decoder config: block_dims[1:] are (in, mid, out) channel triples per block.
    block_dims = ((32,), (32, 16, 16), (16, 8, 8))
    out_channels = 3
    params = init_params(kp, block_dims, out_channels,
                         batch_norm=True, concat_hidden=True)

    # Inputs in PyTorch NCHW convention.
    x = jax.random.normal(kx, (2, 32, 4, 4), jnp.float32)       # bottleneck features
    hidden_states = [
        jax.random.normal(kh0, (2, 8, 17, 17), jnp.float32),    # 2nd block skip (cropped to 16x16)
        jax.random.normal(kh1, (2, 16, 9, 9), jnp.float32),     # 1st block skip (cropped to 8x8)
    ]

    fwd_pallas = jax.jit(functools.partial(unet_decoder_forward,
                                           concat_hidden=True, use_pallas=True))
    fwd_ref = jax.jit(functools.partial(unet_decoder_forward,
                                        concat_hidden=True, use_pallas=False))

    out = jax.block_until_ready(fwd_pallas(params, x, hidden_states))
    assert out.shape == (2, 3, 16, 16), out.shape

    ref = jax.block_until_ready(fwd_ref(params, x, hidden_states))
    assert jnp.allclose(out, ref, rtol=1e-2, atol=1e-2), \
        float(jnp.max(jnp.abs(out - ref)))

    print("KERNEL_OK")
</pallas_src>

<mosaic_0001>
module attributes {stable_mosaic.version = 11 : i64} {
  func.func @_upsample_gemm_kernel(%arg0: i32, %arg1: memref<1x16x32xf32, #tpu.memory_space<vmem>>, %arg2: memref<32x64xbf16, #tpu.memory_space<vmem>>, %arg3: memref<1x64xf32, #tpu.memory_space<vmem>>, %arg4: memref<1x16x64xf32, #tpu.memory_space<vmem>>) attributes {dimension_semantics = [#tpu.dimension_semantics<parallel>], iteration_bounds = array<i64: 2>, scalar_prefetch = 0 : i64, scratch_operands = 0 : i64, tpu.core_type = #tpu.core_type<tc>, window_params = [{transform_indices = @transform_0, window_bounds = array<i64: 1, 16, 32>}, {pipeline_mode = #tpu.pipeline_mode<synchronous>, transform_indices = @transform_1, window_bounds = array<i64: 32, 64>}, {pipeline_mode = #tpu.pipeline_mode<synchronous>, transform_indices = @transform_2, window_bounds = array<i64: 1, 64>}, {transform_indices = @transform_3, window_bounds = array<i64: 1, 16, 64>}]} {
    %c0 = arith.constant 0 : index
    %c0_0 = arith.constant 0 : index
    %c0_1 = arith.constant 0 : index
    %0 = vector.load %arg1[%c0, %c0_0, %c0_1] : memref<1x16x32xf32, #tpu.memory_space<vmem>>, vector<1x16x32xf32>
    %1 = vector.shape_cast %0 : vector<1x16x32xf32> to vector<16x32xf32>
    %2 = arith.truncf %1 : vector<16x32xf32> to vector<16x32xbf16>
    %c0_2 = arith.constant 0 : index
    %c0_3 = arith.constant 0 : index
    %3 = vector.load %arg2[%c0_2, %c0_3] : memref<32x64xbf16, #tpu.memory_space<vmem>>, vector<32x64xbf16>
    %cst = arith.constant dense<0.000000e+00> : vector<16x64xf32>
    %4 = tpu.matmul %2, %3, %cst {dimension_numbers = #tpu.dot_dimension_numbers<[1], [0], [0], [1], [0, 0, 1, 1], [], []>} : vector<16x32xbf16>, vector<32x64xbf16>, vector<16x64xf32> -> vector<16x64xf32>
    %c0_4 = arith.constant 0 : index
    %c0_5 = arith.constant 0 : index
    %5 = vector.load %arg3[%c0_4, %c0_5] : memref<1x64xf32, #tpu.memory_space<vmem>>, vector<1x64xf32>
    %6 = vector.broadcast %5 : vector<1x64xf32> to vector<16x64xf32>
    %7 = arith.addf %4, %6 : vector<16x64xf32>
    %c0_6 = arith.constant 0 : index
    %c0_7 = arith.constant 0 : index
    %c0_8 = arith.constant 0 : index
    %8 = vector.load %arg4[%c0_6, %c0_7, %c0_8] : memref<1x16x64xf32, #tpu.memory_space<vmem>>, vector<1x16x64xf32>
    %9 = vector.shape_cast %8 : vector<1x16x64xf32> to vector<16x64xf32>
    %10 = vector.shape_cast %7 : vector<16x64xf32> to vector<1x16x64xf32>
    tpu.vector_store %arg4[%c0_6, %c0_7, %c0_8], %10 {strides = array<i32>} : memref<1x16x64xf32, #tpu.memory_space<vmem>>, vector<1x16x64xf32>,
    return
  }
  func.func @transform_0(%arg0: i32) -> (i32, i32, i32) {
    %c0_i32 = arith.constant 0 : i32
    %c0_i32_0 = arith.constant 0 : i32
    %c0_i32_1 = arith.constant 0 : i32
    return %arg0, %c0_i32, %c0_i32_0 : i32, i32, i32
  }
  func.func @transform_1(%arg0: i32) -> (i32, i32) {
    %c0_i32 = arith.constant 0 : i32
    %c0_i32_0 = arith.constant 0 : i32
    %c0_i32_1 = arith.constant 0 : i32
    return %c0_i32, %c0_i32_0 : i32, i32
  }
  func.func @transform_2(%arg0: i32) -> (i32, i32) {
    %c0_i32 = arith.constant 0 : i32
    %c0_i32_0 = arith.constant 0 : i32
    %c0_i32_1 = arith.constant 0 : i32
    return %c0_i32, %c0_i32_0 : i32, i32
  }
  func.func @transform_3(%arg0: i32) -> (i32, i32, i32) {
    %c0_i32 = arith.constant 0 : i32
    %c0_i32_0 = arith.constant 0 : i32
    %c0_i32_1 = arith.constant 0 : i32
    return %arg0, %c0_i32, %c0_i32_0 : i32, i32, i32
  }
}

module attributes {stable_mosaic.version = 11 : i64} {
  func.func @_block_kernel(%arg0: i32, %arg1: memref<1x8x8x16xf32, #tpu.memory_space<vmem>>, %arg2: memref<1x8x8x16xf32, #tpu.memory_space<vmem>>, %arg3: memref<9x32x16xbf16, #tpu.memory_space<vmem>>, %arg4: memref<2x16xf32, #tpu.memory_space<vmem>>, %arg5: memref<9x16x16xbf16, #tpu.memory_space<vmem>>, %arg6: memref<2x16xf32, #tpu.memory_space<vmem>>, %arg7: memref<16x32xbf16, #tpu.memory_space<vmem>>, %arg8: memref<1x32xf32, #tpu.memory_space<vmem>>, %arg9: memref<1x64x32xf32, #tpu.memory_space<vmem>>, %arg10: memref<96x32xbf16, #tpu.memory_space<vmem>>, %arg11: memref<96x16xbf16, #tpu.memory_space<vmem>>) attributes {dimension_semantics = [#tpu.dimension_semantics<parallel>], iteration_bounds = array<i64: 2>, scalar_prefetch = 0 : i64, scratch_operands = 2 : i64, tpu.core_type = #tpu.core_type<tc>, window_params = [{transform_indices = @transform_0, window_bounds = array<i64: 1, 8, 8, 16>}, {transform_indices = @transform_1, window_bounds = array<i64: 1, 8, 8, 16>}, {pipeline_mode = #tpu.pipeline_mode<synchronous>, transform_indices = @transform_2, window_bounds = array<i64: 9, 32, 16>}, {pipeline_mode = #tpu.pipeline_mode<synchronous>, transform_indices = @transform_3, window_bounds = array<i64: 2, 16>}, {pipeline_mode = #tpu.pipeline_mode<synchronous>, transform_indices = @transform_4, window_bounds = array<i64: 9, 16, 16>}, {pipeline_mode = #tpu.pipeline_mode<synchronous>, transform_indices = @transform_5, window_bounds = array<i64: 2, 16>}, {pipeline_mode = #tpu.pipeline_mode<synchronous>, transform_indices = @transform_6, window_bounds = array<i64: 16, 32>}, {pipeline_mode = #tpu.pipeline_mode<synchronous>, transform_indices = @transform_7, window_bounds = array<i64: 1, 32>}, {transform_indices = @transform_8, window_bounds = array<i64: 1, 64, 32>}]} {
    %0 = tpu.iota {dimensions = array<i32: 0>} : vector<64x1xi32>
    %c8_i32 = arith.constant 8 : i32
    %c0_i32 = arith.constant 0 : i32
    %1 = arith.cmpi eq, %c8_i32, %c0_i32 : i32
    %c1_i32 = arith.constant 1 : i32
    %2 = arith.select %1, %c1_i32, %c8_i32 : i32
    %3 = vector.broadcast %2 : i32 to vector<64x1xi32>
    %4 = arith.remsi %0, %3 : vector<64x1xi32>
    %c0_i32_0 = arith.constant 0 : i32
    %5 = vector.broadcast %c0_i32_0 : i32 to vector<64x1xi32>
    %6 = arith.cmpi ne, %4, %5 : vector<64x1xi32>
    %c0_i32_1 = arith.constant 0 : i32
    %7 = vector.broadcast %c0_i32_1 : i32 to vector<64x1xi32>
    %8 = arith.cmpi slt, %4, %7 : vector<64x1xi32>
    %c0_i32_2 = arith.constant 0 : i32
    %9 = arith.cmpi slt, %2, %c0_i32_2 : i32
    %10 = vector.broadcast %9 : i1 to vector<64x1xi1>
    %11 = vector.broadcast %10 : vector<64x1xi1> to vector<64x1xi1>
    %12 = arith.xori %8, %11 : vector<64x1xi1>
    %13 = arith.andi %12, %6 : vector<64x1xi1>
    %14 = vector.broadcast %2 : i32 to vector<64x1xi32>
    %15 = arith.addi %4, %14 : vector<64x1xi32>
    %16 = arith.select %13, %15, %4 : vector<64x1xi1>, vector<64x1xi32>
    %c0_i32_3 = arith.constant 0 : i32
    %17 = vector.broadcast %c0_i32_3 : i32 to vector<64x1xi32>
    %18 = arith.cmpi ne, %16, %17 : vector<64x1xi32>
    %c7_i32 = arith.constant 7 : i32
    %19 = vector.broadcast %c7_i32 : i32 to vector<64x1xi32>
    %20 = arith.cmpi ne, %16, %19 : vector<64x1xi32>
    %c0 = arith.constant 0 : index
    %c0_4 = arith.constant 0 : index
    %c0_5 = arith.constant 0 : index
    %c0_6 = arith.constant 0 : index
    %21 = vector.load %arg1[%c0, %c0_4, %c0_5, %c0_6] : memref<1x8x8x16xf32, #tpu.memory_space<vmem>>, vector<1x8x8x16xf32>
    %22 = vector.shape_cast %21 : vector<1x8x8x16xf32> to vector<8x8x16xf32>
    %23 = vector.shape_cast %22 : vector<8x8x16xf32> to vector<64x16xf32>
    %c0_7 = arith.constant 0 : index
    %c0_8 = arith.constant 0 : index
    %c0_9 = arith.constant 0 : index
    %c0_10 = arith.constant 0 : index
    %24 = vector.load %arg2[%c0_7, %c0_8, %c0_9, %c0_10] : memref<1x8x8x16xf32, #tpu.memory_space<vmem>>, vector<1x8x8x16xf32>
    %25 = vector.shape_cast %24 : vector<1x8x8x16xf32> to vector<8x8x16xf32>
    %26 = vector.shape_cast %25 : vector<8x8x16xf32> to vector<64x16xf32>
    %cst = arith.constant 0.000000e+00 : bf16
    %27 = vector.broadcast %cst : bf16 to vector<16x32xbf16>
    %c0_11 = arith.constant 0 : index
    %c0_12 = arith.constant 0 : index
    %28 = vector.load %arg10[%c0_11, %c0_12] : memref<96x32xbf16, #tpu.memory_space<vmem>>, vector<16x32xbf16>
    tpu.vector_store %arg10[%c0_11, %c0_12], %27 {strides = array<i32>} : memref<96x32xbf16, #tpu.memory_space<vmem>>, vector<16x32xbf16>,
    %cst_13 = arith.constant 0.000000e+00 : bf16
    %29 = vector.broadcast %cst_13 : bf16 to vector<16x32xbf16>
    %c80 = arith.constant 80 : index
    %c0_14 = arith.constant 0 : index
    %30 = vector.load %arg10[%c80, %c0_14] : memref<96x32xbf16, #tpu.memory_space<vmem>>, vector<16x32xbf16>
    tpu.vector_store %arg10[%c80, %c0_14], %29 {strides = array<i32>} : memref<96x32xbf16, #tpu.memory_space<vmem>>, vector<16x32xbf16>,
    %31 = arith.truncf %23 : vector<64x16xf32> to vector<64x16xbf16>
    %32 = arith.truncf %26 : vector<64x16xf32> to vector<64x16xbf16>
    %33 = tpu.concatenate %31, %32 in 1 : vector<64x16xbf16>, vector<64x16xbf16> -> vector<64x32xbf16>
    %c16 = arith.constant 16 : index
    %c0_15 = arith.constant 0 : index
    %34 = vector.load %arg10[%c16, %c0_15] : memref<96x32xbf16, #tpu.memory_space<vmem>>, vector<64x32xbf16>
    tpu.vector_store %arg10[%c16, %c0_15], %33 {strides = array<i32>} : memref<96x32xbf16, #tpu.memory_space<vmem>>, vector<64x32xbf16>,
    %cst_16 = arith.constant 0.000000e+00 : f32
    %35 = vector.broadcast %cst_16 : f32 to vector<64x16xf32>
    %c7 = arith.constant 7 : index
    %c0_17 = arith.constant 0 : index
    %36 = vector.load %arg10[%c7, %c0_17] : memref<96x32xbf16, #tpu.memory_space<vmem>>, vector<64x32xbf16>
    %c0_18 = arith.constant 0 : index
    %c0_19 = arith.constant 0 : index
    %c0_20 = arith.constant 0 : index
    %37 = vector.load %arg3[%c0_18, %c0_19, %c0_20] : memref<9x32x16xbf16, #tpu.memory_space<vmem>>, vector<1x32x16xbf16>
    %38 = vector.shape_cast %37 : vector<1x32x16xbf16> to vector<32x16xbf16>
    %cst_21 = arith.constant dense<0.000000e+00> : vector<64x16xf32>
    %39 = tpu.matmul %36, %38, %cst_21 {dimension_numbers = #tpu.dot_dimension_numbers<[1], [0], [0], [1], [0, 0, 1, 1], [], []>} : vector<64x32xbf16>, vector<32x16xbf16>, vector<64x16xf32> -> vector<64x16xf32>
    %cst_22 = arith.constant 0.000000e+00 : f32
    %40 = vector.shape_cast %18 : vector<64x1xi1> to vector<64x1xi1>
    %41 = vector.broadcast %40 : vector<64x1xi1> to vector<64x16xi1>
    %42 = vector.broadcast %cst_22 : f32 to vector<64x16xf32>
    %43 = arith.select %41, %39, %42 : vector<64x16xi1>, vector<64x16xf32>
    %44 = arith.addf %35, %43 : vector<64x16xf32>
    %c8 = arith.constant 8 : index
    %c0_23 = arith.constant 0 : index
    %45 = vector.load %arg10[%c8, %c0_23] : memref<96x32xbf16, #tpu.memory_space<vmem>>, vector<64x32xbf16>
    %c1 = arith.constant 1 : index
    %c0_24 = arith.constant 0 : index
    %c0_25 = arith.constant 0 : index
    %46 = vector.load %arg3[%c1, %c0_24, %c0_25] : memref<9x32x16xbf16, #tpu.memory_space<vmem>>, vector<1x32x16xbf16>
    %47 = vector.shape_cast %46 : vector<1x32x16xbf16> to vector<32x16xbf16>
    %cst_26 = arith.constant dense<0.000000e+00> : vector<64x16xf32>
    %48 = tpu.matmul %45, %47, %cst_26 {dimension_numbers = #tpu.dot_dimension_numbers<[1], [0], [0], [1], [0, 0, 1, 1], [], []>} : vector<64x32xbf16>, vector<32x16xbf16>, vector<64x16xf32> -> vector<64x16xf32>
    %49 = arith.addf %44, %48 : vector<64x16xf32>
    %c9 = arith.constant 9 : index
    %c0_27 = arith.constant 0 : index
    %50 = vector.load %arg10[%c9, %c0_27] : memref<96x32xbf16, #tpu.memory_space<vmem>>, vector<64x32xbf16>
    %c2 = arith.constant 2 : index
    %c0_28 = arith.constant 0 : index
    %c0_29 = arith.constant 0 : index
    %51 = vector.load %arg3[%c2, %c0_28, %c0_29] : memref<9x32x16xbf16, #tpu.memory_space<vmem>>, vector<1x32x16xbf16>
    %52 = vector.shape_cast %51 : vector<1x32x16xbf16> to vector<32x16xbf16>
    %cst_30 = arith.constant dense<0.000000e+00> : vector<64x16xf32>
    %53 = tpu.matmul %50, %52, %cst_30 {dimension_numbers = #tpu.dot_dimension_numbers<[1], [0], [0], [1], [0, 0, 1, 1], [], []>} : vector<64x32xbf16>, vector<32x16xbf16>, vector<64x16xf32> -> vector<64x16xf32>
    %cst_31 = arith.constant 0.000000e+00 : f32
    %54 = vector.shape_cast %20 : vector<64x1xi1> to vector<64x1xi1>
    %55 = vector.broadcast %54 : vector<64x1xi1> to vector<64x16xi1>
    %56 = vector.broadcast %cst_31 : f32 to vector<64x16xf32>
    %57 = arith.select %55, %53, %56 : vector<64x16xi1>, vector<64x16xf32>
    %58 = arith.addf %49, %57 : vector<64x16xf32>
    %c15 = arith.constant 15 : index
    %c0_32 = arith.constant 0 : index
    %59 = vector.load %arg10[%c15, %c0_32] : memref<96x32xbf16, #tpu.memory_space<vmem>>, vector<64x32xbf16>
    %c3 = arith.constant 3 : index
    %c0_33 = arith.constant 0 : index
    %c0_34 = arith.constant 0 : index
    %60 = vector.load %arg3[%c3, %c0_33, %c0_34] : memref<9x32x16xbf16, #tpu.memory_space<vmem>>, vector<1x32x16xbf16>
    %61 = vector.shape_cast %60 : vector<1x32x16xbf16> to vector<32x16xbf16>
    %cst_35 = arith.constant dense<0.000000e+00> : vector<64x16xf32>
    %62 = tpu.matmul %59, %61, %cst_35 {dimension_numbers = #tpu.dot_dimension_numbers<[1], [0], [0], [1], [0, 0, 1, 1], [], []>} : vector<64x32xbf16>, vector<32x16xbf16>, vector<64x16xf32> -> vector<64x16xf32>
    %cst_36 = arith.constant 0.000000e+00 : f32
    %63 = vector.shape_cast %18 : vector<64x1xi1> to vector<64x1xi1>
    %64 = vector.broadcast %63 : vector<64x1xi1> to vector<64x16xi1>
    %65 = vector.broadcast %cst_36 : f32 to vector<64x16xf32>
    %66 = arith.select %64, %62, %65 : vector<64x16xi1>, vector<64x16xf32>
    %67 = arith.addf %58, %66 : vector<64x16xf32>
    %c16_37 = arith.constant 16 : index
    %c0_38 = arith.constant 0 : index
    %68 = vector.load %arg10[%c16_37, %c0_38] : memref<96x32xbf16, #tpu.memory_space<vmem>>, vector<64x32xbf16>
    %c4 = arith.constant 4 : index
    %c0_39 = arith.constant 0 : index
    %c0_40 = arith.constant 0 : index
    %69 = vector.load %arg3[%c4, %c0_39, %c0_40] : memref<9x32x16xbf16, #tpu.memory_space<vmem>>, vector<1x32x16xbf16>
    %70 = vector.shape_cast %69 : vector<1x32x16xbf16> to vector<32x16xbf16>
    %cst_41 = arith.constant dense<0.000000e+00> : vector<64x16xf32>
    %71 = tpu.matmul %68, %70, %cst_41 {dimension_numbers = #tpu.dot_dimension_numbers<[1], [0], [0], [1], [0, 0, 1, 1], [], []>} : vector<64x32xbf16>, vector<32x16xbf16>, vector<64x16xf32> -> vector<64x16xf32>
    %72 = arith.addf %67, %71 : vector<64x16xf32>
    %c17 = arith.constant 17 : index
    %c0_42 = arith.constant 0 : index
    %73 = vector.load %arg10[%c17, %c0_42] : memref<96x32xbf16, #tpu.memory_space<vmem>>, vector<64x32xbf16>
    %c5 = arith.constant 5 : index
    %c0_43 = arith.constant 0 : index
    %c0_44 = arith.constant 0 : index
    %74 = vector.load %arg3[%c5, %c0_43, %c0_44] : memref<9x32x16xbf16, #tpu.memory_space<vmem>>, vector<1x32x16xbf16>
    %75 = vector.shape_cast %74 : vector<1x32x16xbf16> to vector<32x16xbf16>
    %cst_45 = arith.constant dense<0.000000e+00> : vector<64x16xf32>
    %76 = tpu.matmul %73, %75, %cst_45 {dimension_numbers = #tpu.dot_dimension_numbers<[1], [0], [0], [1], [0, 0, 1, 1], [], []>} : vector<64x32xbf16>, vector<32x16xbf16>, vector<64x16xf32> -> vector<64x16xf32>
    %cst_46 = arith.constant 0.000000e+00 : f32
    %77 = vector.shape_cast %20 : vector<64x1xi1> to vector<64x1xi1>
    %78 = vector.broadcast %77 : vector<64x1xi1> to vector<64x16xi1>
    %79 = vector.broadcast %cst_46 : f32 to vector<64x16xf32>
    %80 = arith.select %78, %76, %79 : vector<64x16xi1>, vector<64x16xf32>
    %81 = arith.addf %72, %80 : vector<64x16xf32>
    %c23 = arith.constant 23 : index
    %c0_47 = arith.constant 0 : index
    %82 = vector.load %arg10[%c23, %c0_47] : memref<96x32xbf16, #tpu.memory_space<vmem>>, vector<64x32xbf16>
    %c6 = arith.constant 6 : index
    %c0_48 = arith.constant 0 : index
    %c0_49 = arith.constant 0 : index
    %83 = vector.load %arg3[%c6, %c0_48, %c0_49] : memref<9x32x16xbf16, #tpu.memory_space<vmem>>, vector<1x32x16xbf16>
    %84 = vector.shape_cast %83 : vector<1x32x16xbf16> to vector<32x16xbf16>
    %cst_50 = arith.constant dense<0.000000e+00> : vector<64x16xf32>
    %85 = tpu.matmul %82, %84, %cst_50 {dimension_numbers = #tpu.dot_dimension_numbers<[1], [0], [0], [1], [0, 0, 1, 1], [], []>} : vector<64x32xbf16>, vector<32x16xbf16>, vector<64x16xf32> -> vector<64x16xf32>
    %cst_51 = arith.constant 0.000000e+00 : f32
    %86 = vector.shape_cast %18 : vector<64x1xi1> to vector<64x1xi1>
    %87 = vector.broadcast %86 : vector<64x1xi1> to vector<64x16xi1>
    %88 = vector.broadcast %cst_51 : f32 to vector<64x16xf32>
    %89 = arith.select %87, %85, %88 : vector<64x16xi1>, vector<64x16xf32>
    %90 = arith.addf %81, %89 : vector<64x16xf32>
    %c24 = arith.constant 24 : index
    %c0_52 = arith.constant 0 : index
    %91 = vector.load %arg10[%c24, %c0_52] : memref<96x32xbf16, #tpu.memory_space<vmem>>, vector<64x32xbf16>
    %c7_53 = arith.constant 7 : index
    %c0_54 = arith.constant 0 : index
    %c0_55 = arith.constant 0 : index
    %92 = vector.load %arg3[%c7_53, %c0_54, %c0_55] : memref<9x32x16xbf16, #tpu.memory_space<vmem>>, vector<1x32x16xbf16>
    %93 = vector.shape_cast %92 : vector<1x32x16xbf16> to vector<32x16xbf16>
    %cst_56 = arith.constant dense<0.000000e+00> : vector<64x16xf32>
    %94 = tpu.matmul %91, %93, %cst_56 {dimension_numbers = #tpu.dot_dimension_numbers<[1], [0], [0], [1], [0, 0, 1, 1], [], []>} : vector<64x32xbf16>, vector<32x16xbf16>, vector<64x16xf32> -> vector<64x16xf32>
    %95 = arith.addf %90, %94 : vector<64x16xf32>
    %c25 = arith.constant 25 : index
    %c0_57 = arith.constant 0 : index
    %96 = vector.load %arg10[%c25, %c0_57] : memref<96x32xbf16, #tpu.memory_space<vmem>>, vector<64x32xbf16>
    %c8_58 = arith.constant 8 : index
    %c0_59 = arith.constant 0 : index
    %c0_60 = arith.constant 0 : index
    %97 = vector.load %arg3[%c8_58, %c0_59, %c0_60] : memref<9x32x16xbf16, #tpu.memory_space<vmem>>, vector<1x32x16xbf16>
    %98 = vector.shape_cast %97 : vector<1x32x16xbf16> to vector<32x16xbf16>
    %cst_61 = arith.constant dense<0.000000e+00> : vector<64x16xf32>
    %99 = tpu.matmul %96, %98, %cst_61 {dimension_numbers = #tpu.dot_dimension_numbers<[1], [0], [0], [1], [0, 0, 1, 1], [], []>} : vector<64x32xbf16>, vector<32x16xbf16>, vector<64x16xf32> -> vector<64x16xf32>
    %cst_62 = arith.constant 0.000000e+00 : f32
    %100 = vector.shape_cast %20 : vector<64x1xi1> to vector<64x1xi1>
    %101 = vector.broadcast %100 : vector<64x1xi1> to vector<64x16xi1>
    %102 = vector.broadcast %cst_62 : f32 to vector<64x16xf32>
    %103 = arith.select %101, %99, %102 : vector<64x16xi1>, vector<64x16xf32>
    %104 = arith.addf %95, %103 : vector<64x16xf32>
    %c0_63 = arith.constant 0 : index
    %c0_64 = arith.constant 0 : index
    %105 = vector.load %arg4[%c0_63, %c0_64] : memref<2x16xf32, #tpu.memory_space<vmem>>, vector<1x16xf32>
    %106 = vector.broadcast %105 : vector<1x16xf32> to vector<64x16xf32>
    %107 = arith.mulf %104, %106 : vector<64x16xf32>
    %c1_65 = arith.constant 1 : index
    %c0_66 = arith.constant 0 : index
    %108 = vector.load %arg4[%c1_65, %c0_66] : memref<2x16xf32, #tpu.memory_space<vmem>>, vector<1x16xf32>
    %109 = vector.broadcast %108 : vector<1x16xf32> to vector<64x16xf32>
    %110 = arith.addf %107, %109 : vector<64x16xf32>
    %cst_67 = arith.constant 0.000000e+00 : f32
    %111 = vector.broadcast %cst_67 : f32 to vector<64x16xf32>
    %112 = arith.maximumf %110, %111 : vector<64x16xf32>
    %cst_68 = arith.constant 0.000000e+00 : bf16
    %113 = vector.broadcast %cst_68 : bf16 to vector<16x16xbf16>
    %c0_69 = arith.constant 0 : index
    %c0_70 = arith.constant 0 : index
    %114 = vector.load %arg11[%c0_69, %c0_70] : memref<96x16xbf16, #tpu.memory_space<vmem>>, vector<16x16xbf16>
    tpu.vector_store %arg11[%c0_69, %c0_70], %113 {strides = array<i32>} : memref<96x16xbf16, #tpu.memory_space<vmem>>, vector<16x16xbf16>,
    %cst_71 = arith.constant 0.000000e+00 : bf16
    %115 = vector.broadcast %cst_71 : bf16 to vector<16x16xbf16>
    %c80_72 = arith.constant 80 : index
    %c0_73 = arith.constant 0 : index
    %116 = vector.load %arg11[%c80_72, %c0_73] : memref<96x16xbf16, #tpu.memory_space<vmem>>, vector<16x16xbf16>
    tpu.vector_store %arg11[%c80_72, %c0_73], %115 {strides = array<i32>} : memref<96x16xbf16, #tpu.memory_space<vmem>>, vector<16x16xbf16>,
    %117 = arith.truncf %112 : vector<64x16xf32> to vector<64x16xbf16>
    %c16_74 = arith.constant 16 : index
    %c0_75 = arith.constant 0 : index
    %118 = vector.load %arg11[%c16_74, %c0_75] : memref<96x16xbf16, #tpu.memory_space<vmem>>, vector<64x16xbf16>
    tpu.vector_store %arg11[%c16_74, %c0_75], %117 {strides = array<i32>} : memref<96x16xbf16, #tpu.memory_space<vmem>>, vector<64x16xbf16>,
    %cst_76 = arith.constant 0.000000e+00 : f32
    %119 = vector.broadcast %cst_76 : f32 to vector<64x16xf32>
    %c7_77 = arith.constant 7 : index
    %c0_78 = arith.constant 0 : index
    %120 = vector.load %arg11[%c7_77, %c0_78] : memref<96x16xbf16, #tpu.memory_space<vmem>>, vector<64x16xbf16>
    %c0_79 = arith.constant 0 : index
    %c0_80 = arith.constant 0 : index
    %c0_81 = arith.constant 0 : index
    %121 = vector.load %arg5[%c0_79, %c0_80, %c0_81] : memref<9x16x16xbf16, #tpu.memory_space<vmem>>, vector<1x16x16xbf16>
    %122 = vector.shape_cast %121 : vector<1x16x16xbf16> to vector<16x16xbf16>
    %cst_82 = arith.constant dense<0.000000e+00> : vector<64x16xf32>
    %123 = tpu.matmul %120, %122, %cst_82 {dimension_numbers = #tpu.dot_dimension_numbers<[1], [0], [0], [1], [0, 0, 1, 1], [], []>} : vector<64x16xbf16>, vector<16x16xbf16>, vector<64x16xf32> -> vector<64x16xf32>
    %cst_83 = arith.constant 0.000000e+00 : f32
    %124 = vector.shape_cast %18 : vector<64x1xi1> to vector<64x1xi1>
    %125 = vector.broadcast %124 : vector<64x1xi1> to vector<64x16xi1>
    %126 = vector.broadcast %cst_83 : f32 to vector<64x16xf32>
    %127 = arith.select %125, %123, %126 : vector<64x16xi1>, vector<64x16xf32>
    %128 = arith.addf %119, %127 : vector<64x16xf32>
    %c8_84 = arith.constant 8 : index
    %c0_85 = arith.constant 0 : index
    %129 = vector.load %arg11[%c8_84, %c0_85] : memref<96x16xbf16, #tpu.memory_space<vmem>>, vector<64x16xbf16>
    %c1_86 = arith.constant 1 : index
    %c0_87 = arith.constant 0 : index
    %c0_88 = arith.constant 0 : index
    %130 = vector.load %arg5[%c1_86, %c0_87, %c0_88] : memref<9x16x16xbf16, #tpu.memory_space<vmem>>, vector<1x16x16xbf16>
    %131 = vector.shape_cast %130 : vector<1x16x16xbf16> to vector<16x16xbf16>
    %cst_89 = arith.constant dense<0.000000e+00> : vector<64x16xf32>
    %132 = tpu.matmul %129, %131, %cst_89 {dimension_numbers = #tpu.dot_dimension_numbers<[1], [0], [0], [1], [0, 0, 1, 1], [], []>} : vector<64x16xbf16>, vector<16x16xbf16>, vector<64x16xf32> -> vector<64x16xf32>
    %133 = arith.addf %128, %132 : vector<64x16xf32>
    %c9_90 = arith.constant 9 : index
    %c0_91 = arith.constant 0 : index
    %134 = vector.load %arg11[%c9_90, %c0_91] : memref<96x16xbf16, #tpu.memory_space<vmem>>, vector<64x16xbf16>
    %c2_92 = arith.constant 2 : index
    %c0_93 = arith.constant 0 : index
    %c0_94 = arith.constant 0 : index
    %135 = vector.load %arg5[%c2_92, %c0_93, %c0_94] : memref<9x16x16xbf16, #tpu.memory_space<vmem>>, vector<1x16x16xbf16>
    %136 = vector.shape_cast %135 : vector<1x16x16xbf16> to vector<16x16xbf16>
    %cst_95 = arith.constant dense<0.000000e+00> : vector<64x16xf32>
    %137 = tpu.matmul %134, %136, %cst_95 {dimension_numbers = #tpu.dot_dimension_numbers<[1], [0], [0], [1], [0, 0, 1, 1], [], []>} : vector<64x16xbf16>, vector<16x16xbf16>, vector<64x16xf32> -> vector<64x16xf32>
    %cst_96 = arith.constant 0.000000e+00 : f32
    %138 = vector.shape_cast %20 : vector<64x1xi1> to vector<64x1xi1>
    %139 = vector.broadcast %138 : vector<64x1xi1> to vector<64x16xi1>
    %140 = vector.broadcast %cst_96 : f32 to vector<64x16xf32>
    %141 = arith.select %139, %137, %140 : vector<64x16xi1>, vector<64x16xf32>
    %142 = arith.addf %133, %141 : vector<64x16xf32>
    %c15_97 = arith.constant 15 : index
    %c0_98 = arith.constant 0 : index
    %143 = vector.load %arg11[%c15_97, %c0_98] : memref<96x16xbf16, #tpu.memory_space<vmem>>, vector<64x16xbf16>
    %c3_99 = arith.constant 3 : index
    %c0_100 = arith.constant 0 : index
    %c0_101 = arith.constant 0 : index
    %144 = vector.load %arg5[%c3_99, %c0_100, %c0_101] : memref<9x16x16xbf16, #tpu.memory_space<vmem>>, vector<1x16x16xbf16>
    %145 = vector.shape_cast %144 : vector<1x16x16xbf16> to vector<16x16xbf16>
    %cst_102 = arith.constant dense<0.000000e+00> : vector<64x16xf32>
    %146 = tpu.matmul %143, %145, %cst_102 {dimension_numbers = #tpu.dot_dimension_numbers<[1], [0], [0], [1], [0, 0, 1, 1], [], []>} : vector<64x16xbf16>, vector<16x16xbf16>, vector<64x16xf32> -> vector<64x16xf32>
    %cst_103 = arith.constant 0.000000e+00 : f32
    %147 = vector.shape_cast %18 : vector<64x1xi1> to vector<64x1xi1>
    %148 = vector.broadcast %147 : vector<64x1xi1> to vector<64x16xi1>
    %149 = vector.broadcast %cst_103 : f32 to vector<64x16xf32>
    %150 = arith.select %148, %146, %149 : vector<64x16xi1>, vector<64x16xf32>
    %151 = arith.addf %142, %150 : vector<64x16xf32>
    %c16_104 = arith.constant 16 : index
    %c0_105 = arith.constant 0 : index
    %152 = vector.load %arg11[%c16_104, %c0_105] : memref<96x16xbf16, #tpu.memory_space<vmem>>, vector<64x16xbf16>
    %c4_106 = arith.constant 4 : index
    %c0_107 = arith.constant 0 : index
    %c0_108 = arith.constant 0 : index
    %153 = vector.load %arg5[%c4_106, %c0_107, %c0_108] : memref<9x16x16xbf16, #tpu.memory_space<vmem>>, vector<1x16x16xbf16>
    %154 = vector.shape_cast %153 : vector<1x16x16xbf16> to vector<16x16xbf16>
    %cst_109 = arith.constant dense<0.000000e+00> : vector<64x16xf32>
    %155 = tpu.matmul %152, %154, %cst_109 {dimension_numbers = #tpu.dot_dimension_numbers<[1], [0], [0], [1], [0, 0, 1, 1], [], []>} : vector<64x16xbf16>, vector<16x16xbf16>, vector<64x16xf32> -> vector<64x16xf32>
    %156 = arith.addf %151, %155 : vector<64x16xf32>
    %c17_110 = arith.constant 17 : index
    %c0_111 = arith.constant 0 : index
    %157 = vector.load %arg11[%c17_110, %c0_111] : memref<96x16xbf16, #tpu.memory_space<vmem>>, vector<64x16xbf16>
    %c5_112 = arith.constant 5 : index
    %c0_113 = arith.constant 0 : index
    %c0_114 = arith.constant 0 : index
    %158 = vector.load %arg5[%c5_112, %c0_113, %c0_114] : memref<9x16x16xbf16, #tpu.memory_space<vmem>>, vector<1x16x16xbf16>
    %159 = vector.shape_cast %158 : vector<1x16x16xbf16> to vector<16x16xbf16>
    %cst_115 = arith.constant dense<0.000000e+00> : vector<64x16xf32>
    %160 = tpu.matmul %157, %159, %cst_115 {dimension_numbers = #tpu.dot_dimension_numbers<[1], [0], [0], [1], [0, 0, 1, 1], [], []>} : vector<64x16xbf16>, vector<16x16xbf16>, vector<64x16xf32> -> vector<64x16xf32>
    %cst_116 = arith.constant 0.000000e+00 : f32
    %161 = vector.shape_cast %20 : vector<64x1xi1> to vector<64x1xi1>
    %162 = vector.broadcast %161 : vector<64x1xi1> to vector<64x16xi1>
    %163 = vector.broadcast %cst_116 : f32 to vector<64x16xf32>
    %164 = arith.select %162, %160, %163 : vector<64x16xi1>, vector<64x16xf32>
    %165 = arith.addf %156, %164 : vector<64x16xf32>
    %c23_117 = arith.constant 23 : index
    %c0_118 = arith.constant 0 : index
    %166 = vector.load %arg11[%c23_117, %c0_118] : memref<96x16xbf16, #tpu.memory_space<vmem>>, vector<64x16xbf16>
    %c6_119 = arith.constant 6 : index
    %c0_120 = arith.constant 0 : index
    %c0_121 = arith.constant 0 : index
    %167 = vector.load %arg5[%c6_119, %c0_120, %c0_121] : memref<9x16x16xbf16, #tpu.memory_space<vmem>>, vector<1x16x16xbf16>
    %168 = vector.shape_cast %167 : vector<1x16x16xbf16> to vector<16x16xbf16>
    %cst_122 = arith.constant dense<0.000000e+00> : vector<64x16xf32>
    %169 = tpu.matmul %166, %168, %cst_122 {dimension_numbers = #tpu.dot_dimension_numbers<[1], [0], [0], [1], [0, 0, 1, 1], [], []>} : vector<64x16xbf16>, vector<16x16xbf16>, vector<64x16xf32> -> vector<64x16xf32>
    %cst_123 = arith.constant 0.000000e+00 : f32
    %170 = vector.shape_cast %18 : vector<64x1xi1> to vector<64x1xi1>
    %171 = vector.broadcast %170 : vector<64x1xi1> to vector<64x16xi1>
    %172 = vector.broadcast %cst_123 : f32 to vector<64x16xf32>
    %173 = arith.select %171, %169, %172 : vector<64x16xi1>, vector<64x16xf32>
    %174 = arith.addf %165, %173 : vector<64x16xf32>
    %c24_124 = arith.constant 24 : index
    %c0_125 = arith.constant 0 : index
    %175 = vector.load %arg11[%c24_124, %c0_125] : memref<96x16xbf16, #tpu.memory_space<vmem>>, vector<64x16xbf16>
    %c7_126 = arith.constant 7 : index
    %c0_127 = arith.constant 0 : index
    %c0_128 = arith.constant 0 : index
    %176 = vector.load %arg5[%c7_126, %c0_127, %c0_128] : memref<9x16x16xbf16, #tpu.memory_space<vmem>>, vector<1x16x16xbf16>
    %177 = vector.shape_cast %176 : vector<1x16x16xbf16> to vector<16x16xbf16>
    %cst_129 = arith.constant dense<0.000000e+00> : vector<64x16xf32>
    %178 = tpu.matmul %175, %177, %cst_129 {dimension_numbers = #tpu.dot_dimension_numbers<[1], [0], [0], [1], [0, 0, 1, 1], [], []>} : vector<64x16xbf16>, vector<16x16xbf16>, vector<64x16xf32> -> vector<64x16xf32>
    %179 = arith.addf %174, %178 : vector<64x16xf32>
    %c25_130 = arith.constant 25 : index
    %c0_131 = arith.constant 0 : index
    %180 = vector.load %arg11[%c25_130, %c0_131] : memref<96x16xbf16, #tpu.memory_space<vmem>>, vector<64x16xbf16>
    %c8_132 = arith.constant 8 : index
    %c0_133 = arith.constant 0 : index
    %c0_134 = arith.constant 0 : index
    %181 = vector.load %arg5[%c8_132, %c0_133, %c0_134] : memref<9x16x16xbf16, #tpu.memory_space<vmem>>, vector<1x16x16xbf16>
    %182 = vector.shape_cast %181 : vector<1x16x16xbf16> to vector<16x16xbf16>
    %cst_135 = arith.constant dense<0.000000e+00> : vector<64x16xf32>
    %183 = tpu.matmul %180, %182, %cst_135 {dimension_numbers = #tpu.dot_dimension_numbers<[1], [0], [0], [1], [0, 0, 1, 1], [], []>} : vector<64x16xbf16>, vector<16x16xbf16>, vector<64x16xf32> -> vector<64x16xf32>
    %cst_136 = arith.constant 0.000000e+00 : f32
    %184 = vector.shape_cast %20 : vector<64x1xi1> to vector<64x1xi1>
    %185 = vector.broadcast %184 : vector<64x1xi1> to vector<64x16xi1>
    %186 = vector.broadcast %cst_136 : f32 to vector<64x16xf32>
    %187 = arith.select %185, %183, %186 : vector<64x16xi1>, vector<64x16xf32>
    %188 = arith.addf %179, %187 : vector<64x16xf32>
    %c0_137 = arith.constant 0 : index
    %c0_138 = arith.constant 0 : index
    %189 = vector.load %arg6[%c0_137, %c0_138] : memref<2x16xf32, #tpu.memory_space<vmem>>, vector<1x16xf32>
    %190 = vector.broadcast %189 : vector<1x16xf32> to vector<64x16xf32>
    %191 = arith.mulf %188, %190 : vector<64x16xf32>
    %c1_139 = arith.constant 1 : index
    %c0_140 = arith.constant 0 : index
    %192 = vector.load %arg6[%c1_139, %c0_140] : memref<2x16xf32, #tpu.memory_space<vmem>>, vector<1x16xf32>
    %193 = vector.broadcast %192 : vector<1x16xf32> to vector<64x16xf32>
    %194 = arith.addf %191, %193 : vector<64x16xf32>
    %cst_141 = arith.constant 0.000000e+00 : f32
    %195 = vector.broadcast %cst_141 : f32 to vector<64x16xf32>
    %196 = arith.maximumf %194, %195 : vector<64x16xf32>
    %197 = arith.truncf %196 : vector<64x16xf32> to vector<64x16xbf16>
    %c0_142 = arith.constant 0 : index
    %c0_143 = arith.constant 0 : index
    %198 = vector.load %arg7[%c0_142, %c0_143] : memref<16x32xbf16, #tpu.memory_space<vmem>>, vector<16x32xbf16>
    %cst_144 = arith.constant dense<0.000000e+00> : vector<64x32xf32>
    %199 = tpu.matmul %197, %198, %cst_144 {dimension_numbers = #tpu.dot_dimension_numbers<[1], [0], [0], [1], [0, 0, 1, 1], [], []>} : vector<64x16xbf16>, vector<16x32xbf16>, vector<64x32xf32> -> vector<64x32xf32>
    %c0_145 = arith.constant 0 : index
    %c0_146 = arith.constant 0 : index
    %200 = vector.load %arg8[%c0_145, %c0_146] : memref<1x32xf32, #tpu.memory_space<vmem>>, vector<1x32xf32>
    %201 = vector.broadcast %200 : vector<1x32xf32> to vector<64x32xf32>
    %202 = arith.addf %199, %201 : vector<64x32xf32>
    %c0_147 = arith.constant 0 : index
    %c0_148 = arith.constant 0 : index
    %c0_149 = arith.constant 0 : index
    %203 = vector.load %arg9[%c0_147, %c0_148, %c0_149] : memref<1x64x32xf32, #tpu.memory_space<vmem>>, vector<1x64x32xf32>
    %204 = vector.shape_cast %203 : vector<1x64x32xf32> to vector<64x32xf32>
    %205 = vector.shape_cast %202 : vector<64x32xf32> to vector<1x64x32xf32>
    tpu.vector_store %arg9[%c0_147, %c0_148, %c0_149], %205 {strides = array<i32>} : memref<1x64x32xf32, #tpu.memory_space<vmem>>, vector<1x64x32xf32>,
    return
  }
  func.func @transform_0(%arg0: i32) -> (i32, i32, i32, i32) {
    %c0_i32 = arith.constant 0 : i32
    %c0_i32_0 = arith.constant 0 : i32
    %c0_i32_1 = arith.constant 0 : i32
    %c0_i32_2 = arith.constant 0 : i32
    return %arg0, %c0_i32, %c0_i32_0, %c0_i32_1 : i32, i32, i32, i32
  }
  func.func @transform_1(%arg0: i32) -> (i32, i32, i32, i32) {
    %c0_i32 = arith.constant 0 : i32
    %c0_i32_0 = arith.constant 0 : i32
    %c0_i32_1 = arith.constant 0 : i32
    %c0_i32_2 = arith.constant 0 : i32
    return %arg0, %c0_i32, %c0_i32_0, %c0_i32_1 : i32, i32, i32, i32
  }
  func.func @transform_2(%arg0: i32) -> (i32, i32, i32) {
    %c0_i32 = arith.constant 0 : i32
    %c0_i32_0 = arith.constant 0 : i32
    %c0_i32_1 = arith.constant 0 : i32
    %c0_i32_2 = arith.constant 0 : i32
    return %c0_i32, %c0_i32_0, %c0_i32_1 : i32, i32, i32
  }
  func.func @transform_3(%arg0: i32) -> (i32, i32) {
    %c0_i32 = arith.constant 0 : i32
    %c0_i32_0 = arith.constant 0 : i32
    %c0_i32_1 = arith.constant 0 : i32
    return %c0_i32, %c0_i32_0 : i32, i32
  }
  func.func @transform_4(%arg0: i32) -> (i32, i32, i32) {
    %c0_i32 = arith.constant 0 : i32
    %c0_i32_0 = arith.constant 0 : i32
    %c0_i32_1 = arith.constant 0 : i32
    %c0_i32_2 = arith.constant 0 : i32
    return %c0_i32, %c0_i32_0, %c0_i32_1 : i32, i32, i32
  }
  func.func @transform_5(%arg0: i32) -> (i32, i32) {
    %c0_i32 = arith.constant 0 : i32
    %c0_i32_0 = arith.constant 0 : i32
    %c0_i32_1 = arith.constant 0 : i32
    return %c0_i32, %c0_i32_0 : i32, i32
  }
  func.func @transform_6(%arg0: i32) -> (i32, i32) {
    %c0_i32 = arith.constant 0 : i32
    %c0_i32_0 = arith.constant 0 : i32
    %c0_i32_1 = arith.constant 0 : i32
    return %c0_i32, %c0_i32_0 : i32, i32
  }
  func.func @transform_7(%arg0: i32) -> (i32, i32) {
    %c0_i32 = arith.constant 0 : i32
    %c0_i32_0 = arith.constant 0 : i32
    %c0_i32_1 = arith.constant 0 : i32
    return %c0_i32, %c0_i32_0 : i32, i32
  }
  func.func @transform_8(%arg0: i32) -> (i32, i32, i32) {
    %c0_i32 = arith.constant 0 : i32
    %c0_i32_0 = arith.constant 0 : i32
    %c0_i32_1 = arith.constant 0 : i32
    return %arg0, %c0_i32, %c0_i32_0 : i32, i32, i32
  }
}

module attributes {stable_mosaic.version = 11 : i64} {
  func.func @_block_kernel(%arg0: i32, %arg1: memref<1x16x16x8xf32, #tpu.memory_space<vmem>>, %arg2: memref<1x16x16x8xf32, #tpu.memory_space<vmem>>, %arg3: memref<9x16x8xbf16, #tpu.memory_space<vmem>>, %arg4: memref<2x8xf32, #tpu.memory_space<vmem>>, %arg5: memref<9x8x8xbf16, #tpu.memory_space<vmem>>, %arg6: memref<2x8xf32, #tpu.memory_space<vmem>>, %arg7: memref<9x8x3xbf16, #tpu.memory_space<vmem>>, %arg8: memref<2x3xf32, #tpu.memory_space<vmem>>, %arg9: memref<1x256x3xf32, #tpu.memory_space<vmem>>, %arg10: memref<320x16xbf16, #tpu.memory_space<vmem>>, %arg11: memref<320x8xbf16, #tpu.memory_space<vmem>>, %arg12: memref<320x8xbf16, #tpu.memory_space<vmem>>) attributes {dimension_semantics = [#tpu.dimension_semantics<parallel>], iteration_bounds = array<i64: 2>, scalar_prefetch = 0 : i64, scratch_operands = 3 : i64, tpu.core_type = #tpu.core_type<tc>, window_params = [{transform_indices = @transform_0, window_bounds = array<i64: 1, 16, 16, 8>}, {transform_indices = @transform_1, window_bounds = array<i64: 1, 16, 16, 8>}, {pipeline_mode = #tpu.pipeline_mode<synchronous>, transform_indices = @transform_2, window_bounds = array<i64: 9, 16, 8>}, {pipeline_mode = #tpu.pipeline_mode<synchronous>, transform_indices = @transform_3, window_bounds = array<i64: 2, 8>}, {pipeline_mode = #tpu.pipeline_mode<synchronous>, transform_indices = @transform_4, window_bounds = array<i64: 9, 8, 8>}, {pipeline_mode = #tpu.pipeline_mode<synchronous>, transform_indices = @transform_5, window_bounds = array<i64: 2, 8>}, {pipeline_mode = #tpu.pipeline_mode<synchronous>, transform_indices = @transform_6, window_bounds = array<i64: 9, 8, 3>}, {pipeline_mode = #tpu.pipeline_mode<synchronous>, transform_indices = @transform_7, window_bounds = array<i64: 2, 3>}, {transform_indices = @transform_8, window_bounds = array<i64: 1, 256, 3>}]} {
    %0 = tpu.iota {dimensions = array<i32: 0>} : vector<256x1xi32>
    %c16_i32 = arith.constant 16 : i32
    %c0_i32 = arith.constant 0 : i32
    %1 = arith.cmpi eq, %c16_i32, %c0_i32 : i32
    %c1_i32 = arith.constant 1 : i32
    %2 = arith.select %1, %c1_i32, %c16_i32 : i32
    %3 = vector.broadcast %2 : i32 to vector<256x1xi32>
    %4 = arith.remsi %0, %3 : vector<256x1xi32>
    %c0_i32_0 = arith.constant 0 : i32
    %5 = vector.broadcast %c0_i32_0 : i32 to vector<256x1xi32>
    %6 = arith.cmpi ne, %4, %5 : vector<256x1xi32>
    %c0_i32_1 = arith.constant 0 : i32
    %7 = vector.broadcast %c0_i32_1 : i32 to vector<256x1xi32>
    %8 = arith.cmpi slt, %4, %7 : vector<256x1xi32>
    %c0_i32_2 = arith.constant 0 : i32
    %9 = arith.cmpi slt, %2, %c0_i32_2 : i32
    %10 = vector.broadcast %9 : i1 to vector<256x1xi1>
    %11 = vector.broadcast %10 : vector<256x1xi1> to vector<256x1xi1>
    %12 = arith.xori %8, %11 : vector<256x1xi1>
    %13 = arith.andi %12, %6 : vector<256x1xi1>
    %14 = vector.broadcast %2 : i32 to vector<256x1xi32>
    %15 = arith.addi %4, %14 : vector<256x1xi32>
    %16 = arith.select %13, %15, %4 : vector<256x1xi1>, vector<256x1xi32>
    %c0_i32_3 = arith.constant 0 : i32
    %17 = vector.broadcast %c0_i32_3 : i32 to vector<256x1xi32>
    %18 = arith.cmpi ne, %16, %17 : vector<256x1xi32>
    %c15_i32 = arith.constant 15 : i32
    %19 = vector.broadcast %c15_i32 : i32 to vector<256x1xi32>
    %20 = arith.cmpi ne, %16, %19 : vector<256x1xi32>
    %c0 = arith.constant 0 : index
    %c0_4 = arith.constant 0 : index
    %c0_5 = arith.constant 0 : index
    %c0_6 = arith.constant 0 : index
    %21 = vector.load %arg1[%c0, %c0_4, %c0_5, %c0_6] : memref<1x16x16x8xf32, #tpu.memory_space<vmem>>, vector<1x16x16x8xf32>
    %22 = vector.shape_cast %21 : vector<1x16x16x8xf32> to vector<16x16x8xf32>
    %23 = vector.shape_cast %22 : vector<16x16x8xf32> to vector<256x8xf32>
    %c0_7 = arith.constant 0 : index
    %c0_8 = arith.constant 0 : index
    %c0_9 = arith.constant 0 : index
    %c0_10 = arith.constant 0 : index
    %24 = vector.load %arg2[%c0_7, %c0_8, %c0_9, %c0_10] : memref<1x16x16x8xf32, #tpu.memory_space<vmem>>, vector<1x16x16x8xf32>
    %25 = vector.shape_cast %24 : vector<1x16x16x8xf32> to vector<16x16x8xf32>
    %26 = vector.shape_cast %25 : vector<16x16x8xf32> to vector<256x8xf32>
    %cst = arith.constant 0.000000e+00 : bf16
    %27 = vector.broadcast %cst : bf16 to vector<32x16xbf16>
    %c0_11 = arith.constant 0 : index
    %c0_12 = arith.constant 0 : index
    %28 = vector.load %arg10[%c0_11, %c0_12] : memref<320x16xbf16, #tpu.memory_space<vmem>>, vector<32x16xbf16>
    tpu.vector_store %arg10[%c0_11, %c0_12], %27 {strides = array<i32>} : memref<320x16xbf16, #tpu.memory_space<vmem>>, vector<32x16xbf16>,
    %cst_13 = arith.constant 0.000000e+00 : bf16
    %29 = vector.broadcast %cst_13 : bf16 to vector<32x16xbf16>
    %c288 = arith.constant 288 : index
    %c0_14 = arith.constant 0 : index
    %30 = vector.load %arg10[%c288, %c0_14] : memref<320x16xbf16, #tpu.memory_space<vmem>>, vector<32x16xbf16>
    tpu.vector_store %arg10[%c288, %c0_14], %29 {strides = array<i32>} : memref<320x16xbf16, #tpu.memory_space<vmem>>, vector<32x16xbf16>,
    %31 = arith.truncf %23 : vector<256x8xf32> to vector<256x8xbf16>
    %32 = arith.truncf %26 : vector<256x8xf32> to vector<256x8xbf16>
    %33 = tpu.concatenate %31, %32 in 1 : vector<256x8xbf16>, vector<256x8xbf16> -> vector<256x16xbf16>
    %c32 = arith.constant 32 : index
    %c0_15 = arith.constant 0 : index
    %34 = vector.load %arg10[%c32, %c0_15] : memref<320x16xbf16, #tpu.memory_space<vmem>>, vector<256x16xbf16>
    tpu.vector_store %arg10[%c32, %c0_15], %33 {strides = array<i32>} : memref<320x16xbf16, #tpu.memory_space<vmem>>, vector<256x16xbf16>,
    %cst_16 = arith.constant 0.000000e+00 : f32
    %35 = vector.broadcast %cst_16 : f32 to vector<256x8xf32>
    %c15 = arith.constant 15 : index
    %c0_17 = arith.constant 0 : index
    %36 = vector.load %arg10[%c15, %c0_17] : memref<320x16xbf16, #tpu.memory_space<vmem>>, vector<256x16xbf16>
    %c0_18 = arith.constant 0 : index
    %c0_19 = arith.constant 0 : index
    %c0_20 = arith.constant 0 : index
    %37 = vector.load %arg3[%c0_18, %c0_19, %c0_20] : memref<9x16x8xbf16, #tpu.memory_space<vmem>>, vector<1x16x8xbf16>
    %38 = vector.shape_cast %37 : vector<1x16x8xbf16> to vector<16x8xbf16>
    %cst_21 = arith.constant dense<0.000000e+00> : vector<256x8xf32>
    %39 = tpu.matmul %36, %38, %cst_21 {dimension_numbers = #tpu.dot_dimension_numbers<[1], [0], [0], [1], [0, 0, 1, 1], [], []>} : vector<256x16xbf16>, vector<16x8xbf16>, vector<256x8xf32> -> vector<256x8xf32>
    %cst_22 = arith.constant 0.000000e+00 : f32
    %40 = vector.shape_cast %18 : vector<256x1xi1> to vector<256x1xi1>
    %41 = vector.broadcast %40 : vector<256x1xi1> to vector<256x8xi1>
    %42 = vector.broadcast %cst_22 : f32 to vector<256x8xf32>
    %43 = arith.select %41, %39, %42 : vector<256x8xi1>, vector<256x8xf32>
    %44 = arith.addf %35, %43 : vector<256x8xf32>
    %c16 = arith.constant 16 : index
    %c0_23 = arith.constant 0 : index
    %45 = vector.load %arg10[%c16, %c0_23] : memref<320x16xbf16, #tpu.memory_space<vmem>>, vector<256x16xbf16>
    %c1 = arith.constant 1 : index
    %c0_24 = arith.constant 0 : index
    %c0_25 = arith.constant 0 : index
    %46 = vector.load %arg3[%c1, %c0_24, %c0_25] : memref<9x16x8xbf16, #tpu.memory_space<vmem>>, vector<1x16x8xbf16>
    %47 = vector.shape_cast %46 : vector<1x16x8xbf16> to vector<16x8xbf16>
    %cst_26 = arith.constant dense<0.000000e+00> : vector<256x8xf32>
    %48 = tpu.matmul %45, %47, %cst_26 {dimension_numbers = #tpu.dot_dimension_numbers<[1], [0], [0], [1], [0, 0, 1, 1], [], []>} : vector<256x16xbf16>, vector<16x8xbf16>, vector<256x8xf32> -> vector<256x8xf32>
    %49 = arith.addf %44, %48 : vector<256x8xf32>
    %c17 = arith.constant 17 : index
    %c0_27 = arith.constant 0 : index
    %50 = vector.load %arg10[%c17, %c0_27] : memref<320x16xbf16, #tpu.memory_space<vmem>>, vector<256x16xbf16>
    %c2 = arith.constant 2 : index
    %c0_28 = arith.constant 0 : index
    %c0_29 = arith.constant 0 : index
    %51 = vector.load %arg3[%c2, %c0_28, %c0_29] : memref<9x16x8xbf16, #tpu.memory_space<vmem>>, vector<1x16x8xbf16>
    %52 = vector.shape_cast %51 : vector<1x16x8xbf16> to vector<16x8xbf16>
    %cst_30 = arith.constant dense<0.000000e+00> : vector<256x8xf32>
    %53 = tpu.matmul %50, %52, %cst_30 {dimension_numbers = #tpu.dot_dimension_numbers<[1], [0], [0], [1], [0, 0, 1, 1], [], []>} : vector<256x16xbf16>, vector<16x8xbf16>, vector<256x8xf32> -> vector<256x8xf32>
    %cst_31 = arith.constant 0.000000e+00 : f32
    %54 = vector.shape_cast %20 : vector<256x1xi1> to vector<256x1xi1>
    %55 = vector.broadcast %54 : vector<256x1xi1> to vector<256x8xi1>
    %56 = vector.broadcast %cst_31 : f32 to vector<256x8xf32>
    %57 = arith.select %55, %53, %56 : vector<256x8xi1>, vector<256x8xf32>
    %58 = arith.addf %49, %57 : vector<256x8xf32>
    %c31 = arith.constant 31 : index
    %c0_32 = arith.constant 0 : index
    %59 = vector.load %arg10[%c31, %c0_32] : memref<320x16xbf16, #tpu.memory_space<vmem>>, vector<256x16xbf16>
    %c3 = arith.constant 3 : index
    %c0_33 = arith.constant 0 : index
    %c0_34 = arith.constant 0 : index
    %60 = vector.load %arg3[%c3, %c0_33, %c0_34] : memref<9x16x8xbf16, #tpu.memory_space<vmem>>, vector<1x16x8xbf16>
    %61 = vector.shape_cast %60 : vector<1x16x8xbf16> to vector<16x8xbf16>
    %cst_35 = arith.constant dense<0.000000e+00> : vector<256x8xf32>
    %62 = tpu.matmul %59, %61, %cst_35 {dimension_numbers = #tpu.dot_dimension_numbers<[1], [0], [0], [1], [0, 0, 1, 1], [], []>} : vector<256x16xbf16>, vector<16x8xbf16>, vector<256x8xf32> -> vector<256x8xf32>
    %cst_36 = arith.constant 0.000000e+00 : f32
    %63 = vector.shape_cast %18 : vector<256x1xi1> to vector<256x1xi1>
    %64 = vector.broadcast %63 : vector<256x1xi1> to vector<256x8xi1>
    %65 = vector.broadcast %cst_36 : f32 to vector<256x8xf32>
    %66 = arith.select %64, %62, %65 : vector<256x8xi1>, vector<256x8xf32>
    %67 = arith.addf %58, %66 : vector<256x8xf32>
    %c32_37 = arith.constant 32 : index
    %c0_38 = arith.constant 0 : index
    %68 = vector.load %arg10[%c32_37, %c0_38] : memref<320x16xbf16, #tpu.memory_space<vmem>>, vector<256x16xbf16>
    %c4 = arith.constant 4 : index
    %c0_39 = arith.constant 0 : index
    %c0_40 = arith.constant 0 : index
    %69 = vector.load %arg3[%c4, %c0_39, %c0_40] : memref<9x16x8xbf16, #tpu.memory_space<vmem>>, vector<1x16x8xbf16>
    %70 = vector.shape_cast %69 : vector<1x16x8xbf16> to vector<16x8xbf16>
    %cst_41 = arith.constant dense<0.000000e+00> : vector<256x8xf32>
    %71 = tpu.matmul %68, %70, %cst_41 {dimension_numbers = #tpu.dot_dimension_numbers<[1], [0], [0], [1], [0, 0, 1, 1], [], []>} : vector<256x16xbf16>, vector<16x8xbf16>, vector<256x8xf32> -> vector<256x8xf32>
    %72 = arith.addf %67, %71 : vector<256x8xf32>
    %c33 = arith.constant 33 : index
    %c0_42 = arith.constant 0 : index
    %73 = vector.load %arg10[%c33, %c0_42] : memref<320x16xbf16, #tpu.memory_space<vmem>>, vector<256x16xbf16>
    %c5 = arith.constant 5 : index
    %c0_43 = arith.constant 0 : index
    %c0_44 = arith.constant 0 : index
    %74 = vector.load %arg3[%c5, %c0_43, %c0_44] : memref<9x16x8xbf16, #tpu.memory_space<vmem>>, vector<1x16x8xbf16>
    %75 = vector.shape_cast %74 : vector<1x16x8xbf16> to vector<16x8xbf16>
    %cst_45 = arith.constant dense<0.000000e+00> : vector<256x8xf32>
    %76 = tpu.matmul %73, %75, %cst_45 {dimension_numbers = #tpu.dot_dimension_numbers<[1], [0], [0], [1], [0, 0, 1, 1], [], []>} : vector<256x16xbf16>, vector<16x8xbf16>, vector<256x8xf32> -> vector<256x8xf32>
    %cst_46 = arith.constant 0.000000e+00 : f32
    %77 = vector.shape_cast %20 : vector<256x1xi1> to vector<256x1xi1>
    %78 = vector.broadcast %77 : vector<256x1xi1> to vector<256x8xi1>
    %79 = vector.broadcast %cst_46 : f32 to vector<256x8xf32>
    %80 = arith.select %78, %76, %79 : vector<256x8xi1>, vector<256x8xf32>
    %81 = arith.addf %72, %80 : vector<256x8xf32>
    %c47 = arith.constant 47 : index
    %c0_47 = arith.constant 0 : index
    %82 = vector.load %arg10[%c47, %c0_47] : memref<320x16xbf16, #tpu.memory_space<vmem>>, vector<256x16xbf16>
    %c6 = arith.constant 6 : index
    %c0_48 = arith.constant 0 : index
    %c0_49 = arith.constant 0 : index
    %83 = vector.load %arg3[%c6, %c0_48, %c0_49] : memref<9x16x8xbf16, #tpu.memory_space<vmem>>, vector<1x16x8xbf16>
    %84 = vector.shape_cast %83 : vector<1x16x8xbf16> to vector<16x8xbf16>
    %cst_50 = arith.constant dense<0.000000e+00> : vector<256x8xf32>
    %85 = tpu.matmul %82, %84, %cst_50 {dimension_numbers = #tpu.dot_dimension_numbers<[1], [0], [0], [1], [0, 0, 1, 1], [], []>} : vector<256x16xbf16>, vector<16x8xbf16>, vector<256x8xf32> -> vector<256x8xf32>
    %cst_51 = arith.constant 0.000000e+00 : f32
    %86 = vector.shape_cast %18 : vector<256x1xi1> to vector<256x1xi1>
    %87 = vector.broadcast %86 : vector<256x1xi1> to vector<256x8xi1>
    %88 = vector.broadcast %cst_51 : f32 to vector<256x8xf32>
    %89 = arith.select %87, %85, %88 : vector<256x8xi1>, vector<256x8xf32>
    %90 = arith.addf %81, %89 : vector<256x8xf32>
    %c48 = arith.constant 48 : index
    %c0_52 = arith.constant 0 : index
    %91 = vector.load %arg10[%c48, %c0_52] : memref<320x16xbf16, #tpu.memory_space<vmem>>, vector<256x16xbf16>
    %c7 = arith.constant 7 : index
    %c0_53 = arith.constant 0 : index
    %c0_54 = arith.constant 0 : index
    %92 = vector.load %arg3[%c7, %c0_53, %c0_54] : memref<9x16x8xbf16, #tpu.memory_space<vmem>>, vector<1x16x8xbf16>
    %93 = vector.shape_cast %92 : vector<1x16x8xbf16> to vector<16x8xbf16>
    %cst_55 = arith.constant dense<0.000000e+00> : vector<256x8xf32>
    %94 = tpu.matmul %91, %93, %cst_55 {dimension_numbers = #tpu.dot_dimension_numbers<[1], [0], [0], [1], [0, 0, 1, 1], [], []>} : vector<256x16xbf16>, vector<16x8xbf16>, vector<256x8xf32> -> vector<256x8xf32>
    %95 = arith.addf %90, %94 : vector<256x8xf32>
    %c49 = arith.constant 49 : index
    %c0_56 = arith.constant 0 : index
    %96 = vector.load %arg10[%c49, %c0_56] : memref<320x16xbf16, #tpu.memory_space<vmem>>, vector<256x16xbf16>
    %c8 = arith.constant 8 : index
    %c0_57 = arith.constant 0 : index
    %c0_58 = arith.constant 0 : index
    %97 = vector.load %arg3[%c8, %c0_57, %c0_58] : memref<9x16x8xbf16, #tpu.memory_space<vmem>>, vector<1x16x8xbf16>
    %98 = vector.shape_cast %97 : vector<1x16x8xbf16> to vector<16x8xbf16>
    %cst_59 = arith.constant dense<0.000000e+00> : vector<256x8xf32>
    %99 = tpu.matmul %96, %98, %cst_59 {dimension_numbers = #tpu.dot_dimension_numbers<[1], [0], [0], [1], [0, 0, 1, 1], [], []>} : vector<256x16xbf16>, vector<16x8xbf16>, vector<256x8xf32> -> vector<256x8xf32>
    %cst_60 = arith.constant 0.000000e+00 : f32
    %100 = vector.shape_cast %20 : vector<256x1xi1> to vector<256x1xi1>
    %101 = vector.broadcast %100 : vector<256x1xi1> to vector<256x8xi1>
    %102 = vector.broadcast %cst_60 : f32 to vector<256x8xf32>
    %103 = arith.select %101, %99, %102 : vector<256x8xi1>, vector<256x8xf32>
    %104 = arith.addf %95, %103 : vector<256x8xf32>
    %c0_61 = arith.constant 0 : index
    %c0_62 = arith.constant 0 : index
    %105 = vector.load %arg4[%c0_61, %c0_62] : memref<2x8xf32, #tpu.memory_space<vmem>>, vector<1x8xf32>
    %106 = vector.broadcast %105 : vector<1x8xf32> to vector<256x8xf32>
    %107 = arith.mulf %104, %106 : vector<256x8xf32>
    %c1_63 = arith.constant 1 : index
    %c0_64 = arith.constant 0 : index
    %108 = vector.load %arg4[%c1_63, %c0_64] : memref<2x8xf32, #tpu.memory_space<vmem>>, vector<1x8xf32>
    %109 = vector.broadcast %108 : vector<1x8xf32> to vector<256x8xf32>
    %110 = arith.addf %107, %109 : vector<256x8xf32>
    %cst_65 = arith.constant 0.000000e+00 : f32
    %111 = vector.broadcast %cst_65 : f32 to vector<256x8xf32>
    %112 = arith.maximumf %110, %111 : vector<256x8xf32>
    %cst_66 = arith.constant 0.000000e+00 : bf16
    %113 = vector.broadcast %cst_66 : bf16 to vector<32x8xbf16>
    %c0_67 = arith.constant 0 : index
    %c0_68 = arith.constant 0 : index
    %114 = vector.load %arg11[%c0_67, %c0_68] : memref<320x8xbf16, #tpu.memory_space<vmem>>, vector<32x8xbf16>
    tpu.vector_store %arg11[%c0_67, %c0_68], %113 {strides = array<i32>} : memref<320x8xbf16, #tpu.memory_space<vmem>>, vector<32x8xbf16>,
    %cst_69 = arith.constant 0.000000e+00 : bf16
    %115 = vector.broadcast %cst_69 : bf16 to vector<32x8xbf16>
    %c288_70 = arith.constant 288 : index
    %c0_71 = arith.constant 0 : index
    %116 = vector.load %arg11[%c288_70, %c0_71] : memref<320x8xbf16, #tpu.memory_space<vmem>>, vector<32x8xbf16>
    tpu.vector_store %arg11[%c288_70, %c0_71], %115 {strides = array<i32>} : memref<320x8xbf16, #tpu.memory_space<vmem>>, vector<32x8xbf16>,
    %117 = arith.truncf %112 : vector<256x8xf32> to vector<256x8xbf16>
    %c32_72 = arith.constant 32 : index
    %c0_73 = arith.constant 0 : index
    %118 = vector.load %arg11[%c32_72, %c0_73] : memref<320x8xbf16, #tpu.memory_space<vmem>>, vector<256x8xbf16>
    tpu.vector_store %arg11[%c32_72, %c0_73], %117 {strides = array<i32>} : memref<320x8xbf16, #tpu.memory_space<vmem>>, vector<256x8xbf16>,
    %cst_74 = arith.constant 0.000000e+00 : f32
    %119 = vector.broadcast %cst_74 : f32 to vector<256x8xf32>
    %c15_75 = arith.constant 15 : index
    %c0_76 = arith.constant 0 : index
    %120 = vector.load %arg11[%c15_75, %c0_76] : memref<320x8xbf16, #tpu.memory_space<vmem>>, vector<256x8xbf16>
    %c0_77 = arith.constant 0 : index
    %c0_78 = arith.constant 0 : index
    %c0_79 = arith.constant 0 : index
    %121 = vector.load %arg5[%c0_77, %c0_78, %c0_79] : memref<9x8x8xbf16, #tpu.memory_space<vmem>>, vector<1x8x8xbf16>
    %122 = vector.shape_cast %121 : vector<1x8x8xbf16> to vector<8x8xbf16>
    %cst_80 = arith.constant dense<0.000000e+00> : vector<256x8xf32>
    %123 = tpu.matmul %120, %122, %cst_80 {dimension_numbers = #tpu.dot_dimension_numbers<[1], [0], [0], [1], [0, 0, 1, 1], [], []>} : vector<256x8xbf16>, vector<8x8xbf16>, vector<256x8xf32> -> vector<256x8xf32>
    %cst_81 = arith.constant 0.000000e+00 : f32
    %124 = vector.shape_cast %18 : vector<256x1xi1> to vector<256x1xi1>
    %125 = vector.broadcast %124 : vector<256x1xi1> to vector<256x8xi1>
    %126 = vector.broadcast %cst_81 : f32 to vector<256x8xf32>
    %127 = arith.select %125, %123, %126 : vector<256x8xi1>, vector<256x8xf32>
    %128 = arith.addf %119, %127 : vector<256x8xf32>
    %c16_82 = arith.constant 16 : index
    %c0_83 = arith.constant 0 : index
    %129 = vector.load %arg11[%c16_82, %c0_83] : memref<320x8xbf16, #tpu.memory_space<vmem>>, vector<256x8xbf16>
    %c1_84 = arith.constant 1 : index
    %c0_85 = arith.constant 0 : index
    %c0_86 = arith.constant 0 : index
    %130 = vector.load %arg5[%c1_84, %c0_85, %c0_86] : memref<9x8x8xbf16, #tpu.memory_space<vmem>>, vector<1x8x8xbf16>
    %131 = vector.shape_cast %130 : vector<1x8x8xbf16> to vector<8x8xbf16>
    %cst_87 = arith.constant dense<0.000000e+00> : vector<256x8xf32>
    %132 = tpu.matmul %129, %131, %cst_87 {dimension_numbers = #tpu.dot_dimension_numbers<[1], [0], [0], [1], [0, 0, 1, 1], [], []>} : vector<256x8xbf16>, vector<8x8xbf16>, vector<256x8xf32> -> vector<256x8xf32>
    %133 = arith.addf %128, %132 : vector<256x8xf32>
    %c17_88 = arith.constant 17 : index
    %c0_89 = arith.constant 0 : index
    %134 = vector.load %arg11[%c17_88, %c0_89] : memref<320x8xbf16, #tpu.memory_space<vmem>>, vector<256x8xbf16>
    %c2_90 = arith.constant 2 : index
    %c0_91 = arith.constant 0 : index
    %c0_92 = arith.constant 0 : index
    %135 = vector.load %arg5[%c2_90, %c0_91, %c0_92] : memref<9x8x8xbf16, #tpu.memory_space<vmem>>, vector<1x8x8xbf16>
    %136 = vector.shape_cast %135 : vector<1x8x8xbf16> to vector<8x8xbf16>
    %cst_93 = arith.constant dense<0.000000e+00> : vector<256x8xf32>
    %137 = tpu.matmul %134, %136, %cst_93 {dimension_numbers = #tpu.dot_dimension_numbers<[1], [0], [0], [1], [0, 0, 1, 1], [], []>} : vector<256x8xbf16>, vector<8x8xbf16>, vector<256x8xf32> -> vector<256x8xf32>
    %cst_94 = arith.constant 0.000000e+00 : f32
    %138 = vector.shape_cast %20 : vector<256x1xi1> to vector<256x1xi1>
    %139 = vector.broadcast %138 : vector<256x1xi1> to vector<256x8xi1>
    %140 = vector.broadcast %cst_94 : f32 to vector<256x8xf32>
    %141 = arith.select %139, %137, %140 : vector<256x8xi1>, vector<256x8xf32>
    %142 = arith.addf %133, %141 : vector<256x8xf32>
    %c31_95 = arith.constant 31 : index
    %c0_96 = arith.constant 0 : index
    %143 = vector.load %arg11[%c31_95, %c0_96] : memref<320x8xbf16, #tpu.memory_space<vmem>>, vector<256x8xbf16>
    %c3_97 = arith.constant 3 : index
    %c0_98 = arith.constant 0 : index
    %c0_99 = arith.constant 0 : index
    %144 = vector.load %arg5[%c3_97, %c0_98, %c0_99] : memref<9x8x8xbf16, #tpu.memory_space<vmem>>, vector<1x8x8xbf16>
    %145 = vector.shape_cast %144 : vector<1x8x8xbf16> to vector<8x8xbf16>
    %cst_100 = arith.constant dense<0.000000e+00> : vector<256x8xf32>
    %146 = tpu.matmul %143, %145, %cst_100 {dimension_numbers = #tpu.dot_dimension_numbers<[1], [0], [0], [1], [0, 0, 1, 1], [], []>} : vector<256x8xbf16>, vector<8x8xbf16>, vector<256x8xf32> -> vector<256x8xf32>
    %cst_101 = arith.constant 0.000000e+00 : f32
    %147 = vector.shape_cast %18 : vector<256x1xi1> to vector<256x1xi1>
    %148 = vector.broadcast %147 : vector<256x1xi1> to vector<256x8xi1>
    %149 = vector.broadcast %cst_101 : f32 to vector<256x8xf32>
    %150 = arith.select %148, %146, %149 : vector<256x8xi1>, vector<256x8xf32>
    %151 = arith.addf %142, %150 : vector<256x8xf32>
    %c32_102 = arith.constant 32 : index
    %c0_103 = arith.constant 0 : index
    %152 = vector.load %arg11[%c32_102, %c0_103] : memref<320x8xbf16, #tpu.memory_space<vmem>>, vector<256x8xbf16>
    %c4_104 = arith.constant 4 : index
    %c0_105 = arith.constant 0 : index
    %c0_106 = arith.constant 0 : index
    %153 = vector.load %arg5[%c4_104, %c0_105, %c0_106] : memref<9x8x8xbf16, #tpu.memory_space<vmem>>, vector<1x8x8xbf16>
    %154 = vector.shape_cast %153 : vector<1x8x8xbf16> to vector<8x8xbf16>
    %cst_107 = arith.constant dense<0.000000e+00> : vector<256x8xf32>
    %155 = tpu.matmul %152, %154, %cst_107 {dimension_numbers = #tpu.dot_dimension_numbers<[1], [0], [0], [1], [0, 0, 1, 1], [], []>} : vector<256x8xbf16>, vector<8x8xbf16>, vector<256x8xf32> -> vector<256x8xf32>
    %156 = arith.addf %151, %155 : vector<256x8xf32>
    %c33_108 = arith.constant 33 : index
    %c0_109 = arith.constant 0 : index
    %157 = vector.load %arg11[%c33_108, %c0_109] : memref<320x8xbf16, #tpu.memory_space<vmem>>, vector<256x8xbf16>
    %c5_110 = arith.constant 5 : index
    %c0_111 = arith.constant 0 : index
    %c0_112 = arith.constant 0 : index
    %158 = vector.load %arg5[%c5_110, %c0_111, %c0_112] : memref<9x8x8xbf16, #tpu.memory_space<vmem>>, vector<1x8x8xbf16>
    %159 = vector.shape_cast %158 : vector<1x8x8xbf16> to vector<8x8xbf16>
    %cst_113 = arith.constant dense<0.000000e+00> : vector<256x8xf32>
    %160 = tpu.matmul %157, %159, %cst_113 {dimension_numbers = #tpu.dot_dimension_numbers<[1], [0], [0], [1], [0, 0, 1, 1], [], []>} : vector<256x8xbf16>, vector<8x8xbf16>, vector<256x8xf32> -> vector<256x8xf32>
    %cst_114 = arith.constant 0.000000e+00 : f32
    %161 = vector.shape_cast %20 : vector<256x1xi1> to vector<256x1xi1>
    %162 = vector.broadcast %161 : vector<256x1xi1> to vector<256x8xi1>
    %163 = vector.broadcast %cst_114 : f32 to vector<256x8xf32>
    %164 = arith.select %162, %160, %163 : vector<256x8xi1>, vector<256x8xf32>
    %165 = arith.addf %156, %164 : vector<256x8xf32>
    %c47_115 = arith.constant 47 : index
    %c0_116 = arith.constant 0 : index
    %166 = vector.load %arg11[%c47_115, %c0_116] : memref<320x8xbf16, #tpu.memory_space<vmem>>, vector<256x8xbf16>
    %c6_117 = arith.constant 6 : index
    %c0_118 = arith.constant 0 : index
    %c0_119 = arith.constant 0 : index
    %167 = vector.load %arg5[%c6_117, %c0_118, %c0_119] : memref<9x8x8xbf16, #tpu.memory_space<vmem>>, vector<1x8x8xbf16>
    %168 = vector.shape_cast %167 : vector<1x8x8xbf16> to vector<8x8xbf16>
    %cst_120 = arith.constant dense<0.000000e+00> : vector<256x8xf32>
    %169 = tpu.matmul %166, %168, %cst_120 {dimension_numbers = #tpu.dot_dimension_numbers<[1], [0], [0], [1], [0, 0, 1, 1], [], []>} : vector<256x8xbf16>, vector<8x8xbf16>, vector<256x8xf32> -> vector<256x8xf32>
    %cst_121 = arith.constant 0.000000e+00 : f32
    %170 = vector.shape_cast %18 : vector<256x1xi1> to vector<256x1xi1>
    %171 = vector.broadcast %170 : vector<256x1xi1> to vector<256x8xi1>
    %172 = vector.broadcast %cst_121 : f32 to vector<256x8xf32>
    %173 = arith.select %171, %169, %172 : vector<256x8xi1>, vector<256x8xf32>
    %174 = arith.addf %165, %173 : vector<256x8xf32>
    %c48_122 = arith.constant 48 : index
    %c0_123 = arith.constant 0 : index
    %175 = vector.load %arg11[%c48_122, %c0_123] : memref<320x8xbf16, #tpu.memory_space<vmem>>, vector<256x8xbf16>
    %c7_124 = arith.constant 7 : index
    %c0_125 = arith.constant 0 : index
    %c0_126 = arith.constant 0 : index
    %176 = vector.load %arg5[%c7_124, %c0_125, %c0_126] : memref<9x8x8xbf16, #tpu.memory_space<vmem>>, vector<1x8x8xbf16>
    %177 = vector.shape_cast %176 : vector<1x8x8xbf16> to vector<8x8xbf16>
    %cst_127 = arith.constant dense<0.000000e+00> : vector<256x8xf32>
    %178 = tpu.matmul %175, %177, %cst_127 {dimension_numbers = #tpu.dot_dimension_numbers<[1], [0], [0], [1], [0, 0, 1, 1], [], []>} : vector<256x8xbf16>, vector<8x8xbf16>, vector<256x8xf32> -> vector<256x8xf32>
    %179 = arith.addf %174, %178 : vector<256x8xf32>
    %c49_128 = arith.constant 49 : index
    %c0_129 = arith.constant 0 : index
    %180 = vector.load %arg11[%c49_128, %c0_129] : memref<320x8xbf16, #tpu.memory_space<vmem>>, vector<256x8xbf16>
    %c8_130 = arith.constant 8 : index
    %c0_131 = arith.constant 0 : index
    %c0_132 = arith.constant 0 : index
    %181 = vector.load %arg5[%c8_130, %c0_131, %c0_132] : memref<9x8x8xbf16, #tpu.memory_space<vmem>>, vector<1x8x8xbf16>
    %182 = vector.shape_cast %181 : vector<1x8x8xbf16> to vector<8x8xbf16>
    %cst_133 = arith.constant dense<0.000000e+00> : vector<256x8xf32>
    %183 = tpu.matmul %180, %182, %cst_133 {dimension_numbers = #tpu.dot_dimension_numbers<[1], [0], [0], [1], [0, 0, 1, 1], [], []>} : vector<256x8xbf16>, vector<8x8xbf16>, vector<256x8xf32> -> vector<256x8xf32>
    %cst_134 = arith.constant 0.000000e+00 : f32
    %184 = vector.shape_cast %20 : vector<256x1xi1> to vector<256x1xi1>
    %185 = vector.broadcast %184 : vector<256x1xi1> to vector<256x8xi1>
    %186 = vector.broadcast %cst_134 : f32 to vector<256x8xf32>
    %187 = arith.select %185, %183, %186 : vector<256x8xi1>, vector<256x8xf32>
    %188 = arith.addf %179, %187 : vector<256x8xf32>
    %c0_135 = arith.constant 0 : index
    %c0_136 = arith.constant 0 : index
    %189 = vector.load %arg6[%c0_135, %c0_136] : memref<2x8xf32, #tpu.memory_space<vmem>>, vector<1x8xf32>
    %190 = vector.broadcast %189 : vector<1x8xf32> to vector<256x8xf32>
    %191 = arith.mulf %188, %190 : vector<256x8xf32>
    %c1_137 = arith.constant 1 : index
    %c0_138 = arith.constant 0 : index
    %192 = vector.load %arg6[%c1_137, %c0_138] : memref<2x8xf32, #tpu.memory_space<vmem>>, vector<1x8xf32>
    %193 = vector.broadcast %192 : vector<1x8xf32> to vector<256x8xf32>
    %194 = arith.addf %191, %193 : vector<256x8xf32>
    %cst_139 = arith.constant 0.000000e+00 : f32
    %195 = vector.broadcast %cst_139 : f32 to vector<256x8xf32>
    %196 = arith.maximumf %194, %195 : vector<256x8xf32>
    %cst_140 = arith.constant 0.000000e+00 : bf16
    %197 = vector.broadcast %cst_140 : bf16 to vector<32x8xbf16>
    %c0_141 = arith.constant 0 : index
    %c0_142 = arith.constant 0 : index
    %198 = vector.load %arg12[%c0_141, %c0_142] : memref<320x8xbf16, #tpu.memory_space<vmem>>, vector<32x8xbf16>
    tpu.vector_store %arg12[%c0_141, %c0_142], %197 {strides = array<i32>} : memref<320x8xbf16, #tpu.memory_space<vmem>>, vector<32x8xbf16>,
    %cst_143 = arith.constant 0.000000e+00 : bf16
    %199 = vector.broadcast %cst_143 : bf16 to vector<32x8xbf16>
    %c288_144 = arith.constant 288 : index
    %c0_145 = arith.constant 0 : index
    %200 = vector.load %arg12[%c288_144, %c0_145] : memref<320x8xbf16, #tpu.memory_space<vmem>>, vector<32x8xbf16>
    tpu.vector_store %arg12[%c288_144, %c0_145], %199 {strides = array<i32>} : memref<320x8xbf16, #tpu.memory_space<vmem>>, vector<32x8xbf16>,
    %201 = arith.truncf %196 : vector<256x8xf32> to vector<256x8xbf16>
    %c32_146 = arith.constant 32 : index
    %c0_147 = arith.constant 0 : index
    %202 = vector.load %arg12[%c32_146, %c0_147] : memref<320x8xbf16, #tpu.memory_space<vmem>>, vector<256x8xbf16>
    tpu.vector_store %arg12[%c32_146, %c0_147], %201 {strides = array<i32>} : memref<320x8xbf16, #tpu.memory_space<vmem>>, vector<256x8xbf16>,
    %cst_148 = arith.constant 0.000000e+00 : f32
    %203 = vector.broadcast %cst_148 : f32 to vector<256x3xf32>
    %c15_149 = arith.constant 15 : index
    %c0_150 = arith.constant 0 : index
    %204 = vector.load %arg12[%c15_149, %c0_150] : memref<320x8xbf16, #tpu.memory_space<vmem>>, vector<256x8xbf16>
    %c0_151 = arith.constant 0 : index
    %c0_152 = arith.constant 0 : index
    %c0_153 = arith.constant 0 : index
    %205 = vector.load %arg7[%c0_151, %c0_152, %c0_153] : memref<9x8x3xbf16, #tpu.memory_space<vmem>>, vector<1x8x3xbf16>
    %206 = vector.shape_cast %205 : vector<1x8x3xbf16> to vector<8x3xbf16>
    %cst_154 = arith.constant dense<0.000000e+00> : vector<256x3xf32>
    %207 = tpu.matmul %204, %206, %cst_154 {dimension_numbers = #tpu.dot_dimension_numbers<[1], [0], [0], [1], [0, 0, 1, 1], [], []>} : vector<256x8xbf16>, vector<8x3xbf16>, vector<256x3xf32> -> vector<256x3xf32>
    %cst_155 = arith.constant 0.000000e+00 : f32
    %208 = vector.shape_cast %18 : vector<256x1xi1> to vector<256x1xi1>
    %209 = vector.broadcast %208 : vector<256x1xi1> to vector<256x3xi1>
    %210 = vector.broadcast %cst_155 : f32 to vector<256x3xf32>
    %211 = arith.select %209, %207, %210 : vector<256x3xi1>, vector<256x3xf32>
    %212 = arith.addf %203, %211 : vector<256x3xf32>
    %c16_156 = arith.constant 16 : index
    %c0_157 = arith.constant 0 : index
    %213 = vector.load %arg12[%c16_156, %c0_157] : memref<320x8xbf16, #tpu.memory_space<vmem>>, vector<256x8xbf16>
    %c1_158 = arith.constant 1 : index
    %c0_159 = arith.constant 0 : index
    %c0_160 = arith.constant 0 : index
    %214 = vector.load %arg7[%c1_158, %c0_159, %c0_160] : memref<9x8x3xbf16, #tpu.memory_space<vmem>>, vector<1x8x3xbf16>
    %215 = vector.shape_cast %214 : vector<1x8x3xbf16> to vector<8x3xbf16>
    %cst_161 = arith.constant dense<0.000000e+00> : vector<256x3xf32>
    %216 = tpu.matmul %213, %215, %cst_161 {dimension_numbers = #tpu.dot_dimension_numbers<[1], [0], [0], [1], [0, 0, 1, 1], [], []>} : vector<256x8xbf16>, vector<8x3xbf16>, vector<256x3xf32> -> vector<256x3xf32>
    %217 = arith.addf %212, %216 : vector<256x3xf32>
    %c17_162 = arith.constant 17 : index
    %c0_163 = arith.constant 0 : index
    %218 = vector.load %arg12[%c17_162, %c0_163] : memref<320x8xbf16, #tpu.memory_space<vmem>>, vector<256x8xbf16>
    %c2_164 = arith.constant 2 : index
    %c0_165 = arith.constant 0 : index
    %c0_166 = arith.constant 0 : index
    %219 = vector.load %arg7[%c2_164, %c0_165, %c0_166] : memref<9x8x3xbf16, #tpu.memory_space<vmem>>, vector<1x8x3xbf16>
    %220 = vector.shape_cast %219 : vector<1x8x3xbf16> to vector<8x3xbf16>
    %cst_167 = arith.constant dense<0.000000e+00> : vector<256x3xf32>
    %221 = tpu.matmul %218, %220, %cst_167 {dimension_numbers = #tpu.dot_dimension_numbers<[1], [0], [0], [1], [0, 0, 1, 1], [], []>} : vector<256x8xbf16>, vector<8x3xbf16>, vector<256x3xf32> -> vector<256x3xf32>
    %cst_168 = arith.constant 0.000000e+00 : f32
    %222 = vector.shape_cast %20 : vector<256x1xi1> to vector<256x1xi1>
    %223 = vector.broadcast %222 : vector<256x1xi1> to vector<256x3xi1>
    %224 = vector.broadcast %cst_168 : f32 to vector<256x3xf32>
    %225 = arith.select %223, %221, %224 : vector<256x3xi1>, vector<256x3xf32>
    %226 = arith.addf %217, %225 : vector<256x3xf32>
    %c31_169 = arith.constant 31 : index
    %c0_170 = arith.constant 0 : index
    %227 = vector.load %arg12[%c31_169, %c0_170] : memref<320x8xbf16, #tpu.memory_space<vmem>>, vector<256x8xbf16>
    %c3_171 = arith.constant 3 : index
    %c0_172 = arith.constant 0 : index
    %c0_173 = arith.constant 0 : index
    %228 = vector.load %arg7[%c3_171, %c0_172, %c0_173] : memref<9x8x3xbf16, #tpu.memory_space<vmem>>, vector<1x8x3xbf16>
    %229 = vector.shape_cast %228 : vector<1x8x3xbf16> to vector<8x3xbf16>
    %cst_174 = arith.constant dense<0.000000e+00> : vector<256x3xf32>
    %230 = tpu.matmul %227, %229, %cst_174 {dimension_numbers = #tpu.dot_dimension_numbers<[1], [0], [0], [1], [0, 0, 1, 1], [], []>} : vector<256x8xbf16>, vector<8x3xbf16>, vector<256x3xf32> -> vector<256x3xf32>
    %cst_175 = arith.constant 0.000000e+00 : f32
    %231 = vector.shape_cast %18 : vector<256x1xi1> to vector<256x1xi1>
    %232 = vector.broadcast %231 : vector<256x1xi1> to vector<256x3xi1>
    %233 = vector.broadcast %cst_175 : f32 to vector<256x3xf32>
    %234 = arith.select %232, %230, %233 : vector<256x3xi1>, vector<256x3xf32>
    %235 = arith.addf %226, %234 : vector<256x3xf32>
    %c32_176 = arith.constant 32 : index
    %c0_177 = arith.constant 0 : index
    %236 = vector.load %arg12[%c32_176, %c0_177] : memref<320x8xbf16, #tpu.memory_space<vmem>>, vector<256x8xbf16>
    %c4_178 = arith.constant 4 : index
    %c0_179 = arith.constant 0 : index
    %c0_180 = arith.constant 0 : index
    %237 = vector.load %arg7[%c4_178, %c0_179, %c0_180] : memref<9x8x3xbf16, #tpu.memory_space<vmem>>, vector<1x8x3xbf16>
    %238 = vector.shape_cast %237 : vector<1x8x3xbf16> to vector<8x3xbf16>
    %cst_181 = arith.constant dense<0.000000e+00> : vector<256x3xf32>
    %239 = tpu.matmul %236, %238, %cst_181 {dimension_numbers = #tpu.dot_dimension_numbers<[1], [0], [0], [1], [0, 0, 1, 1], [], []>} : vector<256x8xbf16>, vector<8x3xbf16>, vector<256x3xf32> -> vector<256x3xf32>
    %240 = arith.addf %235, %239 : vector<256x3xf32>
    %c33_182 = arith.constant 33 : index
    %c0_183 = arith.constant 0 : index
    %241 = vector.load %arg12[%c33_182, %c0_183] : memref<320x8xbf16, #tpu.memory_space<vmem>>, vector<256x8xbf16>
    %c5_184 = arith.constant 5 : index
    %c0_185 = arith.constant 0 : index
    %c0_186 = arith.constant 0 : index
    %242 = vector.load %arg7[%c5_184, %c0_185, %c0_186] : memref<9x8x3xbf16, #tpu.memory_space<vmem>>, vector<1x8x3xbf16>
    %243 = vector.shape_cast %242 : vector<1x8x3xbf16> to vector<8x3xbf16>
    %cst_187 = arith.constant dense<0.000000e+00> : vector<256x3xf32>
    %244 = tpu.matmul %241, %243, %cst_187 {dimension_numbers = #tpu.dot_dimension_numbers<[1], [0], [0], [1], [0, 0, 1, 1], [], []>} : vector<256x8xbf16>, vector<8x3xbf16>, vector<256x3xf32> -> vector<256x3xf32>
    %cst_188 = arith.constant 0.000000e+00 : f32
    %245 = vector.shape_cast %20 : vector<256x1xi1> to vector<256x1xi1>
    %246 = vector.broadcast %245 : vector<256x1xi1> to vector<256x3xi1>
    %247 = vector.broadcast %cst_188 : f32 to vector<256x3xf32>
    %248 = arith.select %246, %244, %247 : vector<256x3xi1>, vector<256x3xf32>
    %249 = arith.addf %240, %248 : vector<256x3xf32>
    %c47_189 = arith.constant 47 : index
    %c0_190 = arith.constant 0 : index
    %250 = vector.load %arg12[%c47_189, %c0_190] : memref<320x8xbf16, #tpu.memory_space<vmem>>, vector<256x8xbf16>
    %c6_191 = arith.constant 6 : index
    %c0_192 = arith.constant 0 : index
    %c0_193 = arith.constant 0 : index
    %251 = vector.load %arg7[%c6_191, %c0_192, %c0_193] : memref<9x8x3xbf16, #tpu.memory_space<vmem>>, vector<1x8x3xbf16>
    %252 = vector.shape_cast %251 : vector<1x8x3xbf16> to vector<8x3xbf16>
    %cst_194 = arith.constant dense<0.000000e+00> : vector<256x3xf32>
    %253 = tpu.matmul %250, %252, %cst_194 {dimension_numbers = #tpu.dot_dimension_numbers<[1], [0], [0], [1], [0, 0, 1, 1], [], []>} : vector<256x8xbf16>, vector<8x3xbf16>, vector<256x3xf32> -> vector<256x3xf32>
    %cst_195 = arith.constant 0.000000e+00 : f32
    %254 = vector.shape_cast %18 : vector<256x1xi1> to vector<256x1xi1>
    %255 = vector.broadcast %254 : vector<256x1xi1> to vector<256x3xi1>
    %256 = vector.broadcast %cst_195 : f32 to vector<256x3xf32>
    %257 = arith.select %255, %253, %256 : vector<256x3xi1>, vector<256x3xf32>
    %258 = arith.addf %249, %257 : vector<256x3xf32>
    %c48_196 = arith.constant 48 : index
    %c0_197 = arith.constant 0 : index
    %259 = vector.load %arg12[%c48_196, %c0_197] : memref<320x8xbf16, #tpu.memory_space<vmem>>, vector<256x8xbf16>
    %c7_198 = arith.constant 7 : index
    %c0_199 = arith.constant 0 : index
    %c0_200 = arith.constant 0 : index
    %260 = vector.load %arg7[%c7_198, %c0_199, %c0_200] : memref<9x8x3xbf16, #tpu.memory_space<vmem>>, vector<1x8x3xbf16>
    %261 = vector.shape_cast %260 : vector<1x8x3xbf16> to vector<8x3xbf16>
    %cst_201 = arith.constant dense<0.000000e+00> : vector<256x3xf32>
    %262 = tpu.matmul %259, %261, %cst_201 {dimension_numbers = #tpu.dot_dimension_numbers<[1], [0], [0], [1], [0, 0, 1, 1], [], []>} : vector<256x8xbf16>, vector<8x3xbf16>, vector<256x3xf32> -> vector<256x3xf32>
    %263 = arith.addf %258, %262 : vector<256x3xf32>
    %c49_202 = arith.constant 49 : index
    %c0_203 = arith.constant 0 : index
    %264 = vector.load %arg12[%c49_202, %c0_203] : memref<320x8xbf16, #tpu.memory_space<vmem>>, vector<256x8xbf16>
    %c8_204 = arith.constant 8 : index
    %c0_205 = arith.constant 0 : index
    %c0_206 = arith.constant 0 : index
    %265 = vector.load %arg7[%c8_204, %c0_205, %c0_206] : memref<9x8x3xbf16, #tpu.memory_space<vmem>>, vector<1x8x3xbf16>
    %266 = vector.shape_cast %265 : vector<1x8x3xbf16> to vector<8x3xbf16>
    %cst_207 = arith.constant dense<0.000000e+00> : vector<256x3xf32>
    %267 = tpu.matmul %264, %266, %cst_207 {dimension_numbers = #tpu.dot_dimension_numbers<[1], [0], [0], [1], [0, 0, 1, 1], [], []>} : vector<256x8xbf16>, vector<8x3xbf16>, vector<256x3xf32> -> vector<256x3xf32>
    %cst_208 = arith.constant 0.000000e+00 : f32
    %268 = vector.shape_cast %20 : vector<256x1xi1> to vector<256x1xi1>
    %269 = vector.broadcast %268 : vector<256x1xi1> to vector<256x3xi1>
    %270 = vector.broadcast %cst_208 : f32 to vector<256x3xf32>
    %271 = arith.select %269, %267, %270 : vector<256x3xi1>, vector<256x3xf32>
    %272 = arith.addf %263, %271 : vector<256x3xf32>
    %c0_209 = arith.constant 0 : index
    %c0_210 = arith.constant 0 : index
    %273 = vector.load %arg8[%c0_209, %c0_210] : memref<2x3xf32, #tpu.memory_space<vmem>>, vector<1x3xf32>
    %274 = vector.broadcast %273 : vector<1x3xf32> to vector<256x3xf32>
    %275 = arith.mulf %272, %274 : vector<256x3xf32>
    %c1_211 = arith.constant 1 : index
    %c0_212 = arith.constant 0 : index
    %276 = vector.load %arg8[%c1_211, %c0_212] : memref<2x3xf32, #tpu.memory_space<vmem>>, vector<1x3xf32>
    %277 = vector.broadcast %276 : vector<1x3xf32> to vector<256x3xf32>
    %278 = arith.addf %275, %277 : vector<256x3xf32>
    %c0_213 = arith.constant 0 : index
    %c0_214 = arith.constant 0 : index
    %c0_215 = arith.constant 0 : index
    %279 = vector.load %arg9[%c0_213, %c0_214, %c0_215] : memref<1x256x3xf32, #tpu.memory_space<vmem>>, vector<1x256x3xf32>
    %280 = vector.shape_cast %279 : vector<1x256x3xf32> to vector<256x3xf32>
    %281 = vector.shape_cast %278 : vector<256x3xf32> to vector<1x256x3xf32>
    tpu.vector_store %arg9[%c0_213, %c0_214, %c0_215], %281 {strides = array<i32>} : memref<1x256x3xf32, #tpu.memory_space<vmem>>, vector<1x256x3xf32>,
    return
  }
  func.func @transform_0(%arg0: i32) -> (i32, i32, i32, i32) {
    %c0_i32 = arith.constant 0 : i32
    %c0_i32_0 = arith.constant 0 : i32
    %c0_i32_1 = arith.constant 0 : i32
    %c0_i32_2 = arith.constant 0 : i32
    return %arg0, %c0_i32, %c0_i32_0, %c0_i32_1 : i32, i32, i32, i32
  }
  func.func @transform_1(%arg0: i32) -> (i32, i32, i32, i32) {
    %c0_i32 = arith.constant 0 : i32
    %c0_i32_0 = arith.constant 0 : i32
    %c0_i32_1 = arith.constant 0 : i32
    %c0_i32_2 = arith.constant 0 : i32
    return %arg0, %c0_i32, %c0_i32_0, %c0_i32_1 : i32, i32, i32, i32
  }
  func.func @transform_2(%arg0: i32) -> (i32, i32, i32) {
    %c0_i32 = arith.constant 0 : i32
    %c0_i32_0 = arith.constant 0 : i32
    %c0_i32_1 = arith.constant 0 : i32
    %c0_i32_2 = arith.constant 0 : i32
    return %c0_i32, %c0_i32_0, %c0_i32_1 : i32, i32, i32
  }
  func.func @transform_3(%arg0: i32) -> (i32, i32) {
    %c0_i32 = arith.constant 0 : i32
    %c0_i32_0 = arith.constant 0 : i32
    %c0_i32_1 = arith.constant 0 : i32
    return %c0_i32, %c0_i32_0 : i32, i32
  }
  func.func @transform_4(%arg0: i32) -> (i32, i32, i32) {
    %c0_i32 = arith.constant 0 : i32
    %c0_i32_0 = arith.constant 0 : i32
    %c0_i32_1 = arith.constant 0 : i32
    %c0_i32_2 = arith.constant 0 : i32
    return %c0_i32, %c0_i32_0, %c0_i32_1 : i32, i32, i32
  }
  func.func @transform_5(%arg0: i32) -> (i32, i32) {
    %c0_i32 = arith.constant 0 : i32
    %c0_i32_0 = arith.constant 0 : i32
    %c0_i32_1 = arith.constant 0 : i32
    return %c0_i32, %c0_i32_0 : i32, i32
  }
  func.func @transform_6(%arg0: i32) -> (i32, i32, i32) {
    %c0_i32 = arith.constant 0 : i32
    %c0_i32_0 = arith.constant 0 : i32
    %c0_i32_1 = arith.constant 0 : i32
    %c0_i32_2 = arith.constant 0 : i32
    return %c0_i32, %c0_i32_0, %c0_i32_1 : i32, i32, i32
  }
  func.func @transform_7(%arg0: i32) -> (i32, i32) {
    %c0_i32 = arith.constant 0 : i32
    %c0_i32_0 = arith.constant 0 : i32
    %c0_i32_1 = arith.constant 0 : i32
    return %c0_i32, %c0_i32_0 : i32, i32
  }
  func.func @transform_8(%arg0: i32) -> (i32, i32, i32) {
    %c0_i32 = arith.constant 0 : i32
    %c0_i32_0 = arith.constant 0 : i32
    %c0_i32_1 = arith.constant 0 : i32
    return %arg0, %c0_i32, %c0_i32_0 : i32, i32, i32
  }
}

</mosaic_0001>

<bundles_post_ra>
// kernel: tile.13
= control target key start
LH: loop header
LB: loop body
LE: loop exit
PB: predicated region body
PF: predicated region fallthrough
CT: control target
= control target key end

     0   :  { %s22_s0 = inlined_call_operand.vmem [shape: f32[16], index: 0, kind: input, shape index: {}]   ;;  %s23_s1 = inlined_call_operand.vmem [shape: f32[4,16], index: 1, kind: output, shape index: {}]  }
   0x1   :  { %v4_v0 = vld [vmem:[%s22_s0] ss:$0 sm:$0xff] }
   0x2   :  { %5 = vst [vmem:[%s23_s1] sm:$0xf] %v4_v0 }

// kernel: tile.14
= control target key start
LH: loop header
LB: loop body
LE: loop exit
PB: predicated region body
PF: predicated region fallthrough
CT: control target
= control target key end

     0   :  { %vm7_vm0 = vcmask 130048   ;;  %s37_s8 = smov 16   ;;  %s38_s9 = smov 32   ;;  %vm13_vm1 = vcmask 523648   ;;  %vm19_vm2 = vcmask 392448   ;;  %vm25_vm3 = vcmask 261248   ;;  %s55_s0 = inlined_call_operand.vmem [shape: f32[4,16], index: 0, kind: input, shape index: {}]   ;;  %s56_s1 = inlined_call_operand.vmem [shape: f32[1,64], index: 1, kind: output, shape index: {}]  }
   0x1   :  { %v4_v0 = vld [vmem:[%s55_s0] sm:$0xf]  ;;  %s36_s0 = smov 48  }
   0x2   :  { %5 = vst [vmem:[#allocation1] sm:$0xf] %v4_v0 }
   0x9   :  { %v10_v1 = vld [vmem:[#allocation1 + $0x3] sm:$0x1]   ;;  %v22_v2 = vld [vmem:[#allocation1 + $0x1] sm:$0x1]   ;;  %v6_v3 = vld [vmem:[#allocation1] sm:$0x1]  }
   0xa   :  { %11 = vrot.lane.b32.xlu0 %v10_v1, %s36_s0  ;;  %23 = vrot.lane.b32.xlu1 %v22_v2, %s37_s8  ;;  %v16_v4 = vld [vmem:[#allocation1 + $0x2] sm:$0x1]   ;;  %8 = vst.msk [vmem:[#allocation0] sm:$0x1] %vm7_vm0, %v6_v3  }
   0xe   :  { %17 = vrot.lane.b32.xlu0 %v16_v4, %s38_s9 }
  0x7c   :  { %v12_v5 = vpop.permute.xlu0 %11   ;;  %v24_v6 = vpop.permute.xlu1 %23  }
  0x7d   :  { %14 = vst.msk [vmem:[#allocation0] sm:$0x1] %vm13_vm1, %v12_v5  }
  0x80   :  { %v18_v7 = vpop.permute.xlu0 %17  }
  0x81   :  { %20 = vst.msk [vmem:[#allocation0] sm:$0x1] %vm19_vm2, %v18_v7  }
  0x82   :  { %26 = vst.msk [vmem:[#allocation0] sm:$0x1] %vm25_vm3, %v24_v6  }
  0x89   :  { %v30_v8 = vld [vmem:[#allocation0] sm:$0x1] }
  0x8a   :  { %32 = vst [vmem:[%s56_s1] sm:$0x1] %v30_v8 }

// kernel: tile.18
= control target key start
LH: loop header
LB: loop body
LE: loop exit
PB: predicated region body
PF: predicated region fallthrough
CT: control target
= control target key end

     0   :  { %s22_s0 = inlined_call_operand.vmem [shape: f32[8], index: 0, kind: input, shape index: {}]   ;;  %s23_s1 = inlined_call_operand.vmem [shape: f32[4,8], index: 1, kind: output, shape index: {}]  }
   0x1   :  { %v4_v0 = vld [vmem:[%s22_s0] ss:$0 sm:$0xff] }
   0x2   :  { %5 = vst [vmem:[%s23_s1] sm:$0xf] %v4_v0 }

// kernel: tile.19
= control target key start
LH: loop header
LB: loop body
LE: loop exit
PB: predicated region body
PF: predicated region fallthrough
CT: control target
= control target key end

     0   :  { %vm7_vm0 = vcmask 64512   ;;  %s37_s8 = smov 8   ;;  %s38_s9 = smov 16   ;;  %vm13_vm1 = vcmask 261312   ;;  %vm19_vm2 = vcmask 195712   ;;  %vm25_vm3 = vcmask 130112   ;;  %s55_s0 = inlined_call_operand.vmem [shape: f32[4,8], index: 0, kind: input, shape index: {}]   ;;  %s56_s1 = inlined_call_operand.vmem [shape: f32[1,32], index: 1, kind: output, shape index: {}]  }
   0x1   :  { %v4_v0 = vld [vmem:[%s55_s0] sm:$0xf]  ;;  %s36_s0 = smov 24  }
   0x2   :  { %5 = vst [vmem:[#allocation1] sm:$0xf] %v4_v0 }
   0x9   :  { %v10_v1 = vld [vmem:[#allocation1 + $0x3] sm:$0x1]   ;;  %v22_v2 = vld [vmem:[#allocation1 + $0x1] sm:$0x1]   ;;  %v6_v3 = vld [vmem:[#allocation1] sm:$0x1]  }
   0xa   :  { %11 = vrot.lane.b32.xlu0 %v10_v1, %s36_s0  ;;  %23 = vrot.lane.b32.xlu1 %v22_v2, %s37_s8  ;;  %v16_v4 = vld [vmem:[#allocation1 + $0x2] sm:$0x1]   ;;  %8 = vst.msk [vmem:[#allocation0] sm:$0x1] %vm7_vm0, %v6_v3  }
   0xe   :  { %17 = vrot.lane.b32.xlu0 %v16_v4, %s38_s9 }
  0x7c   :  { %v12_v5 = vpop.permute.xlu0 %11   ;;  %v24_v6 = vpop.permute.xlu1 %23  }
  0x7d   :  { %14 = vst.msk [vmem:[#allocation0] sm:$0x1] %vm13_vm1, %v12_v5  }
  0x80   :  { %v18_v7 = vpop.permute.xlu0 %17  }
  0x81   :  { %20 = vst.msk [vmem:[#allocation0] sm:$0x1] %vm19_vm2, %v18_v7  }
  0x82   :  { %26 = vst.msk [vmem:[#allocation0] sm:$0x1] %vm25_vm3, %v24_v6  }
  0x89   :  { %v30_v8 = vld [vmem:[#allocation0] sm:$0x1] }
  0x8a   :  { %32 = vst [vmem:[%s56_s1] sm:$0x1] %v30_v8 }

// kernel: unet_decoder_forward.3
= control target key start
LH: loop header
LB: loop body
LE: loop exit
PB: predicated region body
PF: predicated region fallthrough
CT: control target
= control target key end

     0   :  { %s371_s12 = smov 0   ;;  %s397_s0 = inlined_call_operand.vmem [shape: f32[2,16,32], index: 0, kind: input, shape index: {}]   ;;  %s398_s1 = inlined_call_operand.vmem [shape: bf16[32,64], index: 1, kind: input, shape index: {}]   ;;  %s399_s2 = inlined_call_operand.vmem [shape: f32[1,64], index: 2, kind: input, shape index: {}]   ;;  %s400_s3 = inlined_call_operand.vmem [shape: f32[2,16,64], index: 3, kind: output, shape index: {}]  }
   0x1 LB: > { %s301_s13 = sadd.s32 4294967295, %s347_s12   ;;  %p305_p0 = scmp.ge.s32.totalorder %s347_s12, 1  ;;  %s347_s12 = sphi %s371_s12, %s13_s12  }
   0x2   : > { %p137_p1 = scmp.lt.s32.totalorder %s347_s12, 3 }
   0x4   : > { %p138_p2 = pnand %p305_p0, %p137_p1 }
   0x5   : > { %v339_v0 = vld [vmem:[%s398_s1] sm:$0xff] (!%p138_p2)   ;;  %v349_v1 = vmov (!%p138_p2), 0.0   ;;  %v340_v2 = vld [vmem:[%s398_s1 + $0x8] sm:$0xff] (!%p138_p2)   ;;  %vm350_vm0 = vmmov (!%p138_p2), 0   ;;  %p161_p3 = scmp.lt.s32.totalorder (!%p138_p2), %s301_s13, 1  ;;  %vm198_vm1 = vcmask (!%p138_p2), 261120  }
   0x6   : > { %141 = sbr.rel (%p138_p2) target bundleno = 236 (0xec), region = 32  ;;  %321 = vmatprep.subr.bf16.mxu0 (!%p138_p2), %v349_v1  ;;  %325 = vmatprep.mubr.msk.bf16.mxu0 (!%p138_p2), %vm350_vm0, %v349_v1  ;;  %v310_v6 = vld [vmem:[%s399_s2] ss:$0 sm:$0xff] (!%p138_p2)  ;;  %vm243_vm2 = vcmask (!%p138_p2), 523264  }
   0x7   : > { %322 = vmatpush3.bf16.msra.mxu0 (!%p138_p2), %v339_v0 }
   0x8   : > { %323 = vmatprep.subr.bf16.mxu0 (!%p138_p2), %v349_v1 }
   0xb   : > { %324 = vmatpush3.bf16.msra.mxu0 (!%p138_p2), %v340_v2 }
   0xd   : > { %s402_s13 = smov (!%p161_p3, %s301_s13), 1 }
   0xe   : > { %s316_s18 = sshll.u32 %s402_s13, 4 }
   0xf   : > { %s165_s21 = scalar_lea.vmem %s397_s0, %s316_s18  ;;  %s170_s26 = scalar_lea.vmem %s400_s3, %s316_s18 }
  0x10   : > { %v172_v3 = vld [vmem:[%s165_s21] sm:$0xff]  ;;  %v173_v4 = vld [vmem:[%s165_s21 + $0x8] sm:$0xff] }
  0x11   : > { %v174_v5 = vpack.c.bf16 %v173_v4, %v172_v3 }
  0x13   : > { %326 = vmatmul.mubr.msk.bf16.vlgmr.msra.gmra.mrb[0].mxu0 %vm198_vm1, %v174_v5 }
  0xe6   : > { %v236_v7 = vpop.f32.mrb[0].mxu0 }
  0xe7   : > { %v237_v8 = vadd.f32 %v310_v6, %v236_v7  ;;  %v327_v9 = vpop.f32.mrb[1].mxu0 }
  0xe8   : > { %v239_v10 = vpop.f32.mrb[2].mxu0 }
  0xe9   : > { %244 = vst.msk [vmem:[%s170_s26] sm:$0xff] %vm243_vm2, %v237_v8  ;;  %v240_v11 = vadd.f32 %v310_v6, %v239_v10  ;;  %v328_v12 = vpop.f32.mrb[3].mxu0 }
  0xeb   : > { %245 = vst.msk [vmem:[%s170_s26 + $0x8] sm:$0xff] %vm243_vm2, %v240_v11 }
  0xec PF: > { %s13_s12 = sadd.s32 1, %s347_s12  }
  0xed   : > { %p10_p4 = scmp.ge.s32.totalorder %s13_s12, 4  }
  0xef   :  { %12 = sbr.rel (!%p10_p4) target bundleno = 1 (0x1), region = 62 }

// kernel: unet_decoder_forward.4
= control target key start
LH: loop header
LB: loop body
LE: loop exit
PB: predicated region body
PF: predicated region fallthrough
CT: control target
= control target key end

     0   :  { %s3806_s27 = smov 0   ;;  %s4606_s0 = inlined_call_operand.vmem [shape: f32[2,8,8,16], index: 0, kind: input, shape index: {}]   ;;  %s4607_s1 = inlined_call_operand.vmem [shape: f32[2,8,8,16], index: 1, kind: input, shape index: {}]   ;;  %s4608_s2 = inlined_call_operand.vmem [shape: bf16[9,32,16], index: 2, kind: input, shape index: {}]   ;;  %s4609_s3 = inlined_call_operand.vmem [shape: f32[2,16], index: 3, kind: input, shape index: {}]   ;;  %s4610_s4 = inlined_call_operand.vmem [shape: bf16[9,16,16], index: 4, kind: input, shape index: {}]   ;;  %s4611_s5 = inlined_call_operand.vmem [shape: f32[2,16], index: 5, kind: input, shape index: {}]   ;;  %s4612_s6 = inlined_call_operand.vmem [shape: bf16[16,32], index: 6, kind: input, shape index: {}]   ;;  %s4613_s7 = inlined_call_operand.vmem [shape: f32[1,32], index: 7, kind: input, shape index: {}]   ;;  %s4614_s8 = inlined_call_operand.vmem [shape: f32[2,64,32], index: 8, kind: output, shape index: {}]  }
   0x1 LB: > { %s3112_s28 = sadd.s32 4294967295, %s3757_s27   ;;  %p3116_p0 = scmp.ge.s32.totalorder %s3757_s27, 1  ;;  %s3757_s27 = sphi %s3806_s27, %s18_s27  }
   0x2   : > { %p272_p1 = scmp.lt.s32.totalorder %s3757_s27, 3 }
   0x4   : > { %p273_p2 = pnand %p3116_p0, %p272_p1 }
   0x5   : > { %p311_p3 = scmp.lt.s32.totalorder (!%p273_p2), %s3112_s28, 1  ;;  %vm4615_vm0 = vcmask (!%p273_p2), 261120   ;;  %vm4621_vm1 = vcmask (!%p273_p2), 130048   ;;  %v3723_v0 = vld [vmem:[%s4608_s2] sm:$0xff] (!%p273_p2)   ;;  %v3724_v1 = vld [vmem:[%s4608_s2 + $0x8] sm:$0xff] (!%p273_p2)   ;;  %v3759_v2 = vmov (!%p273_p2), 0  }
   0x6   : > { %276 = sbr.rel (%p273_p2) target bundleno = 972 (0x3cc), region = 52  ;;  %465 = vst.msk [vmem:[#allocation2] sm:$0xff] (!%p273_p2), %vm4615_vm0, %v3759_v2  ;;  %466 = vst.msk [vmem:[#allocation2 + $0x28] sm:$0xff] (!%p273_p2), %vm4615_vm0, %v3759_v2  ;;  %3389 = vmatprep.subr.bf16.mxu0 (!%p273_p2), %v3723_v0  ;;  %3597 = vmatprep.subr.bf16.mxu1 (!%p273_p2), %v3723_v0  ;;  %s3760_s15 = smov (!%p273_p2), 16   ;;  %v3833_v15 = vld [vmem:[%s4608_s2 + $0x20] sm:$0xff] (!%p273_p2)   ;;  %v3839_v16 = vld [vmem:[%s4608_s2 + $0x10] sm:$0xff] (!%p273_p2)  }
   0x7   : > { %1774 = vst.msk [vmem:[#allocation3] sm:$0xff] (!%p273_p2), %vm4621_vm1, %v3759_v2  ;;  %1775 = vst.msk [vmem:[#allocation3 + $0x28] sm:$0xff] (!%p273_p2), %vm4621_vm1, %v3759_v2  ;;  %3390 = vmatpush3.bf16.msra.mxu0 (!%p273_p2), %v3723_v0  ;;  %3599 = vmatpush3.bf16.msra.mxu1 (!%p273_p2), %v3723_v0  ;;  %vm4619_vm2 = vsmask.f32 (!%p273_p2), 4352  ;;  %vm4617_vm3 = vsmask.f32 (!%p273_p2), 3328 }
   0x8   : > { %3391 = vmatprep.subr.bf16.mxu0 (!%p273_p2), %v3724_v1  ;;  %3598 = vmatprep.subr.bf16.mxu1 (!%p273_p2), %v3724_v1  ;;  %vm4620_vm4 = vcmask (!%p273_p2), 1043456   ;;  %vm4616_vm5 = vsmask.f32 (!%p273_p2), 7424  ;;  %vm4618_vm6 = vsmask.f32 (!%p273_p2), 256 }
   0xb   : > { %3392 = vmatpush3.bf16.msra.mxu0 (!%p273_p2), %v3724_v1  ;;  %3600 = vmatpush3.bf16.msra.mxu1 (!%p273_p2), %v3724_v1 }
   0xc   : > { %3413 = vmatprep.subr.bf16.mxu0 (!%p273_p2), %v3833_v15  ;;  %3401 = vmatprep.subr.bf16.mxu1 (!%p273_p2), %v3839_v16 }
   0xd   : > { %s4746_s28 = smov (!%p311_p3, %s3112_s28), 1  ;;  %v508_v31 = vld [vmem:[#allocation2] sm:$0xf8] }
   0xe   : > { %s3824_s11 = sshll.u32 %s4746_s28, 6  ;;  %v3847_v32 = vld [vmem:[#allocation2] sm:$0xf0]  ;;  %v519_v36 = vshrl.u32 %v508_v31, 16  ;;  %v522_v37 = vshll.u32 %v508_v31, 16 }
   0xf   : > { %s320_s14 = scalar_lea.vmem %s4607_s1, %s3824_s11  ;;  %s315_s22 = scalar_lea.vmem %s4606_s0, %s3824_s11  ;;  %v809_v38 = vshrl.u32 %v3847_v32, 16  ;;  %v812_v39 = vshll.u32 %v3847_v32, 16 }
  0x10   : > { %v458_v3 = vld [vmem:[%s320_s14 + $0x10] sm:$0xff]  ;;  %v459_v4 = vld [vmem:[%s320_s14 + $0x18] sm:$0xff]  ;;  %v456_v5 = vld [vmem:[%s320_s14] sm:$0xff]  ;;  %v521_v43 = vrot.slane %v519_v36, 3  ;;  %v524_v44 = vrot.slane %v522_v37, 4  ;;  %s325_s23 = scalar_lea.vmem %s4614_s8, %s3824_s11 }
  0x11   : > { %v472_v6 = vpack.c.bf16 %v459_v4, %v458_v3  ;;  %v457_v7 = vld [vmem:[%s320_s14 + $0x8] sm:$0xff]  ;;  %v460_v8 = vld [vmem:[%s320_s14 + $0x20] sm:$0xff]  ;;  %v462_v11 = vld [vmem:[%s320_s14 + $0x30] sm:$0xff]  ;;  %v811_v45 = vrot.slane %v809_v38, 4  ;;  %v814_v46 = vrot.slane %v812_v39, 5 }
  0x12   : > { %v461_v9 = vld [vmem:[%s320_s14 + $0x28] sm:$0xff]  ;;  %v471_v10 = vpack.c.bf16 %v457_v7, %v456_v5  ;;  %v463_v12 = vld [vmem:[%s320_s14 + $0x38] sm:$0xff]  ;;  %v450_v17 = vld [vmem:[%s315_s22 + $0x10] sm:$0xff]  ;;  %v525_v53 = vor.u32 %v524_v44, %v521_v43 }
  0x13   : > { %481 = vrot.lane.b32.xlu0 %v472_v6, %s3760_s15  ;;  %v473_v13 = vpack.c.bf16 %v461_v9, %v460_v8  ;;  %v474_v14 = vpack.c.bf16 %v463_v12, %v462_v11  ;;  %v451_v18 = vld [vmem:[%s315_s22 + $0x18] sm:$0xff]  ;;  %v448_v19 = vld [vmem:[%s315_s22] sm:$0xff]  ;;  %v449_v20 = vld [vmem:[%s315_s22 + $0x8] sm:$0xff]  ;;  %v815_v56 = vor.u32 %v814_v46, %v811_v45 }
  0x14   : > { %479 = vrot.lane.b32.xlu1 %v471_v10, %s3760_s15  ;;  %v468_v21 = vpack.c.bf16 %v451_v18, %v450_v17  ;;  %v467_v22 = vpack.c.bf16 %v449_v20, %v448_v19  ;;  %v452_v23 = vld [vmem:[%s315_s22 + $0x20] sm:$0xff]  ;;  %v453_v24 = vld [vmem:[%s315_s22 + $0x28] sm:$0xff]  ;;  %v454_v25 = vld [vmem:[%s315_s22 + $0x30] sm:$0xff]  ;;  %v695_v17 = vrot.slane %v3847_v32, 4 }
  0x15   : > { %v455_v26 = vld [vmem:[%s315_s22 + $0x38] sm:$0xff]  ;;  %v469_v30 = vpack.c.bf16 %v453_v24, %v452_v23  ;;  %v3727_v12 = vld [vmem:[%s4608_s2 + $0x28] sm:$0xff]  }
  0x16   : > { %v470_v34 = vpack.c.bf16 %v455_v26, %v454_v25  ;;  %v3732_v38 = vld [vmem:[%s4608_s2 + $0x58] sm:$0xff]  }
  0x17   : > { %483 = vrot.lane.b32.xlu0 %v473_v13, %s3760_s15 }
  0x18   : > { %485 = vrot.lane.b32.xlu1 %v474_v14, %s3760_s15 }
  0x85   : > { %v482_v27 = vpop.permute.xlu0 %481 }
  0x86   : > { %v494_v28 = vsel %vm4621_vm1, %v468_v21, %v482_v27  ;;  %v480_v29 = vpop.permute.xlu1 %479  ;;  %v3730_v27 = vld [vmem:[%s4608_s2 + $0x50] sm:$0xff]  }
  0x87   : > { %505 = vst.msk [vmem:[#allocation2 + $0x10] sm:$0xff] %vm4615_vm0, %v494_v28  ;;  %v490_v33 = vsel %vm4621_vm1, %v467_v22, %v480_v29 }
  0x88   : > { %504 = vst.msk [vmem:[#allocation2 + $0x8] sm:$0xff] %vm4615_vm0, %v490_v33  ;;  %v3729_v33 = vld [vmem:[%s4608_s2 + $0x30] sm:$0xff]  }
  0x89   : > { %v484_v35 = vpop.permute.xlu0 %483 }
  0x8a   : > { %v498_v40 = vsel %vm4621_vm1, %v469_v30, %v484_v35  ;;  %v486_v41 = vpop.permute.xlu1 %485 }
  0x8b   : > { %506 = vst.msk [vmem:[#allocation2 + $0x18] sm:$0xff] %vm4615_vm0, %v498_v40  ;;  %v502_v42 = vsel %vm4621_vm1, %v470_v34, %v486_v41  ;;  %v958_v41 = vld [vmem:[#allocation2] sm:$0x80] }
  0x8c   : > { %507 = vst.msk [vmem:[#allocation2 + $0x20] sm:$0xff] %vm4615_vm0, %v502_v42  ;;  %v3731_v42 = vld [vmem:[%s4608_s2 + $0x38] sm:$0xff]   ;;  %v967_v46 = vshrl.u32 %v958_v41, 16  ;;  %v1343_v41 = vld [vmem:[#allocation2 + $0x28] sm:$0xf] }
  0x8e   : > { %v3858_v47 = vld [vmem:[#allocation2 + $0x10] sm:$0xff] }
  0x8f   : > { %v3860_v48 = vld [vmem:[#allocation2 + $0x8] sm:$0xff]  ;;  %v3863_v49 = vshrl.u32 %v3858_v47, 16  ;;  %v3866_v50 = vshll.u32 %v3858_v47, 16  ;;  %v3942_v34 = vrot.slane %v3858_v47, 4 }
  0x90   : > { %v3869_v51 = vshrl.u32 %v3860_v48, 16  ;;  %v3872_v52 = vshll.u32 %v3860_v48, 16  ;;  %v696_v18 = vrot.slane %v3860_v48, 4 }
  0x91   : > { %v538_v54 = vrot.slane %v3863_v49, 3  ;;  %v541_v55 = vrot.slane %v3866_v50, 4  ;;  %v820_v19 = vrot.slane %v3863_v49, 4  ;;  %v821_v20 = vrot.slane %v3866_v50, 5 }
  0x92   : > { %v529_v57 = vrot.slane %v3869_v51, 3  ;;  %v532_v58 = vrot.slane %v3872_v52, 4  ;;  %v816_v59 = vrot.slane %v3869_v51, 4  ;;  %v817_v60 = vrot.slane %v3872_v52, 5  ;;  %v3880_v61 = vld [vmem:[#allocation2 + $0x18] sm:$0xff] }
  0x93   : > { %v3882_v62 = vor.u32 %v541_v55, %v538_v54  ;;  %v3885_v63 = vshrl.u32 %v3880_v61, 16  ;;  %v3888_v0 = vshll.u32 %v3880_v61, 16  ;;  %v3890_v1 = vld [vmem:[#allocation2 + $0x20] sm:$0xf]  ;;  %v697_v28 = vsel %vm4620_vm4, %v695_v17, %v696_v18 }
  0x94   : > { %v533_v2 = vor.u32 %v532_v58, %v529_v57  ;;  %v818_v3 = vor.u32 %v817_v60, %v816_v59  ;;  %v554_v4 = vshrl.u32 %v3890_v1, 16  ;;  %v557_v5 = vshll.u32 %v3890_v1, 16  ;;  %v801_v25 = vld [vmem:[#allocation2 + $0x20] sm:$0x1f] }
  0x95   : > { %v547_v6 = vrot.slane %v3885_v63, 3  ;;  %v550_v7 = vrot.slane %v3888_v0, 4  ;;  %v824_v23 = vrot.slane %v3885_v63, 4  ;;  %v825_v24 = vrot.slane %v3888_v0, 5  ;;  %v3734_v54 = vld [vmem:[%s4608_s2 + $0x60] sm:$0xff]  }
  0x96   : > { %v534_v8 = vsel %vm4619_vm2, %v525_v53, %v533_v2  ;;  %v543_v9 = vsel %vm4619_vm2, %v533_v2, %v3882_v62  ;;  %v819_v10 = vsel %vm4617_vm3, %v815_v56, %v818_v3  ;;  %v556_v11 = vrot.slane %v554_v4, 3  ;;  %v3733_v56 = vld [vmem:[%s4608_s2 + $0x40] sm:$0xff]  }
  0x97   : > { %3393 = vmatprep.mubr.msk.bf16.mxu0 %vm4615_vm0, %v534_v8  ;;  %v3904_v13 = vor.u32 %v550_v7, %v547_v6  ;;  %v559_v14 = vrot.slane %v557_v5, 4  ;;  %v3932_v29 = vor.u32 %v821_v20, %v820_v19  ;;  %v829_v30 = vshrl.u32 %v801_v25, 16  ;;  %v3736_v20 = vld [vmem:[%s4608_s2 + $0x68] sm:$0xff]  }
  0x98   : > { %3394 = vmatmul.mubr.msk.bf16.vlgmr.msra.gmra.mrb[0].mxu0 %vm4615_vm0, %v543_v9  ;;  %v832_v31 = vshll.u32 %v801_v25, 16  ;;  %v3936_v32 = vor.u32 %v825_v24, %v824_v23  ;;  %v3947_v36 = vrot.slane %v3880_v61, 4  ;;  %v1206_v40 = vrot.slane %v3872_v52, 1 }
  0x99   : > { %3414 = vmatpush3.bf16.msra.mxu0 %v3833_v15  ;;  %3417 = vmatprep.mubr.msk.bf16.mxu0 %vm4615_vm0, %v819_v10  ;;  %v3916_v21 = vsel %vm4619_vm2, %v3882_v62, %v3904_v13  ;;  %v560_v22 = vor.u32 %v559_v14, %v556_v11  ;;  %v3728_v15 = vld [vmem:[%s4608_s2 + $0x18] sm:$0xff]   ;;  %v823_v35 = vsel %vm4617_vm3, %v818_v3, %v3932_v29  ;;  %v970_v53 = vrot.slane %v3869_v51, 7  ;;  %v3987_v3 = vld [vmem:[#allocation2 + $0x20] sm:$0xff]  ;;  %v1194_v10 = vld [vmem:[#allocation2 + $0x28] sm:$0x1] }
  0x9a   : > { %3397 = vmatprep.mubr.msk.bf16.mxu1 %vm4615_vm0, %v3916_v21  ;;  %3415 = vmatprep.subr.bf16.mxu0 %v3727_v12  ;;  %v834_v37 = vrot.slane %v832_v31, 5  ;;  %v3956_v39 = vsel %vm4617_vm3, %v3932_v29, %v3936_v32  ;;  %v699_v43 = vsel %vm4620_vm4, %v696_v18, %v3942_v34  ;;  %v3970_v44 = vsel %vm4620_vm4, %v3942_v34, %v3947_v36 }
  0x9b   : > { %v561_v26 = vsel %vm4619_vm2, %v3904_v13, %v560_v22  ;;  %v1207_v55 = vor.u32 %v1206_v40, %v3869_v51  ;;  %v1211_v57 = vrot.slane %v3866_v50, 1  ;;  %v702_v58 = vrot.slane %v3890_v1, 4  ;;  %v1342_v1 = vld [vmem:[#allocation2 + $0x8] sm:$0xf8] }
  0x9c   : > { %3398 = vmatmul.mubr.msk.bf16.vlgmr.msra.gmra.mrb[0].mxu1 %vm4615_vm0, %v561_v26  ;;  %v969_v60 = vrot.slane %v967_v46, 7  ;;  %v971_v2 = vor.u32 %v970_v53, %v3872_v52  ;;  %v1219_v4 = vrot.slane %v3888_v0, 1  ;;  %v3996_v52 = vshll.u32 %v3987_v3, 16 }
  0x9d   : > { %3402 = vmatpush3.bf16.msra.mxu1 %v3839_v16  ;;  %3405 = vmatprep.mubr.msk.bf16.mxu1 %vm4615_vm0, %v697_v28  ;;  %v831_v16 = vrot.slane %v829_v30, 4  ;;  %v1212_v51 = vsel %vm4616_vm5, %v1207_v55, %v1211_v57  ;;  %v703_v5 = vsel %vm4620_vm4, %v3947_v36, %v702_v58  ;;  %v973_v6 = vrot.slane %v3863_v49, 7  ;;  %v3740_v55 = vld [vmem:[%s4608_s2 + $0x88] sm:$0xff]  }
  0x9e   : > { %3416 = vmatpush3.bf16.msra.mxu0 %v3727_v12  ;;  %3403 = vmatprep.subr.bf16.mxu1 %v3728_v15  ;;  %v972_v7 = vsel %vm4618_vm6, %v969_v60, %v971_v2  ;;  %v976_v8 = vrot.slane %v3885_v63, 7  ;;  %v1223_v9 = vor.u32 %v1219_v4, %v3885_v63  ;;  %v1350_v11 = vshrl.u32 %v1342_v1, 16 }
  0x9f   : > { %3449 = vmatprep.subr.bf16.mxu0 %v3730_v27  ;;  %v835_v45 = vor.u32 %v834_v37, %v831_v16  ;;  %v1353_v12 = vshll.u32 %v1342_v1, 16  ;;  %v1215_v14 = vor.u32 %v1211_v57, %v3863_v49  ;;  %v1227_v17 = vrot.slane %v3996_v52, 1 }
  0xa0   : > { %v974_v18 = vor.u32 %v973_v6, %v3866_v50  ;;  %v4008_v19 = vshrl.u32 %v3987_v3, 16  ;;  %v977_v63 = vor.u32 %v976_v8, %v3888_v0  ;;  %v1233_v23 = vshll.u32 %v1194_v10, 16  ;;  %v3735_v50 = vld [vmem:[%s4608_s2 + $0x48] sm:$0xff]   ;;  %v3738_v0 = vld [vmem:[%s4608_s2 + $0x80] sm:$0xff]  }
  0xa1   : > { %3404 = vmatpush3.bf16.msra.mxu1 %v3728_v15  ;;  %3418 = vmatmul.mubr.msk.bf16.vlgmr.msra.gmra.mrb[4].mxu0 %vm4615_vm0, %v823_v35  ;;  %v836_v59 = vsel %vm4617_vm3, %v3936_v32, %v835_v45  ;;  %v1220_v22 = vsel %vm4616_vm5, %v1215_v14, %v1219_v4  ;;  %v1228_v49 = vsel %vm4616_vm5, %v1223_v9, %v1227_v17  ;;  %v1352_v24 = vrot.slane %v1350_v11, 3  ;;  %v4102_v14 = vld [vmem:[%s4610_s4 + $0x18] sm:$0xff]  }
  0xa2   : > { %3421 = vmatprep.mubr.msk.bf16.mxu0 %vm4615_vm0, %v3956_v39  ;;  %3425 = vmatprep.subr.bf16.mxu1 %v3729_v33  ;;  %v1355_v25 = vrot.slane %v1353_v12, 4  ;;  %v975_v15 = vsel %vm4618_vm6, %v970_v53, %v974_v18  ;;  %v982_v26 = vrot.slane %v4008_v19, 7  ;;  %v1231_v28 = vor.u32 %v4008_v19, %v1227_v17 }
  0xa3   : > { %3450 = vmatpush3.bf16.msra.mxu0 %v3730_v27  ;;  %v978_v27 = vsel %vm4618_vm6, %v973_v6, %v977_v63  ;;  %v1235_v30 = vrot.slane %v1233_v23, 1  ;;  %v1366_v40 = vrot.slane %v3996_v52, 4  ;;  %v1370_v45 = vshrl.u32 %v1343_v41, 16 }
  0xa4   : > { %3406 = vmatmul.mubr.msk.bf16.vlgmr.msra.gmra.mrb[4].mxu1 %vm4615_vm0, %v699_v43  ;;  %3451 = vmatprep.subr.bf16.mxu0 %v3732_v38  ;;  %v1356_v31 = vor.u32 %v1355_v25, %v1352_v24  ;;  %v985_v35 = vor.u32 %v3996_v52, %v982_v26  ;;  %v1373_v46 = vshll.u32 %v1343_v41, 16  ;;  %v1622_v1 = vrot.slane %v4008_v19, 4 }
  0xa5   : > { %3426 = vmatpush3.bf16.msra.mxu1 %v3729_v33  ;;  %3409 = vmatprep.mubr.msk.bf16.mxu1 %vm4615_vm0, %v3970_v44  ;;  %v3737_v33 = vld [vmem:[%s4608_s2 + $0x70] sm:$0xff]   ;;  %v1236_v16 = vsel %vm4616_vm5, %v1231_v28, %v1235_v30  ;;  %v327_v17 = vlaneseq }
  0xa6   : > { %3427 = vmatprep.subr.bf16.mxu1 %v3731_v42  ;;  %v1360_v37 = vsel %vm4619_vm2, %v1356_v31, %v3882_v62  ;;  %v986_v43 = vsel %vm4618_vm6, %v976_v8, %v985_v35  ;;  %v1375_v57 = vrot.slane %v1373_v46, 4 }
  0xa7   : > { %3452 = vmatpush3.bf16.msra.mxu0 %v3732_v38  ;;  %v1365_v38 = vrot.slane %v4008_v19, 3  ;;  %v328_v18 = vshrl.u32 %v327_v17, 7 }
  0xa8   : > { %3461 = vmatprep.subr.bf16.mxu0 %v3734_v54 }
  0xa9   : > { %3422 = vmatmul.mubr.msk.bf16.gmra.mrb[8].mxu0 %vm4615_vm0, %v836_v59  ;;  %3428 = vmatpush3.bf16.msra.mxu1 %v3731_v42  ;;  %v1483_v42 = vld [vmem:[#allocation2 + $0x8] sm:$0xf0]  ;;  %v1367_v62 = vor.u32 %v1366_v40, %v1365_v38  ;;  %v330_v19 = vadd.s32 16, %v328_v18  ;;  %v331_v63 = vadd.s32 24, %v328_v18  ;;  %v329_v23 = vadd.s32 8, %v328_v18 }
  0xaa   : > { %3453 = vmatprep.mubr.msk.bf16.mxu0 %vm4615_vm0, %v1212_v51  ;;  %3437 = vmatprep.subr.bf16.mxu1 %v3733_v56  ;;  %v1607_v53 = vshrl.u32 %v1483_v42, 16  ;;  %v1494_v51 = vrot.slane %v1483_v42, 4  ;;  %v334_v31 = vadd.s32 48, %v328_v18 }
  0xab   : > { %v1368_v58 = vsel %vm4619_vm2, %v3904_v13, %v1367_v62  ;;  %v354_v24 = vand.u32 7, %v330_v19  ;;  %v361_v26 = vand.u32 7, %v331_v63 }
  0xac   : > { %3410 = vmatmul.mubr.msk.bf16.gmra.mrb[8].mxu1 %vm4615_vm0, %v703_v5  ;;  %v1609_v59 = vrot.slane %v1607_v53, 4  ;;  %v1600_v5 = vld [vmem:[#allocation2 + $0x28] sm:$0x1f] }
  0xad   : > { %3429 = vmatprep.mubr.msk.bf16.mxu1 %vm4615_vm0, %v972_v7  ;;  %v1627_v6 = vshrl.u32 %v1600_v5, 16  ;;  %v1630_v7 = vshll.u32 %v1600_v5, 16  ;;  %vm4105_vm7 = vcmp.ne.s32.totalorder %v354_v24, 0  ;;  %vm4109_vm8 = vcmp.ne.s32.totalorder %v354_v24, 7 }
  0xae   : > { %vm4121_vm11 = vcmp.ne.s32.totalorder %v361_v26, 0  ;;  %vm4129_vm13 = vcmp.ne.s32.totalorder %v361_v26, 7 }
  0xaf   : > { %v1629_v9 = vrot.slane %v1627_v6, 4  ;;  %v1632_v10 = vrot.slane %v1630_v7, 5 }
  0xb1   : > { %3454 = vmatmul.mubr.msk.bf16.vlgmr.msra.gmra.mrb[12].mxu0 %vm4615_vm0, %v1220_v22  ;;  %v1633_v11 = vor.u32 %v1632_v10, %v1629_v9  ;;  %v4658_v9 = vmov 0  ;;  %v4660_v10 = vmov 0 }
  0xb2   : > { %3457 = vmatprep.mubr.msk.bf16.mxu0 %vm4615_vm0, %v1228_v49  ;;  %3462 = vmatpush3.bf16.msra.mxu0 %v3734_v54  ;;  %v1610_v54 = vshll.u32 %v1483_v42, 16  ;;  %v335_v42 = vadd.s32 56, %v328_v18 }
  0xb3   : > { %3463 = vmatprep.subr.bf16.mxu0 %v3736_v20 }
  0xb4   : > { %3430 = vmatmul.mubr.msk.bf16.vlgmr.msra.gmra.mrb[12].mxu1 %vm4615_vm0, %v975_v15  ;;  %v1612_v60 = vrot.slane %v1610_v54, 5 }
  0xb5   : > { %3438 = vmatpush3.bf16.msra.mxu1 %v3733_v56  ;;  %3433 = vmatprep.mubr.msk.bf16.mxu1 %vm4615_vm0, %v978_v27  ;;  %v1372_v56 = vrot.slane %v1370_v45, 3 }
  0xb6   : > { %3439 = vmatprep.subr.bf16.mxu1 %v3735_v50  ;;  %3464 = vmatpush3.bf16.msra.mxu0 %v3736_v20 }
  0xb7   : > { %3485 = vmatprep.subr.bf16.mxu0 %v3738_v0  ;;  %v1376_v2 = vor.u32 %v1375_v57, %v1372_v56  ;;  %v382_v57 = vand.u32 7, %v334_v31 }
  0xb9   : > { %3458 = vmatmul.mubr.msk.bf16.gmra.mrb[16].mxu0 %vm4615_vm0, %v1236_v16  ;;  %3440 = vmatpush3.bf16.msra.mxu1 %v3735_v50  ;;  %v1377_v13 = vsel %vm4619_vm2, %v1367_v62, %v1376_v2  ;;  %v340_v50 = vand.u32 7, %v328_v18  ;;  %v333_v62 = vadd.s32 40, %v328_v18  ;;  %vm4153_vm15 = vcmp.ne.s32.totalorder %v382_v57, 0 }
  0xba   : > { %3465 = vmatprep.mubr.msk.bf16.mxu0 %vm4615_vm0, %v1360_v37  ;;  %3473 = vmatprep.subr.bf16.mxu1 %v3737_v33  ;;  %v332_v37 = vadd.s32 32, %v328_v18 }
  0xbb   : > { %vm4113_vm9 = vcmp.ne.s32.totalorder %v340_v50, 0  ;;  %vm4117_vm10 = vcmp.ne.s32.totalorder %v340_v50, 7 }
  0xbc   : > { %3434 = vmatmul.mubr.msk.bf16.gmra.mrb[16].mxu1 %vm4615_vm0, %v986_v43  ;;  %v368_v2 = vand.u32 7, %v332_v37 }
  0xbd   : > { %3441 = vmatprep.mubr.msk.bf16.mxu1 %vm4615_vm0, %v3860_v48  ;;  %v3739_v48 = vld [vmem:[%s4608_s2 + $0x78] sm:$0xff]  }
  0xbe   : > { %vm4161_vm5 = vcmp.ne.s32.totalorder %v368_v2, 0 }
  0xc1   : > { %3466 = vmatmul.mubr.msk.bf16.vlgmr.msra.gmra.mrb[20].mxu0 %vm4615_vm0, %v3916_v21  ;;  %v1613_v21 = vor.u32 %v1612_v60, %v1609_v59 }
  0xc2   : > { %3469 = vmatprep.mubr.msk.bf16.mxu0 %vm4615_vm0, %v1368_v58  ;;  %3486 = vmatpush3.bf16.msra.mxu0 %v3738_v0  ;;  %v347_v0 = vand.u32 7, %v329_v23 }
  0xc3   : > { %3487 = vmatprep.subr.bf16.mxu0 %v3740_v55  ;;  %v1617_v4 = vsel %vm4617_vm3, %v1613_v21, %v3932_v29  ;;  %v1499_v29 = vrot.slane %v3987_v3, 4 }
  0xc4   : > { %3442 = vmatmul.mubr.msk.bf16.vlgmr.msra.gmra.mrb[4].mxu1 %vm4615_vm0, %v3858_v47  ;;  %v1623_v47 = vrot.slane %v3996_v52, 5  ;;  %vm4125_vm12 = vcmp.ne.s32.totalorder %v347_v0, 0  ;;  %vm4137_vm14 = vcmp.ne.s32.totalorder %v347_v0, 7 }
  0xc5   : > { %3474 = vmatpush3.bf16.msra.mxu1 %v3737_v33  ;;  %3445 = vmatprep.mubr.msk.bf16.mxu1 %vm4615_vm0, %v3880_v61  ;;  %v1496_v61 = vsel %vm4620_vm4, %v1494_v51, %v3942_v34  ;;  %v1500_v34 = vsel %vm4620_vm4, %v3947_v36, %v1499_v29  ;;  %v3742_v36 = vld [vmem:[%s4610_s4 + $0x8] sm:$0xff]  }
  0xc6   : > { %3475 = vmatprep.subr.bf16.mxu1 %v3739_v48  ;;  %3488 = vmatpush3.bf16.msra.mxu0 %v3740_v55  ;;  %v1624_v8 = vor.u32 %v1623_v47, %v1622_v1  ;;  %v389_v1 = vand.u32 7, %v335_v42 }
  0xc7   : > { %3507 = vmatprep.subr.bf16.mxu0 %v3742_v36 }
  0xc8   : > { %v1625_v52 = vsel %vm4617_vm3, %v3936_v32, %v1624_v8  ;;  %v1634_v12 = vsel %vm4617_vm3, %v1624_v8, %v1633_v11  ;;  %v3741_v32 = vld [vmem:[%s4610_s4] sm:$0xff]   ;;  %v4654_v8 = vmov 0  ;;  %vm4165_vm3 = vcmp.ne.s32.totalorder %v368_v2, 7 }
  0xc9   : > { %3470 = vmatmul.mubr.msk.bf16.gmra.mrb[24].mxu0 %vm4615_vm0, %v1377_v13  ;;  %3476 = vmatpush3.bf16.msra.mxu1 %v3739_v48  ;;  %v4659_v9 = vsel %vm4165_vm3, 4294967295, %v4658_v9  ;;  %vm4169_vm6 = vcmp.ne.s32.totalorder %v389_v1, 0  ;;  %vm4173_vm2 = vcmp.ne.s32.totalorder %v389_v1, 7 }
  0xca   : > { %3489 = vmatprep.mubr.msk.bf16.mxu0 %vm4615_vm0, %v1617_v4  ;;  %3497 = vmatprep.subr.bf16.mxu1 %v3741_v32  ;;  %v4661_v10 = vsel %vm4169_vm6, 4294967295, %v4660_v10 }
  0xcc   : > { %3446 = vmatmul.mubr.msk.bf16.gmra.mrb[8].mxu1 %vm4615_vm0, %v3987_v3  ;;  %v1501_v3 = vrot.slane %v1343_v41, 4 }
  0xcd   : > { %3477 = vmatprep.mubr.msk.bf16.mxu1 %vm4615_vm0, %v1496_v61  ;;  %v375_v61 = vand.u32 7, %v333_v62 }
  0xcf   : > { %vm4185_vm1 = vcmp.ne.s32.totalorder %v375_v61, 7 }
  0xd1   : > { %3490 = vmatmul.mubr.msk.bf16.vlgmr.msra.gmra.mrb[28].mxu0 %vm4615_vm0, %v3956_v39  ;;  %v1502_v39 = vsel %vm4620_vm4, %v1499_v29, %v1501_v3  ;;  %v4656_v29 = vmov 0  ;;  %vm4179_vm4 = vcmp.ne.s32.totalorder %v375_v61, 0  ;;  %v4664_v3 = vmov 0 }
  0xd2   : > { %3493 = vmatprep.mubr.msk.bf16.mxu0 %vm4615_vm0, %v1625_v52  ;;  %3508 = vmatpush3.bf16.msra.mxu0 %v3742_v36  ;;  %v4657_v29 = vsel %vm4161_vm5, 4294967295, %v4656_v29  ;;  %v4665_v3 = vsel %vm4179_vm4, 4294967295, %v4664_v3 }
  0xd3   : > { %3527 = vmatprep.subr.bf16.mxu0 %v4102_v14 }
  0xd4   : > { %3478 = vmatmul.mubr.msk.bf16.vlgmr.msra.gmra.mrb[4].mxu1 %vm4615_vm0, %v3970_v44  ;;  %v4096_v44 = vld [vmem:[%s4610_s4 + $0x10] sm:$0xff]  }
  0xd5   : > { %3481 = vmatprep.mubr.msk.bf16.mxu1 %vm4615_vm0, %v1500_v34  ;;  %3498 = vmatpush3.bf16.msra.mxu1 %v3741_v32  ;;  %v4662_v34 = vmov 0  ;;  %v4666_v32 = vmov 0 }
  0xd6   : > { %3517 = vmatprep.subr.bf16.mxu1 %v4096_v44  ;;  %v4663_v34 = vsel %vm4173_vm2, 4294967295, %v4662_v34  ;;  %v4667_v32 = vsel %vm4185_vm1, 4294967295, %v4666_v32 }
  0xd9   : > { %3494 = vmatmul.mubr.msk.bf16.gmra.mrb[32].mxu0 %vm4615_vm0, %v1634_v12 }
  0xdc   : > { %3482 = vmatmul.mubr.msk.bf16.gmra.mrb[8].mxu1 %vm4615_vm0, %v1502_v39  ;;  %vm4157_vm0 = vcmp.ne.s32.totalorder %v382_v57, 7 }
  0xdd   : > { %v4655_v8 = vsel %vm4157_vm0, 4294967295, %v4654_v8 }
 0x16b   : > { %v3395_v20 = vpop.f32.mrb[0].mxu0 }
 0x16c   : > { %v620_v22 = vpop.f32.mrb[1].mxu0  ;;  %v669_v46 = vsel %vm4105_vm7, %v3395_v20, 0.0 }
 0x16d   : > { %v3396_v49 = vpop.f32.mrb[2].mxu0  ;;  %v667_v56 = vsel %vm4113_vm9, %v620_v22, 0.0 }
 0x16e   : > { %v623_v25 = vpop.f32.mrb[3].mxu0  ;;  %v670_v48 = vsel %vm4121_vm11, %v3396_v49, 0.0 }
 0x16f   : > { %v3399_v15 = vpop.f32.mrb[0].mxu1  ;;  %v668_v4 = vsel %vm4125_vm12, %v623_v25, 0.0 }
 0x170   : > { %v636_v27 = vpop.f32.mrb[1].mxu1  ;;  %v673_v11 = vsel %vm4153_vm15, %v3399_v15, 0.0 }
 0x171   : > { %v3400_v28 = vpop.f32.mrb[2].mxu1  ;;  %v671_v36 = vsel %vm4161_vm5, %v636_v27, 0.0 }
 0x172   : > { %v639_v33 = vpop.f32.mrb[3].mxu1  ;;  %v674_v20 = vsel %vm4169_vm6, %v3400_v28, 0.0 }
 0x173   : > { %v672_v49 = vsel %vm4179_vm4, %v639_v33, 0.0 }
 0x174   : > { %v3419_v43 = vpop.f32.mrb[4].mxu0 }
 0x175   : > { %v944_v53 = vsel %vm4109_vm8, %v3419_v43, 0.0  ;;  %v895_v54 = vpop.f32.mrb[5].mxu0 }
 0x176   : > { %v3601_v58 = vadd.f32 %v944_v53, %v669_v46  ;;  %v942_v59 = vsel %vm4117_vm10, %v895_v54, 0.0  ;;  %v3420_v60 = vpop.f32.mrb[6].mxu0 }
 0x177   : > { %v3606_v21 = vadd.f32 %v942_v59, %v667_v56  ;;  %v945_v13 = vsel %vm4129_vm13, %v3420_v60, 0.0  ;;  %v898_v51 = vpop.f32.mrb[7].mxu0 }
 0x178   : > { %v3611_v47 = vadd.f32 %v945_v13, %v670_v48  ;;  %v943_v5 = vsel %vm4137_vm14, %v898_v51, 0.0 }
 0x179   : > { %v3616_v6 = vadd.f32 %v943_v5, %v668_v4 }
 0x17c   : > { %v3423_v52 = vpop.f32.mrb[8].mxu0 }
 0x17d   : > { %v948_v12 = vsel %vm4157_vm0, %v3423_v52, 0.0  ;;  %v911_v39 = vpop.f32.mrb[9].mxu0 }
 0x17e   : > { %v3621_v17 = vadd.f32 %v948_v12, %v673_v11  ;;  %v946_v18 = vsel %vm4165_vm3, %v911_v39, 0.0  ;;  %v3424_v19 = vpop.f32.mrb[10].mxu0 }
 0x17f   : > { %v3626_v22 = vadd.f32 %v946_v18, %v671_v36  ;;  %v949_v63 = vsel %vm4173_vm2, %v3424_v19, 0.0  ;;  %v914_v23 = vpop.f32.mrb[11].mxu0 }
 0x180   : > { %v3631_v24 = vadd.f32 %v949_v63, %v674_v20  ;;  %v947_v25 = vsel %vm4185_vm1, %v914_v23, 0.0 }
 0x181   : > { %v3636_v50 = vadd.f32 %v947_v25, %v672_v49 }
 0x184   : > { %v3455_v15 = vpop.f32.mrb[12].mxu0 }
 0x185   : > { %v1295_v26 = vpop.f32.mrb[13].mxu0  ;;  %v1328_v33 = vsel %vm4109_vm8, %v3455_v15, 0.0 }
 0x186   : > { %v3456_v0 = vpop.f32.mrb[14].mxu0  ;;  %v1326_v56 = vsel %vm4117_vm10, %v1295_v26, 0.0 }
 0x187   : > { %v1298_v27 = vpop.f32.mrb[15].mxu0  ;;  %v3431_v31 = vpop.f32.mrb[12].mxu1  ;;  %v1329_v60 = vsel %vm4129_vm13, %v3456_v0, 0.0 }
 0x188   : > { %v1078_v28 = vsel %vm4105_vm7, %v3431_v31, 0.0  ;;  %v1045_v37 = vpop.f32.mrb[13].mxu1 }
 0x189   : > { %v3602_v42 = vadd.f32 %v3601_v58, %v1078_v28  ;;  %v1076_v43 = vsel %vm4113_vm9, %v1045_v37, 0.0  ;;  %v3432_v46 = vpop.f32.mrb[14].mxu1 }
 0x18a   : > { %v3607_v62 = vadd.f32 %v3606_v21, %v1076_v43  ;;  %v1079_v53 = vsel %vm4121_vm11, %v3432_v46, 0.0  ;;  %v1048_v54 = vpop.f32.mrb[15].mxu1  ;;  %v1327_v21 = vsel %vm4137_vm14, %v1298_v27, 0.0 }
 0x18b   : > { %v3612_v57 = vadd.f32 %v3611_v47, %v1079_v53  ;;  %v1077_v59 = vsel %vm4125_vm12, %v1048_v54, 0.0  ;;  %v3603_v58 = vadd.f32 %v3602_v42, %v1328_v33 }
 0x18c   : > { %v3617_v48 = vadd.f32 %v3616_v6, %v1077_v59  ;;  %v3459_v2 = vpop.f32.mrb[16].mxu0  ;;  %v3608_v13 = vadd.f32 %v3607_v62, %v1326_v56 }
 0x18d   : > { %v1311_v51 = vpop.f32.mrb[17].mxu0  ;;  %v3613_v4 = vadd.f32 %v3612_v57, %v1329_v60  ;;  %v1332_v36 = vsel %vm4157_vm0, %v3459_v2, 0.0 }
 0x18e   : > { %v3460_v1 = vpop.f32.mrb[18].mxu0  ;;  %v3618_v5 = vadd.f32 %v3617_v48, %v1327_v21  ;;  %v1330_v63 = vsel %vm4165_vm3, %v1311_v51, 0.0 }
 0x18f   : > { %v1314_v61 = vpop.f32.mrb[19].mxu0  ;;  %v3435_v52 = vpop.f32.mrb[16].mxu1  ;;  %v1333_v25 = vsel %vm4173_vm2, %v3460_v1, 0.0 }
 0x190   : > { %v1082_v47 = vsel %vm4153_vm15, %v3435_v52, 0.0  ;;  %v1061_v11 = vpop.f32.mrb[17].mxu1 }
 0x191   : > { %v3622_v12 = vadd.f32 %v3621_v17, %v1082_v47  ;;  %v1080_v39 = vsel %vm4161_vm5, %v1061_v11, 0.0  ;;  %v3436_v6 = vpop.f32.mrb[18].mxu1 }
 0x192   : > { %v3627_v18 = vadd.f32 %v3626_v22, %v1080_v39  ;;  %v1083_v19 = vsel %vm4169_vm6, %v3436_v6, 0.0  ;;  %v1064_v20 = vpop.f32.mrb[19].mxu1  ;;  %v1331_v22 = vsel %vm4185_vm1, %v1314_v61, 0.0 }
 0x193   : > { %v3632_v23 = vadd.f32 %v3631_v24, %v1083_v19  ;;  %v1081_v49 = vsel %vm4179_vm4, %v1064_v20, 0.0  ;;  %v3623_v17 = vadd.f32 %v3622_v12, %v1332_v36  ;;  %v3209_v36 = vld [vmem:[%s4609_s3] ss:$0 sm:$0xff] }
 0x194   : > { %v3637_v15 = vadd.f32 %v3636_v50, %v1081_v49  ;;  %v3467_v26 = vpop.f32.mrb[20].mxu0  ;;  %v3628_v0 = vadd.f32 %v3627_v18, %v1330_v63 }
 0x195   : > { %v1469_v27 = vsel %vm4105_vm7, %v3467_v26, 0.0  ;;  %v1436_v31 = vpop.f32.mrb[21].mxu0  ;;  %v3633_v28 = vadd.f32 %v3632_v23, %v1333_v25  ;;  %v3210_v25 = vld [vmem:[%s4609_s3 + $0x1] ss:$0 sm:$0xff] }
 0x196   : > { %v3604_v37 = vadd.f32 %v3603_v58, %v1469_v27  ;;  %v1467_v24 = vsel %vm4113_vm9, %v1436_v31, 0.0  ;;  %v3468_v42 = vpop.f32.mrb[22].mxu0  ;;  %v3638_v43 = vadd.f32 %v3637_v15, %v1331_v22 }
 0x197   : > { %v3609_v46 = vadd.f32 %v3608_v13, %v1467_v24  ;;  %v1470_v50 = vsel %vm4121_vm11, %v3468_v42, 0.0  ;;  %v1439_v33 = vpop.f32.mrb[23].mxu0 }
 0x198   : > { %v3614_v62 = vadd.f32 %v3613_v4, %v1470_v50  ;;  %v1468_v53 = vsel %vm4125_vm12, %v1439_v33, 0.0 }
 0x199   : > { %v3619_v54 = vadd.f32 %v3618_v5, %v1468_v53 }
 0x19c   : > { %v3471_v56 = vpop.f32.mrb[24].mxu0 }
 0x19d   : > { %v1473_v57 = vsel %vm4153_vm15, %v3471_v56, 0.0  ;;  %v1452_v59 = vpop.f32.mrb[25].mxu0 }
 0x19e   : > { %v3624_v58 = vadd.f32 %v3623_v17, %v1473_v57  ;;  %v1471_v60 = vsel %vm4161_vm5, %v1452_v59, 0.0  ;;  %v3472_v48 = vpop.f32.mrb[26].mxu0 }
 0x19f   : > { %v3629_v2 = vadd.f32 %v3628_v0, %v1471_v60  ;;  %v1474_v13 = vsel %vm4169_vm6, %v3472_v48, 0.0  ;;  %v1455_v21 = vpop.f32.mrb[27].mxu0  ;;  %vm4680_vm6 = vsmask.f32 256 }
 0x1a0   : > { %v3634_v51 = vadd.f32 %v3633_v28, %v1474_v13  ;;  %v1472_v4 = vsel %vm4179_vm4, %v1455_v21, 0.0 }
 0x1a1   : > { %v3639_v1 = vadd.f32 %v3638_v43, %v1472_v4 }
 0x1a4   : > { %v3491_v5 = vpop.f32.mrb[28].mxu0 }
 0x1a5   : > { %v1693_v61 = vpop.f32.mrb[29].mxu0  ;;  %v1726_v6 = vsel %vm4109_vm8, %v3491_v5, 0.0 }
 0x1a6   : > { %v3492_v52 = vpop.f32.mrb[30].mxu0  ;;  %v1724_v20 = vsel %vm4117_vm10, %v1693_v61, 0.0 }
 0x1a7   : > { %v1696_v47 = vpop.f32.mrb[31].mxu0  ;;  %v3479_v11 = vpop.f32.mrb[4].mxu1  ;;  %v1727_v17 = vsel %vm4129_vm13, %v3492_v52, 0.0 }
 0x1a8   : > { %v3605_v12 = vadd.f32 %v3604_v37, %v3479_v11  ;;  %v1561_v39 = vpop.f32.mrb[5].mxu1  ;;  %v1725_v0 = vsel %vm4137_vm14, %v1696_v47, 0.0 }
 0x1a9   : > { %v3610_v18 = vadd.f32 %v3609_v46, %v1561_v39  ;;  %v3480_v19 = vpop.f32.mrb[6].mxu1 }
 0x1aa   : > { %v1734_v63 = vadd.f32 %v3605_v12, %v1726_v6  ;;  %v3615_v23 = vadd.f32 %v3614_v62, %v3480_v19  ;;  %v1564_v49 = vpop.f32.mrb[7].mxu1 }
 0x1ab   : > { %v1732_v15 = vadd.f32 %v3610_v18, %v1724_v20  ;;  %v3620_v26 = vadd.f32 %v3619_v54, %v1564_v49 }
 0x1ac   : > { %v1747_v22 = vmul.f32 %v3209_v36, %v1734_v63  ;;  %v1735_v27 = vadd.f32 %v3615_v23, %v1727_v17  ;;  %v3495_v31 = vpop.f32.mrb[32].mxu0 }
 0x1ad   : > { %v1745_v28 = vmul.f32 %v3209_v36, %v1732_v15  ;;  %v1733_v37 = vadd.f32 %v3620_v26, %v1725_v0  ;;  %v1709_v24 = vpop.f32.mrb[33].mxu0  ;;  %v1730_v54 = vsel %vm4157_vm0, %v3495_v31, 0.0  ;;  %vm4700_vm0 = vsmask.f32 7424 }
 0x1ae   : > { %v1760_v42 = vadd.f32 %v3210_v25, %v1747_v22  ;;  %v1748_v43 = vmul.f32 %v3209_v36, %v1735_v27  ;;  %v3496_v46 = vpop.f32.mrb[34].mxu0  ;;  %v1728_v48 = vsel %vm4165_vm3, %v1709_v24, 0.0  ;;  %v1934_v24 = vld [vmem:[#allocation3] sm:$0xf0] }
 0x1af   : > { %v1758_v50 = vadd.f32 %v3210_v25, %v1745_v28  ;;  %v1746_v33 = vmul.f32 %v3209_v36, %v1733_v37  ;;  %v1712_v62 = vpop.f32.mrb[35].mxu0  ;;  %v3483_v53 = vpop.f32.mrb[8].mxu1  ;;  %v1731_v13 = vsel %vm4173_vm2, %v3496_v46, 0.0  ;;  %vm4668_vm2 = vcmask 130048  }
 0x1b0   : > { %v1761_v56 = vadd.f32 %v3210_v25, %v1748_v43  ;;  %v3625_v57 = vadd.f32 %v3624_v58, %v3483_v53  ;;  %v1577_v59 = vpop.f32.mrb[9].mxu1  ;;  %v1768_v5 = vmax.f32 %v1760_v42, 0.0  ;;  %v1784_v58 = vld [vmem:[#allocation3] sm:$0xf8]  ;;  %v1729_v20 = vsel %vm4185_vm1, %v1712_v62, 0.0  ;;  %vm4669_vm4 = vmmov %vm4668_vm2 }
 0x1b1   : > { %v1759_v60 = vadd.f32 %v3210_v25, %v1746_v33  ;;  %v3630_v21 = vadd.f32 %v3629_v2, %v1577_v59  ;;  %v3484_v4 = vpop.f32.mrb[10].mxu1  ;;  %v1766_v12 = vmax.f32 %v1758_v50, 0.0  ;;  %v1795_v0 = vshll.u32 %v1784_v58, 16  ;;  %v2175_v62 = vld [vmem:[#allocation3] sm:$0x80] }
 0x1b2   : > { %v1769_v61 = vmax.f32 %v1761_v56, 0.0  ;;  %v1738_v52 = vadd.f32 %v3625_v57, %v1730_v54  ;;  %v3635_v47 = vadd.f32 %v3634_v51, %v3484_v4  ;;  %v1580_v11 = vpop.f32.mrb[11].mxu1  ;;  %v1792_v51 = vshrl.u32 %v1784_v58, 16 }
 0x1b3   : > { %v1767_v39 = vmax.f32 %v1759_v60, 0.0  ;;  %v1736_v6 = vadd.f32 %v3630_v21, %v1728_v48  ;;  %v3640_v18 = vadd.f32 %v3639_v1, %v1580_v11  ;;  %v1797_v43 = vrot.slane %v1795_v0, 4 }
 0x1b4   : > { %v1777_v19 = vpack.c.bf16 %v1769_v61, %v1768_v5  ;;  %v1751_v63 = vmul.f32 %v3209_v36, %v1738_v52  ;;  %v1739_v23 = vadd.f32 %v3635_v47, %v1731_v13  ;;  %v1794_v42 = vrot.slane %v1792_v51, 3  ;;  %v4320_v51 = vld [vmem:[%s4610_s4 + $0x28] sm:$0xff]  }
 0x1b5   : > { %v1776_v49 = vpack.c.bf16 %v1767_v39, %v1766_v12  ;;  %v1749_v17 = vmul.f32 %v3209_v36, %v1736_v6  ;;  %v1737_v2 = vadd.f32 %v3640_v18, %v1729_v20  ;;  %v1943_v56 = vrot.slane %v1934_v24, 4  ;;  %v4305_v18 = vld [vmem:[%s4610_s4 + $0x20] sm:$0xff]  }
 0x1b6   : > { %1781 = vst.msk [vmem:[#allocation3 + $0x10] sm:$0xff] %vm4668_vm2, %v1777_v19  ;;  %v1764_v15 = vadd.f32 %v3210_v25, %v1751_v63  ;;  %v1752_v26 = vmul.f32 %v3209_v36, %v1739_v23  ;;  %v2181_v4 = vshrl.u32 %v2175_v62, 16  ;;  %v2048_v52 = vshrl.u32 %v1934_v24, 16 }
 0x1b7   : > { %1780 = vst.msk [vmem:[#allocation3 + $0x8] sm:$0xff] %vm4669_vm4, %v1776_v49  ;;  %v1762_v22 = vadd.f32 %v3210_v25, %v1749_v17  ;;  %v1750_v1 = vmul.f32 %v3209_v36, %v1737_v2  ;;  %vm4670_vm4 = vmmov %vm4668_vm2  ;;  %v2051_v47 = vshll.u32 %v1934_v24, 16 }
 0x1b8   : > { %v1765_v27 = vadd.f32 %v3210_v25, %v1752_v26  ;;  %v1772_v28 = vmax.f32 %v1764_v15, 0.0  ;;  %vm4673_vm3 = vmmov %vm4670_vm4  ;;  %v2183_v63 = vrot.slane %v2181_v4, 7  ;;  %v2050_v23 = vrot.slane %v2048_v52, 4 }
 0x1b9   : > { %v1763_v31 = vadd.f32 %v3210_v25, %v1750_v1  ;;  %v1770_v46 = vmax.f32 %v1762_v22, 0.0  ;;  %v1798_v25 = vor.u32 %v1797_v43, %v1794_v42  ;;  %v2053_v15 = vrot.slane %v2051_v47, 5 }
 0x1ba   : > { %v1773_v37 = vmax.f32 %v1765_v27, 0.0 }
 0x1bb   : > { %v1771_v50 = vmax.f32 %v1763_v31, 0.0 }
 0x1bc   : > { %v1779_v33 = vpack.c.bf16 %v1773_v37, %v1772_v28 }
 0x1bd   : > { %v1778_v53 = vpack.c.bf16 %v1771_v50, %v1770_v46  ;;  %v4273_v54 = vld [vmem:[#allocation3 + $0x10] sm:$0xff] }
 0x1be   : > { %1783 = vst.msk [vmem:[#allocation3 + $0x20] sm:$0xff] %vm4668_vm2, %v1779_v33  ;;  %v4276_v57 = vld [vmem:[#allocation3 + $0x8] sm:$0xff]  ;;  %v4279_v36 = vrot.slane %v4273_v54, 4  ;;  %v4282_v59 = vshrl.u32 %v4273_v54, 16  ;;  %v4285_v60 = vshll.u32 %v4273_v54, 16  ;;  %vm4671_vm2 = vcmask 1043456  }
 0x1bf   : > { %1782 = vst.msk [vmem:[#allocation3 + $0x18] sm:$0xff] %vm4670_vm4, %v1778_v53  ;;  %v1944_v48 = vrot.slane %v4276_v57, 4  ;;  %v4290_v13 = vshrl.u32 %v4276_v57, 16  ;;  %v4293_v21 = vshll.u32 %v4276_v57, 16  ;;  %vm4672_vm1 = vmmov %vm4671_vm2 }
 0x1c0   : > { %v1811_v5 = vrot.slane %v4282_v59, 3  ;;  %v1814_v61 = vrot.slane %v4285_v60, 4  ;;  %v2187_v46 = vrot.slane %v4282_v59, 7 }
 0x1c1   : > { %v1945_v11 = vsel %vm4671_vm2, %v1943_v56, %v1944_v48  ;;  %v1947_v12 = vsel %vm4672_vm1, %v1944_v48, %v4279_v36  ;;  %v1802_v39 = vrot.slane %v4290_v13, 3  ;;  %v1805_v6 = vrot.slane %v4293_v21, 4 }
 0x1c2   : > { %3509 = vmatprep.mubr.msk.bf16.mxu0 %vm4670_vm4, %v1945_v11  ;;  %v4308_v58 = vor.u32 %v1814_v61, %v1811_v5  ;;  %v2184_v20 = vrot.slane %v4290_v13, 7  ;;  %vm4674_vm1 = vsmask.f32 4352  ;;  %v2055_v26 = vrot.slane %v4290_v13, 4  ;;  %vm4676_vm4 = vmmov %vm4673_vm3 }
 0x1c3   : > { %3510 = vmatmul.mubr.msk.bf16.vlgmr.msra.gmra.mrb[36].mxu0 %vm4673_vm3, %v1947_v12  ;;  %v1806_v19 = vor.u32 %v1805_v6, %v1802_v39  ;;  %vm4675_vm2 = vmmov %vm4674_vm1  ;;  %v2056_v27 = vrot.slane %v4293_v21, 5  ;;  %v2054_v56 = vor.u32 %v2053_v15, %v2050_v23  ;;  %v2188_v11 = vor.u32 %v2187_v46, %v4285_v60  ;;  %v3748_v15 = vld [vmem:[%s4610_s4 + $0x38] sm:$0xff]  }
 0x1c4   : > { %3528 = vmatpush3.bf16.msra.mxu0 %v4102_v14  ;;  %v2185_v28 = vor.u32 %v2184_v20, %v4293_v21  ;;  %v2059_v12 = vrot.slane %v4282_v59, 4  ;;  %v2060_v39 = vrot.slane %v4285_v60, 5 }
 0x1c5   : > { %v1807_v49 = vsel %vm4674_vm1, %v1798_v25, %v1806_v19  ;;  %v1816_v17 = vsel %vm4675_vm2, %v1806_v19, %v4308_v58  ;;  %v1788_v2 = vld [vmem:[#allocation3 + $0x20] sm:$0xf]  ;;  %3537 = vmatprep.subr.bf16.mxu0 %v4305_v18  ;;  %vm4677_vm1 = vcmask 1043456   ;;  %v2057_v4 = vor.u32 %v2056_v27, %v2055_v26 }
 0x1c6   : > { %3499 = vmatprep.mubr.msk.bf16.mxu1 %vm4673_vm3, %v1807_v49  ;;  %v4324_v0 = vld [vmem:[#allocation3 + $0x18] sm:$0xff]  ;;  %v1950_v14 = vrot.slane %v1788_v2, 4  ;;  %v1827_v22 = vshrl.u32 %v1788_v2, 16  ;;  %v1830_v1 = vshll.u32 %v1788_v2, 16  ;;  %vm4678_vm2 = vmmov %vm4677_vm1  ;;  %v2186_v25 = vsel %vm4680_vm6, %v2183_v63, %v2185_v28  ;;  %v4357_v61 = vld [vmem:[#allocation3 + $0x20] sm:$0xff] }
 0x1c7   : > { %3500 = vmatmul.mubr.msk.bf16.vlgmr.msra.gmra.mrb[20].mxu1 %vm4676_vm4, %v1816_v17  ;;  %v4329_v31 = vrot.slane %v4324_v0, 4  ;;  %v4333_v37 = vshrl.u32 %v4324_v0, 16  ;;  %v4336_v24 = vshll.u32 %v4324_v0, 16  ;;  %vm4679_vm4 = vmmov %vm4673_vm3  ;;  %v4373_v6 = vshrl.u32 %v4357_v61, 16  ;;  %v2043_v17 = vld [vmem:[#allocation3 + $0x20] sm:$0x1f] }
 0x1c8   : > { %3518 = vmatpush3.bf16.msra.mxu1 %v4096_v44  ;;  %v1829_v42 = vrot.slane %v1827_v22, 3  ;;  %v1832_v43 = vrot.slane %v1830_v1, 4  ;;  %v4385_v26 = vor.u32 %v2060_v39, %v2059_v12  ;;  %v2068_v22 = vshrl.u32 %v2043_v17, 16  ;;  %v2666_v39 = vld [vmem:[#allocation3 + $0x8] sm:$0xf0] }
 0x1c9   : > { %v4343_v50 = vsel %vm4677_vm1, %v4279_v36, %v4329_v31  ;;  %v1951_v33 = vsel %vm4678_vm2, %v4329_v31, %v1950_v14  ;;  %v1820_v62 = vrot.slane %v4333_v37, 3  ;;  %v1823_v53 = vrot.slane %v4336_v24, 4  ;;  %3547 = vmatprep.subr.bf16.mxu1 %v4320_v51  ;;  %vm4681_vm1 = vmmov %vm4673_vm3 }
 0x1ca   : > { %3513 = vmatprep.mubr.msk.bf16.mxu0 %vm4673_vm3, %v4343_v50  ;;  %v1833_v44 = vor.u32 %v1832_v43, %v1829_v42  ;;  %v2190_v5 = vrot.slane %v4333_v37, 7  ;;  %vm4682_vm2 = vsmask.f32 4352  ;;  %vm4684_vm6 = vmmov %vm4681_vm1  ;;  %v2063_v23 = vrot.slane %v4333_v37, 4  ;;  %v3747_v42 = vld [vmem:[%s4610_s4 + $0x30] sm:$0xff]  }
 0x1cb   : > { %3514 = vmatmul.mubr.msk.bf16.gmra.mrb[40].mxu0 %vm4679_vm4, %v1951_v33  ;;  %v4354_v48 = vor.u32 %v1823_v53, %v1820_v62  ;;  %vm4683_vm3 = vmmov %vm4682_vm2  ;;  %v2064_v49 = vrot.slane %v4336_v24, 5  ;;  %v2196_v14 = vrot.slane %v4373_v6, 7  ;;  %v2071_v1 = vshll.u32 %v2043_v17, 16 }
 0x1cc   : > { %3529 = vmatprep.mubr.msk.bf16.mxu0 %vm4681_vm1, %v2186_v25  ;;  %vm4685_vm4 = vmmov %vm4681_vm1  ;;  %vm4686_vm1 = vsmask.f32 3328  ;;  %v2191_v63 = vor.u32 %v2190_v5, %v4336_v24 }
 0x1cd   : > { %v4363_v52 = vsel %vm4682_vm2, %v4308_v58, %v4354_v48  ;;  %v1834_v47 = vsel %vm4683_vm3, %v4354_v48, %v1833_v44  ;;  %v2058_v19 = vsel %vm4686_vm1, %v2054_v56, %v2057_v4  ;;  %vm4687_vm2 = vmmov %vm4685_vm4  ;;  %vm4688_vm3 = vsmask.f32 256 }
 0x1ce   : > { %3503 = vmatprep.mubr.msk.bf16.mxu1 %vm4684_vm6, %v4363_v52  ;;  %v2189_v2 = vsel %vm4688_vm3, %v2184_v20, %v2188_v11  ;;  %vm4689_vm6 = vmmov %vm4687_vm2  ;;  %v4390_v28 = vor.u32 %v2064_v49, %v2063_v23  ;;  %v4394_v20 = vshll.u32 %v4357_v61, 16  ;;  %v2073_v62 = vrot.slane %v2071_v1, 5 }
 0x1cf   : > { %3504 = vmatmul.mubr.msk.bf16.gmra.mrb[24].mxu1 %vm4685_vm4, %v1834_v47  ;;  %vm4690_vm4 = vmmov %vm4688_vm3  ;;  %v2416_v47 = vrot.slane %v4336_v24, 1  ;;  %v2675_v23 = vrot.slane %v2666_v39, 4  ;;  %v2680_v1 = vrot.slane %v4357_v61, 4 }
 0x1d0   : > { %3519 = vmatprep.mubr.msk.bf16.mxu1 %vm4687_vm2, %v2058_v19  ;;  %v2192_v27 = vsel %vm4690_vm4, %v2187_v46, %v2191_v63  ;;  %vm4691_vm1 = vmmov %vm4687_vm2  ;;  %vm4692_vm2 = vsmask.f32 3328  ;;  %v2199_v33 = vor.u32 %v4394_v20, %v2196_v14  ;;  %v2070_v46 = vrot.slane %v2068_v22, 4  ;;  %v3749_v19 = vld [vmem:[%s4610_s4 + $0x40] sm:$0xff]  }
 0x1d1   : > { %v2062_v43 = vsel %vm4692_vm2, %v2057_v4, %v4385_v26  ;;  %vm4693_vm3 = vmmov %vm4691_vm1  ;;  %v2408_v4 = vrot.slane %v4285_v60, 1  ;;  %v2424_v24 = vrot.slane %v4394_v20, 1 }
 0x1d2   : > { %vm4695_vm4 = vmmov %vm4691_vm1  ;;  %v2074_v56 = vor.u32 %v2073_v62, %v2070_v46 }
 0x1d3   : > { %3530 = vmatmul.mubr.msk.bf16.vlgmr.msra.gmra.mrb[44].mxu0 %vm4689_vm6, %v2189_v2  ;;  %vm4694_vm6 = vmmov %vm4692_vm2  ;;  %v2412_v12 = vor.u32 %v2408_v4, %v4282_v59 }
 0x1d4   : > { %3533 = vmatprep.mubr.msk.bf16.mxu0 %vm4691_vm1, %v2192_v27  ;;  %3538 = vmatpush3.bf16.msra.mxu0 %v4305_v18  ;;  %v4407_v53 = vsel %vm4694_vm6, %v4385_v26, %v4390_v28  ;;  %v2403_v18 = vrot.slane %v4293_v21, 1  ;;  %vm4696_vm1 = vsmask.f32 256  ;;  %vm4697_vm2 = vmmov %vm4693_vm3  ;;  %v2075_v21 = vsel %vm4694_vm6, %v4390_v28, %v2074_v56 }
 0x1d5   : > { %3567 = vmatprep.subr.bf16.mxu0 %v3748_v15  ;;  %v2200_v44 = vsel %vm4696_vm1, %v2190_v5, %v2199_v33  ;;  %vm4699_vm5 = vmmov %vm4697_vm2  ;;  %v2533_v5 = vld [vmem:[#allocation3 + $0x8] sm:$0xf8]  ;;  %v2554_v27 = vrot.slane %v4373_v6, 3 }
 0x1d6   : > { %v2404_v25 = vor.u32 %v2403_v18, %v4290_v13  ;;  %vm4702_vm1 = vmmov %vm4697_vm2  ;;  %v2420_v13 = vor.u32 %v2416_v47, %v4333_v37  ;;  %v2539_v11 = vshrl.u32 %v2533_v5, 16  ;;  %v2542_v60 = vshll.u32 %v2533_v5, 16 }
 0x1d7   : > { %3520 = vmatmul.mubr.msk.bf16.vlgmr.msra.gmra.mrb[28].mxu1 %vm4693_vm3, %v2062_v43  ;;  %vm4698_vm3 = vmmov %vm4697_vm2  ;;  %v2534_v43 = vld [vmem:[#allocation3 + $0x28] sm:$0xf]  ;;  %v2780_v18 = vshrl.u32 %v2666_v39, 16  ;;  %v2796_v5 = vrot.slane %v4394_v20, 5 }
 0x1d8   : > { %3548 = vmatpush3.bf16.msra.mxu1 %v4320_v51  ;;  %3523 = vmatprep.mubr.msk.bf16.mxu1 %vm4695_vm4, %v4407_v53  ;;  %v2409_v51 = vsel %vm4700_vm0, %v2404_v25, %v2408_v4  ;;  %vm4701_vm4 = vmmov %vm4697_vm2  ;;  %v2541_v59 = vrot.slane %v2539_v11, 3  ;;  %v2544_v49 = vrot.slane %v2542_v60, 4  ;;  %v2562_v33 = vshll.u32 %v2534_v43, 16 }
 0x1d9   : > { %3557 = vmatprep.subr.bf16.mxu1 %v3747_v42  ;;  %vm4706_vm6 = vmmov %vm4702_vm1  ;;  %v2782_v4 = vrot.slane %v2780_v18, 4 }
 0x1da   : > { %v2564_v56 = vrot.slane %v2562_v33, 4 }
 0x1db   : > { %3534 = vmatmul.mubr.msk.bf16.gmra.mrb[48].mxu0 %vm4697_vm2, %v2200_v44  ;;  %vm4703_vm2 = vmmov %vm4702_vm1 }
 0x1dc   : > { %3539 = vmatprep.mubr.msk.bf16.mxu0 %vm4698_vm3, %v4276_v57  ;;  %v2394_v57 = vld [vmem:[#allocation3 + $0x28] sm:$0x1]  ;;  %vm4705_vm3 = vmmov %vm4700_vm0 }
 0x1dd   : > { %v2430_v63 = vshll.u32 %v2394_v57, 16  ;;  %v2425_v37 = vsel %vm4705_vm3, %v2420_v13, %v2424_v24  ;;  %vm4710_vm3 = vsmask.f32 4352  ;;  %v2775_v13 = vld [vmem:[#allocation3 + $0x28] sm:$0x1f] }
 0x1de   : > { %v2800_v57 = vshrl.u32 %v2775_v13, 16  ;;  %v2803_v11 = vshll.u32 %v2775_v13, 16 }
 0x1df   : > { %3524 = vmatmul.mubr.msk.bf16.gmra.mrb[32].mxu1 %vm4699_vm5, %v2075_v21  ;;  %vm4704_vm5 = vmmov %vm4702_vm1  ;;  %v2432_v17 = vrot.slane %v2430_v63, 1 }
 0x1e0   : > { %3549 = vmatprep.mubr.msk.bf16.mxu1 %vm4701_vm4, %v2409_v51  ;;  %vm4707_vm4 = vmmov %vm4702_vm1 }
 0x1e3   : > { %3540 = vmatmul.mubr.msk.bf16.vlgmr.msra.gmra.mrb[36].mxu0 %vm4702_vm1, %v4273_v54  ;;  %v2417_v54 = vsel %vm4700_vm0, %v2412_v12, %v2416_v47  ;;  %vm4708_vm1 = vcmask 1043456   ;;  %v2802_v12 = vrot.slane %v2800_v57, 4 }
 0x1e4   : > { %3543 = vmatprep.mubr.msk.bf16.mxu0 %vm4703_vm2, %v4324_v0  ;;  %3568 = vmatpush3.bf16.msra.mxu0 %v3748_v15  ;;  %v2428_v0 = vor.u32 %v2424_v24, %v4373_v6  ;;  %v2677_v2 = vsel %vm4708_vm1, %v2675_v23, %v4279_v36  ;;  %v2545_v15 = vor.u32 %v2544_v49, %v2541_v59  ;;  %v2559_v36 = vshrl.u32 %v2534_v43, 16 }
 0x1e5   : > { %v2681_v46 = vsel %vm4708_vm1, %v4329_v31, %v2680_v1 }
 0x1e6   : > { %v2433_v14 = vsel %vm4700_vm0, %v2428_v0, %v2432_v17  ;;  %v2549_v22 = vsel %vm4710_vm3, %v2545_v15, %v4308_v58  ;;  %v2783_v58 = vshll.u32 %v2666_v39, 16  ;;  %v2561_v44 = vrot.slane %v2559_v36, 3  ;;  %vm4713_vm0 = vmmov %vm4703_vm2 }
 0x1e7   : > { %3550 = vmatmul.mubr.msk.bf16.vlgmr.msra.gmra.mrb[36].mxu1 %vm4704_vm5, %v2417_v54  ;;  %vm4709_vm5 = vmmov %vm4703_vm2  ;;  %v2805_v39 = vrot.slane %v2803_v11, 5 }
 0x1e8   : > { %3558 = vmatpush3.bf16.msra.mxu1 %v3747_v42  ;;  %3553 = vmatprep.mubr.msk.bf16.mxu1 %vm4706_vm6, %v2425_v37  ;;  %v2555_v42 = vrot.slane %v4394_v20, 4  ;;  %vm4711_vm6 = vmmov %vm4703_vm2  ;;  %v2785_v21 = vrot.slane %v2783_v58, 5  ;;  %v3750_v20 = vld [vmem:[%s4612_s6] sm:$0xff]  }
 0x1e9   : > { %3577 = vmatprep.subr.bf16.mxu1 %v3749_v19  ;;  %3587 = vmatprep.subr.bf16.mxu0 %v3750_v20 }
 0x1ea   : > { %v2556_v62 = vor.u32 %v2555_v42, %v2554_v27  ;;  %v2786_v51 = vor.u32 %v2785_v21, %v2782_v4 }
 0x1eb   : > { %3544 = vmatmul.mubr.msk.bf16.gmra.mrb[40].mxu0 %vm4707_vm4, %v4357_v61  ;;  %vm4712_vm4 = vmmov %vm4703_vm2  ;;  %v2682_v61 = vrot.slane %v2534_v43, 4 }
 0x1ec   : > { %3569 = vmatprep.mubr.msk.bf16.mxu0 %vm4703_vm2, %v2677_v2 }
 0x1ef   : > { %3554 = vmatmul.mubr.msk.bf16.gmra.mrb[40].mxu1 %vm4709_vm5, %v2433_v14  ;;  %vm4714_vm5 = vmmov %vm4710_vm3 }
 0x1f0   : > { %3559 = vmatprep.mubr.msk.bf16.mxu1 %vm4711_vm6, %v2549_v22  ;;  %v2557_v25 = vsel %vm4714_vm5, %v4354_v48, %v2556_v62  ;;  %vm4715_vm3 = vmmov %vm4713_vm0  ;;  %v2795_v48 = vrot.slane %v4373_v6, 4 }
 0x1f1   : > { %vm4716_vm6 = vmmov %vm4708_vm1 }
 0x1f2   : > { %v2683_v31 = vsel %vm4716_vm6, %v2680_v1, %v2682_v61  ;;  %vm4718_vm1 = vmmov %vm4714_vm5  ;;  %v2797_v60 = vor.u32 %v2796_v5, %v2795_v48 }
 0x1f3   : > { %3570 = vmatmul.mubr.msk.bf16.vlgmr.msra.gmra.mrb[36].mxu0 %vm4712_vm4, %v4343_v50  ;;  %v2565_v50 = vor.u32 %v2564_v56, %v2561_v44  ;;  %vm4717_vm4 = vmmov %vm4713_vm0 }
 0x1f4   : > { %3573 = vmatprep.mubr.msk.bf16.mxu0 %vm4703_vm2, %v2681_v46  ;;  %vm4719_vm2 = vmmov %vm4713_vm0  ;;  %3588 = vmatpush3.bf16.msra.mxu0 %v3750_v20 }
 0x1f5   : > { %v2566_v47 = vsel %vm4718_vm1, %v2556_v62, %v2565_v50  ;;  %vm4721_vm5 = vmmov %vm4719_vm2 }
 0x1f7   : > { %3560 = vmatmul.mubr.msk.bf16.vlgmr.msra.gmra.mrb[44].mxu1 %vm4713_vm0, %v4363_v52  ;;  %vm4720_vm0 = vsmask.f32 3328 }
 0x1f8   : > { %3578 = vmatpush3.bf16.msra.mxu1 %v3749_v19  ;;  %3563 = vmatprep.mubr.msk.bf16.mxu1 %vm4715_vm3, %v2557_v25  ;;  %v2790_v52 = vsel %vm4720_vm0, %v2786_v51, %v4385_v26  ;;  %vm4722_vm3 = vmmov %vm4719_vm2  ;;  %v2806_v26 = vor.u32 %v2805_v39, %v2802_v12 }
 0x1f9   : > { %vm4723_vm6 = vmmov %vm4720_vm0 }
 0x1fa   : > { %v2798_v24 = vsel %vm4723_vm6, %v4390_v28, %v2797_v60  ;;  %vm4725_vm1 = vmmov %vm4720_vm0  ;;  %vm4726_vm0 = vnez %v4655_v8  ;;  %vm4729_vm6 = vnez %v4659_v9 }
 0x1fb   : > { %3574 = vmatmul.mubr.msk.bf16.gmra.mrb[40].mxu0 %vm4717_vm4, %v2683_v31  ;;  %vm4724_vm4 = vmmov %vm4719_vm2  ;;  %v2807_v6 = vsel %vm4725_vm1, %v2797_v60, %v2806_v26  ;;  %vm4731_vm1 = vnez %v4663_v34 }
 0x1ff   : > { %3564 = vmatmul.mubr.msk.bf16.gmra.mrb[48].mxu1 %vm4719_vm2, %v2566_v47 }
 0x200   : > { %3579 = vmatprep.mubr.msk.bf16.mxu1 %vm4721_vm5, %v2790_v52  ;;  %vm4727_vm5 = vnez %v4657_v29 }
 0x207   : > { %3580 = vmatmul.mubr.msk.bf16.vlgmr.msra.gmra.mrb[52].mxu1 %vm4722_vm3, %v4407_v53  ;;  %vm4728_vm3 = vnez %v4661_v10 }
 0x208   : > { %3583 = vmatprep.mubr.msk.bf16.mxu1 %vm4724_vm4, %v2798_v24  ;;  %vm4730_vm4 = vnez %v4665_v3 }
 0x20f   : > { %3584 = vmatmul.mubr.msk.bf16.gmra.mrb[56].mxu1 %vm4719_vm2, %v2807_v6  ;;  %vm4732_vm2 = vnez %v4667_v32 }
 0x29a   : > { %v3501_v19 = vpop.f32.mrb[20].mxu1 }
 0x29b   : > { %v1887_v54 = vpop.f32.mrb[21].mxu1  ;;  %v1920_v14 = vsel %vm4105_vm7, %v3501_v19, 0.0 }
 0x29c   : > { %v3502_v63 = vpop.f32.mrb[22].mxu1  ;;  %v1918_v27 = vsel %vm4113_vm9, %v1887_v54, 0.0 }
 0x29d   : > { %v1890_v53 = vpop.f32.mrb[23].mxu1  ;;  %v1921_v42 = vsel %vm4121_vm11, %v3502_v63, 0.0 }
 0x29e   : > { %v1919_v46 = vsel %vm4125_vm12, %v1890_v53, 0.0 }
 0x2a2   : > { %v3505_v37 = vpop.f32.mrb[24].mxu1 }
 0x2a3   : > { %v1903_v23 = vpop.f32.mrb[25].mxu1  ;;  %v1924_v60 = vsel %vm4153_vm15, %v3505_v37, 0.0 }
 0x2a4   : > { %v3506_v28 = vpop.f32.mrb[26].mxu1  ;;  %v1922_v24 = vsel %vm4727_vm5, %v1903_v23, 0.0 }
 0x2a5   : > { %v1906_v59 = vpop.f32.mrb[27].mxu1  ;;  %v1925_v26 = vsel %vm4728_vm3, %v3506_v28, 0.0 }
 0x2a6   : > { %v3531_v49 = vpop.f32.mrb[44].mxu0  ;;  %v1923_v54 = vsel %vm4730_vm4, %v1906_v59, 0.0 }
 0x2a7   : > { %v2253_v0 = vpop.f32.mrb[45].mxu0  ;;  %v2286_v62 = vsel %vm4105_vm7, %v3531_v49, 0.0 }
 0x2a8   : > { %v3532_v17 = vpop.f32.mrb[46].mxu0  ;;  %v2284_v44 = vsel %vm4113_vm9, %v2253_v0, 0.0 }
 0x2a9   : > { %v2256_v2 = vpop.f32.mrb[47].mxu0  ;;  %v2287_v31 = vsel %vm4121_vm11, %v3532_v17, 0.0 }
 0x2aa   : > { %v3521_v15 = vpop.f32.mrb[28].mxu1  ;;  %v2285_v52 = vsel %vm4125_vm12, %v2256_v2, 0.0 }
 0x2ab   : > { %v2161_v22 = vsel %vm4109_vm8, %v3521_v15, 0.0  ;;  %v2128_v1 = vpop.f32.mrb[29].mxu1 }
 0x2ac   : > { %v3641_v43 = vadd.f32 %v2161_v22, %v1920_v14  ;;  %v2159_v36 = vsel %vm4117_vm10, %v2128_v1, 0.0  ;;  %v3522_v33 = vpop.f32.mrb[30].mxu1 }
 0x2ad   : > { %v3646_v18 = vadd.f32 %v2159_v36, %v1918_v27  ;;  %v2162_v58 = vsel %vm4129_vm13, %v3522_v33, 0.0  ;;  %v2131_v61 = vpop.f32.mrb[31].mxu1 }
 0x2ae   : > { %v3651_v56 = vadd.f32 %v2162_v58, %v1921_v42  ;;  %v2160_v25 = vsel %vm4137_vm14, %v2131_v61, 0.0  ;;  %v3535_v4 = vpop.f32.mrb[48].mxu0  ;;  %v3642_v21 = vadd.f32 %v3641_v43, %v2286_v62 }
 0x2af   : > { %v3656_v50 = vadd.f32 %v2160_v25, %v1919_v46  ;;  %v2269_v51 = vpop.f32.mrb[49].mxu0  ;;  %v3647_v47 = vadd.f32 %v3646_v18, %v2284_v44  ;;  %v2290_v63 = vsel %vm4153_vm15, %v3535_v4, 0.0 }
 0x2b0   : > { %v3536_v48 = vpop.f32.mrb[50].mxu0  ;;  %v3652_v5 = vadd.f32 %v3651_v56, %v2287_v31  ;;  %v2288_v23 = vsel %vm4727_vm5, %v2269_v51, 0.0 }
 0x2b1   : > { %v2272_v13 = vpop.f32.mrb[51].mxu0  ;;  %v3657_v57 = vadd.f32 %v3656_v50, %v2285_v52  ;;  %v2291_v2 = vsel %vm4728_vm3, %v3536_v48, 0.0 }
 0x2b2   : > { %v3525_v11 = vpop.f32.mrb[32].mxu1  ;;  %v2289_v14 = vsel %vm4730_vm4, %v2272_v13, 0.0 }
 0x2b3   : > { %v2165_v12 = vsel %vm4726_vm0, %v3525_v11, 0.0  ;;  %v2144_v39 = vpop.f32.mrb[33].mxu1 }
 0x2b4   : > { %v3661_v6 = vadd.f32 %v2165_v12, %v1924_v60  ;;  %v2163_v20 = vsel %vm4729_vm6, %v2144_v39, 0.0  ;;  %v3526_v19 = vpop.f32.mrb[34].mxu1 }
 0x2b5   : > { %v3666_v53 = vadd.f32 %v2163_v20, %v1922_v24  ;;  %v2166_v37 = vsel %vm4731_vm1, %v3526_v19, 0.0  ;;  %v2147_v49 = vpop.f32.mrb[35].mxu1 }
 0x2b6   : > { %v3671_v28 = vadd.f32 %v2166_v37, %v1925_v26  ;;  %v2164_v0 = vsel %vm4732_vm2, %v2147_v49, 0.0  ;;  %v3662_v17 = vadd.f32 %v3661_v6, %v2290_v63 }
 0x2b7   : > { %v3676_v59 = vadd.f32 %v2164_v0, %v1923_v54  ;;  %v3667_v15 = vadd.f32 %v3666_v53, %v2288_v23 }
 0x2b8   : > { %v3672_v22 = vadd.f32 %v3671_v28, %v2291_v2 }
 0x2b9   : > { %v3677_v1 = vadd.f32 %v3676_v59, %v2289_v14 }
 0x2ba   : > { %v3551_v27 = vpop.f32.mrb[36].mxu1 }
 0x2bb   : > { %v2519_v42 = vsel %vm4109_vm8, %v3551_v27, 0.0  ;;  %v2486_v43 = vpop.f32.mrb[37].mxu1 }
 0x2bc   : > { %v3643_v36 = vadd.f32 %v3642_v21, %v2519_v42  ;;  %v2517_v33 = vsel %vm4117_vm10, %v2486_v43, 0.0  ;;  %v3552_v46 = vpop.f32.mrb[38].mxu1 }
 0x2bd   : > { %v3648_v62 = vadd.f32 %v3647_v47, %v2517_v33  ;;  %v2520_v18 = vsel %vm4129_vm13, %v3552_v46, 0.0  ;;  %v2489_v58 = vpop.f32.mrb[39].mxu1 }
 0x2be   : > { %v3653_v61 = vadd.f32 %v3652_v5, %v2520_v18  ;;  %v2518_v44 = vsel %vm4137_vm14, %v2489_v58, 0.0 }
 0x2bf   : > { %v3658_v56 = vadd.f32 %v3657_v57, %v2518_v44 }
 0x2c2   : > { %v3555_v25 = vpop.f32.mrb[40].mxu1 }
 0x2c3   : > { %v2523_v4 = vsel %vm4726_vm0, %v3555_v25, 0.0  ;;  %v2502_v31 = vpop.f32.mrb[41].mxu1  ;;  %v3272_v25 = vld [vmem:[%s4611_s5] ss:$0 sm:$0xff] }
 0x2c4   : > { %v3663_v21 = vadd.f32 %v3662_v17, %v2523_v4  ;;  %v2521_v50 = vsel %vm4729_vm6, %v2502_v31, 0.0  ;;  %v3556_v51 = vpop.f32.mrb[42].mxu1 }
 0x2c5   : > { %v3668_v47 = vadd.f32 %v3667_v15, %v2521_v50  ;;  %v2524_v52 = vsel %vm4731_vm1, %v3556_v51, 0.0  ;;  %v2505_v48 = vpop.f32.mrb[43].mxu1 }
 0x2c6   : > { %v3673_v5 = vadd.f32 %v3672_v22, %v2524_v52  ;;  %v2522_v13 = vsel %vm4732_vm2, %v2505_v48, 0.0  ;;  %v3571_v57 = vpop.f32.mrb[36].mxu0 }
 0x2c7   : > { %v3678_v11 = vadd.f32 %v3677_v1, %v2522_v13  ;;  %v2736_v60 = vpop.f32.mrb[37].mxu0 }
 0x2c8   : > { %v3572_v12 = vpop.f32.mrb[38].mxu0 }
 0x2c9   : > { %v2739_v39 = vpop.f32.mrb[39].mxu0 }
 0x2ca   : > { %v3561_v24 = vpop.f32.mrb[44].mxu1 }
 0x2cb   : > { %v2652_v26 = vsel %vm4105_vm7, %v3561_v24, 0.0  ;;  %v2619_v6 = vpop.f32.mrb[45].mxu1  ;;  %vm4733_vm7 = vcmask 130048  }
 0x2cc   : > { %v3644_v20 = vadd.f32 %v3643_v36, %v2652_v26  ;;  %v2650_v19 = vsel %vm4113_vm9, %v2619_v6, 0.0  ;;  %v3562_v54 = vpop.f32.mrb[46].mxu1  ;;  %vm4735_vm9 = vmmov %vm4733_vm7 }
 0x2cd   : > { %v3649_v63 = vadd.f32 %v3648_v62, %v2650_v19  ;;  %v2653_v53 = vsel %vm4121_vm11, %v3562_v54, 0.0  ;;  %v2622_v37 = vpop.f32.mrb[47].mxu1  ;;  %vm4737_vm11 = vcmask 261120  }
 0x2ce   : > { %v3654_v49 = vadd.f32 %v3653_v61, %v2653_v53  ;;  %v2651_v23 = vsel %vm4125_vm12, %v2622_v37, 0.0  ;;  %v3575_v28 = vpop.f32.mrb[40].mxu0  ;;  %v3645_v0 = vadd.f32 %v3644_v20, %v3571_v57  ;;  %vm4738_vm12 = vmmov %vm4737_vm11 }
 0x2cf   : > { %v3659_v17 = vadd.f32 %v3658_v56, %v2651_v23  ;;  %v2752_v30 = vpop.f32.mrb[41].mxu0  ;;  %v3650_v2 = vadd.f32 %v3649_v63, %v2736_v60 }
 0x2d0   : > { %v3576_v59 = vpop.f32.mrb[42].mxu0  ;;  %v3655_v15 = vadd.f32 %v3654_v49, %v3572_v12 }
 0x2d1   : > { %v2755_v14 = vpop.f32.mrb[43].mxu0  ;;  %v3660_v16 = vadd.f32 %v3659_v17, %v2739_v39 }
 0x2d2   : > { %v3565_v22 = vpop.f32.mrb[48].mxu1 }
 0x2d3   : > { %v2656_v1 = vsel %vm4153_vm15, %v3565_v22, 0.0  ;;  %v2635_v40 = vpop.f32.mrb[49].mxu1  ;;  %vm4741_vm15 = vmmov %vm4737_vm11 }
 0x2d4   : > { %v3664_v27 = vadd.f32 %v3663_v21, %v2656_v1  ;;  %v2654_v42 = vsel %vm4727_vm5, %v2635_v40, 0.0  ;;  %v3566_v41 = vpop.f32.mrb[50].mxu1  ;;  %v3273_v21 = vld [vmem:[%s4611_s5 + $0x1] ss:$0 sm:$0xff] }
 0x2d5   : > { %v3669_v43 = vadd.f32 %v3668_v47, %v2654_v42  ;;  %v2657_v36 = vsel %vm4728_vm3, %v3566_v41, 0.0  ;;  %v2638_v33 = vpop.f32.mrb[51].mxu1 }
 0x2d6   : > { %v3674_v46 = vadd.f32 %v3673_v5, %v2657_v36  ;;  %v2655_v62 = vsel %vm4730_vm4, %v2638_v33, 0.0  ;;  %v3665_v18 = vadd.f32 %v3664_v27, %v3575_v28 }
 0x2d7   : > { %v3679_v58 = vadd.f32 %v3678_v11, %v2655_v62  ;;  %v3670_v61 = vadd.f32 %v3669_v43, %v2752_v30  ;;  %v3274_v43 = vld [vmem:[%s4613_s7] ss:$0 sm:$0xff] }
 0x2d8   : > { %v3675_v7 = vadd.f32 %v3674_v46, %v3576_v59 }
 0x2d9   : > { %v3680_v44 = vadd.f32 %v3679_v58, %v2755_v14 }
 0x2da   : > { %v3581_v56 = vpop.f32.mrb[52].mxu1 }
 0x2db   : > { %v2893_v29 = vsel %vm4109_vm8, %v3581_v56, 0.0  ;;  %v2860_v10 = vpop.f32.mrb[53].mxu1  ;;  %vm4734_vm8 = vmmov %vm4733_vm7 }
 0x2dc   : > { %v2901_v4 = vadd.f32 %v3645_v0, %v2893_v29  ;;  %v2891_v31 = vsel %vm4117_vm10, %v2860_v10, 0.0  ;;  %v3582_v3 = vpop.f32.mrb[54].mxu1  ;;  %vm4736_vm10 = vmmov %vm4733_vm7 }
 0x2dd   : > { %v2899_v50 = vadd.f32 %v3650_v2, %v2891_v31  ;;  %v2894_v51 = vsel %vm4129_vm13, %v3582_v3, 0.0  ;;  %v2863_v35 = vpop.f32.mrb[55].mxu1  ;;  %vm4739_vm13 = vmmov %vm4737_vm11 }
 0x2de   : > { %v2914_v47 = vmul.f32 %v3272_v25, %v2901_v4  ;;  %v2902_v52 = vadd.f32 %v3655_v15, %v2894_v51  ;;  %v2892_v48 = vsel %vm4137_vm14, %v2863_v35, 0.0  ;;  %vm4740_vm14 = vmmov %vm4737_vm11 }
 0x2df   : > { %v2912_v5 = vmul.f32 %v3272_v25, %v2899_v50  ;;  %v2900_v13 = vadd.f32 %v3660_v16, %v2892_v48 }
 0x2e0   : > { %v2927_v57 = vadd.f32 %v3273_v21, %v2914_v47  ;;  %v2915_v38 = vmul.f32 %v3272_v25, %v2902_v52 }
 0x2e1   : > { %v2925_v11 = vadd.f32 %v3273_v21, %v2912_v5  ;;  %v2913_v60 = vmul.f32 %v3272_v25, %v2900_v13 }
 0x2e2   : > { %v2928_v12 = vadd.f32 %v3273_v21, %v2915_v38  ;;  %v3585_v39 = vpop.f32.mrb[56].mxu1  ;;  %v2935_v6 = vmax.f32 %v2927_v57, 0.0 }
 0x2e3   : > { %v2926_v24 = vadd.f32 %v3273_v21, %v2913_v60  ;;  %v2897_v26 = vsel %vm4726_vm0, %v3585_v39, 0.0  ;;  %v2876_v45 = vpop.f32.mrb[57].mxu1  ;;  %v2933_v63 = vmax.f32 %v2925_v11, 0.0  ;;  %vm4742_vm0 = vmmov %vm4737_vm11 }
 0x2e4   : > { %v2936_v20 = vmax.f32 %v2928_v12, 0.0  ;;  %v2905_v19 = vadd.f32 %v3665_v18, %v2897_v26  ;;  %v2895_v55 = vsel %vm4729_vm6, %v2876_v45, 0.0  ;;  %v3586_v54 = vpop.f32.mrb[58].mxu1  ;;  %vm4743_vm5 = vmmov %vm4742_vm0 }
 0x2e5   : > { %v2934_v53 = vmax.f32 %v2926_v24, 0.0  ;;  %v2903_v37 = vadd.f32 %v3670_v61, %v2895_v55  ;;  %v2898_v49 = vsel %vm4731_vm1, %v3586_v54, 0.0  ;;  %v2879_v23 = vpop.f32.mrb[59].mxu1  ;;  %vm4744_vm3 = vmmov %vm4742_vm0 }
 0x2e6   : > { %v2942_v28 = vpack.c.bf16 %v2936_v20, %v2935_v6  ;;  %v2918_v0 = vmul.f32 %v3272_v25, %v2905_v19  ;;  %v2906_v17 = vadd.f32 %v3675_v7, %v2898_v49  ;;  %v2896_v8 = vsel %vm4732_vm2, %v2879_v23, 0.0 }
 0x2e7   : > { %v2916_v30 = vmul.f32 %v3272_v25, %v2903_v37  ;;  %v2904_v2 = vadd.f32 %v3680_v44, %v2896_v8  ;;  %v2941_v59 = vpack.c.bf16 %v2934_v53, %v2933_v63 }
 0x2e8   : > { %v2931_v15 = vadd.f32 %v3273_v21, %v2918_v0  ;;  %v2919_v9 = vmul.f32 %v3272_v25, %v2906_v17 }
 0x2e9   : > { %v2929_v14 = vadd.f32 %v3273_v21, %v2916_v30  ;;  %v2917_v16 = vmul.f32 %v3272_v25, %v2904_v2  ;;  %3589 = vmatprep.mubr.msk.bf16.mxu0 %vm4733_vm7, %v2941_v59 }
 0x2ea   : > { %v2932_v22 = vadd.f32 %v3273_v21, %v2919_v9  ;;  %3590 = vmatmul.mubr.msk.bf16.vlgmr.msra.gmra.mrb[52].mxu0 %vm4734_vm8, %v2942_v28  ;;  %v2939_v1 = vmax.f32 %v2931_v15, 0.0 }
 0x2eb   : > { %v2930_v34 = vadd.f32 %v3273_v21, %v2917_v16  ;;  %v2937_v27 = vmax.f32 %v2929_v14, 0.0 }
 0x2ec   : > { %v2940_v40 = vmax.f32 %v2932_v22, 0.0 }
 0x2ed   : > { %v2938_v42 = vmax.f32 %v2930_v34, 0.0 }
 0x2ee   : > { %v2944_v32 = vpack.c.bf16 %v2940_v40, %v2939_v1 }
 0x2ef   : > { %v2943_v41 = vpack.c.bf16 %v2938_v42, %v2937_v27 }
 0x2f1   : > { %3593 = vmatprep.mubr.msk.bf16.mxu0 %vm4735_vm9, %v2943_v41 }
 0x2f2   : > { %3594 = vmatmul.mubr.msk.bf16.gmra.mrb[56].mxu0 %vm4736_vm10, %v2944_v32 }
 0x3bd   : > { %v3591_v36 = vpop.f32.mrb[52].mxu0 }
 0x3be   : > { %v3015_v33 = vadd.f32 %v3591_v36, %v3274_v43  ;;  %v3006_v46 = vpop.f32.mrb[53].mxu0 }
 0x3bf   : > { %v3007_v62 = vadd.f32 %v3274_v43, %v3006_v46  ;;  %v3592_v18 = vpop.f32.mrb[54].mxu0 }
 0x3c0   : > { %3039 = vst.msk [vmem:[%s325_s23 + $0x10] sm:$0xff] %vm4737_vm11, %v3015_v33  ;;  %v3018_v58 = vadd.f32 %v3592_v18, %v3274_v43  ;;  %v3009_v61 = vpop.f32.mrb[55].mxu0 }
 0x3c1   : > { %3037 = vst.msk [vmem:[%s325_s23] sm:$0xff] %vm4738_vm12, %v3007_v62  ;;  %v3010_v7 = vadd.f32 %v3274_v43, %v3009_v61 }
 0x3c2   : > { %3040 = vst.msk [vmem:[%s325_s23 + $0x18] sm:$0xff] %vm4739_vm13, %v3018_v58 }
 0x3c3   : > { %3038 = vst.msk [vmem:[%s325_s23 + $0x8] sm:$0xff] %vm4740_vm14, %v3010_v7 }
 0x3c5   : > { %v3595_v44 = vpop.f32.mrb[56].mxu0 }
 0x3c6   : > { %v3031_v56 = vadd.f32 %v3595_v44, %v3274_v43  ;;  %v3022_v29 = vpop.f32.mrb[57].mxu0 }
 0x3c7   : > { %v3023_v25 = vadd.f32 %v3274_v43, %v3022_v29  ;;  %v3596_v10 = vpop.f32.mrb[58].mxu0 }
 0x3c8   : > { %3043 = vst.msk [vmem:[%s325_s23 + $0x30] sm:$0xff] %vm4741_vm15, %v3031_v56  ;;  %v3034_v4 = vadd.f32 %v3596_v10, %v3274_v43  ;;  %v3025_v31 = vpop.f32.mrb[59].mxu0 }
 0x3c9   : > { %3041 = vst.msk [vmem:[%s325_s23 + $0x20] sm:$0xff] %vm4742_vm0, %v3023_v25  ;;  %v3026_v3 = vadd.f32 %v3274_v43, %v3025_v31 }
 0x3ca   : > { %3044 = vst.msk [vmem:[%s325_s23 + $0x38] sm:$0xff] %vm4743_vm5, %v3034_v4 }
 0x3cb   : > { %3042 = vst.msk [vmem:[%s325_s23 + $0x28] sm:$0xff] %vm4744_vm3, %v3026_v3 }
 0x3cc PF: > { %s18_s27 = sadd.s32 1, %s3757_s27  }
 0x3cd   : > { %p15_p4 = scmp.ge.s32.totalorder %s18_s27, 4  }
 0x3cf   :  { %17 = sbr.rel (!%p15_p4) target bundleno = 1 (0x1), region = 101 }

// kernel: unet_decoder_forward.5
= control target key start
LH: loop header
LB: loop body
LE: loop exit
PB: predicated region body
PF: predicated region fallthrough
CT: control target
= control target key end

     0   :  { %s12852_s27 = smov 0   ;;  %s17246_s0 = inlined_call_operand.vmem [shape: f32[2,16,16,8], index: 0, kind: input, shape index: {}]   ;;  %s17247_s1 = inlined_call_operand.vmem [shape: f32[2,16,16,8], index: 1, kind: input, shape index: {}]   ;;  %s17248_s2 = inlined_call_operand.vmem [shape: bf16[9,16,8], index: 2, kind: input, shape index: {}]   ;;  %s17249_s3 = inlined_call_operand.vmem [shape: f32[2,8], index: 3, kind: input, shape index: {}]   ;;  %s17250_s4 = inlined_call_operand.vmem [shape: bf16[9,8,8], index: 4, kind: input, shape index: {}]   ;;  %s17251_s5 = inlined_call_operand.vmem [shape: f32[2,8], index: 5, kind: input, shape index: {}]   ;;  %s17252_s6 = inlined_call_operand.vmem [shape: bf16[9,8,3], index: 6, kind: input, shape index: {}]   ;;  %s17253_s7 = inlined_call_operand.vmem [shape: f32[2,3], index: 7, kind: input, shape index: {}]   ;;  %s17254_s8 = inlined_call_operand.vmem [shape: f32[2,256,3], index: 8, kind: output, shape index: {}]  }
   0x1 LB: > { %s10876_s28 = sadd.s32 4294967295, %s12803_s27   ;;  %p10880_p0 = scmp.ge.s32.totalorder %s12803_s27, 1  ;;  %s12803_s27 = sphi %s12852_s27, %s18_s27  }
   0x2   : > { %p272_p1 = scmp.lt.s32.totalorder %s12803_s27, 3 }
   0x4   : > { %p273_p2 = pnand %p10880_p0, %p272_p1 }
   0x6   : > { %276 = sbr.rel (%p273_p2) target bundleno = 1663 (0x67f), region = 52 }
   0xd   : > { %p311_p3 = scmp.lt.s32.totalorder %s10876_s28, 1  ;;  %vm17279_vm0 = vcmask 130048   ;;  %vm17278_vm1 = vcmask 64512   ;;  %v12805_v0 = vmov 0   ;;  %s12806_s11 = smov 8   ;;  %v12778_v33 = vld [vmem:[%s17248_s2] sm:$0xff]  }
   0xe   : > { %873 = vst.msk [vmem:[#allocation2] sm:$0xff] %vm17279_vm0, %v12805_v0  ;;  %874 = vst.msk [vmem:[#allocation2 + $0x8] sm:$0xff] %vm17279_vm0, %v12805_v0  ;;  %11830 = vmatprep.subr.bf16.mxu0 %v12778_v33  ;;  %12748 = vmatprep.subr.bf16.mxu1 %v12778_v33  ;;  %v12922_v41 = vld [vmem:[%s17248_s2 + $0x8] sm:$0xff]   ;;  %vm17277_vm2 = vsmask.f32 256  ;;  %v12933_v49 = vld [vmem:[%s17248_s2 + $0x10] sm:$0xff]  }
   0xf   : > { %s18458_s28 = smov (!%p311_p3, %s10876_s28), 1  ;;  %875 = vst.msk [vmem:[#allocation2 + $0x90] sm:$0xff] %vm17279_vm0, %v12805_v0  ;;  %876 = vst.msk [vmem:[#allocation2 + $0x98] sm:$0xff] %vm17279_vm0, %v12805_v0  ;;  %11831 = vmatpush3.bf16.msra.mxu0 %v12778_v33  ;;  %12749 = vmatpush3.bf16.msra.mxu1 %v12778_v33  ;;  %vm17288_vm3 = vsmask.f32 7424 }
  0x10   : > { %4381 = vst.msk [vmem:[#allocation3] sm:$0xff] %vm17278_vm1, %v12805_v0  ;;  %4382 = vst.msk [vmem:[#allocation3 + $0x8] sm:$0xff] %vm17278_vm1, %v12805_v0  ;;  %s12872_s29 = sshll.u32 %s18458_s28, 8  ;;  %11864 = vmatprep.subr.bf16.mxu1 %v12922_v41  ;;  %11898 = vmatprep.subr.bf16.mxu0 %v12933_v49 }
  0x11   : > { %4383 = vst.msk [vmem:[#allocation3 + $0x90] sm:$0xff] %vm17278_vm1, %v12805_v0  ;;  %4384 = vst.msk [vmem:[#allocation3 + $0x98] sm:$0xff] %vm17278_vm1, %v12805_v0  ;;  %s12878_s10 = scalar_lea.vmem %s17247_s1, %s12872_s29  ;;  %s12958_s20 = scalar_lea.vmem %s17246_s0, %s12872_s29 }
  0x12   : > { %7595 = vst.msk [vmem:[#allocation4] sm:$0xff] %vm17278_vm1, %v12805_v0  ;;  %7596 = vst.msk [vmem:[#allocation4 + $0x8] sm:$0xff] %vm17278_vm1, %v12805_v0  ;;  %v854_v1 = vld [vmem:[%s12878_s10 + $0x70] sm:$0xff]  ;;  %v855_v2 = vld [vmem:[%s12878_s10 + $0x78] sm:$0xff]  ;;  %s17054_s23 = scalar_lea.vmem %s17254_s8, %s12872_s29 }
  0x13   : > { %7597 = vst.msk [vmem:[#allocation4 + $0x90] sm:$0xff] %vm17278_vm1, %v12805_v0  ;;  %7598 = vst.msk [vmem:[#allocation4 + $0x98] sm:$0xff] %vm17278_vm1, %v12805_v0  ;;  %v840_v3 = vld [vmem:[%s12878_s10] sm:$0xff]  ;;  %v900_v4 = vpack.c.bf16 %v855_v2, %v854_v1  ;;  %v841_v5 = vld [vmem:[%s12878_s10 + $0x8] sm:$0xff] }
  0x14   : > { %v856_v6 = vld [vmem:[%s12878_s10 + $0x80] sm:$0xff]  ;;  %v857_v7 = vld [vmem:[%s12878_s10 + $0x88] sm:$0xff]  ;;  %v893_v8 = vpack.c.bf16 %v841_v5, %v840_v3  ;;  %v858_v13 = vld [vmem:[%s12878_s10 + $0x90] sm:$0xff] }
  0x15   : > { %v852_v9 = vld [vmem:[%s12878_s10 + $0x60] sm:$0xff]  ;;  %v853_v10 = vld [vmem:[%s12878_s10 + $0x68] sm:$0xff]  ;;  %939 = vrot.lane.b32.xlu0 %v900_v4, %s12806_s11  ;;  %v901_v11 = vpack.c.bf16 %v857_v7, %v856_v6  ;;  %v859_v14 = vld [vmem:[%s12878_s10 + $0x98] sm:$0xff] }
  0x16   : > { %925 = vrot.lane.b32.xlu1 %v893_v8, %s12806_s11  ;;  %v899_v12 = vpack.c.bf16 %v853_v10, %v852_v9  ;;  %v842_v15 = vld [vmem:[%s12878_s10 + $0x10] sm:$0xff]  ;;  %v843_v16 = vld [vmem:[%s12878_s10 + $0x18] sm:$0xff]  ;;  %v902_v17 = vpack.c.bf16 %v859_v14, %v858_v13  ;;  %v860_v19 = vld [vmem:[%s12878_s10 + $0xa0] sm:$0xff] }
  0x17   : > { %v894_v18 = vpack.c.bf16 %v843_v16, %v842_v15  ;;  %v861_v20 = vld [vmem:[%s12878_s10 + $0xa8] sm:$0xff]  ;;  %v844_v21 = vld [vmem:[%s12878_s10 + $0x20] sm:$0xff]  ;;  %v862_v25 = vld [vmem:[%s12878_s10 + $0xb0] sm:$0xff] }
  0x18   : > { %v845_v22 = vld [vmem:[%s12878_s10 + $0x28] sm:$0xff]  ;;  %v903_v23 = vpack.c.bf16 %v861_v20, %v860_v19  ;;  %v863_v26 = vld [vmem:[%s12878_s10 + $0xb8] sm:$0xff]  ;;  %v846_v27 = vld [vmem:[%s12878_s10 + $0x30] sm:$0xff] }
  0x19   : > { %941 = vrot.lane.b32.xlu0 %v901_v11, %s12806_s11  ;;  %v895_v24 = vpack.c.bf16 %v845_v22, %v844_v21  ;;  %v847_v28 = vld [vmem:[%s12878_s10 + $0x38] sm:$0xff]  ;;  %v904_v29 = vpack.c.bf16 %v863_v26, %v862_v25  ;;  %v864_v30 = vld [vmem:[%s12878_s10 + $0xc0] sm:$0xff]  ;;  %v865_v31 = vld [vmem:[%s12878_s10 + $0xc8] sm:$0xff] }
  0x1a   : > { %937 = vrot.lane.b32.xlu1 %v899_v12, %s12806_s11  ;;  %v896_v32 = vpack.c.bf16 %v847_v28, %v846_v27  ;;  %v1038_v34 = vld [vmem:[#allocation2] sm:$0x80]  ;;  %v12913_v35 = vld [vmem:[#allocation2 + $0x8] sm:$0xff]  ;;  %v905_v42 = vpack.c.bf16 %v865_v31, %v864_v30  ;;  %v866_v47 = vld [vmem:[%s12878_s10 + $0xd0] sm:$0xff] }
  0x1b   : > { %v848_v36 = vld [vmem:[%s12878_s10 + $0x40] sm:$0xff]  ;;  %v849_v37 = vld [vmem:[%s12878_s10 + $0x48] sm:$0xff]  ;;  %v1059_v38 = vshrl.u32 %v1038_v34, 16  ;;  %v1063_v39 = vshrl.u32 %v12913_v35, 16  ;;  %v1066_v40 = vshll.u32 %v12913_v35, 16  ;;  %v867_v48 = vld [vmem:[%s12878_s10 + $0xd8] sm:$0xff] }
  0x1c   : > { %v897_v46 = vpack.c.bf16 %v849_v37, %v848_v36  ;;  %v850_v50 = vld [vmem:[%s12878_s10 + $0x50] sm:$0xff]  ;;  %v851_v51 = vld [vmem:[%s12878_s10 + $0x58] sm:$0xff]  ;;  %v906_v54 = vpack.c.bf16 %v867_v48, %v866_v47  ;;  %v868_v55 = vld [vmem:[%s12878_s10 + $0xe0] sm:$0xff] }
  0x1d   : > { %943 = vrot.lane.b32.xlu0 %v902_v17, %s12806_s11  ;;  %v1061_v43 = vrot.slane %v1059_v38, 7  ;;  %v12925_v44 = vrot.slane %v1063_v39, 7  ;;  %v1793_v45 = vrot.slane %v1066_v40, 1  ;;  %v898_v57 = vpack.c.bf16 %v851_v51, %v850_v50  ;;  %v869_v58 = vld [vmem:[%s12878_s10 + $0xe8] sm:$0xff]  ;;  %v870_v59 = vld [vmem:[%s12878_s10 + $0xf0] sm:$0xff]  ;;  %v871_v60 = vld [vmem:[%s12878_s10 + $0xf8] sm:$0xff] }
  0x1e   : > { %927 = vrot.lane.b32.xlu1 %v894_v18, %s12806_s11  ;;  %v907_v61 = vpack.c.bf16 %v869_v58, %v868_v55  ;;  %v908_v62 = vpack.c.bf16 %v871_v60, %v870_v59  ;;  %v822_v63 = vld [vmem:[%s12958_s20 + $0x70] sm:$0xff]  ;;  %v823_v0 = vld [vmem:[%s12958_s20 + $0x78] sm:$0xff]  ;;  %v808_v1 = vld [vmem:[%s12958_s20] sm:$0xff] }
  0x1f   : > { %v1068_v52 = vor.u32 %v1066_v40, %v12925_v44  ;;  %v12939_v53 = vor.u32 %v1793_v45, %v1063_v39  ;;  %v809_v2 = vld [vmem:[%s12958_s20 + $0x8] sm:$0xff]  ;;  %v884_v3 = vpack.c.bf16 %v823_v0, %v822_v63  ;;  %v824_v5 = vld [vmem:[%s12958_s20 + $0x80] sm:$0xff]  ;;  %v826_v15 = vld [vmem:[%s12958_s20 + $0x90] sm:$0xff] }
  0x20   : > { %v877_v4 = vpack.c.bf16 %v809_v2, %v808_v1  ;;  %v825_v6 = vld [vmem:[%s12958_s20 + $0x88] sm:$0xff]  ;;  %v820_v7 = vld [vmem:[%s12958_s20 + $0x60] sm:$0xff]  ;;  %v827_v16 = vld [vmem:[%s12958_s20 + $0x98] sm:$0xff] }
  0x21   : > { %945 = vrot.lane.b32.xlu0 %v903_v23, %s12806_s11  ;;  %v1069_v56 = vsel %vm17277_vm2, %v1061_v43, %v1068_v52  ;;  %v821_v8 = vld [vmem:[%s12958_s20 + $0x68] sm:$0xff]  ;;  %v885_v12 = vpack.c.bf16 %v825_v6, %v824_v5  ;;  %v810_v17 = vld [vmem:[%s12958_s20 + $0x10] sm:$0xff]  ;;  %v811_v18 = vld [vmem:[%s12958_s20 + $0x18] sm:$0xff]  ;;  %v886_v22 = vpack.c.bf16 %v827_v16, %v826_v15 }
  0x22   : > { %929 = vrot.lane.b32.xlu1 %v895_v24, %s12806_s11  ;;  %11832 = vmatprep.mubr.msk.bf16.mxu0 %vm17279_vm0, %v1069_v56  ;;  %v883_v14 = vpack.c.bf16 %v821_v8, %v820_v7  ;;  %v878_v24 = vpack.c.bf16 %v811_v18, %v810_v17  ;;  %v828_v25 = vld [vmem:[%s12958_s20 + $0xa0] sm:$0xff]  ;;  %v829_v26 = vld [vmem:[%s12958_s20 + $0xa8] sm:$0xff]  ;;  %v830_v33 = vld [vmem:[%s12958_s20 + $0xb0] sm:$0xff] }
  0x23   : > { %v812_v27 = vld [vmem:[%s12958_s20 + $0x20] sm:$0xff]  ;;  %v813_v28 = vld [vmem:[%s12958_s20 + $0x28] sm:$0xff]  ;;  %v831_v34 = vld [vmem:[%s12958_s20 + $0xb8] sm:$0xff] }
  0x24   : > { %v879_v38 = vpack.c.bf16 %v813_v28, %v812_v27  ;;  %v815_v43 = vld [vmem:[%s12958_s20 + $0x38] sm:$0xff]  ;;  %v888_v47 = vpack.c.bf16 %v831_v34, %v830_v33  ;;  %v832_v55 = vld [vmem:[%s12958_s20 + $0xc0] sm:$0xff]  ;;  %v833_v56 = vld [vmem:[%s12958_s20 + $0xc8] sm:$0xff] }
  0x25   : > { %947 = vrot.lane.b32.xlu0 %v904_v29, %s12806_s11  ;;  %v816_v1 = vld [vmem:[%s12958_s20 + $0x40] sm:$0xff]  ;;  %v817_v2 = vld [vmem:[%s12958_s20 + $0x48] sm:$0xff]  ;;  %v834_v16 = vld [vmem:[%s12958_s20 + $0xd0] sm:$0xff] }
  0x26   : > { %931 = vrot.lane.b32.xlu1 %v896_v32, %s12806_s11  ;;  %v887_v32 = vpack.c.bf16 %v829_v26, %v828_v25  ;;  %v13031_v7 = vld [vmem:[%s17248_s2 + $0x20] sm:$0xff]   ;;  %v881_v15 = vpack.c.bf16 %v817_v2, %v816_v1  ;;  %v835_v17 = vld [vmem:[%s12958_s20 + $0xd8] sm:$0xff]  ;;  %v837_v34 = vld [vmem:[%s12958_s20 + $0xe8] sm:$0xff] }
  0x27   : > { %v836_v33 = vld [vmem:[%s12958_s20 + $0xe0] sm:$0xff] }
  0x29   : > { %949 = vrot.lane.b32.xlu0 %v905_v42, %s12806_s11  ;;  %v814_v42 = vld [vmem:[%s12958_s20 + $0x30] sm:$0xff] }
  0x2a   : > { %933 = vrot.lane.b32.xlu1 %v897_v46, %s12806_s11  ;;  %v880_v59 = vpack.c.bf16 %v815_v43, %v814_v42 }
  0x2d   : > { %951 = vrot.lane.b32.xlu0 %v906_v54, %s12806_s11 }
  0x2e   : > { %935 = vrot.lane.b32.xlu1 %v898_v57, %s12806_s11 }
  0x31   : > { %953 = vrot.lane.b32.xlu0 %v907_v61, %s12806_s11 }
  0x32   : > { %955 = vrot.lane.b32.xlu1 %v908_v62, %s12806_s11 }
  0x87   : > { %v940_v9 = vpop.permute.xlu0 %939 }
  0x88   : > { %v988_v10 = vsel %vm17278_vm1, %v884_v3, %v940_v9  ;;  %v926_v11 = vpop.permute.xlu1 %925 }
  0x89   : > { %1029 = vst.msk [vmem:[#allocation2 + $0x48] sm:$0xff] %vm17279_vm0, %v988_v10  ;;  %v960_v13 = vsel %vm17278_vm1, %v877_v4, %v926_v11  ;;  %v889_v4 = vpack.c.bf16 %v833_v56, %v832_v55 }
  0x8a   : > { %1022 = vst.msk [vmem:[#allocation2 + $0x10] sm:$0xff] %vm17279_vm0, %v960_v13 }
  0x8b   : > { %v942_v19 = vpop.permute.xlu0 %941 }
  0x8c   : > { %v992_v20 = vsel %vm17278_vm1, %v885_v12, %v942_v19  ;;  %v938_v21 = vpop.permute.xlu1 %937 }
  0x8d   : > { %1030 = vst.msk [vmem:[#allocation2 + $0x50] sm:$0xff] %vm17279_vm0, %v992_v20  ;;  %v984_v23 = vsel %vm17278_vm1, %v883_v14, %v938_v21  ;;  %v818_v21 = vld [vmem:[%s12958_s20 + $0x50] sm:$0xff] }
  0x8e   : > { %1028 = vst.msk [vmem:[#allocation2 + $0x40] sm:$0xff] %vm17279_vm0, %v984_v23 }
  0x8f   : > { %v944_v29 = vpop.permute.xlu0 %943 }
  0x90   : > { %v996_v30 = vsel %vm17278_vm1, %v886_v22, %v944_v29  ;;  %v928_v31 = vpop.permute.xlu1 %927  ;;  %v12987_v36 = vld [vmem:[#allocation2 + $0x48] sm:$0xff]  ;;  %v819_v22 = vld [vmem:[%s12958_s20 + $0x58] sm:$0xff] }
  0x91   : > { %1031 = vst.msk [vmem:[#allocation2 + $0x58] sm:$0xff] %vm17279_vm0, %v996_v30  ;;  %v964_v37 = vsel %vm17278_vm1, %v878_v24, %v928_v31  ;;  %v12991_v39 = vld [vmem:[#allocation2 + $0x10] sm:$0xff]  ;;  %v1127_v40 = vshrl.u32 %v12987_v36, 16  ;;  %v1130_v0 = vshll.u32 %v12987_v36, 16  ;;  %v13067_v24 = vld [vmem:[%s17248_s2 + $0x18] sm:$0xff]   ;;  %v890_v30 = vpack.c.bf16 %v835_v17, %v834_v16 }
  0x92   : > { %1023 = vst.msk [vmem:[#allocation2 + $0x18] sm:$0xff] %vm17279_vm0, %v964_v37  ;;  %v1071_v45 = vshrl.u32 %v12991_v39, 16  ;;  %v1074_v52 = vshll.u32 %v12991_v39, 16  ;;  %v882_v42 = vpack.c.bf16 %v819_v22, %v818_v21 }
  0x93   : > { %v946_v46 = vpop.permute.xlu0 %945  ;;  %v1129_v54 = vrot.slane %v1127_v40, 7 }
  0x94   : > { %v1000_v48 = vsel %vm17278_vm1, %v887_v32, %v946_v46  ;;  %v930_v50 = vpop.permute.xlu1 %929  ;;  %v13001_v51 = vrot.slane %v1071_v45, 7  ;;  %v13008_v57 = vld [vmem:[#allocation2 + $0x50] sm:$0xff] }
  0x95   : > { %1032 = vst.msk [vmem:[#allocation2 + $0x60] sm:$0xff] %vm17279_vm0, %v1000_v48  ;;  %v968_v58 = vsel %vm17278_vm1, %v879_v38, %v930_v50  ;;  %v13012_v60 = vld [vmem:[#allocation2 + $0x40] sm:$0xff]  ;;  %v17262_v61 = vshrl.u32 %v13008_v57, 16  ;;  %v1138_v6 = vshll.u32 %v13008_v57, 16  ;;  %v1132_v12 = vor.u32 %v1130_v0, %v1129_v54  ;;  %v838_v50 = vld [vmem:[%s12958_s20 + $0xf0] sm:$0xff] }
  0x96   : > { %1024 = vst.msk [vmem:[#allocation2 + $0x20] sm:$0xff] %vm17279_vm0, %v968_v58  ;;  %v13019_v62 = vor.u32 %v1074_v52, %v13001_v51  ;;  %v1119_v63 = vshrl.u32 %v13012_v60, 16  ;;  %v891_v58 = vpack.c.bf16 %v837_v34, %v836_v33 }
  0x97   : > { %v948_v3 = vpop.permute.xlu0 %947  ;;  %v1137_v5 = vrot.slane %v17262_v61, 7 }
  0x98   : > { %v1004_v8 = vsel %vm17278_vm1, %v888_v47, %v948_v3  ;;  %v932_v9 = vpop.permute.xlu1 %931  ;;  %v1077_v10 = vsel %vm17277_vm2, %v12925_v44, %v13019_v62  ;;  %v13039_v11 = vrot.slane %v1119_v63, 7  ;;  %v13043_v13 = vld [vmem:[#allocation2 + $0x58] sm:$0xff] }
  0x99   : > { %1033 = vst.msk [vmem:[#allocation2 + $0x68] sm:$0xff] %vm17279_vm0, %v1004_v8  ;;  %v972_v14 = vsel %vm17278_vm1, %v880_v59, %v932_v9  ;;  %11833 = vmatmul.mubr.msk.bf16.vlgmr.msra.gmra.mrb[0].mxu0 %vm17279_vm0, %v1077_v10  ;;  %v1140_v44 = vor.u32 %v1138_v6, %v1137_v5  ;;  %v13052_v18 = vld [vmem:[#allocation2 + $0x18] sm:$0xff]  ;;  %v17261_v19 = vshrl.u32 %v13043_v13, 16  ;;  %v1146_v27 = vshll.u32 %v13043_v13, 16 }
  0x9a   : > { %1025 = vst.msk [vmem:[#allocation2 + $0x28] sm:$0xff] %vm17279_vm0, %v972_v14  ;;  %v13058_v20 = vsel %vm17277_vm2, %v13039_v11, %v1132_v12  ;;  %11899 = vmatpush3.bf16.msra.mxu0 %v12933_v49  ;;  %v1079_v23 = vshrl.u32 %v13052_v18, 16  ;;  %v1082_v32 = vshll.u32 %v13052_v18, 16 }
  0x9b   : > { %11848 = vmatprep.mubr.msk.bf16.mxu1 %vm17279_vm0, %v13058_v20  ;;  %v950_v25 = vpop.permute.xlu0 %949  ;;  %v13072_v26 = vsel %vm17277_vm2, %v1129_v54, %v1140_v44  ;;  %v1145_v49 = vrot.slane %v17261_v19, 7  ;;  %11966 = vmatprep.subr.bf16.mxu0 %v13031_v7  ;;  %v839_v54 = vld [vmem:[%s12958_s20 + $0xf8] sm:$0xff] }
  0x9c   : > { %v1008_v28 = vsel %vm17278_vm1, %v889_v4, %v950_v25  ;;  %v934_v29 = vpop.permute.xlu1 %933  ;;  %11849 = vmatmul.mubr.msk.bf16.vlgmr.msra.gmra.mrb[0].mxu1 %vm17279_vm0, %v13072_v26  ;;  %v1081_v31 = vrot.slane %v1079_v23, 7  ;;  %v13086_v37 = vld [vmem:[#allocation2 + $0x60] sm:$0xff]  ;;  %v892_v12 = vpack.c.bf16 %v839_v54, %v838_v50 }
  0x9d   : > { %1034 = vst.msk [vmem:[#allocation2 + $0x70] sm:$0xff] %vm17279_vm0, %v1008_v28  ;;  %v976_v38 = vsel %vm17278_vm1, %v881_v15, %v934_v29  ;;  %11865 = vmatpush3.bf16.msra.mxu1 %v12922_v41  ;;  %v1148_v43 = vor.u32 %v1146_v27, %v1145_v49  ;;  %v13093_v46 = vld [vmem:[#allocation2 + $0x20] sm:$0xff]  ;;  %v17260_v47 = vshrl.u32 %v13086_v37, 16  ;;  %v17264_v1 = vshll.u32 %v13086_v37, 16 }
  0x9e   : > { %1026 = vst.msk [vmem:[#allocation2 + $0x30] sm:$0xff] %vm17279_vm0, %v976_v38  ;;  %v13099_v48 = vor.u32 %v1082_v32, %v1081_v31  ;;  %v1087_v55 = vshrl.u32 %v13093_v46, 16  ;;  %11932 = vmatprep.subr.bf16.mxu1 %v13067_v24  ;;  %v1090_v8 = vshll.u32 %v13093_v46, 16 }
  0x9f   : > { %v952_v41 = vpop.permute.xlu0 %951  ;;  %v13106_v56 = vsel %vm17277_vm2, %v1137_v5, %v1148_v43  ;;  %v1153_v59 = vrot.slane %v17260_v47, 7  ;;  %v1122_v47 = vshll.u32 %v13012_v60, 16 }
  0xa0   : > { %v1012_v2 = vsel %vm17278_vm1, %v890_v30, %v952_v41  ;;  %v936_v3 = vpop.permute.xlu1 %935  ;;  %v13115_v4 = vsel %vm17277_vm2, %v13001_v51, %v13099_v48  ;;  %11852 = vmatprep.mubr.msk.bf16.mxu1 %vm17279_vm0, %v13106_v56  ;;  %v1089_v5 = vrot.slane %v1087_v55, 7  ;;  %v13122_v9 = vld [vmem:[#allocation2 + $0x68] sm:$0xff] }
  0xa1   : > { %1035 = vst.msk [vmem:[#allocation2 + $0x78] sm:$0xff] %vm17279_vm0, %v1012_v2  ;;  %v980_v10 = vsel %vm17278_vm1, %v882_v42, %v936_v3  ;;  %11836 = vmatprep.mubr.msk.bf16.mxu0 %vm17279_vm0, %v13115_v4  ;;  %v1156_v51 = vor.u32 %v17264_v1, %v1153_v59  ;;  %v13130_v14 = vld [vmem:[#allocation2 + $0x28] sm:$0xff]  ;;  %v17256_v15 = vshrl.u32 %v13122_v9, 16  ;;  %v17259_v25 = vshll.u32 %v13122_v9, 16 }
  0xa2   : > { %1027 = vst.msk [vmem:[#allocation2 + $0x38] sm:$0xff] %vm17279_vm0, %v980_v10  ;;  %v1092_v44 = vor.u32 %v1090_v8, %v1089_v5  ;;  %v1095_v16 = vshrl.u32 %v13130_v14, 16 }
  0xa3   : > { %v954_v17 = vpop.permute.xlu0 %953  ;;  %v13136_v21 = vsel %vm17277_vm2, %v1145_v49, %v1156_v51  ;;  %v1161_v22 = vrot.slane %v17256_v15, 7  ;;  %v1098_v49 = vshll.u32 %v13130_v14, 16 }
  0xa4   : > { %v1016_v28 = vsel %vm17278_vm1, %v891_v58, %v954_v17  ;;  %v956_v29 = vpop.permute.xlu1 %955  ;;  %v13143_v30 = vsel %vm17277_vm2, %v1081_v31, %v1092_v44  ;;  %11853 = vmatmul.mubr.msk.bf16.gmra.mrb[4].mxu1 %vm17279_vm0, %v13136_v21  ;;  %v1097_v33 = vrot.slane %v1095_v16, 7  ;;  %v13150_v34 = vld [vmem:[#allocation2 + $0x70] sm:$0xff] }
  0xa5   : > { %1036 = vst.msk [vmem:[#allocation2 + $0x80] sm:$0xff] %vm17279_vm0, %v1016_v28  ;;  %v1020_v38 = vsel %vm17278_vm1, %v892_v12, %v956_v29  ;;  %11837 = vmatmul.mubr.msk.bf16.gmra.mrb[4].mxu0 %vm17279_vm0, %v13143_v30  ;;  %v1164_v31 = vor.u32 %v17259_v25, %v1161_v22  ;;  %v13158_v42 = vld [vmem:[#allocation2 + $0x30] sm:$0xff]  ;;  %v17255_v43 = vshrl.u32 %v13150_v34, 16  ;;  %v17257_v2 = vshll.u32 %v13150_v34, 16 }
  0xa6   : > { %1037 = vst.msk [vmem:[#allocation2 + $0x88] sm:$0xff] %vm17279_vm0, %v1020_v38  ;;  %v1100_v50 = vor.u32 %v1098_v49, %v1097_v33  ;;  %v1103_v54 = vshrl.u32 %v13158_v42, 16  ;;  %v1106_v12 = vshll.u32 %v13158_v42, 16  ;;  %v1814_v25 = vrot.slane %v1090_v8, 1 }
  0xa7   : > { %v13164_v41 = vsel %vm17277_vm2, %v1153_v59, %v1164_v31  ;;  %v1169_v58 = vrot.slane %v17255_v43, 7 }
  0xa8   : > { %v13170_v3 = vsel %vm17277_vm2, %v1089_v5, %v1100_v50  ;;  %11856 = vmatprep.mubr.msk.bf16.mxu1 %vm17279_vm0, %v13164_v41  ;;  %v1105_v10 = vrot.slane %v1103_v54, 7  ;;  %v13177_v51 = vld [vmem:[#allocation2 + $0x78] sm:$0xff] }
  0xa9   : > { %11840 = vmatprep.mubr.msk.bf16.mxu0 %vm17279_vm0, %v13170_v3  ;;  %v1172_v59 = vor.u32 %v17257_v2, %v1169_v58  ;;  %v13183_v44 = vld [vmem:[#allocation2 + $0x38] sm:$0xff]  ;;  %v17258_v5 = vshrl.u32 %v13177_v51, 16  ;;  %v17263_v31 = vshll.u32 %v13177_v51, 16 }
  0xaa   : > { %v1108_v17 = vor.u32 %v1106_v12, %v1105_v10  ;;  %v1111_v28 = vshrl.u32 %v13183_v44, 16  ;;  %v1114_v15 = vshll.u32 %v13183_v44, 16 }
  0xab   : > { %v13188_v29 = vsel %vm17277_vm2, %v1161_v22, %v1172_v59  ;;  %v1177_v38 = vrot.slane %v17258_v5, 7 }
  0xac   : > { %v13194_v50 = vsel %vm17277_vm2, %v1097_v33, %v1108_v17  ;;  %11857 = vmatmul.mubr.msk.bf16.gmra.mrb[8].mxu1 %vm17279_vm0, %v13188_v29  ;;  %v1113_v43 = vrot.slane %v1111_v28, 7  ;;  %v13199_v2 = vld [vmem:[#allocation2 + $0x80] sm:$0xff]  ;;  %v1798_v33 = vrot.slane %v1074_v52, 1  ;;  %v1806_v17 = vrot.slane %v1082_v32, 1 }
  0xad   : > { %11841 = vmatmul.mubr.msk.bf16.gmra.mrb[8].mxu0 %vm17279_vm0, %v13194_v50  ;;  %v1180_v22 = vor.u32 %v17263_v31, %v1177_v38  ;;  %v17265_v59 = vshrl.u32 %v13199_v2, 16  ;;  %v17266_v31 = vshll.u32 %v13199_v2, 16  ;;  %v1822_v52 = vrot.slane %v1098_v49, 1 }
  0xae   : > { %v1116_v5 = vor.u32 %v1114_v15, %v1113_v43  ;;  %v2916_v32 = vrot.slane %v1130_v0, 1  ;;  %v1799_v49 = vsel %vm17288_vm3, %v12939_v53, %v1798_v33  ;;  %v1818_v0 = vor.u32 %v1814_v25, %v1087_v55 }
  0xaf   : > { %v13212_v19 = vsel %vm17277_vm2, %v1169_v58, %v1180_v22  ;;  %v13216_v61 = vrot.slane %v17265_v59, 7  ;;  %v1802_v58 = vor.u32 %v1798_v33, %v1071_v45  ;;  %v1846_v45 = vrot.slane %v1122_v47, 1 }
  0xb0   : > { %v13220_v1 = vsel %vm17277_vm2, %v1105_v10, %v1116_v5  ;;  %11860 = vmatprep.mubr.msk.bf16.mxu1 %vm17279_vm0, %v13212_v19  ;;  %v1810_v10 = vor.u32 %v1806_v17, %v1079_v23  ;;  %v1124_v5 = vor.u32 %v1122_v47, %v13039_v11  ;;  %v13255_v53 = vsel %vm17288_vm3, %v1818_v0, %v1822_v52 }
  0xb1   : > { %11844 = vmatprep.mubr.msk.bf16.mxu0 %vm17279_vm0, %v13220_v1  ;;  %v1188_v8 = vor.u32 %v17266_v31, %v13216_v61  ;;  %v13244_v59 = vsel %vm17288_vm3, %v1802_v58, %v1806_v17  ;;  %v1830_v11 = vrot.slane %v1106_v12, 1  ;;  %v1838_v55 = vrot.slane %v1114_v15, 1 }
  0xb2   : > { %v13247_v31 = vsel %vm17288_vm3, %v1810_v10, %v1814_v25  ;;  %v13250_v23 = vsel %vm17277_vm2, %v1113_v43, %v1124_v5  ;;  %v1826_v47 = vor.u32 %v1822_v52, %v1095_v16  ;;  %v13267_v43 = vld [vmem:[%s17248_s2 + $0x28] sm:$0xff]   ;;  %v17563_v52 = vshrl.u32 %v13008_v57, 16 }
  0xb3   : > { %v13241_v22 = vsel %vm17277_vm2, %v1177_v38, %v1188_v8  ;;  %v1842_v25 = vor.u32 %v1838_v55, %v1111_v28  ;;  %v1834_v15 = vor.u32 %v1830_v11, %v1103_v54  ;;  %v2920_v54 = vor.u32 %v2916_v32, %v1127_v40 }
  0xb4   : > { %11861 = vmatmul.mubr.msk.bf16.gmra.mrb[12].mxu1 %vm17279_vm0, %v13241_v22  ;;  %v13272_v38 = vsel %vm17288_vm3, %v1826_v47, %v1830_v11  ;;  %v2932_v28 = vrot.slane %v1146_v27, 1  ;;  %v17562_v40 = vshll.u32 %v13086_v37, 16  ;;  %v17565_v27 = vshrl.u32 %v13086_v37, 16 }
  0xb5   : > { %11845 = vmatmul.mubr.msk.bf16.gmra.mrb[12].mxu0 %vm17279_vm0, %v13250_v23  ;;  %11866 = vmatprep.mubr.msk.bf16.mxu1 %vm17279_vm0, %v12913_v35  ;;  %v13277_v35 = vld [vmem:[%s17248_s2 + $0x30] sm:$0xff]   ;;  %v13290_v16 = vsel %vm17288_vm3, %v1834_v15, %v1838_v55  ;;  %v13293_v12 = vsel %vm17288_vm3, %v1842_v25, %v1846_v45  ;;  %v17566_v5 = vshll.u32 %v13122_v9, 16  ;;  %v17568_v47 = vshrl.u32 %v13122_v9, 16 }
  0xb6   : > { %11900 = vmatprep.mubr.msk.bf16.mxu0 %vm17279_vm0, %v1799_v49  ;;  %v2940_v33 = vrot.slane %v17562_v40, 1  ;;  %v17569_v15 = vshrl.u32 %v13150_v34, 16  ;;  %v17571_v40 = vshll.u32 %v13199_v2, 16 }
  0xb7   : > { %v2948_v49 = vrot.slane %v17566_v5, 1  ;;  %v13379_v5 = vld [vmem:[#allocation2 + $0x88] sm:$0xff] }
  0xb8   : > { %v2944_v10 = vor.u32 %v2940_v33, %v17565_v27 }
  0xb9   : > { %v2952_v25 = vor.u32 %v2948_v49, %v17568_v47 }
  0xba   : > { %v13338_v55 = vsel %vm17288_vm3, %v2944_v10, %v2948_v49  ;;  %v2321_v49 = vshll.u32 %v13379_v5, 16 }
  0xbc   : > { %11867 = vmatmul.mubr.msk.bf16.vlgmr.msra.gmra.mrb[16].mxu1 %vm17279_vm0, %v12991_v39 }
  0xbd   : > { %11901 = vmatmul.mubr.msk.bf16.vlgmr.msra.gmra.mrb[16].mxu0 %vm17279_vm0, %v13244_v59  ;;  %11933 = vmatpush3.bf16.msra.mxu1 %v13067_v24  ;;  %v2912_v24 = vor.u32 %v1846_v45, %v1119_v63  ;;  %v17567_v45 = vshll.u32 %v13150_v34, 16 }
  0xbe   : > { %11870 = vmatprep.mubr.msk.bf16.mxu1 %vm17279_vm0, %v13052_v18  ;;  %11904 = vmatprep.mubr.msk.bf16.mxu0 %vm17279_vm0, %v13247_v31 }
  0xbf   : > { %11967 = vmatpush3.bf16.msra.mxu0 %v13031_v7  ;;  %12000 = vmatprep.subr.bf16.mxu1 %v13267_v43  ;;  %v2924_v7 = vrot.slane %v1138_v6, 1  ;;  %v13314_v63 = vsel %vm17288_vm3, %v2912_v24, %v2916_v32  ;;  %v17564_v6 = vshrl.u32 %v13043_v13, 16  ;;  %v2956_v11 = vrot.slane %v17567_v45, 1 }
  0xc0   : > { %12034 = vmatprep.subr.bf16.mxu0 %v13277_v35  ;;  %v2318_v45 = vshrl.u32 %v13379_v5, 16 }
  0xc1   : > { %v13319_v17 = vsel %vm17288_vm3, %v2920_v54, %v2924_v7  ;;  %v2928_v8 = vor.u32 %v2924_v7, %v17563_v52  ;;  %v2936_v58 = vor.u32 %v2932_v28, %v17564_v6  ;;  %v2960_v24 = vor.u32 %v2956_v11, %v17569_v15  ;;  %v2263_v15 = vld [vmem:[#allocation2 + $0x8] sm:$0x80] }
  0xc2   : > { %v17570_v54 = vshll.u32 %v13177_v51, 16 }
  0xc3   : > { %v13330_v32 = vsel %vm17288_vm3, %v2928_v8, %v2932_v28  ;;  %v13333_v0 = vsel %vm17288_vm3, %v2936_v58, %v2940_v33  ;;  %v13349_v28 = vsel %vm17288_vm3, %v2952_v25, %v2956_v11  ;;  %v2972_v33 = vrot.slane %v17571_v40, 1  ;;  %v1783_v25 = vld [vmem:[#allocation2 + $0x88] sm:$0x1] }
  0xc4   : > { %11871 = vmatmul.mubr.msk.bf16.gmra.mrb[20].mxu1 %vm17279_vm0, %v13093_v46  ;;  %v2964_v7 = vrot.slane %v17570_v54, 1  ;;  %v17572_v8 = vshrl.u32 %v13177_v51, 16  ;;  %v17573_v58 = vshrl.u32 %v13199_v2, 16  ;;  %v13393_v11 = vrot.slane %v2321_v49, 1 }
  0xc5   : > { %11905 = vmatmul.mubr.msk.bf16.gmra.mrb[20].mxu0 %vm17279_vm0, %v13255_v53  ;;  %11874 = vmatprep.mubr.msk.bf16.mxu1 %vm17279_vm0, %v13130_v14  ;;  %v2269_v54 = vshrl.u32 %v2263_v15, 16 }
  0xc6   : > { %11908 = vmatprep.mubr.msk.bf16.mxu0 %vm17279_vm0, %v13272_v38  ;;  %v13358_v52 = vsel %vm17288_vm3, %v2960_v24, %v2964_v7  ;;  %v2968_v6 = vor.u32 %v2964_v7, %v17572_v8  ;;  %v13366_v27 = vor.u32 %v2972_v33, %v17573_v58  ;;  %v13396_v47 = vor.u32 %v13393_v11, %v2318_v45  ;;  %v12786_v58 = vld [vmem:[%s17248_s2 + $0x40] sm:$0xff]  }
  0xc7   : > { %v1916_v24 = vshll.u32 %v1783_v25, 16  ;;  %v2271_v40 = vrot.slane %v2269_v54, 7 }
  0xc8   : > { %v13369_v10 = vsel %vm17288_vm3, %v2968_v6, %v2972_v33  ;;  %v12785_v6 = vld [vmem:[%s17248_s2 + $0x38] sm:$0xff]  }
  0xc9   : > { %v1918_v7 = vrot.slane %v1916_v24, 1  ;;  %v2274_v8 = vsel %vm17277_vm2, %v2271_v40, %v13019_v62 }
  0xcb   : > { %v1919_v33 = vsel %vm17288_vm3, %v13366_v27, %v1918_v7 }
  0xcc   : > { %11875 = vmatmul.mubr.msk.bf16.gmra.mrb[24].mxu1 %vm17279_vm0, %v13158_v42 }
  0xcd   : > { %11909 = vmatmul.mubr.msk.bf16.gmra.mrb[24].mxu0 %vm17279_vm0, %v13290_v16  ;;  %11878 = vmatprep.mubr.msk.bf16.mxu1 %vm17279_vm0, %v13183_v44 }
  0xce   : > { %11912 = vmatprep.mubr.msk.bf16.mxu0 %vm17279_vm0, %v13293_v12 }
  0xd4   : > { %11879 = vmatmul.mubr.msk.bf16.gmra.mrb[28].mxu1 %vm17279_vm0, %v13012_v60 }
  0xd5   : > { %11913 = vmatmul.mubr.msk.bf16.gmra.mrb[28].mxu0 %vm17279_vm0, %v13314_v63  ;;  %11882 = vmatprep.mubr.msk.bf16.mxu1 %vm17279_vm0, %v12987_v36 }
  0xd6   : > { %11916 = vmatprep.mubr.msk.bf16.mxu0 %vm17279_vm0, %v13319_v17 }
  0xdc   : > { %11883 = vmatmul.mubr.msk.bf16.gmra.mrb[32].mxu1 %vm17279_vm0, %v13008_v57 }
  0xdd   : > { %11917 = vmatmul.mubr.msk.bf16.gmra.mrb[32].mxu0 %vm17279_vm0, %v13330_v32  ;;  %11886 = vmatprep.mubr.msk.bf16.mxu1 %vm17279_vm0, %v13043_v13 }
  0xde   : > { %11920 = vmatprep.mubr.msk.bf16.mxu0 %vm17279_vm0, %v13333_v0 }
  0xe4   : > { %11887 = vmatmul.mubr.msk.bf16.gmra.mrb[36].mxu1 %vm17279_vm0, %v13086_v37 }
  0xe5   : > { %11921 = vmatmul.mubr.msk.bf16.gmra.mrb[36].mxu0 %vm17279_vm0, %v13338_v55  ;;  %11890 = vmatprep.mubr.msk.bf16.mxu1 %vm17279_vm0, %v13122_v9 }
  0xe6   : > { %11924 = vmatprep.mubr.msk.bf16.mxu0 %vm17279_vm0, %v13349_v28 }
  0xec   : > { %11891 = vmatmul.mubr.msk.bf16.gmra.mrb[40].mxu1 %vm17279_vm0, %v13150_v34 }
  0xed   : > { %11925 = vmatmul.mubr.msk.bf16.gmra.mrb[40].mxu0 %vm17279_vm0, %v13358_v52  ;;  %11894 = vmatprep.mubr.msk.bf16.mxu1 %vm17279_vm0, %v13177_v51 }
  0xee   : > { %11928 = vmatprep.mubr.msk.bf16.mxu0 %vm17279_vm0, %v13369_v10 }
  0xf4   : > { %11895 = vmatmul.mubr.msk.bf16.gmra.mrb[44].mxu1 %vm17279_vm0, %v13199_v2 }
  0xf5   : > { %11929 = vmatmul.mubr.msk.bf16.gmra.mrb[44].mxu0 %vm17279_vm0, %v1919_v33  ;;  %11934 = vmatprep.mubr.msk.bf16.mxu1 %vm17279_vm0, %v2274_v8 }
  0xf6   : > { %11968 = vmatprep.mubr.msk.bf16.mxu0 %vm17279_vm0, %v12991_v39  ;;  %v3269_v39 = vld [vmem:[#allocation2 + $0x10] sm:$0x80] }
  0xfc   : > { %11935 = vmatmul.mubr.msk.bf16.vlgmr.msra.gmra.mrb[48].mxu1 %vm17279_vm0, %v13115_v4 }
  0xfd   : > { %11969 = vmatmul.mubr.msk.bf16.vlgmr.msra.gmra.mrb[48].mxu0 %vm17279_vm0, %v13052_v18  ;;  %12001 = vmatpush3.bf16.msra.mxu1 %v13267_v43 }
  0xfe   : > { %11938 = vmatprep.mubr.msk.bf16.mxu1 %vm17279_vm0, %v13143_v30  ;;  %11972 = vmatprep.mubr.msk.bf16.mxu0 %vm17279_vm0, %v13093_v46 }
  0xff   : > { %12035 = vmatpush3.bf16.msra.mxu0 %v13277_v35  ;;  %12068 = vmatprep.subr.bf16.mxu1 %v12785_v6  ;;  %v3847_v35 = vld [vmem:[#allocation2 + $0x30] sm:$0xff] }
 0x100   : > { %12102 = vmatprep.subr.bf16.mxu0 %v12786_v58 }
 0x104   : > { %11939 = vmatmul.mubr.msk.bf16.gmra.mrb[52].mxu1 %vm17279_vm0, %v13170_v3 }
 0x105   : > { %11973 = vmatmul.mubr.msk.bf16.gmra.mrb[52].mxu0 %vm17279_vm0, %v13130_v14  ;;  %11942 = vmatprep.mubr.msk.bf16.mxu1 %vm17279_vm0, %v13194_v50 }
 0x106   : > { %11976 = vmatprep.mubr.msk.bf16.mxu0 %vm17279_vm0, %v13158_v42 }
 0x10c   : > { %11943 = vmatmul.mubr.msk.bf16.gmra.mrb[56].mxu1 %vm17279_vm0, %v13220_v1 }
 0x10d   : > { %11977 = vmatmul.mubr.msk.bf16.gmra.mrb[56].mxu0 %vm17279_vm0, %v13183_v44  ;;  %11946 = vmatprep.mubr.msk.bf16.mxu1 %vm17279_vm0, %v13250_v23 }
 0x10e   : > { %11980 = vmatprep.mubr.msk.bf16.mxu0 %vm17279_vm0, %v13012_v60  ;;  %v3275_v60 = vshrl.u32 %v3269_v39, 16 }
 0x114   : > { %11947 = vmatmul.mubr.msk.bf16.gmra.mrb[60].mxu1 %vm17279_vm0, %v13058_v20 }
 0x115   : > { %11981 = vmatmul.mubr.msk.bf16.gmra.mrb[60].mxu0 %vm17279_vm0, %v12987_v36  ;;  %11950 = vmatprep.mubr.msk.bf16.mxu1 %vm17279_vm0, %v13072_v26  ;;  %v13480_v36 = vrot.slane %v2318_v45, 7 }
 0x116   : > { %11984 = vmatprep.mubr.msk.bf16.mxu0 %vm17279_vm0, %v13008_v57 }
 0x117   : > { %v2323_v57 = vor.u32 %v2321_v49, %v13480_v36 }
 0x119   : > { %v2324_v62 = vsel %vm17277_vm2, %v13216_v61, %v2323_v57  ;;  %v13549_v61 = vld [vmem:[#allocation2 + $0x90] sm:$0xff] }
 0x11c   : > { %11951 = vmatmul.mubr.msk.bf16.gmra.mrb[64].mxu1 %vm17279_vm0, %v13106_v56 }
 0x11d   : > { %11985 = vmatmul.mubr.msk.bf16.gmra.mrb[64].mxu0 %vm17279_vm0, %v13043_v13  ;;  %11954 = vmatprep.mubr.msk.bf16.mxu1 %vm17279_vm0, %v13136_v21  ;;  %v3277_v13 = vrot.slane %v3275_v60, 7 }
 0x11e   : > { %11988 = vmatprep.mubr.msk.bf16.mxu0 %vm17279_vm0, %v13086_v37 }
 0x11f   : > { %v3280_v37 = vsel %vm17277_vm2, %v3277_v13, %v13099_v48  ;;  %v3844_v48 = vld [vmem:[#allocation2 + $0x18] sm:$0xff]  ;;  %v3850_v13 = vld [vmem:[#allocation2 + $0x48] sm:$0xff] }
 0x120   : > { %v3867_v4 = vshll.u32 %v3844_v48, 16 }
 0x124   : > { %11955 = vmatmul.mubr.msk.bf16.gmra.mrb[68].mxu1 %vm17279_vm0, %v13164_v41 }
 0x125   : > { %11989 = vmatmul.mubr.msk.bf16.gmra.mrb[68].mxu0 %vm17279_vm0, %v13122_v9  ;;  %11958 = vmatprep.mubr.msk.bf16.mxu1 %vm17279_vm0, %v13188_v29 }
 0x126   : > { %11992 = vmatprep.mubr.msk.bf16.mxu0 %vm17279_vm0, %v13150_v34 }
 0x12c   : > { %11959 = vmatmul.mubr.msk.bf16.gmra.mrb[72].mxu1 %vm17279_vm0, %v13212_v19 }
 0x12d   : > { %11993 = vmatmul.mubr.msk.bf16.gmra.mrb[72].mxu0 %vm17279_vm0, %v13177_v51  ;;  %11962 = vmatprep.mubr.msk.bf16.mxu1 %vm17279_vm0, %v13241_v22 }
 0x12e   : > { %11996 = vmatprep.mubr.msk.bf16.mxu0 %vm17279_vm0, %v13199_v2 }
 0x134   : > { %11963 = vmatmul.mubr.msk.bf16.gmra.mrb[76].mxu1 %vm17279_vm0, %v2324_v62 }
 0x135   : > { %11997 = vmatmul.mubr.msk.bf16.gmra.mrb[76].mxu0 %vm17279_vm0, %v13379_v5  ;;  %12002 = vmatprep.mubr.msk.bf16.mxu1 %vm17279_vm0, %v13244_v59 }
 0x136   : > { %12036 = vmatprep.mubr.msk.bf16.mxu0 %vm17279_vm0, %v3280_v37 }
 0x13c   : > { %12003 = vmatmul.mubr.msk.bf16.vlgmr.msra.gmra.mrb[80].mxu1 %vm17279_vm0, %v13247_v31  ;;  %v3865_v31 = vshrl.u32 %v3844_v48, 16 }
 0x13d   : > { %12037 = vmatmul.mubr.msk.bf16.vlgmr.msra.gmra.mrb[80].mxu0 %vm17279_vm0, %v13143_v30  ;;  %12069 = vmatpush3.bf16.msra.mxu1 %v12785_v6  ;;  %v327_v6 = vlaneseq }
 0x13e   : > { %12006 = vmatprep.mubr.msk.bf16.mxu1 %vm17279_vm0, %v13255_v53  ;;  %12040 = vmatprep.mubr.msk.bf16.mxu0 %vm17279_vm0, %v13170_v3 }
 0x13f   : > { %12103 = vmatpush3.bf16.msra.mxu0 %v12786_v58 }
 0x144   : > { %12007 = vmatmul.mubr.msk.bf16.gmra.mrb[84].mxu1 %vm17279_vm0, %v13272_v38 }
 0x145   : > { %12041 = vmatmul.mubr.msk.bf16.gmra.mrb[84].mxu0 %vm17279_vm0, %v13194_v50  ;;  %12010 = vmatprep.mubr.msk.bf16.mxu1 %vm17279_vm0, %v13290_v16  ;;  %v3869_v50 = vrot.slane %v3867_v4, 1 }
 0x146   : > { %12044 = vmatprep.mubr.msk.bf16.mxu0 %vm17279_vm0, %v13220_v1 }
 0x14c   : > { %12011 = vmatmul.mubr.msk.bf16.gmra.mrb[88].mxu1 %vm17279_vm0, %v13293_v12  ;;  %v3870_v12 = vor.u32 %v3869_v50, %v3865_v31 }
 0x14d   : > { %12045 = vmatmul.mubr.msk.bf16.gmra.mrb[88].mxu0 %vm17279_vm0, %v13250_v23  ;;  %12014 = vmatprep.mubr.msk.bf16.mxu1 %vm17279_vm0, %v13314_v63 }
 0x14e   : > { %12048 = vmatprep.mubr.msk.bf16.mxu0 %vm17279_vm0, %v13058_v20  ;;  %v2854_v20 = vld [vmem:[#allocation2 + $0x90] sm:$0x1] }
 0x14f   : > { %v2986_v1 = vshll.u32 %v2854_v20, 16 }
 0x154   : > { %12015 = vmatmul.mubr.msk.bf16.gmra.mrb[92].mxu1 %vm17279_vm0, %v13319_v17 }
 0x155   : > { %12049 = vmatmul.mubr.msk.bf16.gmra.mrb[92].mxu0 %vm17279_vm0, %v13072_v26  ;;  %12018 = vmatprep.mubr.msk.bf16.mxu1 %vm17279_vm0, %v13330_v32  ;;  %v17267_v26 = vshrl.u32 %v13549_v61, 16 }
 0x156   : > { %12052 = vmatprep.mubr.msk.bf16.mxu0 %vm17279_vm0, %v13106_v56  ;;  %v3845_v56 = vld [vmem:[#allocation2 + $0x20] sm:$0xff] }
 0x157   : > { %v3326_v30 = vrot.slane %v17267_v26, 7  ;;  %v13682_v26 = vld [vmem:[#allocation2 + $0x78] sm:$0xff] }
 0x15c   : > { %12019 = vmatmul.mubr.msk.bf16.gmra.mrb[96].mxu1 %vm17279_vm0, %v13333_v0  ;;  %v3888_v0 = vshll.u32 %v3847_v35, 16 }
 0x15d   : > { %12053 = vmatmul.mubr.msk.bf16.gmra.mrb[96].mxu0 %vm17279_vm0, %v13136_v21  ;;  %12022 = vmatprep.mubr.msk.bf16.mxu1 %vm17279_vm0, %v13338_v55  ;;  %v2981_v21 = vsel %vm17288_vm3, %v13366_v27, %v13393_v11  ;;  %v3876_v55 = vshrl.u32 %v3845_v56, 16 }
 0x15e   : > { %12056 = vmatprep.mubr.msk.bf16.mxu0 %vm17279_vm0, %v13164_v41  ;;  %v3872_v41 = vshll.u32 %v3845_v56, 16 }
 0x160   : > { %v3874_v43 = vrot.slane %v3872_v41, 1 }
 0x162   : > { %v3875_v32 = vsel %vm17288_vm3, %v3870_v12, %v3874_v43  ;;  %v3878_v54 = vor.u32 %v3876_v55, %v3874_v43  ;;  %v3852_v43 = vld [vmem:[#allocation2 + $0x58] sm:$0xff] }
 0x164   : > { %12023 = vmatmul.mubr.msk.bf16.gmra.mrb[100].mxu1 %vm17279_vm0, %v13349_v28  ;;  %v3848_v28 = vld [vmem:[#allocation2 + $0x38] sm:$0xff] }
 0x165   : > { %12057 = vmatmul.mubr.msk.bf16.gmra.mrb[100].mxu0 %vm17279_vm0, %v13188_v29  ;;  %12026 = vmatprep.mubr.msk.bf16.mxu1 %vm17279_vm0, %v13358_v52  ;;  %v2988_v29 = vrot.slane %v2986_v1, 1  ;;  %v3896_v24 = vshll.u32 %v3848_v28, 16  ;;  %v3900_v60 = vshrl.u32 %v3848_v28, 16  ;;  %v3916_v28 = vshrl.u32 %v3850_v13, 16 }
 0x166   : > { %12060 = vmatprep.mubr.msk.bf16.mxu0 %vm17279_vm0, %v13212_v19  ;;  %v17268_v19 = vshll.u32 %v13549_v61, 16 }
 0x167   : > { %v2989_v16 = vsel %vm17288_vm3, %v13396_v47, %v2988_v29  ;;  %v3898_v57 = vrot.slane %v3896_v24, 1 }
 0x168   : > { %v3329_v23 = vor.u32 %v17268_v19, %v3326_v30  ;;  %v3851_v30 = vld [vmem:[#allocation2 + $0x50] sm:$0xff] }
 0x169   : > { %v3902_v4 = vor.u32 %v3900_v60, %v3898_v57  ;;  %v3920_v12 = vshll.u32 %v3851_v30, 16 }
 0x16a   : > { %v3330_v17 = vsel %vm17277_vm2, %v13480_v36, %v3329_v23  ;;  %v3849_v36 = vld [vmem:[#allocation2 + $0x40] sm:$0xff] }
 0x16b   : > { %v3904_v20 = vshll.u32 %v3849_v36, 16 }
 0x16c   : > { %v13554_v9 = vpop.f32.mrb[0].mxu0  ;;  %12027 = vmatmul.mubr.msk.bf16.gmra.mrb[104].mxu1 %vm17279_vm0, %v13369_v10 }
 0x16d   : > { %v13564_v34 = vpop.f32.mrb[1].mxu0  ;;  %12061 = vmatmul.mubr.msk.bf16.gmra.mrb[104].mxu0 %vm17279_vm0, %v13241_v22  ;;  %12030 = vmatprep.mubr.msk.bf16.mxu1 %vm17279_vm0, %v2981_v21  ;;  %v3846_v22 = vld [vmem:[#allocation2 + $0x28] sm:$0xff]  ;;  %v3912_v21 = vshll.u32 %v3850_v13, 16  ;;  %v3906_v23 = vrot.slane %v3904_v20, 1 }
 0x16e   : > { %v13569_v2 = vpop.f32.mrb[2].mxu0  ;;  %12064 = vmatprep.mubr.msk.bf16.mxu0 %vm17279_vm0, %v2324_v62  ;;  %v3880_v63 = vshll.u32 %v3846_v22, 16  ;;  %v3884_v10 = vshrl.u32 %v3846_v22, 16  ;;  %v3892_v62 = vshrl.u32 %v3847_v35, 16  ;;  %v3908_v22 = vshrl.u32 %v3849_v36, 16 }
 0x16f   : > { %v13572_v3 = vpop.f32.mrb[3].mxu0  ;;  %v13574_v51 = vpop.f32.mrb[0].mxu1 }
 0x170   : > { %v13576_v59 = vpop.f32.mrb[1].mxu1  ;;  %v3882_v27 = vrot.slane %v3880_v63, 1  ;;  %v3907_v63 = vsel %vm17288_vm3, %v3902_v4, %v3906_v23  ;;  %v3910_v55 = vor.u32 %v3908_v22, %v3906_v23  ;;  %v3932_v22 = vshrl.u32 %v3852_v43, 16 }
 0x171   : > { %v13580_v53 = vpop.f32.mrb[2].mxu1 }
 0x172   : > { %v13582_v38 = vpop.f32.mrb[3].mxu1  ;;  %v3886_v8 = vor.u32 %v3884_v10, %v3882_v27  ;;  %v3883_v58 = vsel %vm17288_vm3, %v3878_v54, %v3882_v27  ;;  %v13647_v27 = vld [vmem:[#allocation2 + $0x60] sm:$0xff] }
 0x173   : > { %v3936_v20 = vshll.u32 %v13647_v27, 16 }
 0x174   : > { %12031 = vmatmul.mubr.msk.bf16.gmra.mrb[108].mxu1 %vm17279_vm0, %v2989_v16 }
 0x175   : > { %12065 = vmatmul.mubr.msk.bf16.gmra.mrb[108].mxu0 %vm17279_vm0, %v3330_v17  ;;  %12070 = vmatprep.mubr.msk.bf16.mxu1 %vm17279_vm0, %v13052_v18  ;;  %v3890_v18 = vrot.slane %v3888_v0, 1  ;;  %v3914_v17 = vrot.slane %v3912_v21, 1 }
 0x176   : > { %12104 = vmatprep.mubr.msk.bf16.mxu0 %vm17279_vm0, %v3875_v32  ;;  %v3928_v32 = vshll.u32 %v3852_v43, 16  ;;  %v17581_v43 = vmov 0 }
 0x177   : > { %v13594_v52 = vpop.f32.mrb[4].mxu1  ;;  %v3891_v39 = vsel %vm17288_vm3, %v3886_v8, %v3890_v18  ;;  %v3894_v31 = vor.u32 %v3892_v62, %v3890_v18  ;;  %v3918_v36 = vor.u32 %v3916_v28, %v3914_v17  ;;  %v3924_v62 = vshrl.u32 %v3851_v30, 16  ;;  %v12787_v30 = vld [vmem:[#allocation2 + $0x40] sm:$0xff] }
 0x178   : > { %v13596_v49 = vpop.f32.mrb[4].mxu0  ;;  %v13598_v45 = vpop.f32.mrb[5].mxu1  ;;  %v3930_v13 = vrot.slane %v3928_v32, 1  ;;  %v3915_v23 = vsel %vm17288_vm3, %v3910_v55, %v3914_v17  ;;  %v12788_v55 = vld [vmem:[#allocation2 + $0x48] sm:$0xff] }
 0x179   : > { %v13600_v25 = vpop.f32.mrb[5].mxu0  ;;  %v13602_v15 = vpop.f32.mrb[6].mxu1  ;;  %v3899_v16 = vsel %vm17288_vm3, %v3894_v31, %v3898_v57 }
 0x17a   : > { %v13604_v7 = vpop.f32.mrb[6].mxu0  ;;  %v13606_v40 = vpop.f32.mrb[7].mxu1 }
 0x17b   : > { %v13608_v33 = vpop.f32.mrb[7].mxu0 }
 0x17c   : > { %12071 = vmatmul.mubr.msk.bf16.vlgmr.msra.gmra.mrb[112].mxu1 %vm17279_vm0, %v13093_v46  ;;  %v13620_v46 = vshrl.u32 %v327_v6, 7 }
 0x17d   : > { %12105 = vmatmul.mubr.msk.bf16.vlgmr.msra.gmra.mrb[112].mxu0 %vm17279_vm0, %v3883_v58  ;;  %12074 = vmatprep.mubr.msk.bf16.mxu1 %vm17279_vm0, %v13130_v14 }
 0x17e   : > { %12108 = vmatprep.mubr.msk.bf16.mxu0 %vm17279_vm0, %v3891_v39  ;;  %v330_v35 = vadd.s32 16, %v13620_v46  ;;  %v331_v54 = vadd.s32 24, %v13620_v46  ;;  %v364_v8 = vand.u32 15, %v13620_v46  ;;  %v329_v39 = vadd.s32 8, %v13620_v46 }
 0x17f   : > { %v13618_v37 = vpop.f32.mrb[8].mxu1  ;;  %v334_v21 = vadd.s32 48, %v13620_v46  ;;  %v332_v17 = vadd.s32 32, %v13620_v46 }
 0x180   : > { %v13622_v48 = vpop.f32.mrb[8].mxu0  ;;  %v13624_v56 = vpop.f32.mrb[9].mxu1  ;;  %v378_v10 = vand.u32 15, %v330_v35  ;;  %v385_v32 = vand.u32 15, %v331_v54  ;;  %vm13684_vm5 = vcmp.ne.s32.totalorder %v364_v8, 0  ;;  %v3934_v54 = vor.u32 %v3932_v22, %v3930_v13 }
 0x181   : > { %v13626_v1 = vpop.f32.mrb[9].mxu0  ;;  %v13628_v14 = vpop.f32.mrb[10].mxu1  ;;  %v17582_v43 = vsel %vm13684_vm5, 4294967295, %v17581_v43  ;;  %v406_v35 = vand.u32 15, %v334_v21  ;;  %v335_v22 = vadd.s32 56, %v13620_v46 }
 0x182   : > { %v13630_v41 = vpop.f32.mrb[10].mxu0  ;;  %v13632_v29 = vpop.f32.mrb[11].mxu1  ;;  %vm13675_vm4 = vcmp.ne.s32.totalorder %v378_v10, 0  ;;  %17583 = vst [vmem:[#allocation10_spill] sm:$0xff] %v17582_v43  ;;  %v371_v10 = vand.u32 15, %v329_v39  ;;  %vm13703_vm6 = vcmp.ne.s32.totalorder %v385_v32, 15 }
 0x183   : > { %v13634_v50 = vpop.f32.mrb[11].mxu0  ;;  %v1471_v19 = vsel %vm13675_vm4, %v13554_v9, 0.0  ;;  %v392_v9 = vand.u32 15, %v332_v17  ;;  %v333_v43 = vadd.s32 40, %v13620_v46  ;;  %v338_v17 = vadd.s32 80, %v13620_v46 }
 0x184   : > { %12075 = vmatmul.mubr.msk.bf16.gmra.mrb[116].mxu1 %vm17279_vm0, %v13158_v42  ;;  %v13649_v42 = vld [vmem:[#allocation2 + $0x68] sm:$0xff]  ;;  %vm13708_vm7 = vcmp.ne.s32.totalorder %v371_v10, 15  ;;  %vm13724_vm8 = vcmp.ne.s32.totalorder %v406_v35, 0 }
 0x185   : > { %12109 = vmatmul.mubr.msk.bf16.gmra.mrb[116].mxu0 %vm17279_vm0, %v3899_v16  ;;  %12078 = vmatprep.mubr.msk.bf16.mxu1 %vm17279_vm0, %v13183_v44  ;;  %v3922_v44 = vrot.slane %v3920_v12, 1  ;;  %v3944_v4 = vshll.u32 %v13649_v42, 16  ;;  %v13673_v16 = vld [vmem:[#allocation2 + $0x70] sm:$0xff]  ;;  %v17578_v12 = vmov 0  ;;  %v3948_v28 = vshrl.u32 %v13649_v42, 16 }
 0x186   : > { %12112 = vmatprep.mubr.msk.bf16.mxu0 %vm17279_vm0, %v3907_v63  ;;  %v17579_v12 = vsel %vm13675_vm4, 4294967295, %v17578_v12  ;;  %v3952_v8 = vshll.u32 %v13673_v16, 16  ;;  %vm13735_vm9 = vcmp.ne.s32.totalorder %v392_v9, 0 }
 0x187   : > { %v13645_v0 = vpop.f32.mrb[12].mxu1  ;;  %17580 = vst [vmem:[#allocation9_spill] sm:$0xff] %v17579_v12  ;;  %v3923_v63 = vsel %vm17288_vm3, %v3918_v36, %v3922_v44  ;;  %v3938_v36 = vrot.slane %v3936_v20, 1  ;;  %v13692_v42 = vrot.slane %v3944_v4, 1  ;;  %v17584_v4 = vmov 0 }
 0x188   : > { %17574 = vst [vmem:[#allocation5_spill] sm:$0xff] %v13645_v0  ;;  %v13651_v18 = vpop.f32.mrb[12].mxu0  ;;  %v13653_v24 = vpop.f32.mrb[13].mxu1  ;;  %v17585_v4 = vsel %vm13703_vm6, 4294967295, %v17584_v4 }
 0x189   : > { %17575 = vst [vmem:[#allocation6_spill] sm:$0xff] %v13653_v24  ;;  %v13657_v6 = vpop.f32.mrb[13].mxu0  ;;  %v13659_v58 = vpop.f32.mrb[14].mxu1  ;;  %17586 = vst [vmem:[#allocation11_spill] sm:$0xff] %v17585_v4  ;;  %v3939_v24 = vsel %vm17288_vm3, %v3934_v54, %v3938_v36  ;;  %v13733_v54 = vld [vmem:[#allocation2 + $0x80] sm:$0xff]  ;;  %v3950_v9 = vor.u32 %v3948_v28, %v13692_v42 }
 0x18a   : > { %17576 = vst [vmem:[#allocation7_spill] sm:$0xff] %v13659_v58  ;;  %v13662_v57 = vpop.f32.mrb[14].mxu0  ;;  %v13664_v60 = vpop.f32.mrb[15].mxu1 }
 0x18b   : > { %17577 = vst [vmem:[#allocation8_spill] sm:$0xff] %v13664_v60  ;;  %v13669_v31 = vpop.f32.mrb[15].mxu0 }
 0x18c   : > { %12079 = vmatmul.mubr.msk.bf16.gmra.mrb[120].mxu1 %vm17279_vm0, %v12787_v30  ;;  %v3926_v30 = vor.u32 %v3924_v62, %v3922_v44  ;;  %v1469_v44 = vsel %vm13684_vm5, %v13564_v34, 0.0 }
 0x18d   : > { %12113 = vmatmul.mubr.msk.bf16.gmra.mrb[120].mxu0 %vm17279_vm0, %v3915_v23  ;;  %12082 = vmatprep.mubr.msk.bf16.mxu1 %vm17279_vm0, %v12788_v55  ;;  %v3960_v55 = vshll.u32 %v13682_v26, 16  ;;  %v17587_v23 = vmov 0 }
 0x18e   : > { %12116 = vmatprep.mubr.msk.bf16.mxu0 %vm17279_vm0, %v3923_v63  ;;  %v17588_v23 = vsel %vm13708_vm7, 4294967295, %v17587_v23  ;;  %v3931_v58 = vsel %vm17288_vm3, %v3926_v30, %v3930_v13  ;;  %v413_v30 = vand.u32 15, %v335_v22  ;;  %v17596_v22 = vshrl.u32 %v13647_v27, 16 }
 0x18f   : > { %v11868_v60 = vpop.f32.mrb[16].mxu1  ;;  %17589 = vst [vmem:[#allocation12_spill] sm:$0xff] %v17588_v23  ;;  %v1473_v27 = vsel %vm13735_vm9, %v13600_v25, 0.0 }
 0x190   : > { %v1737_v39 = vadd.f32 %v11868_v60, %v1471_v19  ;;  %v11902_v62 = vpop.f32.mrb[16].mxu0  ;;  %v1608_v20 = vpop.f32.mrb[17].mxu1  ;;  %vm13758_vm10 = vcmp.ne.s32.totalorder %v413_v30, 15 }
 0x191   : > { %v1735_v21 = vadd.f32 %v1608_v20, %v1469_v44  ;;  %v2008_v63 = vpop.f32.mrb[17].mxu0  ;;  %v11869_v12 = vpop.f32.mrb[18].mxu1 }
 0x192   : > { %v13713_v34 = vadd.f32 %v11902_v62, %v1737_v39  ;;  %v1738_v19 = vadd.f32 %v11869_v12, %v13569_v2  ;;  %v11903_v60 = vpop.f32.mrb[18].mxu0  ;;  %v1611_v32 = vpop.f32.mrb[19].mxu1  ;;  %v17590_v39 = vmov 0  ;;  %v12789_v12 = vld [vmem:[#allocation2 + $0x50] sm:$0xff]  ;;  %v17593_v62 = vmov 0 }
 0x193   : > { %v13719_v44 = vadd.f32 %v2008_v63, %v1735_v21  ;;  %v2202_v10 = vsel %vm13703_vm6, %v11903_v60, 0.0  ;;  %v1736_v20 = vadd.f32 %v1611_v32, %v13572_v3  ;;  %v2011_v0 = vpop.f32.mrb[19].mxu0  ;;  %v17591_v39 = vsel %vm13724_vm8, 4294967295, %v17590_v39  ;;  %v12790_v21 = vld [vmem:[#allocation2 + $0x58] sm:$0xff] }
 0x194   : > { %17592 = vst [vmem:[#allocation13_spill] sm:$0xff] %v17591_v39  ;;  %v13728_v2 = vadd.f32 %v2202_v10, %v1738_v19  ;;  %v2200_v13 = vsel %vm13708_vm7, %v2011_v0, 0.0  ;;  %12083 = vmatmul.mubr.msk.bf16.gmra.mrb[124].mxu1 %vm17279_vm0, %v12789_v12  ;;  %v17594_v62 = vsel %vm13735_vm9, 4294967295, %v17593_v62  ;;  %v336_v3 = vadd.s32 64, %v13620_v46 }
 0x195   : > { %17595 = vst [vmem:[#allocation14_spill] sm:$0xff] %v17594_v62  ;;  %v13740_v35 = vadd.f32 %v2200_v13, %v1736_v20  ;;  %12117 = vmatmul.mubr.msk.bf16.gmra.mrb[124].mxu0 %vm17279_vm0, %v3931_v58  ;;  %12086 = vmatprep.mubr.msk.bf16.mxu1 %vm17279_vm0, %v12790_v21  ;;  %v399_v0 = vand.u32 15, %v333_v43  ;;  %v3942_v63 = vor.u32 %v17596_v22, %v3938_v36  ;;  %v3954_v19 = vrot.slane %v3952_v8, 1 }
 0x196   : > { %12120 = vmatprep.mubr.msk.bf16.mxu0 %vm17279_vm0, %v3939_v24  ;;  %v3964_v60 = vshrl.u32 %v13682_v26, 16  ;;  %v1475_v32 = vsel %vm13724_vm8, %v13596_v49, 0.0  ;;  %v434_v10 = vand.u32 15, %v338_v17  ;;  %v13752_v20 = vrot.slane %v3960_v55, 1 }
 0x197   : > { %v11872_v58 = vpop.f32.mrb[20].mxu1  ;;  %v3968_v43 = vshll.u32 %v13733_v54, 16  ;;  %v17597_v8 = vmov 0  ;;  %v339_v26 = vadd.s32 88, %v13620_v46  ;;  %v420_v49 = vand.u32 15, %v336_v3 }
 0x198   : > { %v1741_v24 = vadd.f32 %v11872_v58, %v1475_v32  ;;  %v11906_v36 = vpop.f32.mrb[20].mxu0  ;;  %v1624_v28 = vpop.f32.mrb[21].mxu1  ;;  %v17598_v8 = vsel %vm13758_vm10, 4294967295, %v17597_v8  ;;  %vm13763_vm11 = vcmp.ne.s32.totalorder %v399_v0, 15  ;;  %v17600_v12 = vmov 0 }
 0x199   : > { %17599 = vst [vmem:[#allocation15_spill] sm:$0xff] %v17598_v8  ;;  %v1739_v17 = vadd.f32 %v1624_v28, %v1473_v27  ;;  %v2024_v13 = vpop.f32.mrb[21].mxu0  ;;  %v11873_v55 = vpop.f32.mrb[22].mxu1  ;;  %v17601_v12 = vsel %vm13763_vm11, 4294967295, %v17600_v12  ;;  %v337_v21 = vadd.s32 72, %v13620_v46  ;;  %v3947_v58 = vsel %vm17288_vm3, %v3942_v63, %v13692_v42  ;;  %v12791_v63 = vld [vmem:[#allocation2 + $0x60] sm:$0xff] }
 0x19a   : > { %17602 = vst [vmem:[#allocation16_spill] sm:$0xff] %v17601_v12  ;;  %v13768_v25 = vadd.f32 %v11906_v36, %v1741_v24  ;;  %v1742_v22 = vadd.f32 %v11873_v55, %v13604_v7  ;;  %v11907_v30 = vpop.f32.mrb[22].mxu0  ;;  %v1627_v32 = vpop.f32.mrb[23].mxu1  ;;  %v3955_v3 = vsel %vm17288_vm3, %v3950_v9, %v3954_v19  ;;  %v342_v27 = vadd.s32 112, %v13620_v46 }
 0x19b   : > { %v13775_v28 = vadd.f32 %v2024_v13, %v1739_v17  ;;  %v2206_v0 = vsel %vm13758_vm10, %v11907_v30, 0.0  ;;  %v1740_v23 = vadd.f32 %v1627_v32, %v13608_v33  ;;  %v2027_v24 = vpop.f32.mrb[23].mxu0  ;;  %vm13780_vm12 = vcmp.ne.s32.totalorder %v434_v10, 0  ;;  %v12792_v10 = vld [vmem:[#allocation2 + $0x68] sm:$0xff] }
 0x19c   : > { %v17603_v36 = vmov 0  ;;  %v13784_v7 = vadd.f32 %v2206_v0, %v1742_v22  ;;  %v2204_v42 = vsel %vm13763_vm11, %v2027_v24, 0.0  ;;  %12087 = vmatmul.mubr.msk.bf16.gmra.mrb[128].mxu1 %vm17279_vm0, %v12791_v63  ;;  %v441_v9 = vand.u32 15, %v339_v26 }
 0x19d   : > { %v17604_v36 = vsel %vm13780_vm12, 4294967295, %v17603_v36  ;;  %vm13789_vm13 = vcmp.ne.s32.totalorder %v420_v49, 0  ;;  %v17606_v17 = vmov 0  ;;  %v340_v33 = vadd.s32 96, %v13620_v46  ;;  %12121 = vmatmul.mubr.msk.bf16.gmra.mrb[128].mxu0 %vm17279_vm0, %v3947_v58  ;;  %12090 = vmatprep.mubr.msk.bf16.mxu1 %vm17279_vm0, %v12792_v10 }
 0x19e   : > { %17605 = vst [vmem:[#allocation17_spill] sm:$0xff] %v17604_v36  ;;  %v17607_v17 = vsel %vm13789_vm13, 4294967295, %v17606_v17  ;;  %v13794_v13 = vadd.f32 %v2204_v42, %v1740_v23  ;;  %v427_v55 = vand.u32 15, %v337_v21  ;;  %12124 = vmatprep.mubr.msk.bf16.mxu0 %vm17279_vm0, %v3955_v3  ;;  %v17609_v22 = vshrl.u32 %v13673_v16, 16 }
 0x19f   : > { %17608 = vst [vmem:[#allocation18_spill] sm:$0xff] %v17607_v17  ;;  %v3970_v26 = vrot.slane %v3968_v43, 1  ;;  %v3972_v49 = vshrl.u32 %v13733_v54, 16  ;;  %v1479_v32 = vsel %vm13780_vm12, %v13622_v48, 0.0  ;;  %v462_v23 = vand.u32 15, %v342_v27  ;;  %v11876_v0 = vpop.f32.mrb[24].mxu1 }
 0x1a0   : > { %v3958_v30 = vor.u32 %v17609_v22, %v3954_v19  ;;  %v3966_v58 = vor.u32 %v3964_v60, %v13752_v20  ;;  %v17610_v24 = vshll.u32 %v13549_v61, 16  ;;  %v1477_v16 = vsel %vm13789_vm13, %v13626_v1, 0.0  ;;  %v11910_v43 = vpop.f32.mrb[24].mxu0  ;;  %v1640_v21 = vpop.f32.mrb[25].mxu1 }
 0x1a1   : > { %v1745_v19 = vadd.f32 %v11876_v0, %v1479_v32  ;;  %vm13813_vm14 = vcmp.ne.s32.totalorder %v441_v9, 15  ;;  %v17611_v54 = vmov 0  ;;  %v343_v48 = vadd.s32 120, %v13620_v46  ;;  %v2040_v60 = vpop.f32.mrb[25].mxu0  ;;  %v11877_v63 = vpop.f32.mrb[26].mxu1 }
 0x1a2   : > { %v13808_v42 = vrot.slane %v17610_v24, 1  ;;  %v17612_v54 = vsel %vm13813_vm14, 4294967295, %v17611_v54  ;;  %v448_v3 = vand.u32 15, %v340_v33  ;;  %v1743_v27 = vadd.f32 %v1640_v21, %v1477_v16  ;;  %v11911_v9 = vpop.f32.mrb[26].mxu0  ;;  %v1643_v0 = vpop.f32.mrb[27].mxu1 }
 0x1a3   : > { %17613 = vst [vmem:[#allocation19_spill] sm:$0xff] %v17612_v54  ;;  %vm13818_vm15 = vcmp.ne.s32.totalorder %v427_v55, 15  ;;  %v17614_v10 = vmov 0  ;;  %v341_v22 = vadd.s32 104, %v13620_v46  ;;  %v13823_v1 = vadd.f32 %v11910_v43, %v1745_v19  ;;  %v2043_v19 = vpop.f32.mrb[27].mxu0 }
 0x1a4   : > { %v17615_v10 = vsel %vm13818_vm15, 4294967295, %v17614_v10  ;;  %v1746_v32 = vadd.f32 %v11877_v63, %v13630_v41  ;;  %v3963_v24 = vsel %vm17288_vm3, %v3958_v30, %v13752_v20  ;;  %v3971_v33 = vsel %vm17288_vm3, %v3966_v58, %v3970_v26  ;;  %v12793_v30 = vld [vmem:[#allocation2 + $0x70] sm:$0xff] }
 0x1a5   : > { %17616 = vst [vmem:[#allocation20_spill] sm:$0xff] %v17615_v10  ;;  %v346_v16 = vadd.s32 144, %v13620_v46  ;;  %v13830_v21 = vadd.f32 %v2040_v60, %v1743_v27  ;;  %v2210_v55 = vsel %vm13813_vm14, %v11911_v9, 0.0  ;;  %v1744_v12 = vadd.f32 %v1643_v0, %v13634_v50  ;;  %12091 = vmatmul.mubr.msk.bf16.gmra.mrb[132].mxu1 %vm17279_vm0, %v12793_v30  ;;  %12125 = vmatmul.mubr.msk.bf16.gmra.mrb[132].mxu0 %vm17279_vm0, %v3963_v24  ;;  %v3860_v0 = vld [vmem:[#allocation2 + $0x98] sm:$0x1] }
 0x1a6   : > { %vm13835_vm2 = vcmp.ne.s32.totalorder %v462_v23, 0  ;;  %v17617_v43 = vmov 0  ;;  %v13839_v41 = vadd.f32 %v2210_v55, %v1746_v32  ;;  %v2208_v20 = vsel %vm13818_vm15, %v2043_v19, 0.0  ;;  %v12794_v23 = vld [vmem:[#allocation2 + $0x78] sm:$0xff]  ;;  %12128 = vmatprep.mubr.msk.bf16.mxu0 %vm17279_vm0, %v3971_v33 }
 0x1a7   : > { %v17618_v43 = vsel %vm13835_vm2, 4294967295, %v17617_v43  ;;  %v469_v58 = vand.u32 15, %v343_v48  ;;  %v344_v27 = vadd.s32 128, %v13620_v46  ;;  %vm13845_vm1 = vcmp.ne.s32.totalorder %v448_v3, 0  ;;  %12094 = vmatprep.mubr.msk.bf16.mxu1 %vm17279_vm0, %v12794_v23  ;;  %v11880_v3 = vpop.f32.mrb[28].mxu1 }
 0x1a8   : > { %17619 = vst [vmem:[#allocation21_spill] sm:$0xff] %v17618_v43  ;;  %v17620_v60 = vmov 0  ;;  %v13849_v50 = vadd.f32 %v2208_v20, %v1744_v12  ;;  %v455_v63 = vand.u32 15, %v341_v22  ;;  %v3974_v32 = vor.u32 %v3972_v49, %v3970_v26  ;;  %v11914_v22 = vpop.f32.mrb[28].mxu0  ;;  %v1656_v19 = vpop.f32.mrb[29].mxu1 }
 0x1a9   : > { %v17621_v60 = vsel %vm13845_vm1, 4294967295, %v17620_v60  ;;  %v490_v9 = vand.u32 15, %v346_v16  ;;  %v1483_v48 = vsel %vm13835_vm2, %v13651_v18, 0.0  ;;  %v3987_v12 = vsel %vm17288_vm3, %v13396_v47, %v13808_v42  ;;  %v2056_v16 = vpop.f32.mrb[29].mxu0  ;;  %v11881_v20 = vpop.f32.mrb[30].mxu1 }
 0x1aa   : > { %17622 = vst [vmem:[#allocation22_spill] sm:$0xff] %v17621_v60  ;;  %v1481_v24 = vsel %vm13845_vm1, %v13657_v6, 0.0  ;;  %v1749_v55 = vadd.f32 %v11880_v3, %v1483_v48  ;;  %vm13863_vm0 = vcmp.ne.s32.totalorder %v469_v58, 15  ;;  %v17623_v26 = vmov 0  ;;  %v11915_v58 = vpop.f32.mrb[30].mxu0  ;;  %v1659_v48 = vpop.f32.mrb[31].mxu1 }
 0x1ab   : > { %v17624_v26 = vsel %vm13863_vm0, 4294967295, %v17623_v26  ;;  %v347_v49 = vadd.s32 152, %v13620_v46  ;;  %v476_v18 = vand.u32 15, %v344_v27  ;;  %v1747_v33 = vadd.f32 %v1656_v19, %v1481_v24  ;;  %v2059_v54 = vpop.f32.mrb[31].mxu0 }
 0x1ac   : > { %17625 = vst [vmem:[#allocation23_spill] sm:$0xff] %v17624_v26  ;;  %vm13868_vm15 = vcmp.ne.s32.totalorder %v455_v63, 15  ;;  %v17626_v47 = vmov 0  ;;  %v345_v30 = vadd.s32 136, %v13620_v46  ;;  %v13873_v6 = vadd.f32 %v11914_v22, %v1749_v55 }
 0x1ad   : > { %v17627_v47 = vsel %vm13868_vm15, 4294967295, %v17626_v47  ;;  %v1750_v23 = vadd.f32 %v11881_v20, %v13662_v57  ;;  %v3979_v3 = vsel %vm17288_vm3, %v3974_v32, %v13393_v11  ;;  %v3992_v10 = vshll.u32 %v3860_v0, 16  ;;  %v12795_v32 = vld [vmem:[#allocation2 + $0x80] sm:$0xff] }
 0x1ae   : > { %17628 = vst [vmem:[#allocation24_spill] sm:$0xff] %v17627_v47  ;;  %v350_v27 = vadd.s32 176, %v13620_v46  ;;  %v13879_v24 = vadd.f32 %v2056_v16, %v1747_v33  ;;  %v2214_v63 = vsel %vm13863_vm0, %v11915_v58, 0.0  ;;  %v1748_v19 = vadd.f32 %v1659_v48, %v13669_v31  ;;  %v4434_v16 = vld [vmem:[%s17250_s4] sm:$0xf] }
 0x1af   : > { %vm13884_vm14 = vcmp.ne.s32.totalorder %v490_v9, 0  ;;  %v17629_v55 = vmov 0  ;;  %v13888_v57 = vadd.f32 %v2214_v63, %v1750_v23  ;;  %v2212_v11 = vsel %vm13868_vm15, %v2059_v54, 0.0  ;;  %v11884_v58 = vpop.f32.mrb[32].mxu1 }
 0x1b0   : > { %v17630_v55 = vsel %vm13884_vm14, 4294967295, %v17629_v55  ;;  %vm17632_vm3 = vcmask 130048   ;;  %v497_v0 = vand.u32 15, %v347_v49  ;;  %vm13893_vm11 = vcmp.ne.s32.totalorder %v476_v18, 0 }
 0x1b1   : > { %17631 = vst [vmem:[#allocation25_spill] sm:$0xff] %v17630_v55  ;;  %12095 = vmatmul.mubr.msk.bf16.gmra.mrb[136].mxu1 %vm17632_vm3, %v12795_v32  ;;  %v17633_v22 = vmov 0  ;;  %v348_v31 = vadd.s32 160, %v13620_v46  ;;  %v13898_v33 = vadd.f32 %v2212_v11, %v1748_v19  ;;  %vm17636_vm0 = vmmov %vm17632_vm3  ;;  %v483_v9 = vand.u32 15, %v345_v30  ;;  %v1672_v30 = vpop.f32.mrb[33].mxu1 }
 0x1b2   : > { %v17634_v22 = vsel %vm13893_vm11, 4294967295, %v17633_v22  ;;  %12129 = vmatmul.mubr.msk.bf16.gmra.mrb[136].mxu0 %vm17636_vm0, %v3979_v3  ;;  %vm17637_vm10 = vmmov %vm17636_vm0  ;;  %v17639_v54 = vshrl.u32 %v13549_v61, 16  ;;  %v3994_v18 = vrot.slane %v3992_v10, 1  ;;  %vm17297_vm3 = vcmask 1043456   ;;  %v11885_v19 = vpop.f32.mrb[34].mxu1 }
 0x1b3   : > { %17635 = vst [vmem:[#allocation26_spill] sm:$0xff] %v17634_v22  ;;  %12098 = vmatprep.mubr.msk.bf16.mxu1 %vm17637_vm10, %v13379_v5  ;;  %vm17638_vm7 = vmmov %vm17636_vm0  ;;  %v1487_v20 = vsel %vm13884_vm14, %v13574_v51, 0.0  ;;  %v518_v23 = vand.u32 15, %v350_v27  ;;  %12750 = vmatprep.subr.msk.bf16.mxu1 %vm17297_vm3, %v4434_v16  ;;  %v4617_v5 = vsel %vm17297_vm3, %v4434_v16, 0  ;;  %vm13918_vm0 = vcmp.ne.s32.totalorder %v497_v0, 15  ;;  %v1675_v16 = vpop.f32.mrb[35].mxu1 }
 0x1b4   : > { %12132 = vmatprep.mubr.msk.bf16.mxu0 %vm17638_vm7, %v3987_v12  ;;  %v3990_v49 = vor.u32 %v13808_v42, %v17639_v54  ;;  %v1485_v42 = vsel %vm13893_vm11, %v13576_v59, 0.0  ;;  %v1753_v10 = vadd.f32 %v11884_v58, %v1487_v20  ;;  %v11918_v12 = vpop.f32.mrb[32].mxu0  ;;  %v17640_v48 = vmov 0  ;;  %12137 = vmatpush3.bf16.msra.mxu1 %v4617_v5  ;;  %v17715_v17 = vld [vmem:[#allocation23_spill] sm:$0xff] }
 0x1b5   : > { %v17641_v48 = vsel %vm13918_vm0, 4294967295, %v17640_v48  ;;  %v351_v3 = vadd.s32 184, %v13620_v46  ;;  %v504_v51 = vand.u32 15, %v348_v31  ;;  %v1751_v27 = vadd.f32 %v1672_v30, %v1485_v42  ;;  %v2072_v63 = vpop.f32.mrb[33].mxu0 }
 0x1b6   : > { %17642 = vst [vmem:[#allocation27_spill] sm:$0xff] %v17641_v48  ;;  %vm13923_vm7 = vcmp.ne.s32.totalorder %v483_v9, 15  ;;  %v17643_v11 = vmov 0  ;;  %v349_v59 = vadd.s32 168, %v13620_v46  ;;  %v13928_v32 = vadd.f32 %v11918_v12, %v1753_v10  ;;  %v11919_v54 = vpop.f32.mrb[34].mxu0 }
 0x1b7   : > { %v17644_v11 = vsel %vm13923_vm7, 4294967295, %v17643_v11  ;;  %v1754_v0 = vadd.f32 %v11885_v19, %v13580_v53  ;;  %vm17646_vm10 = vsmask.f32 7424  ;;  %v354_v58 = vadd.s32 208, %v13620_v46  ;;  %v2075_v42 = vpop.f32.mrb[35].mxu0  ;;  %v11888_v19 = vpop.f32.mrb[36].mxu1 }
 0x1b8   : > { %17645 = vst [vmem:[#allocation28_spill] sm:$0xff] %v17644_v11  ;;  %v3995_v20 = vsel %vm17646_vm10, %v3990_v49, %v3994_v18  ;;  %v13933_v31 = vadd.f32 %v2072_v63, %v1751_v27  ;;  %v2218_v9 = vsel %vm13918_vm0, %v11919_v54, 0.0  ;;  %v1752_v5 = vadd.f32 %v1675_v16, %v13582_v38 }
 0x1b9   : > { %vm13938_vm3 = vcmp.ne.s32.totalorder %v518_v23, 0  ;;  %v17647_v30 = vmov 0  ;;  %v13942_v10 = vadd.f32 %v2218_v9, %v1754_v0  ;;  %v2216_v53 = vsel %vm13923_vm7, %v2075_v42, 0.0  ;;  %v1688_v0 = vpop.f32.mrb[37].mxu1 }
 0x1ba   : > { %v17648_v30 = vsel %vm13938_vm3, 4294967295, %v17647_v30  ;;  %vm17650_vm10 = vcmask 130048   ;;  %v525_v49 = vand.u32 15, %v351_v3  ;;  %vm13948_vm15 = vcmp.ne.s32.totalorder %v504_v51, 0  ;;  %v11922_v51 = vpop.f32.mrb[36].mxu0 }
 0x1bb   : > { %17649 = vst [vmem:[#allocation29_spill] sm:$0xff] %v17648_v30  ;;  %12099 = vmatmul.mubr.msk.bf16.gmra.mrb[140].mxu1 %vm17650_vm10, %v13549_v61  ;;  %v17651_v18 = vmov 0  ;;  %v352_v38 = vadd.s32 192, %v13620_v46  ;;  %v13953_v12 = vadd.f32 %v2216_v53, %v1752_v5  ;;  %vm17654_vm0 = vmmov %vm17650_vm10  ;;  %v511_v23 = vand.u32 15, %v349_v59  ;;  %v2088_v9 = vpop.f32.mrb[37].mxu0  ;;  %v11889_v5 = vpop.f32.mrb[38].mxu1 }
 0x1bc   : > { %v17652_v18 = vsel %vm13948_vm15, 4294967295, %v17651_v18  ;;  %12133 = vmatmul.mubr.msk.bf16.gmra.mrb[140].mxu0 %vm17654_vm0, %v3995_v20  ;;  %v1491_v27 = vsel %vm13938_vm3, %v13594_v52, 0.0  ;;  %v546_v63 = vand.u32 15, %v354_v58  ;;  %v1489_v61 = vsel %vm13948_vm15, %v13598_v45, 0.0  ;;  %v11923_v53 = vpop.f32.mrb[38].mxu0 }
 0x1bd   : > { %17653 = vst [vmem:[#allocation30_spill] sm:$0xff] %v17652_v18  ;;  %v1757_v3 = vadd.f32 %v11888_v19, %v1491_v27  ;;  %vm13962_vm10 = vcmp.ne.s32.totalorder %v525_v49, 15  ;;  %v17655_v54 = vmov 0  ;;  %v355_v16 = vadd.s32 216, %v13620_v46  ;;  %v1691_v49 = vpop.f32.mrb[39].mxu1 }
 0x1be   : > { %v17656_v54 = vsel %vm13962_vm10, 4294967295, %v17655_v54  ;;  %v532_v59 = vand.u32 15, %v352_v38  ;;  %v1755_v20 = vadd.f32 %v1688_v0, %v1489_v61  ;;  %vm13967_vm0 = vcmp.ne.s32.totalorder %v511_v23, 15  ;;  %v2091_v61 = vpop.f32.mrb[39].mxu0 }
 0x1bf   : > { %17657 = vst [vmem:[#allocation31_spill] sm:$0xff] %v17656_v54  ;;  %v17658_v52 = vmov 0  ;;  %v353_v58 = vadd.s32 200, %v13620_v46  ;;  %v13972_v45 = vadd.f32 %v11922_v51, %v1757_v3  ;;  %v1758_v42 = vadd.f32 %v11889_v5, %v13602_v15 }
 0x1c0   : > { %v17659_v52 = vsel %vm13967_vm0, 4294967295, %v17658_v52  ;;  %v358_v27 = vadd.s32 240, %v13620_v46  ;;  %v13976_v19 = vadd.f32 %v2088_v9, %v1755_v20  ;;  %v2222_v38 = vsel %vm13962_vm10, %v11923_v53, 0.0 }
 0x1c1   : > { %17660 = vst [vmem:[#allocation32_spill] sm:$0xff] %v17659_v52  ;;  %v1756_v23 = vadd.f32 %v1691_v49, %v13606_v40  ;;  %vm13981_vm7 = vcmp.ne.s32.totalorder %v546_v63, 0  ;;  %v17661_v0 = vmov 0  ;;  %v13985_v3 = vadd.f32 %v2222_v38, %v1758_v42  ;;  %v11892_v42 = vpop.f32.mrb[40].mxu1 }
 0x1c2   : > { %v17662_v0 = vsel %vm13981_vm7, 4294967295, %v17661_v0  ;;  %v2220_v15 = vsel %vm13967_vm0, %v2091_v61, 0.0  ;;  %v553_v51 = vand.u32 15, %v355_v16  ;;  %vm13989_vm6 = vcmp.ne.s32.totalorder %v532_v59, 0  ;;  %v11926_v59 = vpop.f32.mrb[40].mxu0  ;;  %v1704_v38 = vpop.f32.mrb[41].mxu1 }
 0x1c3   : > { %17663 = vst [vmem:[#allocation33_spill] sm:$0xff] %v17662_v0  ;;  %v17664_v5 = vmov 0  ;;  %v356_v20 = vadd.s32 224, %v13620_v46  ;;  %v13994_v9 = vadd.f32 %v2220_v15, %v1756_v23  ;;  %v539_v40 = vand.u32 15, %v353_v58  ;;  %v2104_v52 = vpop.f32.mrb[41].mxu0  ;;  %v11893_v54 = vpop.f32.mrb[42].mxu1 }
 0x1c4   : > { %v17665_v5 = vsel %vm13989_vm6, 4294967295, %v17664_v5  ;;  %v1495_v63 = vsel %vm13981_vm7, %v13618_v37, 0.0  ;;  %v574_v53 = vand.u32 15, %v358_v27  ;;  %v1493_v49 = vsel %vm13989_vm6, %v13624_v56, 0.0 }
 0x1c5   : > { %17666 = vst [vmem:[#allocation34_spill] sm:$0xff] %v17665_v5  ;;  %v1761_v16 = vadd.f32 %v11892_v42, %v1495_v63  ;;  %vm14002_vm0 = vcmp.ne.s32.totalorder %v553_v51, 15  ;;  %v17667_v61 = vmov 0  ;;  %v359_v23 = vadd.s32 248, %v13620_v46  ;;  %v11927_v51 = vpop.f32.mrb[42].mxu0  ;;  %v1707_v42 = vpop.f32.mrb[43].mxu1 }
 0x1c6   : > { %v17668_v61 = vsel %vm14002_vm0, 4294967295, %v17667_v61  ;;  %v560_v58 = vand.u32 15, %v356_v20  ;;  %v1759_v15 = vadd.f32 %v1704_v38, %v1493_v49  ;;  %vm14007_vm10 = vcmp.ne.s32.totalorder %v539_v40, 15  ;;  %v2107_v38 = vpop.f32.mrb[43].mxu0 }
 0x1c7   : > { %17669 = vst [vmem:[#allocation35_spill] sm:$0xff] %v17668_v61  ;;  %v17670_v37 = vmov 0  ;;  %v357_v27 = vadd.s32 232, %v13620_v46  ;;  %v14012_v56 = vadd.f32 %v11926_v59, %v1761_v16  ;;  %v1762_v63 = vadd.f32 %v11893_v54, %v13628_v14  ;;  %v17679_v59 = vld [vmem:[#allocation5_spill] sm:$0xff] }
 0x1c8   : > { %v17671_v37 = vsel %vm14007_vm10, 4294967295, %v17670_v37  ;;  %v14015_v11 = vadd.f32 %v2104_v52, %v1759_v15  ;;  %v2226_v20 = vsel %vm14002_vm0, %v11927_v51, 0.0  ;;  %v1760_v49 = vadd.f32 %v1707_v42, %v13632_v29  ;;  %v17680_v15 = vld [vmem:[#allocation6_spill] sm:$0xff]  ;;  %v11930_v42 = vpop.f32.mrb[44].mxu0 }
 0x1c9   : > { %17672 = vst [vmem:[#allocation36_spill] sm:$0xff] %v17671_v37  ;;  %vm14020_vm6 = vcmp.ne.s32.totalorder %v574_v53, 0  ;;  %v17673_v40 = vmov 0  ;;  %v14024_v48 = vadd.f32 %v2226_v20, %v1762_v63  ;;  %v2224_v46 = vsel %vm14007_vm10, %v2107_v38, 0.0  ;;  %v11896_v53 = vpop.f32.mrb[44].mxu1 }
 0x1ca   : > { %v17674_v40 = vsel %vm14020_vm6, 4294967295, %v17673_v40  ;;  %v581_v14 = vand.u32 15, %v359_v23  ;;  %vm14028_vm7 = vcmp.ne.s32.totalorder %v560_v58, 0  ;;  %v17676_v54 = vmov 0  ;;  %v1720_v20 = vpop.f32.mrb[45].mxu1 }
 0x1cb   : > { %17675 = vst [vmem:[#allocation37_spill] sm:$0xff] %v17674_v40  ;;  %v17677_v54 = vsel %vm14028_vm7, 4294967295, %v17676_v54  ;;  %v14032_v52 = vadd.f32 %v2224_v46, %v1760_v49  ;;  %v567_v16 = vand.u32 15, %v357_v27  ;;  %v1499_v29 = vsel %vm14020_vm6, %v17679_v59, 0.0  ;;  %v2120_v49 = vpop.f32.mrb[45].mxu0  ;;  %v11897_v38 = vpop.f32.mrb[46].mxu1 }
 0x1cc   : > { %17678 = vst [vmem:[#allocation38_spill] sm:$0xff] %v17677_v54  ;;  %v1497_v63 = vsel %vm14028_vm7, %v17680_v15, 0.0  ;;  %v1765_v51 = vadd.f32 %v11896_v53, %v1499_v29  ;;  %vm14040_vm10 = vcmp.ne.s32.totalorder %v581_v14, 15  ;;  %v17681_v23 = vmov 0  ;;  %v17687_v59 = vld [vmem:[#allocation7_spill] sm:$0xff]  ;;  %v11931_v61 = vpop.f32.mrb[46].mxu0 }
 0x1cd   : > { %v17682_v23 = vsel %vm14040_vm10, 4294967295, %v17681_v23  ;;  %v1763_v58 = vadd.f32 %v1720_v20, %v1497_v63  ;;  %vm14044_vm0 = vcmp.ne.s32.totalorder %v567_v16, 15  ;;  %v17684_v27 = vmov 0  ;;  %v1723_v15 = vpop.f32.mrb[47].mxu1  ;;  %v17688_v53 = vld [vmem:[#allocation8_spill] sm:$0xff]  ;;  %v2123_v63 = vpop.f32.mrb[47].mxu0 }
 0x1ce   : > { %17683 = vst [vmem:[#allocation5_spill] sm:$0xff] %v17682_v23  ;;  %v17685_v27 = vsel %vm14044_vm0, 4294967295, %v17684_v27  ;;  %v14048_v46 = vadd.f32 %v11930_v42, %v1765_v51  ;;  %v1766_v37 = vadd.f32 %v11897_v38, %v17687_v59  ;;  %v2230_v14 = vsel %vm14040_vm10, %v11931_v61, 0.0 }
 0x1cf   : > { %17686 = vst [vmem:[#allocation6_spill] sm:$0xff] %v17685_v27  ;;  %v14051_v29 = vadd.f32 %v2120_v49, %v1763_v58  ;;  %v1764_v47 = vadd.f32 %v1723_v15, %v17688_v53  ;;  %v2228_v16 = vsel %vm14044_vm0, %v2123_v63, 0.0  ;;  %v11936_v51 = vpop.f32.mrb[48].mxu1  ;;  %vm17691_vm0 = vcmask 1043456  }
 0x1d0   : > { %v14056_v20 = vadd.f32 %v2230_v14, %v1766_v37  ;;  %v2542_v38 = vsel %vm13675_vm4, %v11936_v51, 0.0  ;;  %v11970_v59 = vpop.f32.mrb[48].mxu0  ;;  %v2413_v58 = vpop.f32.mrb[49].mxu1  ;;  %vm17692_vm10 = vmmov %vm17691_vm0 }
 0x1d1   : > { %v14060_v26 = vadd.f32 %v2228_v16, %v1764_v47  ;;  %v2574_v49 = vadd.f32 %v2542_v38, %v13713_v34  ;;  %v2540_v61 = vsel %vm13684_vm5, %v2413_v58, 0.0  ;;  %v2679_v15 = vpop.f32.mrb[49].mxu0  ;;  %v11937_v53 = vpop.f32.mrb[50].mxu1 }
 0x1d2   : > { %v2572_v37 = vadd.f32 %v2540_v61, %v13719_v44  ;;  %v2575_v14 = vadd.f32 %v11937_v53, %v13728_v2  ;;  %v11971_v63 = vpop.f32.mrb[50].mxu0  ;;  %v2416_v47 = vpop.f32.mrb[51].mxu1 }
 0x1d3   : > { %v14069_v16 = vadd.f32 %v11970_v59, %v2574_v49  ;;  %v2573_v27 = vadd.f32 %v2416_v47, %v13740_v35  ;;  %v2682_v51 = vpop.f32.mrb[51].mxu0 }
 0x1d4   : > { %v14072_v8 = vadd.f32 %v2679_v15, %v2572_v37  ;;  %v14074_v4 = vadd.f32 %v11971_v63, %v2575_v14 }
 0x1d5   : > { %v14076_v34 = vadd.f32 %v2682_v51, %v2573_v27 }
 0x1d7   : > { %v11940_v38 = vpop.f32.mrb[52].mxu1 }
 0x1d8   : > { %v2546_v58 = vsel %vm13724_vm8, %v11940_v38, 0.0  ;;  %v11974_v44 = vpop.f32.mrb[52].mxu0  ;;  %v2429_v61 = vpop.f32.mrb[53].mxu1 }
 0x1d9   : > { %v2578_v2 = vadd.f32 %v2546_v58, %v13768_v25  ;;  %v2544_v59 = vsel %vm13735_vm9, %v2429_v61, 0.0  ;;  %v2695_v49 = vpop.f32.mrb[53].mxu0  ;;  %v11941_v35 = vpop.f32.mrb[54].mxu1 }
 0x1da   : > { %v2576_v15 = vadd.f32 %v2544_v59, %v13775_v28  ;;  %v2579_v53 = vadd.f32 %v11941_v35, %v13784_v7  ;;  %v11975_v37 = vpop.f32.mrb[54].mxu0  ;;  %v2432_v27 = vpop.f32.mrb[55].mxu1 }
 0x1db   : > { %v14085_v14 = vadd.f32 %v11974_v44, %v2578_v2  ;;  %v2577_v63 = vadd.f32 %v2432_v27, %v13794_v13  ;;  %v2698_v47 = vpop.f32.mrb[55].mxu0 }
 0x1dc   : > { %v14088_v51 = vadd.f32 %v2695_v49, %v2576_v15  ;;  %v14090_v38 = vadd.f32 %v11975_v37, %v2579_v53 }
 0x1dd   : > { %v14092_v25 = vadd.f32 %v2698_v47, %v2577_v63 }
 0x1df   : > { %v11944_v58 = vpop.f32.mrb[56].mxu1 }
 0x1e0   : > { %v2550_v61 = vsel %vm13780_vm12, %v11944_v58, 0.0  ;;  %v11978_v28 = vpop.f32.mrb[56].mxu0  ;;  %v2445_v59 = vpop.f32.mrb[57].mxu1 }
 0x1e1   : > { %v2582_v7 = vadd.f32 %v2550_v61, %v13823_v1  ;;  %v2548_v44 = vsel %vm13789_vm13, %v2445_v59, 0.0  ;;  %v2711_v2 = vpop.f32.mrb[57].mxu0  ;;  %v11945_v13 = vpop.f32.mrb[58].mxu1 }
 0x1e2   : > { %v2580_v49 = vadd.f32 %v2548_v44, %v13830_v21  ;;  %v2583_v35 = vadd.f32 %v11945_v13, %v13839_v41  ;;  %v11979_v15 = vpop.f32.mrb[58].mxu0  ;;  %v2448_v53 = vpop.f32.mrb[59].mxu1 }
 0x1e3   : > { %v14101_v37 = vadd.f32 %v11978_v28, %v2582_v7  ;;  %v2581_v27 = vadd.f32 %v2448_v53, %v13849_v50  ;;  %v2714_v63 = vpop.f32.mrb[59].mxu0 }
 0x1e4   : > { %v14104_v47 = vadd.f32 %v2711_v2, %v2580_v49  ;;  %v14106_v58 = vadd.f32 %v11979_v15, %v2583_v35 }
 0x1e5   : > { %v14108_v1 = vadd.f32 %v2714_v63, %v2581_v27 }
 0x1e7   : > { %v11948_v61 = vpop.f32.mrb[60].mxu1 }
 0x1e8   : > { %v2554_v59 = vsel %vm13835_vm2, %v11948_v61, 0.0  ;;  %v11982_v21 = vpop.f32.mrb[60].mxu0  ;;  %v2461_v44 = vpop.f32.mrb[61].mxu1 }
 0x1e9   : > { %v2586_v41 = vadd.f32 %v2554_v59, %v13873_v6  ;;  %v2552_v28 = vsel %vm13845_vm1, %v2461_v44, 0.0  ;;  %v2727_v7 = vpop.f32.mrb[61].mxu0  ;;  %v11949_v50 = vpop.f32.mrb[62].mxu1  ;;  %v14129_v44 = vld [vmem:[#allocation3 + $0x8] sm:$0xff]  ;;  %vm17693_vm1 = vcmask 64512  }
 0x1ea   : > { %v2584_v2 = vadd.f32 %v2552_v28, %v13879_v24  ;;  %v2587_v13 = vadd.f32 %v11949_v50, %v13888_v57  ;;  %v11983_v49 = vpop.f32.mrb[62].mxu0  ;;  %v2464_v35 = vpop.f32.mrb[63].mxu1  ;;  %v11074_v24 = vld [vmem:[%s17250_s4 + $0x4] sm:$0xf]  ;;  %12172 = vmatprep.mubr.msk.bf16.mxu0 %vm17693_vm1, %v14129_v44  ;;  %vm17695_vm1 = vmmov %vm17691_vm0 }
 0x1eb   : > { %v14117_v15 = vadd.f32 %v11982_v21, %v2586_v41  ;;  %v2585_v53 = vadd.f32 %v2464_v35, %v13898_v33  ;;  %v2730_v27 = vpop.f32.mrb[63].mxu0  ;;  %12751 = vmatprep.subr.msk.bf16.mxu0 %vm17691_vm0, %v11074_v24  ;;  %v4879_v33 = vsel %vm17692_vm10, %v11074_v24, 0  ;;  %vm17696_vm10 = vsmask.f32 256 }
 0x1ec   : > { %v14120_v63 = vadd.f32 %v2727_v7, %v2584_v2  ;;  %v14122_v61 = vadd.f32 %v11983_v49, %v2587_v13  ;;  %12171 = vmatpush3.bf16.msra.mxu0 %v4879_v33  ;;  %v17350_v13 = vshrl.u32 %v14129_v44, 16  ;;  %vm17697_vm0 = vcmask 64512  }
 0x1ed   : > { %v14124_v6 = vadd.f32 %v2730_v27, %v2585_v53 }
 0x1ee   : > { %v14154_v33 = vrot.slane %v17350_v13, 7 }
 0x1ef   : > { %v11952_v59 = vpop.f32.mrb[64].mxu1 }
 0x1f0   : > { %v2558_v57 = vsel %vm13884_vm14, %v11952_v59, 0.0  ;;  %v11986_v21 = vpop.f32.mrb[64].mxu0  ;;  %v2477_v41 = vpop.f32.mrb[65].mxu1  ;;  %17694 = vst [vmem:[#allocation7_spill] sm:$0xff] %v14154_v33 }
 0x1f1   : > { %v2590_v28 = vadd.f32 %v2558_v57, %v13928_v32  ;;  %v2556_v7 = vsel %vm13893_vm11, %v2477_v41, 0.0  ;;  %v2743_v50 = vpop.f32.mrb[65].mxu0  ;;  %v11953_v2 = vpop.f32.mrb[66].mxu1 }
 0x1f2   : > { %v2588_v49 = vadd.f32 %v2556_v7, %v13933_v31  ;;  %v2591_v35 = vadd.f32 %v11953_v2, %v13942_v10  ;;  %v11987_v53 = vpop.f32.mrb[66].mxu0  ;;  %v2480_v27 = vpop.f32.mrb[67].mxu1  ;;  %v17351_v10 = vshll.u32 %v14129_v44, 16 }
 0x1f3   : > { %v14143_v59 = vadd.f32 %v11986_v21, %v2590_v28  ;;  %v2589_v24 = vadd.f32 %v2480_v27, %v13953_v12  ;;  %v2746_v55 = vpop.f32.mrb[67].mxu0  ;;  %v4417_v12 = vld [vmem:[#allocation3] sm:$0x80]  ;;  %v14168_v27 = vld [vmem:[%s17250_s4 + $0x8] sm:$0xf] }
 0x1f4   : > { %v14146_v32 = vadd.f32 %v2743_v50, %v2588_v49  ;;  %v14148_v57 = vadd.f32 %v11987_v53, %v2591_v35  ;;  %v4445_v35 = vor.u32 %v17351_v10, %v14154_v33  ;;  %v4436_v53 = vshrl.u32 %v4417_v12, 16  ;;  %12752 = vmatprep.subr.msk.bf16.mxu1 %vm17695_vm1, %v14168_v27 }
 0x1f5   : > { %v14150_v41 = vadd.f32 %v2746_v55, %v2589_v24  ;;  %vm17699_vm1 = vnez %v17665_v5 }
 0x1f6   : > { %v4438_v12 = vrot.slane %v4436_v53, 7 }
 0x1f7   : > { %v11956_v31 = vpop.f32.mrb[68].mxu1 }
 0x1f8   : > { %v2562_v21 = vsel %vm13938_vm3, %v11956_v31, 0.0  ;;  %v11990_v28 = vpop.f32.mrb[68].mxu0  ;;  %v2493_v7 = vpop.f32.mrb[69].mxu1 }
 0x1f9   : > { %v2594_v50 = vadd.f32 %v2562_v21, %v13972_v45  ;;  %v2560_v2 = vsel %vm13948_vm15, %v2493_v7, 0.0  ;;  %v2759_v55 = vpop.f32.mrb[69].mxu0  ;;  %v11957_v49 = vpop.f32.mrb[70].mxu1  ;;  %vm17698_vm15 = vnez %v17662_v0 }
 0x1fa   : > { %v2592_v24 = vadd.f32 %v2560_v2, %v13976_v19  ;;  %v2595_v31 = vadd.f32 %v11957_v49, %v13985_v3  ;;  %v11991_v45 = vpop.f32.mrb[70].mxu0  ;;  %v2496_v21 = vpop.f32.mrb[71].mxu1  ;;  %v4446_v19 = vsel %vm17696_vm10, %v4438_v12, %v4445_v35 }
 0x1fb   : > { %v14174_v7 = vadd.f32 %v11990_v28, %v2594_v50  ;;  %v2593_v13 = vadd.f32 %v2496_v21, %v13994_v9  ;;  %v2762_v10 = vpop.f32.mrb[71].mxu0  ;;  %12138 = vmatprep.mubr.msk.bf16.mxu1 %vm17697_vm0, %v4446_v19 }
 0x1fc   : > { %v14177_v33 = vadd.f32 %v2759_v55, %v2592_v24  ;;  %v14179_v18 = vadd.f32 %v11991_v45, %v2595_v31 }
 0x1fd   : > { %v14181_v30 = vadd.f32 %v2762_v10, %v2593_v13 }
 0x1ff   : > { %v11960_v3 = vpop.f32.mrb[72].mxu1 }
 0x200   : > { %v2566_v2 = vsel %vm17698_vm15, %v11960_v3, 0.0  ;;  %v11994_v28 = vpop.f32.mrb[72].mxu0  ;;  %v2509_v50 = vpop.f32.mrb[73].mxu1 }
 0x201   : > { %v2598_v9 = vadd.f32 %v2566_v2, %v14012_v56  ;;  %v2564_v55 = vsel %vm17699_vm1, %v2509_v50, 0.0  ;;  %v2775_v49 = vpop.f32.mrb[73].mxu0  ;;  %v11961_v53 = vpop.f32.mrb[74].mxu1 }
 0x202   : > { %v2596_v13 = vadd.f32 %v2564_v55, %v14015_v11  ;;  %v2599_v10 = vadd.f32 %v11961_v53, %v14024_v48  ;;  %v11995_v35 = vpop.f32.mrb[74].mxu0  ;;  %v2512_v24 = vpop.f32.mrb[75].mxu1 }
 0x203   : > { %v14192_v31 = vadd.f32 %v11994_v28, %v2598_v9  ;;  %v2597_v45 = vadd.f32 %v2512_v24, %v14032_v52  ;;  %v2778_v21 = vpop.f32.mrb[75].mxu0 }
 0x204   : > { %v14195_v12 = vadd.f32 %v2775_v49, %v2596_v13  ;;  %v14197_v19 = vadd.f32 %v11995_v35, %v2599_v10 }
 0x205   : > { %v14199_v56 = vadd.f32 %v2778_v21, %v2597_v45 }
 0x207   : > { %v11964_v3 = vpop.f32.mrb[76].mxu1 }
 0x208   : > { %v2570_v2 = vsel %vm14020_vm6, %v11964_v3, 0.0  ;;  %v11998_v11 = vpop.f32.mrb[76].mxu0  ;;  %v2525_v50 = vpop.f32.mrb[77].mxu1 }
 0x209   : > { %v2602_v48 = vadd.f32 %v2570_v2, %v14048_v46  ;;  %v2568_v28 = vsel %vm14028_vm7, %v2525_v50, 0.0  ;;  %v2791_v9 = vpop.f32.mrb[77].mxu0  ;;  %v11965_v52 = vpop.f32.mrb[78].mxu1 }
 0x20a   : > { %v2600_v55 = vadd.f32 %v2568_v28, %v14051_v29  ;;  %v2603_v49 = vadd.f32 %v11965_v52, %v14056_v20  ;;  %v11999_v53 = vpop.f32.mrb[78].mxu0  ;;  %v2528_v13 = vpop.f32.mrb[79].mxu1  ;;  %v17700_v52 = vld [vmem:[#allocation11_spill] sm:$0xff] }
 0x20b   : > { %v14208_v10 = vadd.f32 %v11998_v11, %v2602_v48  ;;  %v2601_v35 = vadd.f32 %v2528_v13, %v14060_v26  ;;  %v2794_v24 = vpop.f32.mrb[79].mxu0  ;;  %vm17701_vm10 = vnez %v17700_v52 }
 0x20c   : > { %v14211_v45 = vadd.f32 %v2791_v9, %v2600_v55  ;;  %v14213_v21 = vadd.f32 %v11999_v53, %v2603_v49 }
 0x20d   : > { %v14215_v46 = vadd.f32 %v2794_v24, %v2601_v35  ;;  %v17702_v35 = vld [vmem:[#allocation12_spill] sm:$0xff] }
 0x20e   : > { %vm17703_vm0 = vnez %v17702_v35 }
 0x20f   : > { %v12004_v3 = vpop.f32.mrb[80].mxu1 }
 0x210   : > { %v3239_v2 = vadd.f32 %v12004_v3, %v14069_v16  ;;  %v12038_v50 = vpop.f32.mrb[80].mxu0  ;;  %v3078_v29 = vpop.f32.mrb[81].mxu1 }
 0x211   : > { %v3548_v20 = vsel %vm13675_vm4, %v12038_v50, 0.0  ;;  %v3237_v11 = vadd.f32 %v3078_v29, %v14072_v8  ;;  %v3419_v48 = vpop.f32.mrb[81].mxu0  ;;  %v12005_v28 = vpop.f32.mrb[82].mxu1  ;;  %vm17714_vm4 = vnez %v17621_v60 }
 0x212   : > { %v14221_v26 = vadd.f32 %v3548_v20, %v3239_v2  ;;  %v3546_v9 = vsel %vm13684_vm5, %v3419_v48, 0.0  ;;  %v3208_v55 = vsel %vm17701_vm10, %v12005_v28, 0.0  ;;  %v12039_v49 = vpop.f32.mrb[82].mxu0  ;;  %v3081_v53 = vpop.f32.mrb[83].mxu1 }
 0x213   : > { %v14227_v16 = vadd.f32 %v3546_v9, %v3237_v11  ;;  %v3240_v13 = vadd.f32 %v3208_v55, %v14074_v4  ;;  %v3206_v24 = vsel %vm17703_vm0, %v3081_v53, 0.0  ;;  %v3422_v8 = vpop.f32.mrb[83].mxu0 }
 0x214   : > { %v3238_v3 = vadd.f32 %v3206_v24, %v14076_v34 }
 0x215   : > { %v14233_v2 = vadd.f32 %v12039_v49, %v3240_v13  ;;  %v17704_v49 = vld [vmem:[#allocation15_spill] sm:$0xff] }
 0x216   : > { %v14235_v50 = vadd.f32 %v3422_v8, %v3238_v3  ;;  %vm17705_vm5 = vnez %v17704_v49 }
 0x217   : > { %v12008_v29 = vpop.f32.mrb[84].mxu1 }
 0x218   : > { %v3243_v20 = vadd.f32 %v12008_v29, %v14085_v14  ;;  %v12042_v48 = vpop.f32.mrb[84].mxu0  ;;  %v3094_v28 = vpop.f32.mrb[85].mxu1  ;;  %v17706_v29 = vld [vmem:[#allocation16_spill] sm:$0xff] }
 0x219   : > { %v3552_v11 = vsel %vm13724_vm8, %v12042_v48, 0.0  ;;  %v3241_v4 = vadd.f32 %v3094_v28, %v14088_v51  ;;  %v3435_v9 = vpop.f32.mrb[85].mxu0  ;;  %v12009_v55 = vpop.f32.mrb[86].mxu1  ;;  %vm17707_vm8 = vnez %v17706_v29 }
 0x21a   : > { %v14241_v53 = vadd.f32 %v3552_v11, %v3243_v20  ;;  %v3550_v34 = vsel %vm13735_vm9, %v3435_v9, 0.0  ;;  %v3212_v13 = vsel %vm17705_vm5, %v12009_v55, 0.0  ;;  %v12043_v24 = vpop.f32.mrb[86].mxu0  ;;  %v3097_v8 = vpop.f32.mrb[87].mxu1 }
 0x21b   : > { %v14247_v14 = vadd.f32 %v3550_v34, %v3241_v4  ;;  %v3244_v3 = vadd.f32 %v3212_v13, %v14090_v38  ;;  %v3210_v48 = vsel %vm17707_vm8, %v3097_v8, 0.0  ;;  %v3438_v51 = vpop.f32.mrb[87].mxu0 }
 0x21c   : > { %v3242_v28 = vadd.f32 %v3210_v48, %v14092_v25 }
 0x21d   : > { %v14253_v20 = vadd.f32 %v12043_v24, %v3244_v3  ;;  %v17708_v24 = vld [vmem:[#allocation19_spill] sm:$0xff] }
 0x21e   : > { %v14255_v11 = vadd.f32 %v3438_v51, %v3242_v28  ;;  %vm17709_vm9 = vnez %v17708_v24 }
 0x21f   : > { %v12012_v9 = vpop.f32.mrb[88].mxu1 }
 0x220   : > { %v3247_v62 = vadd.f32 %v12012_v9, %v14101_v37  ;;  %v12046_v55 = vpop.f32.mrb[88].mxu0  ;;  %v3110_v39 = vpop.f32.mrb[89].mxu1  ;;  %v17710_v9 = vld [vmem:[#allocation20_spill] sm:$0xff] }
 0x221   : > { %v3556_v4 = vsel %vm13780_vm12, %v12046_v55, 0.0  ;;  %v3245_v38 = vadd.f32 %v3110_v39, %v14104_v47  ;;  %v3451_v34 = vpop.f32.mrb[89].mxu0  ;;  %v12013_v13 = vpop.f32.mrb[90].mxu1  ;;  %vm17711_vm12 = vnez %v17710_v9 }
 0x222   : > { %v14261_v8 = vadd.f32 %v3556_v4, %v3247_v62  ;;  %v3554_v25 = vsel %vm13789_vm13, %v3451_v34, 0.0  ;;  %v3216_v3 = vsel %vm17709_vm9, %v12013_v13, 0.0  ;;  %v12047_v48 = vpop.f32.mrb[90].mxu0  ;;  %v3113_v51 = vpop.f32.mrb[91].mxu1  ;;  %v14280_v34 = vld [vmem:[%s17250_s4 + $0xc] sm:$0xf] }
 0x223   : > { %v14267_v37 = vadd.f32 %v3554_v25, %v3245_v38  ;;  %v3248_v28 = vadd.f32 %v3216_v3, %v14106_v58  ;;  %v3214_v55 = vsel %vm17711_vm12, %v3113_v51, 0.0  ;;  %v3454_v39 = vpop.f32.mrb[91].mxu0  ;;  %vm17712_vm13 = vcmask 1043456  }
 0x224   : > { %v3246_v47 = vadd.f32 %v3214_v55, %v14108_v1  ;;  %12753 = vmatprep.subr.msk.bf16.mxu0 %vm17712_vm13, %v14280_v34  ;;  %vm17716_vm13 = vnez %v17715_v17 }
 0x225   : > { %v14273_v62 = vadd.f32 %v12047_v48, %v3248_v28  ;;  %v17713_v28 = vshll.u32 %v14129_v44, 16 }
 0x226   : > { %v14275_v4 = vadd.f32 %v3454_v39, %v3246_v47 }
 0x227   : > { %v12016_v13 = vpop.f32.mrb[92].mxu1  ;;  %v5098_v55 = vrot.slane %v17713_v28, 1  ;;  %v17719_v28 = vshrl.u32 %v14129_v44, 16 }
 0x228   : > { %v3251_v58 = vadd.f32 %v12016_v13, %v14117_v15  ;;  %v12050_v38 = vpop.f32.mrb[92].mxu0  ;;  %v3126_v25 = vpop.f32.mrb[93].mxu1 }
 0x229   : > { %v3560_v1 = vsel %vm13835_vm2, %v12050_v38, 0.0  ;;  %v3249_v3 = vadd.f32 %v3126_v25, %v14120_v63  ;;  %v3467_v48 = vpop.f32.mrb[93].mxu0  ;;  %v12017_v51 = vpop.f32.mrb[94].mxu1  ;;  %v17717_v63 = vld [vmem:[#allocation24_spill] sm:$0xff] }
 0x22a   : > { %v14290_v39 = vadd.f32 %v3560_v1, %v3251_v58  ;;  %v3558_v47 = vsel %vm17714_vm4, %v3467_v48, 0.0  ;;  %v3220_v15 = vsel %vm17716_vm13, %v12017_v51, 0.0  ;;  %v12051_v13 = vpop.f32.mrb[94].mxu0  ;;  %v3129_v36 = vpop.f32.mrb[95].mxu1  ;;  %vm17718_vm2 = vnez %v17717_v63 }
 0x22b   : > { %v14296_v23 = vadd.f32 %v3558_v47, %v3249_v3  ;;  %v3252_v38 = vadd.f32 %v3220_v15, %v14122_v61  ;;  %v3218_v25 = vsel %vm17718_vm2, %v3129_v36, 0.0  ;;  %v3470_v43 = vpop.f32.mrb[95].mxu0  ;;  %v14303_v58 = vor.u32 %v5098_v55, %v17719_v28 }
 0x22c   : > { %v3250_v1 = vadd.f32 %v3218_v25, %v14124_v6 }
 0x22d   : > { %17720 = vst [vmem:[#allocation8_spill] sm:$0xff] %v14303_v58  ;;  %v14306_v48 = vadd.f32 %v12051_v13, %v3252_v38  ;;  %v17722_v13 = vld [vmem:[#allocation27_spill] sm:$0xff]  ;;  %v17727_v58 = vld [vmem:[#allocation30_spill] sm:$0xff] }
 0x22e   : > { %v14308_v60 = vadd.f32 %v3470_v43, %v3250_v1  ;;  %vm17723_vm4 = vnez %v17722_v13  ;;  %v17724_v1 = vld [vmem:[#allocation28_spill] sm:$0xff] }
 0x22f   : > { %v12020_v51 = vpop.f32.mrb[96].mxu1 }
 0x230   : > { %v3255_v3 = vadd.f32 %v12020_v51, %v14143_v59  ;;  %v12054_v47 = vpop.f32.mrb[96].mxu0  ;;  %v3142_v42 = vpop.f32.mrb[97].mxu1 }
 0x231   : > { %v3564_v15 = vsel %vm13884_vm14, %v12054_v47, 0.0  ;;  %v3253_v36 = vadd.f32 %v3142_v42, %v14146_v32  ;;  %v3483_v63 = vpop.f32.mrb[97].mxu0  ;;  %v12021_v44 = vpop.f32.mrb[98].mxu1  ;;  %vm17725_vm14 = vnez %v17724_v1 }
 0x232   : > { %v14314_v55 = vadd.f32 %v3564_v15, %v3255_v3  ;;  %v3562_v6 = vsel %vm13893_vm11, %v3483_v63, 0.0  ;;  %v3224_v43 = vsel %vm17723_vm4, %v12021_v44, 0.0  ;;  %v12055_v38 = vpop.f32.mrb[98].mxu0  ;;  %v3145_v25 = vpop.f32.mrb[99].mxu1  ;;  %vm17728_vm11 = vnez %v17727_v58 }
 0x233   : > { %v14320_v59 = vadd.f32 %v3562_v6, %v3253_v36  ;;  %v3256_v28 = vadd.f32 %v3224_v43, %v14148_v57  ;;  %v3222_v51 = vsel %vm17725_vm14, %v3145_v25, 0.0  ;;  %v3486_v42 = vpop.f32.mrb[99].mxu0 }
 0x234   : > { %v3254_v32 = vadd.f32 %v3222_v51, %v14150_v41 }
 0x235   : > { %v14326_v3 = vadd.f32 %v12055_v38, %v3256_v28  ;;  %v17729_v38 = vld [vmem:[#allocation31_spill] sm:$0xff] }
 0x236   : > { %v14328_v47 = vadd.f32 %v3486_v42, %v3254_v32  ;;  %vm17730_vm14 = vnez %v17729_v38 }
 0x237   : > { %v12024_v63 = vpop.f32.mrb[100].mxu1 }
 0x238   : > { %v3259_v15 = vadd.f32 %v12024_v63, %v14174_v7  ;;  %v12058_v44 = vpop.f32.mrb[100].mxu0  ;;  %v3158_v22 = vpop.f32.mrb[101].mxu1  ;;  %v17731_v63 = vld [vmem:[#allocation32_spill] sm:$0xff] }
 0x239   : > { %v3568_v36 = vsel %vm13938_vm3, %v12058_v44, 0.0  ;;  %v3257_v57 = vadd.f32 %v3158_v22, %v14177_v33  ;;  %v3499_v6 = vpop.f32.mrb[101].mxu0  ;;  %v12025_v43 = vpop.f32.mrb[102].mxu1  ;;  %vm17732_vm3 = vnez %v17731_v63 }
 0x23a   : > { %v14334_v25 = vadd.f32 %v3568_v36, %v3259_v15  ;;  %v3566_v41 = vsel %vm17728_vm11, %v3499_v6, 0.0  ;;  %v3228_v28 = vsel %vm17730_vm14, %v12025_v43, 0.0  ;;  %v12059_v51 = vpop.f32.mrb[102].mxu0  ;;  %v3161_v42 = vpop.f32.mrb[103].mxu1 }
 0x23b   : > { %v14340_v7 = vadd.f32 %v3566_v41, %v3257_v57  ;;  %v3260_v32 = vadd.f32 %v3228_v28, %v14179_v18  ;;  %v3226_v44 = vsel %vm17732_vm3, %v3161_v42, 0.0  ;;  %v3502_v22 = vpop.f32.mrb[103].mxu0 }
 0x23c   : > { %v3258_v33 = vadd.f32 %v3226_v44, %v14181_v30 }
 0x23d   : > { %v14346_v15 = vadd.f32 %v12059_v51, %v3260_v32  ;;  %v17733_v51 = vld [vmem:[#allocation35_spill] sm:$0xff] }
 0x23e   : > { %v14348_v36 = vadd.f32 %v3502_v22, %v3258_v33  ;;  %vm17734_vm11 = vnez %v17733_v51 }
 0x23f   : > { %v12028_v6 = vpop.f32.mrb[104].mxu1 }
 0x240   : > { %v3263_v58 = vadd.f32 %v12028_v6, %v14192_v31  ;;  %v12062_v43 = vpop.f32.mrb[104].mxu0  ;;  %v3174_v61 = vpop.f32.mrb[105].mxu1  ;;  %v17735_v6 = vld [vmem:[#allocation36_spill] sm:$0xff] }
 0x241   : > { %v3572_v57 = vsel %vm17698_vm15, %v12062_v43, 0.0  ;;  %v3261_v18 = vadd.f32 %v3174_v61, %v14195_v12  ;;  %v3515_v41 = vpop.f32.mrb[105].mxu0  ;;  %v12029_v28 = vpop.f32.mrb[106].mxu1  ;;  %vm17736_vm15 = vnez %v17735_v6 }
 0x242   : > { %v14354_v42 = vadd.f32 %v3572_v57, %v3263_v58  ;;  %v3570_v30 = vsel %vm17699_vm1, %v3515_v41, 0.0  ;;  %v3232_v32 = vsel %vm17734_vm11, %v12029_v28, 0.0  ;;  %v12063_v44 = vpop.f32.mrb[106].mxu0  ;;  %v3177_v22 = vpop.f32.mrb[107].mxu1 }
 0x243   : > { %v14360_v31 = vadd.f32 %v3570_v30, %v3261_v18  ;;  %v3264_v33 = vadd.f32 %v3232_v32, %v14197_v19  ;;  %v3230_v43 = vsel %vm17736_vm15, %v3177_v22, 0.0  ;;  %v3518_v12 = vpop.f32.mrb[107].mxu0 }
 0x244   : > { %v3262_v61 = vadd.f32 %v3230_v43, %v14199_v56 }
 0x245   : > { %v14366_v58 = vadd.f32 %v12063_v44, %v3264_v33  ;;  %v17737_v44 = vld [vmem:[#allocation5_spill] sm:$0xff] }
 0x246   : > { %v14368_v57 = vadd.f32 %v3518_v12, %v3262_v61  ;;  %vm17738_vm1 = vnez %v17737_v44 }
 0x247   : > { %v12032_v41 = vpop.f32.mrb[108].mxu1 }
 0x248   : > { %v3267_v5 = vadd.f32 %v12032_v41, %v14208_v10  ;;  %v12066_v28 = vpop.f32.mrb[108].mxu0  ;;  %v3190_v0 = vpop.f32.mrb[109].mxu1  ;;  %v17739_v41 = vld [vmem:[#allocation6_spill] sm:$0xff] }
 0x249   : > { %v3576_v18 = vsel %vm14020_vm6, %v12066_v28, 0.0  ;;  %v3265_v19 = vadd.f32 %v3190_v0, %v14211_v45  ;;  %v3531_v30 = vpop.f32.mrb[109].mxu0  ;;  %v12033_v32 = vpop.f32.mrb[110].mxu1  ;;  %vm17740_vm6 = vnez %v17739_v41 }
 0x24a   : > { %v14374_v22 = vadd.f32 %v3576_v18, %v3267_v5  ;;  %v3574_v56 = vsel %vm14028_vm7, %v3531_v30, 0.0  ;;  %v3236_v33 = vsel %vm17738_vm1, %v12033_v32, 0.0  ;;  %v12067_v43 = vpop.f32.mrb[110].mxu0  ;;  %v3193_v12 = vpop.f32.mrb[111].mxu1 }
 0x24b   : > { %v14380_v10 = vadd.f32 %v3574_v56, %v3265_v19  ;;  %v3268_v61 = vadd.f32 %v3236_v33, %v14213_v21  ;;  %v3234_v28 = vsel %vm17740_vm6, %v3193_v12, 0.0  ;;  %v3534_v0 = vpop.f32.mrb[111].mxu0  ;;  %v14394_v19 = vld [vmem:[%s17249_s3] ss:$0 sm:$0xff] }
 0x24c   : > { %v3266_v45 = vadd.f32 %v3234_v28, %v14215_v46 }
 0x24d   : > { %v14386_v5 = vadd.f32 %v12067_v43, %v3268_v61 }
 0x24e   : > { %v14388_v18 = vadd.f32 %v3534_v0, %v3266_v45 }
 0x24f   : > { %v12072_v30 = vpop.f32.mrb[112].mxu1 }
 0x250   : > { %17741 = vst [vmem:[#allocation39_spill] sm:$0xff] %v14388_v18  ;;  %v3814_v54 = vadd.f32 %v12072_v30, %v14221_v26  ;;  %v12106_v32 = vpop.f32.mrb[112].mxu0  ;;  %v3685_v40 = vpop.f32.mrb[113].mxu1  ;;  %v14401_v26 = vld [vmem:[%s17249_s3 + $0x1] ss:$0 sm:$0xff] }
 0x251   : > { %v3812_v21 = vadd.f32 %v3685_v40, %v14227_v16  ;;  %v4084_v56 = vpop.f32.mrb[113].mxu0  ;;  %v12073_v33 = vpop.f32.mrb[114].mxu1 }
 0x252   : > { %v4245_v12 = vadd.f32 %v12106_v32, %v3814_v54  ;;  %v3815_v46 = vadd.f32 %v12073_v33, %v14233_v2  ;;  %v12107_v43 = vpop.f32.mrb[114].mxu0  ;;  %v3688_v61 = vpop.f32.mrb[115].mxu1 }
 0x253   : > { %v4243_v28 = vadd.f32 %v4084_v56, %v3812_v21  ;;  %v4214_v0 = vsel %vm17701_vm10, %v12107_v43, 0.0  ;;  %v3813_v45 = vadd.f32 %v3688_v61, %v14235_v50  ;;  %v4087_v30 = vpop.f32.mrb[115].mxu0 }
 0x254   : > { %v4282_v40 = vmul.f32 %v14394_v19, %v4245_v12  ;;  %v4246_v16 = vadd.f32 %v4214_v0, %v3815_v46  ;;  %v4212_v54 = vsel %vm17703_vm0, %v4087_v30, 0.0  ;;  %vm17742_vm0 = vcmask 64512  }
 0x255   : > { %v4280_v2 = vmul.f32 %v14394_v19, %v4243_v28  ;;  %v4244_v32 = vadd.f32 %v4212_v54, %v3813_v45 }
 0x256   : > { %v4319_v33 = vadd.f32 %v14401_v26, %v4282_v40  ;;  %v4283_v41 = vmul.f32 %v14394_v19, %v4246_v16 }
 0x257   : > { %v4317_v21 = vadd.f32 %v14401_v26, %v4280_v2  ;;  %v4281_v56 = vmul.f32 %v14394_v19, %v4244_v32  ;;  %v12076_v43 = vpop.f32.mrb[116].mxu1 }
 0x258   : > { %v4320_v50 = vadd.f32 %v14401_v26, %v4283_v41  ;;  %v3818_v12 = vadd.f32 %v12076_v43, %v14241_v53  ;;  %v12110_v46 = vpop.f32.mrb[116].mxu0  ;;  %v3701_v61 = vpop.f32.mrb[117].mxu1  ;;  %v4351_v0 = vmax.f32 %v4319_v33, 0.0 }
 0x259   : > { %v4318_v30 = vadd.f32 %v14401_v26, %v4281_v56  ;;  %v3816_v28 = vadd.f32 %v3701_v61, %v14247_v14  ;;  %v4100_v45 = vpop.f32.mrb[117].mxu0  ;;  %v12077_v40 = vpop.f32.mrb[118].mxu1  ;;  %v4349_v54 = vmax.f32 %v4317_v21, 0.0 }
 0x25a   : > { %v4352_v16 = vmax.f32 %v4320_v50, 0.0  ;;  %v4249_v35 = vadd.f32 %v12110_v46, %v3818_v12  ;;  %v3819_v2 = vadd.f32 %v12077_v40, %v14253_v20  ;;  %v12111_v32 = vpop.f32.mrb[118].mxu0  ;;  %v3704_v52 = vpop.f32.mrb[119].mxu1 }
 0x25b   : > { %v4350_v18 = vmax.f32 %v4318_v30, 0.0  ;;  %v4247_v41 = vadd.f32 %v4100_v45, %v3816_v28  ;;  %v4218_v53 = vsel %vm17705_vm5, %v12111_v32, 0.0  ;;  %v3817_v33 = vadd.f32 %v3704_v52, %v14255_v11  ;;  %v4103_v43 = vpop.f32.mrb[119].mxu0  ;;  %vm17743_vm5 = vmmov %vm17742_vm0 }
 0x25c   : > { %v4386_v56 = vpack.c.bf16 %v4352_v16, %v4351_v0  ;;  %v4286_v14 = vmul.f32 %v14394_v19, %v4249_v35  ;;  %v4250_v61 = vadd.f32 %v4218_v53, %v3819_v2  ;;  %v4216_v21 = vsel %vm17707_vm8, %v4103_v43, 0.0 }
 0x25d   : > { %v4385_v50 = vpack.c.bf16 %v4350_v18, %v4349_v54  ;;  %v4284_v20 = vmul.f32 %v14394_v19, %v4247_v41  ;;  %v4248_v12 = vadd.f32 %v4216_v21, %v3817_v33 }
 0x25e   : > { %4402 = vst.msk [vmem:[#allocation3 + $0x18] sm:$0xff] %vm17742_vm0, %v4386_v56  ;;  %v4323_v46 = vadd.f32 %v14401_v26, %v4286_v14  ;;  %v4287_v30 = vmul.f32 %v14394_v19, %v4250_v61 }
 0x25f   : > { %4401 = vst.msk [vmem:[#allocation3 + $0x10] sm:$0xff] %vm17743_vm5, %v4385_v50  ;;  %v4321_v52 = vadd.f32 %v14401_v26, %v4284_v20  ;;  %v4285_v35 = vmul.f32 %v14394_v19, %v4248_v12  ;;  %v12080_v11 = vpop.f32.mrb[120].mxu1  ;;  %vm17744_vm5 = vcmask 1043456  }
 0x260   : > { %v4324_v0 = vadd.f32 %v14401_v26, %v4287_v30  ;;  %v3822_v18 = vadd.f32 %v12080_v11, %v14261_v8  ;;  %v12114_v28 = vpop.f32.mrb[120].mxu0  ;;  %v3717_v45 = vpop.f32.mrb[121].mxu1  ;;  %v4355_v40 = vmax.f32 %v4323_v46, 0.0  ;;  %v14438_v41 = vsel %vm17744_vm5, %v14168_v27, 0  ;;  %vm17745_vm0 = vmmov %vm17744_vm5 }
 0x261   : > { %v4322_v54 = vadd.f32 %v14401_v26, %v4285_v35  ;;  %v3820_v16 = vadd.f32 %v3717_v45, %v14267_v37  ;;  %v4116_v2 = vpop.f32.mrb[121].mxu0  ;;  %v12081_v32 = vpop.f32.mrb[122].mxu1  ;;  %v4353_v53 = vmax.f32 %v4321_v52, 0.0  ;;  %vm17746_vm5 = vcmask 64512  }
 0x262   : > { %v4356_v33 = vmax.f32 %v4324_v0, 0.0  ;;  %v4253_v43 = vadd.f32 %v12114_v28, %v3822_v18  ;;  %v3823_v56 = vadd.f32 %v12081_v32, %v14273_v62  ;;  %v12115_v14 = vpop.f32.mrb[122].mxu0  ;;  %v3720_v8 = vpop.f32.mrb[123].mxu1  ;;  %v5611_v0 = vsel %vm17745_vm0, %v14280_v34, 0  ;;  %vm17748_vm0 = vmmov %vm17746_vm5 }
 0x263   : > { %v4354_v61 = vmax.f32 %v4322_v54, 0.0  ;;  %v4251_v21 = vadd.f32 %v4116_v2, %v3820_v16  ;;  %v4222_v50 = vsel %vm17709_vm9, %v12115_v14, 0.0  ;;  %v3821_v37 = vadd.f32 %v3720_v8, %v14275_v4  ;;  %v4119_v20 = vpop.f32.mrb[123].mxu0  ;;  %v14462_v54 = vld [vmem:[%s17250_s4 + $0x14] sm:$0xf] }
 0x264   : > { %v4388_v12 = vpack.c.bf16 %v4356_v33, %v4355_v40  ;;  %v4290_v46 = vmul.f32 %v14394_v19, %v4253_v43  ;;  %v4254_v27 = vadd.f32 %v4222_v50, %v3823_v56  ;;  %v4220_v30 = vsel %vm17711_vm12, %v4119_v20, 0.0  ;;  %vm17747_vm12 = vmmov %vm17746_vm5 }
 0x265   : > { %v4387_v52 = vpack.c.bf16 %v4354_v61, %v4353_v53  ;;  %v4288_v62 = vmul.f32 %v14394_v19, %v4251_v21  ;;  %v4252_v35 = vadd.f32 %v4220_v30, %v3821_v37  ;;  %v14448_v11 = vld [vmem:[#allocation3 + $0x18] sm:$0xff] }
 0x266   : > { %4404 = vst.msk [vmem:[#allocation3 + $0x28] sm:$0xff] %vm17746_vm5, %v4388_v12  ;;  %v4327_v4 = vadd.f32 %v14401_v26, %v4290_v46  ;;  %v4291_v18 = vmul.f32 %v14394_v19, %v4254_v27  ;;  %v14455_v28 = vld [vmem:[#allocation3 + $0x10] sm:$0xff]  ;;  %v17415_v45 = vshrl.u32 %v14448_v11, 16  ;;  %v17417_v40 = vshll.u32 %v14448_v11, 16 }
 0x267   : > { %4403 = vst.msk [vmem:[#allocation3 + $0x20] sm:$0xff] %vm17747_vm12, %v4387_v52  ;;  %v4325_v34 = vadd.f32 %v14401_v26, %v4288_v62  ;;  %v4289_v16 = vmul.f32 %v14394_v19, %v4252_v35  ;;  %v12084_v2 = vpop.f32.mrb[124].mxu1  ;;  %v17416_v32 = vshrl.u32 %v14455_v28, 16  ;;  %v17429_v53 = vshll.u32 %v14455_v28, 16  ;;  %12173 = vmatmul.mubr.msk.bf16.vlgmr.msra.gmra.mrb[144].mxu0 %vm17748_vm0, %v14455_v28  ;;  %vm17749_vm12 = vmmov %vm17748_vm0 }
 0x268   : > { %v4359_v33 = vmax.f32 %v4327_v4, 0.0  ;;  %v4328_v43 = vadd.f32 %v14401_v26, %v4291_v18  ;;  %v3826_v56 = vadd.f32 %v12084_v2, %v14290_v39  ;;  %v12118_v14 = vpop.f32.mrb[124].mxu0  ;;  %v3733_v8 = vpop.f32.mrb[125].mxu1  ;;  %v14475_v61 = vrot.slane %v17415_v45, 7  ;;  %12176 = vmatprep.mubr.msk.bf16.mxu0 %vm17749_vm12, %v14448_v11  ;;  %12239 = vmatpush3.bf16.msra.mxu0 %v5611_v0 }
 0x269   : > { %v4357_v21 = vmax.f32 %v4325_v34, 0.0  ;;  %v4326_v50 = vadd.f32 %v14401_v26, %v4289_v16  ;;  %v4450_v37 = vrot.slane %v17416_v32, 7  ;;  %v3824_v20 = vadd.f32 %v3733_v8, %v14296_v23  ;;  %v4132_v12 = vpop.f32.mrb[125].mxu0  ;;  %v12085_v39 = vpop.f32.mrb[126].mxu1 }
 0x26a   : > { %vm17750_vm5 = vcmask 1043456   ;;  %v4360_v46 = vmax.f32 %v4328_v43, 0.0  ;;  %v4257_v27 = vadd.f32 %v12118_v14, %v3826_v56  ;;  %v14488_v30 = vor.u32 %v17417_v40, %v14475_v61  ;;  %v12119_v62 = vpop.f32.mrb[126].mxu0  ;;  %v3736_v35 = vpop.f32.mrb[127].mxu1 }
 0x26b   : > { %12755 = vmatprep.subr.msk.bf16.mxu0 %vm17750_vm5, %v14462_v54  ;;  %v3827_v52 = vadd.f32 %v12085_v39, %v14306_v48  ;;  %v4358_v0 = vmax.f32 %v4326_v50, 0.0  ;;  %v14493_v23 = vor.u32 %v17429_v53, %v4450_v37  ;;  %v4255_v4 = vadd.f32 %v4132_v12, %v3824_v20  ;;  %v4135_v34 = vpop.f32.mrb[127].mxu0  ;;  %v17752_v39 = vld [vmem:[#allocation7_spill] sm:$0xff]  ;;  %vm17754_vm5 = vmmov %vm17749_vm12 }
 0x26c   : > { %v4226_v18 = vsel %vm17716_vm13, %v12119_v62, 0.0  ;;  %v4390_v16 = vpack.c.bf16 %v4360_v46, %v4359_v33  ;;  %v4294_v2 = vmul.f32 %v14394_v19, %v4257_v27  ;;  %v3825_v56 = vadd.f32 %v3736_v35, %v14308_v60  ;;  %v14510_v33 = vld [vmem:[%s17250_s4 + $0x10] sm:$0xf] }
 0x26d   : > { %v4258_v43 = vadd.f32 %v4226_v18, %v3827_v52  ;;  %v4389_v14 = vpack.c.bf16 %v4358_v0, %v4357_v21  ;;  %v4292_v48 = vmul.f32 %v14394_v19, %v4255_v4  ;;  %v4224_v50 = vsel %vm17718_vm2, %v4135_v34, 0.0  ;;  %v14505_v12 = vld [vmem:[#allocation3 + $0x28] sm:$0xff] }
 0x26e   : > { %vm17753_vm0 = vsmask.f32 256  ;;  %4406 = vst.msk [vmem:[#allocation3 + $0x38] sm:$0xff] %vm17749_vm12, %v4390_v16  ;;  %v4331_v60 = vadd.f32 %v14401_v26, %v4294_v2  ;;  %v4256_v46 = vadd.f32 %v4224_v50, %v3825_v56  ;;  %v14520_v52 = vld [vmem:[#allocation3 + $0x20] sm:$0xff]  ;;  %v17414_v18 = vshrl.u32 %v14505_v12, 16 }
 0x26f   : > { %v4454_v20 = vsel %vm17753_vm0, %v17752_v39, %v14493_v23  ;;  %v4295_v21 = vmul.f32 %v14394_v19, %v4258_v43  ;;  %vm17755_vm2 = vmmov %vm17753_vm0  ;;  %v4329_v62 = vadd.f32 %v14401_v26, %v4292_v48  ;;  %v12088_v35 = vpop.f32.mrb[128].mxu1  ;;  %v17413_v0 = vshrl.u32 %v14520_v52, 16 }
 0x270   : > { %12139 = vmatmul.mubr.msk.bf16.vlgmr.msra.gmra.mrb[144].mxu1 %vm17754_vm5, %v4454_v20  ;;  %v14518_v27 = vsel %vm17755_vm2, %v4450_v37, %v14488_v30  ;;  %vm17756_vm0 = vmmov %vm17754_vm5  ;;  %v17418_v4 = vshll.u32 %v14520_v52, 16  ;;  %v4363_v37 = vmax.f32 %v4331_v60, 0.0  ;;  %v4293_v16 = vmul.f32 %v14394_v19, %v4256_v46  ;;  %v12122_v43 = vpop.f32.mrb[128].mxu0 }
 0x271   : > { %4405 = vst.msk [vmem:[#allocation3 + $0x30] sm:$0xff] %vm17756_vm0, %v4389_v14  ;;  %12205 = vmatpush3.bf16.msra.mxu1 %v14438_v41  ;;  %vm17757_vm12 = vmmov %vm17756_vm0  ;;  %v4332_v34 = vadd.f32 %v14401_v26, %v4295_v21  ;;  %v3830_v2 = vadd.f32 %v12088_v35, %v14314_v55  ;;  %v3749_v41 = vpop.f32.mrb[129].mxu1  ;;  %vm17759_vm5 = vcmask 1043456   ;;  %v4361_v56 = vmax.f32 %v4329_v62, 0.0  ;;  %v4148_v50 = vpop.f32.mrb[129].mxu0 }
 0x272   : > { %12142 = vmatprep.mubr.msk.bf16.mxu1 %vm17757_vm12, %v14518_v27  ;;  %vm17758_vm2 = vmmov %vm17756_vm0  ;;  %12754 = vmatprep.subr.msk.bf16.mxu1 %vm17759_vm5, %v14510_v33  ;;  %v4466_v14 = vrot.slane %v17413_v0, 7  ;;  %v3828_v48 = vadd.f32 %v3749_v41, %v14320_v59  ;;  %v14542_v39 = vrot.slane %v17414_v18, 7  ;;  %v12089_v55 = vpop.f32.mrb[130].mxu1  ;;  %v4330_v60 = vadd.f32 %v14401_v26, %v4293_v16  ;;  %v12123_v62 = vpop.f32.mrb[130].mxu0 }
 0x273   : > { %12177 = vmatmul.mubr.msk.bf16.gmra.mrb[148].mxu0 %vm17758_vm2, %v14520_v52  ;;  %v4364_v20 = vmax.f32 %v4332_v34, 0.0  ;;  %v4261_v21 = vadd.f32 %v12122_v43, %v3830_v2  ;;  %v17421_v46 = vshll.u32 %v14505_v12, 16  ;;  %v3752_v35 = vpop.f32.mrb[131].mxu1  ;;  %v3831_v0 = vadd.f32 %v12089_v55, %v14326_v3  ;;  %v4151_v45 = vpop.f32.mrb[131].mxu0  ;;  %vm17761_vm2 = vmmov %vm17756_vm0 }
 0x274   : > { %12180 = vmatprep.mubr.msk.bf16.mxu0 %vm17756_vm0, %v14505_v12  ;;  %v4469_v59 = vor.u32 %v17418_v4, %v4466_v14  ;;  %v4259_v41 = vadd.f32 %v4148_v50, %v3828_v48  ;;  %v4230_v18 = vsel %vm17723_vm4, %v12123_v62, 0.0  ;;  %v4362_v40 = vmax.f32 %v4330_v60, 0.0 }
 0x275   : > { %v4392_v32 = vpack.c.bf16 %v4364_v20, %v4363_v37  ;;  %v4298_v34 = vmul.f32 %v14394_v19, %v4261_v21  ;;  %v4477_v16 = vor.u32 %v17421_v46, %v14542_v39  ;;  %v4262_v43 = vadd.f32 %v4230_v18, %v3831_v0  ;;  %v14561_v48 = vld [vmem:[#allocation3 + $0x38] sm:$0xff] }
 0x276   : > { %v4296_v2 = vmul.f32 %v14394_v19, %v4259_v41  ;;  %v3829_v4 = vadd.f32 %v3752_v35, %v14328_v47  ;;  %vm17760_vm12 = vnez %v17724_v1  ;;  %v4391_v37 = vpack.c.bf16 %v4362_v40, %v4361_v56 }
 0x277   : > { %v4228_v3 = vsel %vm17760_vm12, %v4151_v45, 0.0  ;;  %4408 = vst.msk [vmem:[#allocation3 + $0x48] sm:$0xff] %vm17761_vm2, %v4392_v32  ;;  %v4335_v50 = vadd.f32 %v14401_v26, %v4298_v34  ;;  %vm17762_vm5 = vsmask.f32 256  ;;  %v4299_v45 = vmul.f32 %v14394_v19, %v4262_v43  ;;  %vm17764_vm12 = vmmov %vm17761_vm2 }
 0x278   : > { %v14567_v55 = vsel %vm17762_vm5, %v14475_v61, %v4469_v59  ;;  %vm17763_vm0 = vmmov %vm17762_vm5  ;;  %v14572_v0 = vld [vmem:[#allocation3 + $0x30] sm:$0xff]  ;;  %v4333_v47 = vadd.f32 %v14401_v26, %v4296_v2  ;;  %v4260_v18 = vadd.f32 %v4228_v3, %v3829_v4  ;;  %v12092_v40 = vpop.f32.mrb[132].mxu1  ;;  %4407 = vst.msk [vmem:[#allocation3 + $0x40] sm:$0xff] %vm17761_vm2, %v4391_v37  ;;  %v17420_v21 = vshrl.u32 %v14561_v48, 16 }
 0x279   : > { %v14570_v20 = vsel %vm17763_vm0, %v4466_v14, %v4477_v16  ;;  %12143 = vmatmul.mubr.msk.bf16.gmra.mrb[148].mxu1 %vm17764_vm12, %v14567_v55  ;;  %v17419_v32 = vshrl.u32 %v14572_v0, 16  ;;  %v4367_v61 = vmax.f32 %v4335_v50, 0.0  ;;  %v3834_v56 = vadd.f32 %v12092_v40, %v14334_v25  ;;  %v12126_v14 = vpop.f32.mrb[132].mxu0  ;;  %vm17765_vm5 = vmmov %vm17761_vm2  ;;  %v3765_v4 = vpop.f32.mrb[133].mxu1 }
 0x27a   : > { %12146 = vmatprep.mubr.msk.bf16.mxu1 %vm17765_vm5, %v14570_v20  ;;  %v17422_v60 = vshll.u32 %v14572_v0, 16  ;;  %vm17766_vm0 = vmmov %vm17761_vm2  ;;  %v4365_v62 = vmax.f32 %v4333_v47, 0.0  ;;  %v4336_v35 = vadd.f32 %v14401_v26, %v4299_v45  ;;  %v4297_v59 = vmul.f32 %v14394_v19, %v4260_v18  ;;  %v4164_v41 = vpop.f32.mrb[133].mxu0  ;;  %v12093_v34 = vpop.f32.mrb[134].mxu1 }
 0x27b   : > { %12181 = vmatmul.mubr.msk.bf16.gmra.mrb[152].mxu0 %vm17766_vm0, %v14572_v0  ;;  %v4482_v25 = vrot.slane %v17419_v32, 7  ;;  %vm17767_vm12 = vmmov %vm17766_vm0  ;;  %v4265_v16 = vadd.f32 %v12126_v14, %v3834_v56  ;;  %v3832_v2 = vadd.f32 %v3765_v4, %v14340_v7  ;;  %v14596_v43 = vrot.slane %v17420_v21, 7  ;;  %v12127_v37 = vpop.f32.mrb[134].mxu0  ;;  %v3768_v50 = vpop.f32.mrb[135].mxu1 }
 0x27c   : > { %12184 = vmatprep.mubr.msk.bf16.mxu0 %vm17767_vm12, %v14561_v48  ;;  %v17423_v3 = vshll.u32 %v14561_v48, 16  ;;  %v4368_v47 = vmax.f32 %v4336_v35, 0.0  ;;  %v4334_v45 = vadd.f32 %v14401_v26, %v4297_v59  ;;  %v3835_v40 = vadd.f32 %v12093_v34, %v14346_v15  ;;  %v4167_v32 = vpop.f32.mrb[135].mxu0  ;;  %vm17769_vm5 = vmmov %vm17766_vm0 }
 0x27d   : > { %v4485_v18 = vor.u32 %v17422_v60, %v4482_v25  ;;  %v4302_v56 = vmul.f32 %v14394_v19, %v4265_v16  ;;  %v4263_v7 = vadd.f32 %v4164_v41, %v3832_v2  ;;  %v4234_v4 = vsel %vm17730_vm14, %v12127_v37, 0.0 }
 0x27e   : > { %v4493_v14 = vor.u32 %v17423_v3, %v14596_v43  ;;  %v4394_v21 = vpack.c.bf16 %v4368_v47, %v4367_v61  ;;  %v4366_v35 = vmax.f32 %v4334_v45, 0.0  ;;  %v4266_v46 = vadd.f32 %v4234_v4, %v3835_v40 }
 0x27f   : > { %v3833_v59 = vadd.f32 %v3768_v50, %v14348_v36  ;;  %v4339_v60 = vadd.f32 %v14401_v26, %v4302_v56  ;;  %v4300_v15 = vmul.f32 %v14394_v19, %v4263_v7  ;;  %v4232_v34 = vsel %vm17732_vm3, %v4167_v32, 0.0  ;;  %v14625_v50 = vld [vmem:[#allocation3 + $0x40] sm:$0xff]  ;;  %v14627_v32 = vld [vmem:[#allocation3 + $0x48] sm:$0xff] }
 0x280   : > { %vm17768_vm2 = vsmask.f32 256  ;;  %4410 = vst.msk [vmem:[#allocation3 + $0x58] sm:$0xff] %vm17769_vm5, %v4394_v21  ;;  %v4393_v16 = vpack.c.bf16 %v4366_v35, %v4365_v62  ;;  %v4303_v61 = vmul.f32 %v14394_v19, %v4266_v46  ;;  %v17424_v46 = vshrl.u32 %v14625_v50, 16  ;;  %vm17772_vm5 = vmmov %vm17766_vm0 }
 0x281   : > { %v14616_v41 = vsel %vm17768_vm2, %v14542_v39, %v4485_v18  ;;  %v4264_v2 = vadd.f32 %v4232_v34, %v3833_v59  ;;  %vm17770_vm12 = vmmov %vm17768_vm2  ;;  %v4371_v47 = vmax.f32 %v4339_v60, 0.0  ;;  %v4337_v39 = vadd.f32 %v14401_v26, %v4300_v15 }
 0x282   : > { %12147 = vmatmul.mubr.msk.bf16.gmra.mrb[152].mxu1 %vm17766_vm0, %v14616_v41  ;;  %v14623_v37 = vsel %vm17770_vm12, %v4482_v25, %v4493_v14  ;;  %vm17771_vm2 = vmmov %vm17766_vm0  ;;  %4409 = vst.msk [vmem:[#allocation3 + $0x50] sm:$0xff] %vm17766_vm0, %v4393_v16  ;;  %v4340_v45 = vadd.f32 %v14401_v26, %v4303_v61  ;;  %v17428_v18 = vshll.u32 %v14625_v50, 16  ;;  %v4498_v4 = vrot.slane %v17424_v46, 7 }
 0x283   : > { %12150 = vmatprep.mubr.msk.bf16.mxu1 %vm17771_vm2, %v14623_v37  ;;  %12185 = vmatmul.mubr.msk.bf16.gmra.mrb[156].mxu0 %vm17772_vm5, %v14625_v50  ;;  %v4301_v60 = vmul.f32 %v14394_v19, %v4264_v2  ;;  %vm17773_vm12 = vmmov %vm17766_vm0  ;;  %v4369_v7 = vmax.f32 %v4337_v39, 0.0  ;;  %v17425_v35 = vshrl.u32 %v14627_v32, 16  ;;  %vm17775_vm5 = vsmask.f32 256 }
 0x284   : > { %v12096_v36 = vpop.f32.mrb[136].mxu1  ;;  %12188 = vmatprep.mubr.msk.bf16.mxu0 %vm17773_vm12, %v14627_v32  ;;  %v4372_v34 = vmax.f32 %v4340_v45, 0.0  ;;  %v4501_v39 = vor.u32 %v17428_v18, %v4498_v4  ;;  %vm17774_vm2 = vmmov %vm17766_vm0  ;;  %v17827_v44 = vshrl.u32 %v14627_v32, 16 }
 0x285   : > { %v3838_v21 = vadd.f32 %v12096_v36, %v14354_v42  ;;  %v12130_v62 = vpop.f32.mrb[136].mxu0  ;;  %v3781_v25 = vpop.f32.mrb[137].mxu1  ;;  %v4338_v16 = vadd.f32 %v14401_v26, %v4301_v60  ;;  %vm17776_vm12 = vmmov %vm17766_vm0 }
 0x286   : > { %v3836_v42 = vadd.f32 %v3781_v25, %v14360_v31  ;;  %v4180_v40 = vpop.f32.mrb[137].mxu0  ;;  %v12097_v56 = vpop.f32.mrb[138].mxu1  ;;  %v17427_v31 = vshll.u32 %v14627_v32, 16  ;;  %v4396_v25 = vpack.c.bf16 %v4372_v34, %v4371_v47  ;;  %v14666_v47 = vsel %vm17775_vm5, %v14596_v43, %v4501_v39 }
 0x287   : > { %v4269_v14 = vadd.f32 %v12130_v62, %v3838_v21  ;;  %v12131_v59 = vpop.f32.mrb[138].mxu0  ;;  %v3784_v15 = vpop.f32.mrb[139].mxu1  ;;  %v4506_v21 = vrot.slane %v17425_v35, 7  ;;  %v3839_v62 = vadd.f32 %v12097_v56, %v14366_v58  ;;  %v4370_v3 = vmax.f32 %v4338_v16, 0.0 }
 0x288   : > { %v4267_v61 = vadd.f32 %v4180_v40, %v3836_v42  ;;  %v4183_v2 = vpop.f32.mrb[139].mxu0  ;;  %v4238_v60 = vsel %vm17734_vm11, %v12131_v59, 0.0  ;;  %v3837_v46 = vadd.f32 %v3784_v15, %v14368_v57  ;;  %4412 = vst.msk [vmem:[#allocation3 + $0x68] sm:$0xff] %vm17774_vm2, %v4396_v25  ;;  %vm17777_vm2 = vmmov %vm17775_vm5 }
 0x289   : > { %v4306_v36 = vmul.f32 %v14394_v19, %v4269_v14  ;;  %v4509_v40 = vor.u32 %v17427_v31, %v4506_v21  ;;  %v4270_v14 = vadd.f32 %v4238_v60, %v3839_v62  ;;  %v4395_v35 = vpack.c.bf16 %v4370_v3, %v4369_v7  ;;  %v14673_v3 = vld [vmem:[#allocation3 + $0x50] sm:$0xff]  ;;  %vm17778_vm5 = vmmov %vm17766_vm0 }
 0x28a   : > { %v4304_v45 = vmul.f32 %v14394_v19, %v4267_v61  ;;  %v4236_v58 = vsel %vm17736_vm15, %v4183_v2, 0.0  ;;  %12151 = vmatmul.mubr.msk.bf16.gmra.mrb[156].mxu1 %vm17766_vm0, %v14666_v47  ;;  %v14675_v61 = vld [vmem:[#allocation3 + $0x58] sm:$0xff]  ;;  %v17780_v31 = vld [vmem:[#allocation39_spill] sm:$0xff]  ;;  %vm17854_vm15 = vsmask.f32 256 }
 0x28b   : > { %v4343_v42 = vadd.f32 %v14401_v26, %v4306_v36  ;;  %v4307_v34 = vmul.f32 %v14394_v19, %v4270_v14  ;;  %v4268_v16 = vadd.f32 %v4236_v58, %v3837_v46  ;;  %4411 = vst.msk [vmem:[#allocation3 + $0x60] sm:$0xff] %vm17776_vm12, %v4395_v35  ;;  %v14679_v2 = vsel %vm17777_vm2, %v4498_v4, %v4509_v40  ;;  %vm17779_vm12 = vmmov %vm17766_vm0 }
 0x28c   : > { %v4341_v59 = vadd.f32 %v14401_v26, %v4304_v45  ;;  %v17426_v36 = vshrl.u32 %v14673_v3, 16  ;;  %v17430_v46 = vshll.u32 %v14673_v3, 16  ;;  %12189 = vmatmul.mubr.msk.bf16.gmra.mrb[160].mxu0 %vm17778_vm5, %v14673_v3  ;;  %12154 = vmatprep.mubr.msk.bf16.mxu1 %vm17766_vm0, %v14679_v2  ;;  %v17431_v40 = vshrl.u32 %v14675_v61, 16  ;;  %vm17782_vm5 = vmmov %vm17766_vm0 }
 0x28d   : > { %v4375_v43 = vmax.f32 %v4343_v42, 0.0  ;;  %v4344_v62 = vadd.f32 %v14401_v26, %v4307_v34  ;;  %v4305_v25 = vmul.f32 %v14394_v19, %v4268_v16  ;;  %v17439_v14 = vshll.u32 %v14675_v61, 16  ;;  %12192 = vmatprep.mubr.msk.bf16.mxu0 %vm17779_vm12, %v14675_v61  ;;  %vm17783_vm12 = vmmov %vm17777_vm2 }
 0x28e   : > { %v12100_v56 = vpop.f32.mrb[140].mxu1  ;;  %v4514_v42 = vrot.slane %v17426_v36, 7  ;;  %v4373_v53 = vmax.f32 %v4341_v59, 0.0  ;;  %v17829_v63 = vshrl.u32 %v14675_v61, 16 }
 0x28f   : > { %v3842_v57 = vadd.f32 %v12100_v56, %v14374_v22  ;;  %v12134_v15 = vpop.f32.mrb[140].mxu0  ;;  %v3797_v7 = vpop.f32.mrb[141].mxu1  ;;  %v4376_v34 = vmax.f32 %v4344_v62, 0.0  ;;  %v4342_v16 = vadd.f32 %v14401_v26, %v4305_v25 }
 0x290   : > { %v4196_v22 = vpop.f32.mrb[141].mxu0  ;;  %v12101_v39 = vpop.f32.mrb[142].mxu1  ;;  %v3840_v4 = vadd.f32 %v3797_v7, %v14380_v10  ;;  %v4522_v7 = vrot.slane %v17431_v40, 7  ;;  %v14714_v40 = vld [vmem:[#allocation3 + $0x68] sm:$0xff] }
 0x291   : > { %v4273_v45 = vadd.f32 %v12134_v15, %v3842_v57  ;;  %v12135_v35 = vpop.f32.mrb[142].mxu0  ;;  %v3800_v60 = vpop.f32.mrb[143].mxu1  ;;  %v3843_v58 = vadd.f32 %v12101_v39, %v14386_v5  ;;  %v4517_v15 = vor.u32 %v17430_v46, %v4514_v42  ;;  %v4398_v5 = vpack.c.bf16 %v4376_v34, %v4375_v43 }
 0x292   : > { %v4199_v56 = vpop.f32.mrb[143].mxu0  ;;  %v4271_v57 = vadd.f32 %v4196_v22, %v3840_v4  ;;  %v4242_v36 = vsel %vm17738_vm1, %v12135_v35, 0.0  ;;  %v3841_v18 = vadd.f32 %v3800_v60, %v17780_v31  ;;  %v4374_v39 = vmax.f32 %v4342_v16, 0.0  ;;  %v14719_v43 = vld [vmem:[#allocation3 + $0x60] sm:$0xff]  ;;  %vm17791_vm1 = vmmov %vm17766_vm0 }
 0x293   : > { %v4310_v10 = vmul.f32 %v14394_v19, %v4273_v45  ;;  %v4525_v25 = vor.u32 %v17439_v14, %v4522_v7  ;;  %v4274_v22 = vadd.f32 %v4242_v36, %v3843_v58  ;;  %v4240_v4 = vsel %vm17740_vm6, %v4199_v56, 0.0  ;;  %4414 = vst.msk [vmem:[#allocation3 + $0x78] sm:$0xff] %vm17782_vm5, %v4398_v5  ;;  %vm17785_vm5 = vmmov %vm17766_vm0 }
 0x294   : > { %v4308_v62 = vmul.f32 %v14394_v19, %v4271_v57  ;;  %v14712_v46 = vsel %vm17777_vm2, %v4506_v21, %v4517_v15  ;;  %v4397_v31 = vpack.c.bf16 %v4374_v39, %v4373_v53  ;;  %v4272_v59 = vadd.f32 %v4240_v4, %v3841_v18  ;;  %vm17784_vm2 = vmmov %vm17766_vm0 }
 0x295   : > { %12155 = vmatmul.mubr.msk.bf16.gmra.mrb[160].mxu1 %vm17766_vm0, %v14712_v46  ;;  %v4347_v35 = vadd.f32 %v14401_v26, %v4310_v10  ;;  %v4311_v36 = vmul.f32 %v14394_v19, %v4274_v22  ;;  %v14724_v60 = vsel %vm17783_vm12, %v4514_v42, %v4525_v25  ;;  %v4528_v21 = vshrl.u32 %v14719_v43, 16  ;;  %12193 = vmatmul.mubr.msk.bf16.gmra.mrb[164].mxu0 %vm17784_vm2, %v14719_v43  ;;  %vm17786_vm6 = vmmov %vm17766_vm0 }
 0x296   : > { %4413 = vst.msk [vmem:[#allocation3 + $0x70] sm:$0xff] %vm17785_vm5, %v4397_v31  ;;  %v4345_v53 = vadd.f32 %v14401_v26, %v4308_v62  ;;  %v4309_v18 = vmul.f32 %v14394_v19, %v4272_v59  ;;  %12158 = vmatprep.mubr.msk.bf16.mxu1 %vm17766_vm0, %v14724_v60  ;;  %v4536_v58 = vshrl.u32 %v14714_v40, 16  ;;  %12196 = vmatprep.mubr.msk.bf16.mxu0 %vm17786_vm6, %v14714_v40  ;;  %v4531_v34 = vshll.u32 %v14719_v43, 16  ;;  %v5501_v59 = vld [vmem:[#allocation3 + $0x8] sm:$0x80]  ;;  %vm17787_vm6 = vmmov %vm17766_vm0 }
 0x297   : > { %v4348_v42 = vadd.f32 %v14401_v26, %v4311_v36  ;;  %v4530_v56 = vrot.slane %v4528_v21, 7  ;;  %v4539_v57 = vshll.u32 %v14714_v40, 16  ;;  %v4379_v15 = vmax.f32 %v4347_v35, 0.0  ;;  %vm17788_vm2 = vmmov %vm17783_vm12 }
 0x298   : > { %v4346_v16 = vadd.f32 %v14401_v26, %v4309_v18  ;;  %v4538_v10 = vrot.slane %v4536_v58, 7  ;;  %v4377_v39 = vmax.f32 %v4345_v53, 0.0  ;;  %vm17789_vm5 = vmmov %vm17766_vm0 }
 0x299   : > { %v4380_v19 = vmax.f32 %v4348_v42, 0.0  ;;  %v4533_v5 = vor.u32 %v4531_v34, %v4530_v56  ;;  %v5506_v42 = vshrl.u32 %v5501_v59, 16 }
 0x29a   : > { %v4378_v62 = vmax.f32 %v4346_v16, 0.0  ;;  %v4541_v25 = vor.u32 %v4539_v57, %v4538_v10  ;;  %v14744_v31 = vld [vmem:[#allocation3 + $0x78] sm:$0xff] }
 0x29b   : > { %v4400_v22 = vpack.c.bf16 %v4380_v19, %v4379_v15  ;;  %v14742_v4 = vsel %vm17783_vm12, %v4522_v7, %v4533_v5  ;;  %v17434_v35 = vshrl.u32 %v14744_v31, 16  ;;  %vm17790_vm12 = vmmov %vm17766_vm0 }
 0x29c   : > { %v4399_v36 = vpack.c.bf16 %v4378_v62, %v4377_v39  ;;  %v14749_v26 = vsel %vm17788_vm2, %v4530_v56, %v4541_v25  ;;  %v17436_v56 = vshll.u32 %v14744_v31, 16  ;;  %v5508_v39 = vrot.slane %v5506_v42, 7 }
 0x29d   : > { %12159 = vmatmul.mubr.msk.bf16.gmra.mrb[164].mxu1 %vm17787_vm6, %v14742_v4  ;;  %4416 = vst.msk [vmem:[#allocation3 + $0x88] sm:$0xff] %vm17789_vm5, %v4400_v22  ;;  %v14755_v53 = vld [vmem:[#allocation3 + $0x70] sm:$0xff]  ;;  %v4554_v18 = vrot.slane %v17434_v35, 7  ;;  %vm17792_vm6 = vmmov %vm17766_vm0 }
 0x29e   : > { %12162 = vmatprep.mubr.msk.bf16.mxu1 %vm17766_vm0, %v14749_v26  ;;  %4415 = vst.msk [vmem:[#allocation3 + $0x80] sm:$0xff] %vm17790_vm12, %v4399_v36  ;;  %v17435_v7 = vshrl.u32 %v14755_v53, 16  ;;  %12197 = vmatmul.mubr.msk.bf16.gmra.mrb[168].mxu0 %vm17791_vm1, %v14755_v53  ;;  %v17437_v15 = vshll.u32 %v14755_v53, 16  ;;  %vm17793_vm1 = vmmov %vm17788_vm2 }
 0x29f   : > { %12200 = vmatprep.mubr.msk.bf16.mxu0 %vm17792_vm6, %v14744_v31  ;;  %v4557_v19 = vor.u32 %v17436_v56, %v4554_v18  ;;  %vm17794_vm2 = vmmov %vm17766_vm0  ;;  %v5191_v56 = vrot.slane %v4539_v57, 1 }
 0x2a0   : > { %v4546_v16 = vrot.slane %v17435_v7, 7  ;;  %vm17795_vm5 = vmmov %vm17793_vm1 }
 0x2a1   : > { %vm17796_vm12 = vmmov %vm17766_vm0 }
 0x2a2   : > { %v4549_v5 = vor.u32 %v17437_v15, %v4546_v16  ;;  %v14779_v25 = vsel %vm17795_vm5, %v4546_v16, %v4557_v19  ;;  %vm17797_vm6 = vmmov %vm17793_vm1  ;;  %v17799_v16 = vshll.u32 %v14455_v28, 16 }
 0x2a4   : > { %v14774_v62 = vsel %vm17793_vm1, %v4538_v10, %v4549_v5  ;;  %v5511_v10 = vsel %vm17797_vm6, %v5508_v39, %v14493_v23  ;;  %vm17798_vm1 = vmmov %vm17766_vm0  ;;  %v5103_v19 = vrot.slane %v17799_v16, 1  ;;  %v5183_v5 = vrot.slane %v4531_v34, 1  ;;  %v17802_v39 = vld [vmem:[#allocation8_spill] sm:$0xff]  ;;  %v14893_v8 = vld [vmem:[#allocation3 + $0x88] sm:$0xff] }
 0x2a5   : > { %12163 = vmatmul.mubr.msk.bf16.gmra.mrb[168].mxu1 %vm17794_vm2, %v14774_v62  ;;  %v14781_v22 = vld [vmem:[#allocation3 + $0x80] sm:$0xff]  ;;  %vm17800_vm2 = vmmov %vm17795_vm5  ;;  %vm17801_vm5 = vcmask 1043456   ;;  %v5195_v34 = vor.u32 %v5191_v56, %v4536_v58 }
 0x2a6   : > { %12166 = vmatprep.mubr.msk.bf16.mxu1 %vm17766_vm0, %v14779_v25  ;;  %v17438_v59 = vshrl.u32 %v14781_v22, 16  ;;  %12201 = vmatmul.mubr.msk.bf16.gmra.mrb[172].mxu0 %vm17796_vm12, %v14781_v22  ;;  %v4563_v42 = vshll.u32 %v14781_v22, 16  ;;  %v5187_v7 = vor.u32 %v5183_v5, %v4528_v21  ;;  %v6268_v23 = vsel %vm17801_vm5, %v14462_v54, 0  ;;  %v14814_v21 = vld [vmem:[%s17250_s4 + $0x1c] sm:$0xf]  ;;  %vm17807_vm5 = vmmov %vm17766_vm0 }
 0x2a7   : > { %12240 = vmatprep.mubr.msk.bf16.mxu0 %vm17798_vm1, %v5511_v10  ;;  %vm17803_vm12 = vsmask.f32 7424  ;;  %vm17805_vm1 = vmmov %vm17766_vm0  ;;  %v17808_v54 = vshll.u32 %v14448_v11, 16 }
 0x2a8   : > { %v14793_v36 = vrot.slane %v17438_v59, 7  ;;  %v5104_v10 = vsel %vm17803_vm12, %v17802_v39, %v5103_v19  ;;  %vm17804_vm6 = vmmov %vm17803_vm12  ;;  %v17814_v39 = vshll.u32 %v14505_v12, 16 }
 0x2a9   : > { %v14809_v59 = vsel %vm17804_vm6, %v5187_v7, %v5191_v56  ;;  %v5111_v57 = vrot.slane %v17808_v54, 1  ;;  %v17811_v7 = vshll.u32 %v14520_v52, 16 }
 0x2aa   : > { %v4565_v35 = vor.u32 %v4563_v42, %v14793_v36 }
 0x2ac   : > { %v14800_v15 = vsel %vm17800_vm2, %v4554_v18, %v4565_v35  ;;  %vm17806_vm2 = vmmov %vm17766_vm0  ;;  %v17809_v35 = vshrl.u32 %v14455_v28, 16  ;;  %v5119_v18 = vrot.slane %v17811_v7, 1  ;;  %v17819_v7 = vshll.u32 %v14625_v50, 16 }
 0x2ad   : > { %12167 = vmatmul.mubr.msk.bf16.gmra.mrb[172].mxu1 %vm17766_vm0, %v14800_v15  ;;  %vm17810_vm0 = vcmask 1043456  }
 0x2ae   : > { %12206 = vmatprep.mubr.msk.bf16.mxu1 %vm17805_vm1, %v5104_v10  ;;  %12241 = vmatmul.mubr.msk.bf16.vlgmr.msra.gmra.mrb[176].mxu0 %vm17806_vm2, %v14518_v27  ;;  %v5107_v58 = vor.u32 %v5103_v19, %v17809_v35  ;;  %vm17812_vm12 = vmmov %vm17810_vm0  ;;  %v17813_v27 = vshrl.u32 %v14448_v11, 16  ;;  %v5127_v10 = vrot.slane %v17814_v39, 1  ;;  %v14841_v19 = vld [vmem:[%s17250_s4 + $0x18] sm:$0xf]  ;;  %v17820_v39 = vshll.u32 %v14627_v32, 16 }
 0x2af   : > { %12244 = vmatprep.mubr.msk.bf16.mxu0 %vm17807_vm5, %v14567_v55  ;;  %12307 = vmatpush3.bf16.msra.mxu0 %v6268_v23  ;;  %v5873_v56 = vsel %vm17812_vm12, %v14510_v33, 0  ;;  %vm17815_vm2 = vmmov %vm17804_vm6  ;;  %v17816_v33 = vshrl.u32 %v14520_v52, 16 }
 0x2b0   : > { %12757 = vmatprep.subr.msk.bf16.mxu0 %vm17810_vm0, %v14814_v21  ;;  %v5115_v16 = vor.u32 %v5111_v57, %v17813_v27  ;;  %v14836_v23 = vsel %vm17804_vm6, %v5107_v58, %v5111_v57  ;;  %vm17817_vm5 = vmmov %vm17805_vm1  ;;  %v17818_v57 = vshll.u32 %v14572_v0, 16  ;;  %v6137_v27 = vrot.slane %v17819_v7, 1 }
 0x2b1   : > { %v5123_v35 = vor.u32 %v5119_v18, %v17816_v33  ;;  %v6145_v14 = vrot.slane %v17820_v39, 1  ;;  %vm17821_vm0 = vmmov %vm17805_vm1  ;;  %v17824_v33 = vshll.u32 %v14675_v61, 16  ;;  %v17826_v7 = vshrl.u32 %v14625_v50, 16 }
 0x2b2   : > { %v14846_v54 = vsel %vm17815_vm2, %v5115_v16, %v5119_v18  ;;  %v5135_v58 = vrot.slane %v17818_v57, 1  ;;  %v17822_v16 = vshrl.u32 %v14505_v12, 16  ;;  %v17823_v18 = vshll.u32 %v14673_v3, 16  ;;  %vm17825_vm6 = vmmov %vm17821_vm0 }
 0x2b3   : > { %v6161_v57 = vrot.slane %v17824_v33, 1  ;;  %v6141_v39 = vor.u32 %v6137_v27, %v17826_v7  ;;  %v6149_v6 = vor.u32 %v6145_v14, %v17827_v44  ;;  %v17834_v44 = vshll.u32 %v14755_v53, 16 }
 0x2b4   : > { %v5131_v45 = vor.u32 %v5127_v10, %v17822_v16  ;;  %v17828_v16 = vshrl.u32 %v14673_v3, 16 }
 0x2b5   : > { %12207 = vmatmul.mubr.msk.bf16.vlgmr.msra.gmra.mrb[176].mxu1 %vm17805_vm1, %v14836_v23  ;;  %v6165_v38 = vor.u32 %v6161_v57, %v17829_v63  ;;  %vm17830_vm1 = vmmov %vm17815_vm2  ;;  %v6185_v13 = vrot.slane %v17834_v44, 1  ;;  %v17836_v63 = vshll.u32 %v14744_v31, 16 }
 0x2b6   : > { %12273 = vmatpush3.bf16.msra.mxu1 %v5873_v56  ;;  %12210 = vmatprep.mubr.msk.bf16.mxu1 %vm17817_vm5, %v14846_v54  ;;  %v6153_v56 = vrot.slane %v17823_v18, 1  ;;  %v14879_v18 = vsel %vm17830_vm1, %v6141_v39, %v6145_v14  ;;  %vm17831_vm2 = vmmov %vm17830_vm1  ;;  %v6201_v39 = vrot.slane %v4563_v42, 1  ;;  %v17843_v42 = vshrl.u32 %v14781_v22, 16 }
 0x2b7   : > { %12245 = vmatmul.mubr.msk.bf16.gmra.mrb[180].mxu0 %vm17821_vm0, %v14570_v20  ;;  %12756 = vmatprep.subr.msk.bf16.mxu1 %vm17812_vm12, %v14841_v19  ;;  %vm17832_vm5 = vmmov %vm17830_vm1  ;;  %v6193_v14 = vrot.slane %v17836_v63, 1 }
 0x2b8   : > { %12248 = vmatprep.mubr.msk.bf16.mxu0 %vm17825_vm6, %v14616_v41  ;;  %v6157_v51 = vor.u32 %v6153_v56, %v17828_v16  ;;  %v14882_v33 = vsel %vm17831_vm2, %v6149_v6, %v6153_v56  ;;  %vm17833_vm0 = vmmov %vm17830_vm1  ;;  %v17842_v56 = vshrl.u32 %v14744_v31, 16  ;;  %v14911_v44 = vor.u32 %v6201_v39, %v17843_v42 }
 0x2b9   : > { %v14888_v7 = vsel %vm17833_vm0, %v6165_v38, %v5183_v5  ;;  %vm17835_vm12 = vmmov %vm17833_vm0  ;;  %v17839_v38 = vshrl.u32 %v14755_v53, 16 }
 0x2ba   : > { %v14885_v1 = vsel %vm17832_vm5, %v6157_v51, %v6161_v57  ;;  %v5128_v16 = vsel %vm17835_vm12, %v5123_v35, %v5127_v10  ;;  %vm17837_vm1 = vmmov %vm17833_vm0  ;;  %v17841_v10 = vshll.u32 %v14561_v48, 16  ;;  %v6197_v57 = vor.u32 %v6193_v14, %v17842_v56 }
 0x2bb   : > { %v5136_v6 = vsel %vm17837_vm1, %v5131_v45, %v5135_v58  ;;  %vm17838_vm2 = vmmov %vm17833_vm0  ;;  %v6189_v5 = vor.u32 %v6185_v13, %v17839_v38  ;;  %v5555_v45 = vshrl.u32 %v14893_v8, 16 }
 0x2bc   : > { %v14900_v51 = vsel %vm17838_vm2, %v5195_v34, %v6185_v13  ;;  %vm17840_vm5 = vmmov %vm17825_vm6  ;;  %v5143_v35 = vrot.slane %v17841_v10, 1  ;;  %v17847_v13 = vshrl.u32 %v14572_v0, 16  ;;  %v14924_v38 = vsel %vm17837_vm1, %v6197_v57, %v6201_v39 }
 0x2bd   : > { %12211 = vmatmul.mubr.msk.bf16.gmra.mrb[180].mxu1 %vm17825_vm6, %v5128_v16  ;;  %vm17844_vm0 = vmmov %vm17840_vm5  ;;  %v17848_v10 = vshrl.u32 %v14561_v48, 16  ;;  %v14928_v42 = vrot.slane %v5555_v45, 7 }
 0x2be   : > { %12214 = vmatprep.mubr.msk.bf16.mxu1 %vm17840_vm5, %v5136_v6  ;;  %vm17845_vm12 = vmmov %vm17837_vm1  ;;  %v5139_v63 = vor.u32 %v5135_v58, %v17847_v13 }
 0x2bf   : > { %12249 = vmatmul.mubr.msk.bf16.gmra.mrb[184].mxu0 %vm17844_vm0, %v14623_v37  ;;  %v14917_v34 = vsel %vm17845_vm12, %v6189_v5, %v6193_v14  ;;  %vm17846_vm6 = vmmov %vm17844_vm0  ;;  %v5147_v56 = vor.u32 %v5143_v35, %v17848_v10  ;;  %v5558_v14 = vshll.u32 %v14893_v8, 16  ;;  %v5090_v5 = vld [vmem:[#allocation3 + $0x88] sm:$0x1] }
 0x2c0   : > { %12252 = vmatprep.mubr.msk.bf16.mxu0 %vm17846_vm6, %v14666_v47  ;;  %vm17849_vm2 = vmmov %vm17837_vm1 }
 0x2c1   : > { %v5144_v17 = vsel %vm17849_vm2, %v5139_v63, %v5143_v35  ;;  %vm17850_vm5 = vmmov %vm17837_vm1  ;;  %v6546_v58 = vor.u32 %v5558_v14, %v14928_v42  ;;  %v5221_v35 = vshll.u32 %v5090_v5, 16  ;;  %v11193_v63 = vld [vmem:[%s17250_s4 + $0x20] sm:$0xf] }
 0x2c2   : > { %v5152_v9 = vsel %vm17850_vm5, %v5147_v56, %v6137_v27  ;;  %vm17851_vm12 = vmmov %vm17844_vm0  ;;  %v17927_v56 = vld [vmem:[#allocation13_spill] sm:$0xff] }
 0x2c3   : > { %vm17852_vm6 = vmmov %vm17844_vm0  ;;  %v14942_v39 = vsel %vm17854_vm15, %v14793_v36, %v6546_v58  ;;  %v14960_v36 = vrot.slane %v5558_v14, 1  ;;  %v5223_v57 = vrot.slane %v5221_v35, 1 }
 0x2c4   : > { %vm17853_vm1 = vmmov %vm17844_vm0 }
 0x2c5   : > { %12215 = vmatmul.mubr.msk.bf16.gmra.mrb[184].mxu1 %vm17844_vm0, %v5144_v17  ;;  %vm17855_vm2 = vmmov %vm17844_vm0  ;;  %v14963_v27 = vor.u32 %v14960_v36, %v5555_v45 }
 0x2c6   : > { %12218 = vmatprep.mubr.msk.bf16.mxu1 %vm17851_vm12, %v5152_v9  ;;  %vm17856_vm5 = vmmov %vm17844_vm0 }
 0x2c7   : > { %12253 = vmatmul.mubr.msk.bf16.gmra.mrb[188].mxu0 %vm17852_vm6, %v14679_v2  ;;  %vm17857_vm12 = vmmov %vm17844_vm0 }
 0x2c8   : > { %12256 = vmatprep.mubr.msk.bf16.mxu0 %vm17853_vm1, %v14712_v46  ;;  %vm17858_vm6 = vmmov %vm17844_vm0 }
 0x2c9   : > { %vm17859_vm1 = vmmov %vm17844_vm0 }
 0x2ca   : > { %vm17860_vm15 = vmmov %vm17844_vm0 }
 0x2cd   : > { %12219 = vmatmul.mubr.msk.bf16.gmra.mrb[188].mxu1 %vm17855_vm2, %v14879_v18  ;;  %vm17861_vm2 = vmmov %vm17844_vm0 }
 0x2ce   : > { %12222 = vmatprep.mubr.msk.bf16.mxu1 %vm17856_vm5, %v14882_v33  ;;  %vm17862_vm5 = vmmov %vm17844_vm0 }
 0x2cf   : > { %12257 = vmatmul.mubr.msk.bf16.gmra.mrb[192].mxu0 %vm17844_vm0, %v14724_v60 }
 0x2d0   : > { %12260 = vmatprep.mubr.msk.bf16.mxu0 %vm17857_vm12, %v14742_v4  ;;  %vm17863_vm12 = vmmov %vm17844_vm0 }
 0x2d5   : > { %12223 = vmatmul.mubr.msk.bf16.gmra.mrb[192].mxu1 %vm17858_vm6, %v14885_v1  ;;  %vm17864_vm6 = vmmov %vm17844_vm0 }
 0x2d6   : > { %12226 = vmatprep.mubr.msk.bf16.mxu1 %vm17859_vm1, %v14888_v7  ;;  %vm17865_vm1 = vmmov %vm17844_vm0 }
 0x2d7   : > { %12261 = vmatmul.mubr.msk.bf16.gmra.mrb[196].mxu0 %vm17860_vm15, %v14749_v26  ;;  %vm17866_vm15 = vmmov %vm17844_vm0 }
 0x2d8   : > { %12264 = vmatprep.mubr.msk.bf16.mxu0 %vm17861_vm2, %v14774_v62  ;;  %vm17867_vm2 = vmmov %vm17844_vm0 }
 0x2d9   : > { %vm17873_vm11 = vmmov %vm17865_vm1 }
 0x2dd   : > { %12227 = vmatmul.mubr.msk.bf16.gmra.mrb[196].mxu1 %vm17862_vm5, %v14809_v59  ;;  %vm17868_vm5 = vmmov %vm17844_vm0 }
 0x2de   : > { %12230 = vmatprep.mubr.msk.bf16.mxu1 %vm17844_vm0, %v14900_v51  ;;  %vm17869_vm0 = vsmask.f32 7424 }
 0x2df   : > { %12265 = vmatmul.mubr.msk.bf16.gmra.mrb[200].mxu0 %vm17863_vm12, %v14779_v25  ;;  %v5224_v45 = vsel %vm17869_vm0, %v14911_v44, %v5223_v57  ;;  %vm17870_vm12 = vmmov %vm17865_vm1 }
 0x2e0   : > { %12268 = vmatprep.mubr.msk.bf16.mxu0 %vm17864_vm6, %v14800_v15  ;;  %vm17871_vm6 = vcmask 1043456   ;;  %vm17876_vm0 = vmmov %vm17865_vm1 }
 0x2e1   : > { %v6867_v13 = vsel %vm17871_vm6, %v14814_v21, 0  ;;  %vm17884_vm3 = vmmov %vm17876_vm0 }
 0x2e5   : > { %12231 = vmatmul.mubr.msk.bf16.gmra.mrb[200].mxu1 %vm17865_vm1, %v14917_v34 }
 0x2e6   : > { %12234 = vmatprep.mubr.msk.bf16.mxu1 %vm17866_vm15, %v14924_v38  ;;  %vm17872_vm15 = vmmov %vm17865_vm1 }
 0x2e7   : > { %12269 = vmatmul.mubr.msk.bf16.gmra.mrb[204].mxu0 %vm17867_vm2, %v14942_v39  ;;  %vm17874_vm2 = vmmov %vm17871_vm6 }
 0x2e8   : > { %12308 = vmatprep.mubr.msk.bf16.mxu0 %vm17868_vm5, %v14836_v23  ;;  %v6605_v23 = vsel %vm17874_vm2, %v14841_v19, 0  ;;  %vm17875_vm5 = vmmov %vm17865_vm1  ;;  %v12796_v19 = vld [vmem:[#allocation3 + $0x18] sm:$0xff] }
 0x2e9   : > { %vm17878_vm6 = vmmov %vm17874_vm2 }
 0x2ea   : > { %vm17882_vm2 = vmmov %vm17876_vm0 }
 0x2ed   : > { %12235 = vmatmul.mubr.msk.bf16.gmra.mrb[204].mxu1 %vm17870_vm12, %v5224_v45  ;;  %vm17877_vm12 = vmmov %vm17876_vm0 }
 0x2ee   : > { %12274 = vmatprep.mubr.msk.bf16.mxu1 %vm17865_vm1, %v14455_v28  ;;  %vm17880_vm1 = vmmov %vm17876_vm0  ;;  %v6495_v28 = vld [vmem:[#allocation3 + $0x10] sm:$0x80] }
 0x2ef   : > { %12309 = vmatmul.mubr.msk.bf16.vlgmr.msra.gmra.mrb[208].mxu0 %vm17872_vm15, %v14846_v54  ;;  %vm17881_vm15 = vmmov %vm17876_vm0 }
 0x2f0   : > { %12312 = vmatprep.mubr.msk.bf16.mxu0 %vm17873_vm11, %v5128_v16  ;;  %12375 = vmatpush3.bf16.msra.mxu0 %v6867_v13  ;;  %vm17879_vm11 = vmmov %vm17876_vm0 }
 0x2f5   : > { %12275 = vmatmul.mubr.msk.bf16.vlgmr.msra.gmra.mrb[208].mxu1 %vm17875_vm5, %v14448_v11  ;;  %vm17883_vm5 = vmmov %vm17876_vm0 }
 0x2f6   : > { %12341 = vmatpush3.bf16.msra.mxu1 %v6605_v23  ;;  %12278 = vmatprep.mubr.msk.bf16.mxu1 %vm17876_vm0, %v14520_v52 }
 0x2f7   : > { %12313 = vmatmul.mubr.msk.bf16.gmra.mrb[212].mxu0 %vm17877_vm12, %v5136_v6  ;;  %12758 = vmatprep.subr.msk.bf16.mxu1 %vm17878_vm6, %v11193_v63  ;;  %vm17885_vm12 = vmmov %vm17876_vm0 }
 0x2f8   : > { %12316 = vmatprep.mubr.msk.bf16.mxu0 %vm17879_vm11, %v5144_v17  ;;  %vm17886_vm6 = vmmov %vm17876_vm0  ;;  %v6084_v17 = vld [vmem:[#allocation3 + $0x90] sm:$0x1] }
 0x2f9   : > { %vm17887_vm11 = vmmov %vm17876_vm0 }
 0x2fd   : > { %12279 = vmatmul.mubr.msk.bf16.gmra.mrb[212].mxu1 %vm17880_vm1, %v14505_v12  ;;  %vm17888_vm1 = vmmov %vm17876_vm0 }
 0x2fe   : > { %12282 = vmatprep.mubr.msk.bf16.mxu1 %vm17881_vm15, %v14572_v0  ;;  %vm17889_vm15 = vmmov %vm17876_vm0 }
 0x2ff   : > { %12317 = vmatmul.mubr.msk.bf16.gmra.mrb[216].mxu0 %vm17882_vm2, %v5152_v9  ;;  %vm17891_vm2 = vmmov %vm17876_vm0  ;;  %v6215_v9 = vshll.u32 %v6084_v17, 16 }
 0x300   : > { %12320 = vmatprep.mubr.msk.bf16.mxu0 %vm17883_vm5, %v14879_v18  ;;  %vm17892_vm5 = vmmov %vm17876_vm0 }
 0x301   : > { %v6217_v11 = vrot.slane %v6215_v9, 1 }
 0x305   : > { %12283 = vmatmul.mubr.msk.bf16.gmra.mrb[216].mxu1 %vm17884_vm3, %v14561_v48  ;;  %vm17890_vm3 = vmmov %vm17876_vm0 }
 0x306   : > { %12286 = vmatprep.mubr.msk.bf16.mxu1 %vm17876_vm0, %v14625_v50 }
 0x307   : > { %12321 = vmatmul.mubr.msk.bf16.gmra.mrb[220].mxu0 %vm17885_vm12, %v14882_v33  ;;  %vm17893_vm12 = vmmov %vm17876_vm0 }
 0x308   : > { %12324 = vmatprep.mubr.msk.bf16.mxu0 %vm17886_vm6, %v14885_v1  ;;  %vm17894_vm6 = vmmov %vm17876_vm0 }
 0x30d   : > { %12287 = vmatmul.mubr.msk.bf16.gmra.mrb[220].mxu1 %vm17887_vm11, %v14627_v32  ;;  %vm17895_vm11 = vmmov %vm17876_vm0 }
 0x30e   : > { %12290 = vmatprep.mubr.msk.bf16.mxu1 %vm17888_vm1, %v14673_v3  ;;  %vm17896_vm1 = vmmov %vm17876_vm0 }
 0x30f   : > { %12325 = vmatmul.mubr.msk.bf16.gmra.mrb[224].mxu0 %vm17889_vm15, %v14888_v7  ;;  %vm17897_vm15 = vsmask.f32 7424 }
 0x310   : > { %12328 = vmatprep.mubr.msk.bf16.mxu0 %vm17890_vm3, %v14809_v59  ;;  %v6210_v1 = vsel %vm17897_vm15, %v14911_v44, %v14960_v36  ;;  %vm17898_vm3 = vmmov %vm17876_vm0  ;;  %v6500_v59 = vshrl.u32 %v6495_v28, 16 }
 0x312   : > { %v6502_v54 = vrot.slane %v6500_v59, 7 }
 0x315   : > { %12291 = vmatmul.mubr.msk.bf16.gmra.mrb[224].mxu1 %vm17891_vm2, %v14675_v61  ;;  %vm17899_vm2 = vmmov %vm17876_vm0 }
 0x316   : > { %12294 = vmatprep.mubr.msk.bf16.mxu1 %vm17892_vm5, %v14719_v43  ;;  %vm17900_vm5 = vmmov %vm17876_vm0 }
 0x317   : > { %12329 = vmatmul.mubr.msk.bf16.gmra.mrb[228].mxu0 %vm17876_vm0, %v14900_v51  ;;  %vm17901_vm0 = vmmov %vm17897_vm15 }
 0x318   : > { %12332 = vmatprep.mubr.msk.bf16.mxu0 %vm17893_vm12, %v14917_v34  ;;  %v6218_v21 = vsel %vm17901_vm0, %v14963_v27, %v6217_v11  ;;  %vm17902_vm12 = vmmov %vm17896_vm1 }
 0x319   : > { %vm17906_vm15 = vmmov %vm17899_vm2 }
 0x31a   : > { %vm17909_vm0 = vmmov %vm17899_vm2 }
 0x31b   : > { %vm17940_vm14 = vmmov %vm17909_vm0 }
 0x31d   : > { %12295 = vmatmul.mubr.msk.bf16.gmra.mrb[228].mxu1 %vm17894_vm6, %v14714_v40  ;;  %vm17903_vm6 = vmmov %vm17896_vm1 }
 0x31e   : > { %12298 = vmatprep.mubr.msk.bf16.mxu1 %vm17895_vm11, %v14755_v53  ;;  %vm17904_vm11 = vmmov %vm17896_vm1 }
 0x31f   : > { %12333 = vmatmul.mubr.msk.bf16.gmra.mrb[232].mxu0 %vm17896_vm1, %v14924_v38  ;;  %vm17905_vm1 = vsmask.f32 256 }
 0x320   : > { %12336 = vmatprep.mubr.msk.bf16.mxu0 %vm17898_vm3, %v6210_v1  ;;  %v6505_v18 = vsel %vm17905_vm1, %v6502_v54, %v14488_v30  ;;  %vm17907_vm3 = vmmov %vm17899_vm2  ;;  %v17934_v1 = vld [vmem:[#allocation17_spill] sm:$0xff] }
 0x321   : > { %vm17913_vm1 = vmmov %vm17909_vm0 }
 0x325   : > { %12299 = vmatmul.mubr.msk.bf16.gmra.mrb[232].mxu1 %vm17899_vm2, %v14744_v31 }
 0x326   : > { %12302 = vmatprep.mubr.msk.bf16.mxu1 %vm17900_vm5, %v14781_v22  ;;  %vm17908_vm5 = vcmask 1043456  }
 0x327   : > { %12337 = vmatmul.mubr.msk.bf16.gmra.mrb[236].mxu0 %vm17902_vm12, %v6218_v21  ;;  %v7262_v33 = vsel %vm17908_vm5, %v11193_v63, 0  ;;  %vm17910_vm12 = vmmov %vm17909_vm0 }
 0x328   : > { %12376 = vmatprep.mubr.msk.bf16.mxu0 %vm17903_vm6, %v12796_v19  ;;  %vm17911_vm6 = vmmov %vm17909_vm0 }
 0x329   : > { %vm17917_vm5 = vmmov %vm17909_vm0 }
 0x32d   : > { %12303 = vmatmul.mubr.msk.bf16.gmra.mrb[236].mxu1 %vm17904_vm11, %v14893_v8  ;;  %vm17912_vm11 = vmmov %vm17909_vm0 }
 0x32e   : > { %12342 = vmatprep.mubr.msk.bf16.mxu1 %vm17906_vm15, %v6505_v18  ;;  %vm17914_vm15 = vmmov %vm17909_vm0 }
 0x32f   : > { %12377 = vmatmul.mubr.msk.bf16.vlgmr.msra.gmra.mrb[240].mxu0 %vm17907_vm3, %v14520_v52  ;;  %vm17915_vm3 = vmmov %vm17909_vm0 }
 0x330   : > { %12380 = vmatprep.mubr.msk.bf16.mxu0 %vm17899_vm2, %v14505_v12  ;;  %vm17916_vm2 = vmmov %vm17909_vm0 }
 0x335   : > { %12343 = vmatmul.mubr.msk.bf16.vlgmr.msra.gmra.mrb[240].mxu1 %vm17909_vm0, %v14567_v55 }
 0x336   : > { %12409 = vmatpush3.bf16.msra.mxu1 %v7262_v33  ;;  %12346 = vmatprep.mubr.msk.bf16.mxu1 %vm17910_vm12, %v14570_v20 }
 0x337   : > { %12381 = vmatmul.mubr.msk.bf16.gmra.mrb[244].mxu0 %vm17911_vm6, %v14572_v0  ;;  %v17918_v0 = vld [vmem:[#allocation9_spill] sm:$0xff]  ;;  %vm17920_vm6 = vmmov %vm17909_vm0 }
 0x338   : > { %12384 = vmatprep.mubr.msk.bf16.mxu0 %vm17912_vm11, %v14561_v48  ;;  %vm17919_vm12 = vnez %v17918_v0 }
 0x33a   : > { %v12174_v30 = vpop.f32.mrb[144].mxu0 }
 0x33b   : > { %v4915_v12 = vpop.f32.mrb[145].mxu0 }
 0x33c   : > { %v12175_v52 = vpop.f32.mrb[146].mxu0 }
 0x33d   : > { %12347 = vmatmul.mubr.msk.bf16.gmra.mrb[244].mxu1 %vm17913_vm1, %v14616_v41  ;;  %v4918_v55 = vpop.f32.mrb[147].mxu0  ;;  %vm17923_vm1 = vmmov %vm17909_vm0 }
 0x33e   : > { %12350 = vmatprep.mubr.msk.bf16.mxu1 %vm17914_vm15, %v14623_v37  ;;  %vm17924_vm15 = vmmov %vm17909_vm0 }
 0x33f   : > { %12385 = vmatmul.mubr.msk.bf16.gmra.mrb[248].mxu0 %vm17915_vm3, %v14625_v50  ;;  %vm17925_vm3 = vmmov %vm17909_vm0 }
 0x340   : > { %12388 = vmatprep.mubr.msk.bf16.mxu0 %vm17916_vm2, %v14627_v32  ;;  %v17921_v32 = vld [vmem:[#allocation10_spill] sm:$0xff]  ;;  %vm17926_vm2 = vmmov %vm17909_vm0 }
 0x341   : > { %vm17922_vm11 = vnez %v17921_v32 }
 0x343   : > { %v12140_v48 = vpop.f32.mrb[144].mxu1 }
 0x344   : > { %v4653_v20 = vpop.f32.mrb[145].mxu1  ;;  %v4782_v41 = vsel %vm17919_vm12, %v12140_v48, 0.0 }
 0x345   : > { %12351 = vmatmul.mubr.msk.bf16.gmra.mrb[248].mxu1 %vm17917_vm5, %v14666_v47  ;;  %v12141_v50 = vpop.f32.mrb[146].mxu1  ;;  %v15086_v7 = vadd.f32 %v12174_v30, %v4782_v41  ;;  %v4780_v16 = vsel %vm17922_vm11, %v4653_v20, 0.0  ;;  %vm17928_vm5 = vnez %v17927_v56  ;;  %v7062_v20 = vld [vmem:[#allocation3 + $0x18] sm:$0xff]  ;;  %v17941_v41 = vld [vmem:[#allocation21_spill] sm:$0xff] }
 0x346   : > { %12354 = vmatprep.mubr.msk.bf16.mxu1 %vm17909_vm0, %v14679_v2  ;;  %v12178_v37 = vpop.f32.mrb[148].mxu0  ;;  %v4656_v6 = vpop.f32.mrb[147].mxu1  ;;  %v15092_v2 = vadd.f32 %v4915_v12, %v4780_v16  ;;  %v15094_v51 = vadd.f32 %v12175_v52, %v12141_v50  ;;  %vm17942_vm4 = vnez %v17941_v41 }
 0x347   : > { %12389 = vmatmul.mubr.msk.bf16.gmra.mrb[252].mxu0 %vm17920_vm6, %v14673_v3  ;;  %v4931_v47 = vpop.f32.mrb[149].mxu0  ;;  %v15096_v34 = vadd.f32 %v4918_v55, %v4656_v6 }
 0x348   : > { %12392 = vmatprep.mubr.msk.bf16.mxu0 %vm17923_vm1, %v14675_v61  ;;  %v12179_v44 = vpop.f32.mrb[150].mxu0  ;;  %vm17931_vm1 = vmmov %vm17909_vm0 }
 0x349   : > { %v4934_v3 = vpop.f32.mrb[151].mxu0 }
 0x34c   : > { %v12144_v38 = vpop.f32.mrb[148].mxu1 }
 0x34d   : > { %12355 = vmatmul.mubr.msk.bf16.gmra.mrb[252].mxu1 %vm17924_vm15, %v14712_v46  ;;  %v4669_v61 = vpop.f32.mrb[149].mxu1  ;;  %v4786_v14 = vsel %vm17928_vm5, %v12144_v38, 0.0  ;;  %v17929_v46 = vld [vmem:[#allocation14_spill] sm:$0xff]  ;;  %vm17932_vm15 = vmmov %vm17909_vm0 }
 0x34e   : > { %12358 = vmatprep.mubr.msk.bf16.mxu1 %vm17925_vm3, %v14724_v60  ;;  %v12182_v10 = vpop.f32.mrb[152].mxu0  ;;  %v12145_v58 = vpop.f32.mrb[150].mxu1  ;;  %v15108_v35 = vadd.f32 %v12178_v37, %v4786_v14  ;;  %vm17930_vm6 = vnez %v17929_v46  ;;  %vm17933_vm3 = vmmov %vm17909_vm0 }
 0x34f   : > { %12393 = vmatmul.mubr.msk.bf16.gmra.mrb[0].mxu0 %vm17926_vm2, %v14719_v43  ;;  %v4947_v5 = vpop.f32.mrb[153].mxu0  ;;  %v4784_v57 = vsel %vm17930_vm6, %v4669_v61, 0.0  ;;  %v4672_v60 = vpop.f32.mrb[151].mxu1  ;;  %v15114_v43 = vadd.f32 %v12179_v44, %v12145_v58  ;;  %vm17935_vm2 = vnez %v17934_v1  ;;  %v7063_v44 = vld [vmem:[#allocation3 + $0x20] sm:$0xff]  ;;  %v7084_v61 = vshll.u32 %v7062_v20, 16 }
 0x350   : > { %12396 = vmatprep.mubr.msk.bf16.mxu0 %vm17909_vm0, %v14714_v40  ;;  %v12183_v45 = vpop.f32.mrb[154].mxu0  ;;  %v15112_v13 = vadd.f32 %v4931_v47, %v4784_v57  ;;  %v15116_v63 = vadd.f32 %v4934_v3, %v4672_v60 }
 0x351   : > { %v4950_v23 = vpop.f32.mrb[155].mxu0  ;;  %v7086_v60 = vrot.slane %v7084_v61, 1 }
 0x355   : > { %12359 = vmatmul.mubr.msk.bf16.gmra.mrb[0].mxu1 %vm17931_vm1, %v14742_v4  ;;  %v12148_v40 = vpop.f32.mrb[152].mxu1  ;;  %v17936_v4 = vld [vmem:[#allocation18_spill] sm:$0xff] }
 0x356   : > { %12362 = vmatprep.mubr.msk.bf16.mxu1 %vm17932_vm15, %v14749_v26  ;;  %v4685_v17 = vpop.f32.mrb[153].mxu1  ;;  %v12186_v9 = vpop.f32.mrb[156].mxu0  ;;  %v4790_v11 = vsel %vm17935_vm2, %v12148_v40, 0.0  ;;  %vm17937_vm1 = vnez %v17936_v4  ;;  %vm17938_vm15 = vmmov %vm17909_vm0 }
 0x357   : > { %12397 = vmatmul.mubr.msk.bf16.gmra.mrb[4].mxu0 %vm17933_vm3, %v14755_v53  ;;  %v12149_v28 = vpop.f32.mrb[154].mxu1  ;;  %v4963_v59 = vpop.f32.mrb[157].mxu0  ;;  %v15128_v21 = vadd.f32 %v12182_v10, %v4790_v11  ;;  %v4788_v19 = vsel %vm17937_vm1, %v4685_v17, 0.0  ;;  %vm17939_vm3 = vmmov %vm17909_vm0  ;;  %v7064_v17 = vld [vmem:[#allocation3 + $0x28] sm:$0xff] }
 0x358   : > { %12400 = vmatprep.mubr.msk.bf16.mxu0 %vm17909_vm0, %v14744_v31  ;;  %v4688_v26 = vpop.f32.mrb[155].mxu1  ;;  %v12187_v54 = vpop.f32.mrb[158].mxu0  ;;  %v15132_v18 = vadd.f32 %v4947_v5, %v4788_v19  ;;  %v15134_v53 = vadd.f32 %v12183_v45, %v12149_v28  ;;  %v15140_v31 = vld [vmem:[#allocation3 + $0x90] sm:$0xff]  ;;  %v7089_v5 = vshll.u32 %v7063_v44, 16  ;;  %v7097_v61 = vshll.u32 %v7064_v17, 16 }
 0x359   : > { %v4966_v33 = vpop.f32.mrb[159].mxu0  ;;  %v15136_v30 = vadd.f32 %v4950_v23, %v4688_v26  ;;  %v17455_v48 = vshrl.u32 %v15140_v31, 16  ;;  %v17456_v58 = vshll.u32 %v15140_v31, 16 }
 0x35a   : > { %v7091_v19 = vrot.slane %v7089_v5, 1 }
 0x35b   : > { %v6551_v14 = vrot.slane %v17455_v48, 7 }
 0x35d   : > { %12363 = vmatmul.mubr.msk.bf16.gmra.mrb[4].mxu1 %vm17938_vm15, %v14774_v62  ;;  %v12152_v12 = vpop.f32.mrb[156].mxu1  ;;  %v6554_v45 = vor.u32 %v17456_v58, %v6551_v14 }
 0x35e   : > { %12366 = vmatprep.mubr.msk.bf16.mxu1 %vm17939_vm3, %v14779_v25  ;;  %v4701_v52 = vpop.f32.mrb[157].mxu1  ;;  %v4794_v62 = vsel %vm17942_vm4, %v12152_v12, 0.0  ;;  %v17943_v25 = vld [vmem:[#allocation22_spill] sm:$0xff]  ;;  %vm17946_vm3 = vmmov %vm17909_vm0 }
 0x35f   : > { %12401 = vmatmul.mubr.msk.bf16.gmra.mrb[8].mxu0 %vm17909_vm0, %v14781_v22  ;;  %v12190_v55 = vpop.f32.mrb[160].mxu0  ;;  %v12153_v37 = vpop.f32.mrb[158].mxu1  ;;  %v15151_v16 = vadd.f32 %v12186_v9, %v4794_v62  ;;  %vm17944_vm15 = vnez %v17943_v25  ;;  %v17947_v9 = vld [vmem:[#allocation25_spill] sm:$0xff] }
 0x360   : > { %12404 = vmatprep.mubr.msk.bf16.mxu0 %vm17940_vm14, %v14893_v8  ;;  %v4979_v50 = vpop.f32.mrb[161].mxu0  ;;  %v4792_v47 = vsel %vm17944_vm15, %v4701_v52, 0.0  ;;  %v4704_v22 = vpop.f32.mrb[159].mxu1  ;;  %v15157_v8 = vadd.f32 %v12187_v54, %v12153_v37  ;;  %vm17945_vm14 = vmmov %vm17909_vm0  ;;  %vm17948_vm13 = vnez %v17947_v9  ;;  %v7065_v52 = vld [vmem:[#allocation3 + $0x30] sm:$0xff] }
 0x361   : > { %v12191_v6 = vpop.f32.mrb[162].mxu0  ;;  %v15155_v3 = vadd.f32 %v4963_v59, %v4792_v47  ;;  %v15159_v10 = vadd.f32 %v4966_v33, %v4704_v22  ;;  %v7082_v59 = vshrl.u32 %v7062_v20, 16  ;;  %v7105_v5 = vshll.u32 %v7065_v52, 16 }
 0x362   : > { %v4982_v38 = vpop.f32.mrb[163].mxu0 }
 0x363   : > { %v7087_v22 = vor.u32 %v7086_v60, %v7082_v59  ;;  %v17955_v60 = vld [vmem:[#allocation29_spill] sm:$0xff] }
 0x364   : > { %vm17956_vm15 = vnez %v17955_v60 }
 0x365   : > { %12367 = vmatmul.mubr.msk.bf16.gmra.mrb[8].mxu1 %vm17945_vm14, %v14800_v15 }
 0x366   : > { %12370 = vmatprep.mubr.msk.bf16.mxu1 %vm17946_vm3, %v14942_v39  ;;  %v17949_v39 = vld [vmem:[#allocation26_spill] sm:$0xff]  ;;  %vm17952_vm3 = vsmask.f32 256 }
 0x367   : > { %12405 = vmatmul.mubr.msk.bf16.gmra.mrb[12].mxu0 %vm17909_vm0, %v15140_v31  ;;  %vm17950_vm14 = vnez %v17949_v39  ;;  %v6555_v20 = vsel %vm17952_vm3, %v14928_v42, %v6554_v45  ;;  %v7107_v42 = vrot.slane %v7105_v5, 1  ;;  %vm17964_vm3 = vmmov %vm17909_vm0 }
 0x368   : > { %v12156_v57 = vpop.f32.mrb[160].mxu1  ;;  %v12194_v40 = vpop.f32.mrb[164].mxu0 }
 0x369   : > { %v4717_v23 = vpop.f32.mrb[161].mxu1  ;;  %v4798_v11 = vsel %vm17948_vm13, %v12156_v57, 0.0  ;;  %v4995_v15 = vpop.f32.mrb[165].mxu0  ;;  %vm17953_vm13 = vsmask.f32 7424  ;;  %v7093_v57 = vshrl.u32 %v7063_v44, 16 }
 0x36a   : > { %v12157_v28 = vpop.f32.mrb[162].mxu1  ;;  %v15174_v26 = vadd.f32 %v12190_v55, %v4798_v11  ;;  %v4796_v54 = vsel %vm17950_vm14, %v4717_v23, 0.0  ;;  %v12195_v12 = vpop.f32.mrb[166].mxu0  ;;  %v7092_v55 = vsel %vm17953_vm13, %v7087_v22, %v7091_v19  ;;  %vm17954_vm14 = vmmov %vm17909_vm0 }
 0x36b   : > { %v4720_v33 = vpop.f32.mrb[163].mxu1  ;;  %v15178_v62 = vadd.f32 %v4979_v50, %v4796_v54  ;;  %v15180_v37 = vadd.f32 %v12191_v6, %v12157_v28  ;;  %v4998_v47 = vpop.f32.mrb[167].mxu0  ;;  %v7099_v50 = vrot.slane %v7097_v61, 1  ;;  %v7095_v6 = vor.u32 %v7093_v57, %v7091_v19  ;;  %v7066_v28 = vld [vmem:[#allocation3 + $0x38] sm:$0xff] }
 0x36c   : > { %v15182_v14 = vadd.f32 %v4982_v38, %v4720_v33  ;;  %v7101_v33 = vshrl.u32 %v7064_v17, 16  ;;  %v7113_v60 = vshll.u32 %v7066_v28, 16 }
 0x36d   : > { %12371 = vmatmul.mubr.msk.bf16.gmra.mrb[12].mxu1 %vm17909_vm0, %v6555_v20  ;;  %v17958_v20 = vld [vmem:[#allocation30_spill] sm:$0xff] }
 0x36e   : > { %17951 = vst [vmem:[#allocation7_spill] sm:$0xff] %v15182_v14  ;;  %12410 = vmatprep.mubr.msk.bf16.mxu1 %vm17954_vm14, %v7092_v55  ;;  %vm17959_vm13 = vnez %v17958_v20  ;;  %v7067_v55 = vld [vmem:[#allocation3 + $0x40] sm:$0xff]  ;;  %v7103_v58 = vor.u32 %v7101_v33, %v7099_v50  ;;  %vm17963_vm14 = vsmask.f32 7424  ;;  %v7117_v20 = vshrl.u32 %v7066_v28, 16 }
 0x36f   : > { %v7100_v17 = vsel %vm17963_vm14, %v7095_v6, %v7099_v50  ;;  %vm17965_vm0 = vmmov %vm17963_vm14 }
 0x370   : > { %v12160_v23 = vpop.f32.mrb[164].mxu1 }
 0x371   : > { %v4733_v11 = vpop.f32.mrb[165].mxu1  ;;  %v4802_v38 = vsel %vm17956_vm15, %v12160_v23, 0.0  ;;  %v12198_v59 = vpop.f32.mrb[168].mxu0 }
 0x372   : > { %v12161_v54 = vpop.f32.mrb[166].mxu1  ;;  %v15191_v45 = vadd.f32 %v12194_v40, %v4802_v38  ;;  %v4800_v22 = vsel %vm17959_vm13, %v4733_v11, 0.0  ;;  %v5011_v44 = vpop.f32.mrb[169].mxu0  ;;  %v7108_v40 = vsel %vm17965_vm0, %v7103_v58, %v7107_v42  ;;  %v7121_v11 = vshll.u32 %v7067_v55, 16  ;;  %vm17966_vm13 = vmmov %vm17964_vm3  ;;  %v17970_v58 = vld [vmem:[#allocation34_spill] sm:$0xff] }
 0x373   : > { %v4736_v48 = vpop.f32.mrb[167].mxu1  ;;  %v15195_v61 = vadd.f32 %v4995_v15, %v4800_v22  ;;  %v15197_v19 = vadd.f32 %v12195_v12, %v12161_v54  ;;  %v12199_v57 = vpop.f32.mrb[170].mxu0  ;;  %v7109_v38 = vshrl.u32 %v7065_v52, 16  ;;  %v7115_v15 = vrot.slane %v7113_v60, 1  ;;  %v7068_v54 = vld [vmem:[#allocation3 + $0x48] sm:$0xff] }
 0x374   : > { %17957 = vst [vmem:[#allocation39_spill] sm:$0xff] %v15191_v45  ;;  %v15199_v23 = vadd.f32 %v4998_v47, %v4736_v48  ;;  %v5014_v5 = vpop.f32.mrb[171].mxu0  ;;  %v7123_v48 = vrot.slane %v7121_v11, 1  ;;  %v17967_v47 = vld [vmem:[#allocation33_spill] sm:$0xff]  ;;  %vm17971_vm14 = vnez %v17970_v58  ;;  %v7125_v58 = vshrl.u32 %v7067_v55, 16 }
 0x375   : > { %17960 = vst [vmem:[#allocation8_spill] sm:$0xff] %v15195_v61  ;;  %17961 = vst [vmem:[#allocation40_spill] sm:$0xff] %v15197_v19  ;;  %12411 = vmatmul.mubr.msk.bf16.vlgmr.msra.gmra.mrb[16].mxu1 %vm17964_vm3, %v7100_v17  ;;  %v7111_v22 = vor.u32 %v7109_v38, %v7107_v42  ;;  %vm17968_vm15 = vnez %v17967_v47  ;;  %v7069_v17 = vld [vmem:[#allocation3 + $0x50] sm:$0xff]  ;;  %v7119_v42 = vor.u32 %v7117_v20, %v7115_v15  ;;  %v7129_v38 = vshll.u32 %v7068_v54, 16 }
 0x376   : > { %17962 = vst [vmem:[#allocation41_spill] sm:$0xff] %v15199_v23  ;;  %12414 = vmatprep.mubr.msk.bf16.mxu1 %vm17966_vm13, %v7108_v40  ;;  %vm17974_vm13 = vmmov %vm17965_vm0  ;;  %v7127_v20 = vor.u32 %v7125_v58, %v7123_v48 }
 0x377   : > { %v7116_v28 = vsel %vm17974_vm13, %v7111_v22, %v7115_v15  ;;  %v17977_v15 = vld [vmem:[#allocation37_spill] sm:$0xff] }
 0x378   : > { %v12164_v12 = vpop.f32.mrb[168].mxu1  ;;  %vm17978_vm13 = vnez %v17977_v15 }
 0x379   : > { %v4749_v19 = vpop.f32.mrb[169].mxu1  ;;  %v12202_v33 = vpop.f32.mrb[172].mxu0  ;;  %v4806_v50 = vsel %vm17968_vm15, %v12164_v12, 0.0 }
 0x37a   : > { %v12165_v6 = vpop.f32.mrb[170].mxu1  ;;  %v5027_v23 = vpop.f32.mrb[173].mxu0  ;;  %v15207_v61 = vadd.f32 %v12198_v59, %v4806_v50  ;;  %v4804_v52 = vsel %vm17971_vm14, %v4749_v19, 0.0  ;;  %v7124_v59 = vsel %vm17965_vm0, %v7119_v42, %v7123_v48  ;;  %v7137_v50 = vshll.u32 %v7069_v17, 16  ;;  %vm17976_vm14 = vmmov %vm17964_vm3 }
 0x37b   : > { %v4752_v40 = vpop.f32.mrb[171].mxu1  ;;  %v12203_v60 = vpop.f32.mrb[174].mxu0  ;;  %v15211_v45 = vadd.f32 %v5011_v44, %v4804_v52  ;;  %v15213_v14 = vadd.f32 %v12199_v57, %v12165_v6  ;;  %v7131_v19 = vrot.slane %v7129_v38, 1  ;;  %v7070_v44 = vld [vmem:[#allocation3 + $0x58] sm:$0xff]  ;;  %v7133_v6 = vshrl.u32 %v7068_v54, 16 }
 0x37c   : > { %17969 = vst [vmem:[#allocation42_spill] sm:$0xff] %v15207_v61  ;;  %v5030_v11 = vpop.f32.mrb[175].mxu0  ;;  %v15216_v12 = vadd.f32 %v5014_v5, %v4752_v40  ;;  %v7145_v58 = vshll.u32 %v7070_v44, 16  ;;  %v7141_v42 = vshrl.u32 %v7069_v17, 16  ;;  %v7073_v17 = vld [vmem:[#allocation3 + $0x70] sm:$0xff] }
 0x37d   : > { %17972 = vst [vmem:[#allocation43_spill] sm:$0xff] %v15211_v45  ;;  %17973 = vst [vmem:[#allocation44_spill] sm:$0xff] %v15213_v14  ;;  %12415 = vmatmul.mubr.msk.bf16.gmra.mrb[20].mxu1 %vm17964_vm3, %v7116_v28  ;;  %v7139_v14 = vrot.slane %v7137_v50, 1  ;;  %v7071_v28 = vld [vmem:[#allocation3 + $0x60] sm:$0xff]  ;;  %v7135_v48 = vor.u32 %v7133_v6, %v7131_v19  ;;  %v7072_v6 = vld [vmem:[#allocation3 + $0x68] sm:$0xff] }
 0x37e   : > { %17975 = vst [vmem:[#allocation45_spill] sm:$0xff] %v15216_v12  ;;  %12418 = vmatprep.mubr.msk.bf16.mxu1 %vm17976_vm14, %v7124_v59  ;;  %vm17980_vm14 = vmmov %vm17965_vm0 }
 0x37f   : > { %v7132_v54 = vsel %vm17980_vm14, %v7127_v20, %v7131_v19  ;;  %v7143_v15 = vor.u32 %v7141_v42, %v7139_v14 }
 0x380   : > { %v12168_v47 = vpop.f32.mrb[172].mxu1 }
 0x381   : > { %v4765_v52 = vpop.f32.mrb[173].mxu1  ;;  %v12242_v57 = vpop.f32.mrb[176].mxu0  ;;  %v4810_v5 = vsel %vm17978_vm13, %v12168_v47, 0.0 }
 0x382   : > { %v12169_v22 = vpop.f32.mrb[174].mxu1  ;;  %v5647_v40 = vpop.f32.mrb[177].mxu0  ;;  %v15223_v12 = vadd.f32 %v12202_v33, %v4810_v5  ;;  %v4808_v55 = vsel %vm14028_vm7, %v4765_v52, 0.0  ;;  %v7140_v33 = vsel %vm17965_vm0, %v7135_v48, %v7139_v14  ;;  %v7153_v5 = vshll.u32 %v7071_v28, 16  ;;  %vm17982_vm7 = vmmov %vm17964_vm3 }
 0x383   : > { %v4768_v59 = vpop.f32.mrb[175].mxu1  ;;  %v12243_v38 = vpop.f32.mrb[178].mxu0  ;;  %v15227_v45 = vadd.f32 %v5027_v23, %v4808_v55  ;;  %v15229_v61 = vadd.f32 %v12203_v60, %v12169_v22  ;;  %v7147_v52 = vrot.slane %v7145_v58, 1  ;;  %v7149_v55 = vshrl.u32 %v7070_v44, 16 }
 0x384   : > { %v5650_v50 = vpop.f32.mrb[179].mxu0  ;;  %v15232_v47 = vadd.f32 %v5030_v11, %v4768_v59  ;;  %v7155_v19 = vrot.slane %v7153_v5, 1  ;;  %v5776_v11 = vsel %vm17919_vm12, %v12242_v57, 0.0  ;;  %v5774_v58 = vsel %vm17922_vm11, %v5647_v40, 0.0  ;;  %vm17987_vm11 = vmmov %vm17964_vm3 }
 0x385   : > { %12419 = vmatmul.mubr.msk.bf16.gmra.mrb[24].mxu1 %vm17964_vm3, %v7132_v54  ;;  %v7161_v54 = vshll.u32 %v7072_v6, 16 }
 0x386   : > { %17981 = vst [vmem:[#allocation46_spill] sm:$0xff] %v15232_v47  ;;  %12422 = vmatprep.mubr.msk.bf16.mxu1 %vm17982_vm7, %v7140_v33  ;;  %v17983_v33 = vld [vmem:[#allocation11_spill] sm:$0xff]  ;;  %vm17984_vm7 = vmmov %vm17965_vm0 }
 0x387   : > { %v7148_v5 = vsel %vm17984_vm7, %v7143_v15, %v7147_v52  ;;  %vm17989_vm7 = vmmov %vm17965_vm0 }
 0x388   : > { %v12208_v23 = vpop.f32.mrb[176].mxu1 }
 0x389   : > { %v5471_v60 = vadd.f32 %v12208_v23, %v15086_v7  ;;  %v5310_v22 = vpop.f32.mrb[177].mxu1  ;;  %v7151_v23 = vor.u32 %v7149_v55, %v7147_v52  ;;  %v7169_v55 = vshll.u32 %v7073_v17, 16  ;;  %v7074_v52 = vld [vmem:[#allocation3 + $0x78] sm:$0xff] }
 0x38a   : > { %v5469_v20 = vadd.f32 %v5310_v22, %v15092_v2  ;;  %v12246_v59 = vpop.f32.mrb[180].mxu0  ;;  %v12209_v48 = vpop.f32.mrb[178].mxu1  ;;  %v17985_v2 = vld [vmem:[#allocation12_spill] sm:$0xff] }
 0x38b   : > { %v5440_v14 = vsel %vm17701_vm10, %v12209_v48, 0.0  ;;  %v5663_v42 = vpop.f32.mrb[181].mxu0  ;;  %v5313_v7 = vpop.f32.mrb[179].mxu1  ;;  %v15245_v44 = vadd.f32 %v5776_v11, %v5471_v60  ;;  %vm17986_vm14 = vnez %v17985_v2  ;;  %v7156_v48 = vsel %vm17965_vm0, %v7151_v23, %v7155_v19 }
 0x38c   : > { %v5472_v57 = vadd.f32 %v5440_v14, %v15094_v51  ;;  %v5438_v22 = vsel %vm17986_vm14, %v5313_v7, 0.0  ;;  %v12247_v0 = vpop.f32.mrb[182].mxu0  ;;  %v15251_v47 = vadd.f32 %v5774_v58, %v5469_v20  ;;  %v7157_v60 = vshrl.u32 %v7071_v28, 16 }
 0x38d   : > { %v5470_v40 = vadd.f32 %v5438_v22, %v15096_v34  ;;  %v5666_v32 = vpop.f32.mrb[183].mxu0  ;;  %12423 = vmatmul.mubr.msk.bf16.gmra.mrb[28].mxu1 %vm17964_vm3, %v7148_v5  ;;  %v7163_v51 = vrot.slane %v7161_v54, 1  ;;  %v7165_v7 = vshrl.u32 %v7072_v6, 16  ;;  %v7171_v22 = vrot.slane %v7169_v55, 1 }
 0x38e   : > { %12426 = vmatprep.mubr.msk.bf16.mxu1 %vm17987_vm11, %v7156_v48  ;;  %v15257_v15 = vadd.f32 %v12243_v38, %v5472_v57  ;;  %v7159_v14 = vor.u32 %v7157_v60, %v7155_v19  ;;  %v5780_v23 = vsel %vm17928_vm5, %v12246_v59, 0.0  ;;  %v7177_v38 = vshll.u32 %v7074_v52, 16  ;;  %v7075_v57 = vld [vmem:[#allocation3 + $0x80] sm:$0xff] }
 0x38f   : > { %v15259_v11 = vadd.f32 %v5650_v50, %v5470_v40  ;;  %v5778_v50 = vsel %vm17930_vm6, %v5663_v42, 0.0  ;;  %vm17988_vm11 = vnez %v17704_v49  ;;  %v7167_v40 = vor.u32 %v7165_v7, %v7163_v51  ;;  %vm17990_vm6 = vmmov %vm17964_vm3 }
 0x390   : > { %v12212_v20 = vpop.f32.mrb[180].mxu1  ;;  %v7164_v55 = vsel %vm17989_vm7, %v7159_v14, %v7163_v51  ;;  %v7185_v7 = vshll.u32 %v7075_v57, 16  ;;  %vm18010_vm5 = vnez %v17949_v39 }
 0x391   : > { %v5475_v58 = vadd.f32 %v12212_v20, %v15108_v35  ;;  %v5326_v34 = vpop.f32.mrb[181].mxu1 }
 0x392   : > { %v5473_v28 = vadd.f32 %v5326_v34, %v15112_v13  ;;  %v12250_v5 = vpop.f32.mrb[184].mxu0  ;;  %v12213_v48 = vpop.f32.mrb[182].mxu1 }
 0x393   : > { %v5444_v19 = vsel %vm17988_vm11, %v12213_v48, 0.0  ;;  %v5679_v54 = vpop.f32.mrb[185].mxu0  ;;  %v5329_v35 = vpop.f32.mrb[183].mxu1  ;;  %v15269_v6 = vadd.f32 %v5780_v23, %v5475_v58  ;;  %v7172_v48 = vsel %vm17965_vm0, %v7167_v40, %v7171_v22  ;;  %v7173_v58 = vshrl.u32 %v7073_v17, 16 }
 0x394   : > { %v5476_v59 = vadd.f32 %v5444_v19, %v15114_v43  ;;  %v5442_v13 = vsel %vm17707_vm8, %v5329_v35, 0.0  ;;  %v12251_v60 = vpop.f32.mrb[186].mxu0  ;;  %v15275_v20 = vadd.f32 %v5778_v50, %v5473_v28  ;;  %v7179_v43 = vrot.slane %v7177_v38, 1 }
 0x395   : > { %v5474_v42 = vadd.f32 %v5442_v13, %v15116_v63  ;;  %v5682_v34 = vpop.f32.mrb[187].mxu0  ;;  %12427 = vmatmul.mubr.msk.bf16.gmra.mrb[32].mxu1 %vm17964_vm3, %v7164_v55  ;;  %v7175_v23 = vor.u32 %v7173_v58, %v7171_v22  ;;  %v7181_v63 = vshrl.u32 %v7074_v52, 16  ;;  %v7187_v35 = vrot.slane %v7185_v7, 1 }
 0x396   : > { %12430 = vmatprep.mubr.msk.bf16.mxu1 %vm17990_vm6, %v7172_v48  ;;  %v15281_v51 = vadd.f32 %v12247_v0, %v5476_v59  ;;  %v5784_v55 = vsel %vm17935_vm2, %v12250_v5, 0.0  ;;  %v5782_v0 = vsel %vm17937_vm1, %v5679_v54, 0.0  ;;  %vm17991_vm6 = vmmov %vm17965_vm0  ;;  %v17992_v5 = vld [vmem:[#allocation20_spill] sm:$0xff]  ;;  %vm18006_vm2 = vcmask 1043456  }
 0x397   : > { %v15283_v14 = vadd.f32 %v5666_v32, %v5474_v42  ;;  %v7183_v59 = vor.u32 %v7181_v63, %v7179_v43  ;;  %v7180_v52 = vsel %vm17991_vm6, %v7175_v23, %v7179_v43  ;;  %vm17993_vm7 = vnez %v17992_v5  ;;  %vm17994_vm1 = vmmov %vm17964_vm3  ;;  %v7078_v43 = vld [vmem:[#allocation3 + $0x98] sm:$0x1] }
 0x398   : > { %v12216_v19 = vpop.f32.mrb[184].mxu1 }
 0x399   : > { %v5479_v28 = vadd.f32 %v12216_v19, %v15128_v21  ;;  %v5342_v50 = vpop.f32.mrb[185].mxu1  ;;  %v7188_v19 = vsel %vm17965_vm0, %v7183_v59, %v7187_v35  ;;  %v17997_v59 = vld [vmem:[#allocation23_spill] sm:$0xff] }
 0x39a   : > { %v5477_v40 = vadd.f32 %v5342_v50, %v15132_v18  ;;  %v12254_v17 = vpop.f32.mrb[188].mxu0  ;;  %v12217_v13 = vpop.f32.mrb[186].mxu1  ;;  %v7189_v50 = vshrl.u32 %v7075_v57, 16  ;;  %vm17998_vm6 = vnez %v17997_v59 }
 0x39b   : > { %v5448_v32 = vsel %vm17709_vm9, %v12217_v13, 0.0  ;;  %v5695_v22 = vpop.f32.mrb[189].mxu0  ;;  %v5345_v38 = vpop.f32.mrb[187].mxu1  ;;  %v15293_v21 = vadd.f32 %v5784_v55, %v5479_v28 }
 0x39c   : > { %v5480_v42 = vadd.f32 %v5448_v32, %v15134_v53  ;;  %v5446_v18 = vsel %vm17993_vm7, %v5345_v38, 0.0  ;;  %v12255_v48 = vpop.f32.mrb[190].mxu0  ;;  %v15299_v7 = vadd.f32 %v5782_v0, %v5477_v40  ;;  %v7191_v23 = vor.u32 %v7189_v50, %v7187_v35 }
 0x39d   : > { %v5478_v54 = vadd.f32 %v5446_v18, %v15136_v30  ;;  %v5698_v58 = vpop.f32.mrb[191].mxu0  ;;  %12431 = vmatmul.mubr.msk.bf16.gmra.mrb[36].mxu1 %vm17964_vm3, %v7180_v52  ;;  %v17995_v30 = vshll.u32 %v15140_v31, 16  ;;  %v5788_v0 = vsel %vm17942_vm4, %v12254_v17, 0.0  ;;  %vm17999_vm3 = vmmov %vm17965_vm0 }
 0x39e   : > { %12434 = vmatprep.mubr.msk.bf16.mxu1 %vm17994_vm1, %v7188_v19  ;;  %v15305_v28 = vadd.f32 %v12251_v60, %v5480_v42  ;;  %v7209_v60 = vshll.u32 %v7078_v43, 16  ;;  %vm17996_vm1 = vnez %v17943_v25  ;;  %v7196_v18 = vsel %vm17999_vm3, %v7191_v23, %v14960_v36  ;;  %vm18003_vm4 = vmmov %vm17999_vm3  ;;  %v7648_v23 = vld [vmem:[%s17252_s6] sm:$0xf] }
 0x39f   : > { %v15307_v53 = vadd.f32 %v5682_v34, %v5478_v54  ;;  %v7203_v13 = vrot.slane %v17995_v30, 1  ;;  %v5786_v34 = vsel %vm17996_vm1, %v5695_v22, 0.0  ;;  %v18000_v54 = vld [vmem:[#allocation24_spill] sm:$0xff]  ;;  %vm18002_vm1 = vcmask 64512   ;;  %12759 = vmatprep.subr.msk.bf16.mxu0 %vm18006_vm2, %v7648_v23 }
 0x3a0   : > { %v12220_v63 = vpop.f32.mrb[188].mxu1  ;;  %vm18001_vm0 = vnez %v18000_v54  ;;  %v7211_v36 = vrot.slane %v7209_v60, 1  ;;  %vm18005_vm3 = vmmov %vm18002_vm1 }
 0x3a1   : > { %v5483_v55 = vadd.f32 %v12220_v63, %v15151_v16  ;;  %v5358_v40 = vpop.f32.mrb[189].mxu1  ;;  %v7204_v63 = vsel %vm18003_vm4, %v14963_v27, %v7203_v13  ;;  %vm18008_vm4 = vnez %v17947_v9  ;;  %v18029_v9 = vld [vmem:[#allocation42_spill] sm:$0xff] }
 0x3a2   : > { %v5481_v57 = vadd.f32 %v5358_v40, %v15155_v3  ;;  %v12258_v32 = vpop.f32.mrb[192].mxu0  ;;  %v12221_v38 = vpop.f32.mrb[190].mxu1 }
 0x3a3   : > { %v5452_v35 = vsel %vm17998_vm6, %v12221_v38, 0.0  ;;  %v5711_v52 = vpop.f32.mrb[193].mxu0  ;;  %v5361_v16 = vpop.f32.mrb[191].mxu1  ;;  %v15319_v42 = vadd.f32 %v5788_v0, %v5483_v55  ;;  %v18004_v55 = vshrl.u32 %v15140_v31, 16 }
 0x3a4   : > { %v5484_v17 = vadd.f32 %v5452_v35, %v15157_v8  ;;  %v5450_v3 = vsel %vm18001_vm0, %v5361_v16, 0.0  ;;  %v12259_v19 = vpop.f32.mrb[194].mxu0  ;;  %v15326_v50 = vadd.f32 %v5786_v34, %v5481_v57  ;;  %v18011_v34 = vld [vmem:[#allocation27_spill] sm:$0xff] }
 0x3a5   : > { %v5482_v22 = vadd.f32 %v5450_v3, %v15159_v10  ;;  %v5714_v43 = vpop.f32.mrb[195].mxu0  ;;  %12435 = vmatmul.mubr.msk.bf16.gmra.mrb[40].mxu1 %vm18002_vm1, %v7196_v18  ;;  %v7207_v40 = vor.u32 %v7203_v13, %v18004_v55  ;;  %vm18007_vm1 = vmmov %vm18006_vm2  ;;  %v5792_v13 = vsel %vm18008_vm4, %v12258_v32, 0.0  ;;  %vm18012_vm2 = vnez %v18011_v34  ;;  %v18013_v3 = vld [vmem:[#allocation28_spill] sm:$0xff] }
 0x3a6   : > { %12438 = vmatprep.mubr.msk.bf16.mxu1 %vm18005_vm3, %v7204_v63  ;;  %v15335_v8 = vadd.f32 %v12255_v48, %v5484_v17  ;;  %v7830_v10 = vsel %vm18007_vm1, %v7648_v23, 0  ;;  %vm18009_vm3 = vsmask.f32 7424  ;;  %vm18014_vm1 = vnez %v18013_v3 }
 0x3a7   : > { %v15340_v30 = vadd.f32 %v5698_v58, %v5482_v22  ;;  %12443 = vmatpush3.bf16.msra.mxu0 %v7830_v10  ;;  %v7212_v48 = vsel %vm18009_vm3, %v7207_v40, %v7211_v36  ;;  %v5790_v58 = vsel %vm18010_vm5, %v5711_v52, 0.0  ;;  %vm18016_vm3 = vcmask 64512   ;;  %v18017_v10 = vld [vmem:[#allocation39_spill] sm:$0xff] }
 0x3a8   : > { %v12224_v0 = vpop.f32.mrb[192].mxu1 }
 0x3a9   : > { %v5487_v27 = vadd.f32 %v12224_v0, %v15174_v26  ;;  %v5374_v31 = vpop.f32.mrb[193].mxu1 }
 0x3aa   : > { %v5485_v57 = vadd.f32 %v5374_v31, %v15178_v62  ;;  %v12262_v38 = vpop.f32.mrb[196].mxu0  ;;  %v12225_v60 = vpop.f32.mrb[194].mxu1  ;;  %v18015_v62 = vld [vmem:[#allocation7_spill] sm:$0xff] }
 0x3ab   : > { %v5456_v35 = vsel %vm18012_vm2, %v12225_v60, 0.0  ;;  %v5727_v16 = vpop.f32.mrb[197].mxu0  ;;  %v5377_v18 = vpop.f32.mrb[195].mxu1  ;;  %v15353_v17 = vadd.f32 %v5792_v13, %v5487_v27  ;;  %v18020_v13 = vld [vmem:[#allocation8_spill] sm:$0xff] }
 0x3ac   : > { %v5488_v26 = vadd.f32 %v5456_v35, %v15180_v37  ;;  %v5454_v32 = vsel %vm18014_vm1, %v5377_v18, 0.0  ;;  %v12263_v22 = vpop.f32.mrb[198].mxu0  ;;  %v15358_v63 = vadd.f32 %v5790_v58, %v5485_v57  ;;  %v18018_v37 = vld [vmem:[#allocation29_spill] sm:$0xff]  ;;  %v18021_v35 = vld [vmem:[#allocation30_spill] sm:$0xff] }
 0x3ad   : > { %v5486_v55 = vadd.f32 %v5454_v32, %v18015_v62  ;;  %v5730_v40 = vpop.f32.mrb[199].mxu0  ;;  %12439 = vmatmul.mubr.msk.bf16.gmra.mrb[44].mxu1 %vm18016_vm3, %v7212_v48  ;;  %vm18019_vm5 = vnez %v18018_v37  ;;  %vm18022_vm4 = vnez %v18021_v35  ;;  %v18023_v32 = vld [vmem:[#allocation31_spill] sm:$0xff]  ;;  %v18025_v62 = vld [vmem:[#allocation40_spill] sm:$0xff] }
 0x3ae   : > { %v15362_v52 = vadd.f32 %v12259_v19, %v5488_v26  ;;  %v5796_v31 = vsel %vm18019_vm5, %v12262_v38, 0.0  ;;  %v5794_v18 = vsel %vm18022_vm4, %v5727_v16, 0.0  ;;  %vm18024_vm3 = vnez %v18023_v32 }
 0x3af   : > { %v15364_v36 = vadd.f32 %v5714_v43, %v5486_v55 }
 0x3b0   : > { %v12228_v23 = vpop.f32.mrb[196].mxu1 }
 0x3b1   : > { %v5491_v0 = vadd.f32 %v12228_v23, %v18017_v10  ;;  %v5390_v27 = vpop.f32.mrb[197].mxu1  ;;  %v18026_v23 = vld [vmem:[#allocation32_spill] sm:$0xff] }
 0x3b2   : > { %v5489_v60 = vadd.f32 %v5390_v27, %v18020_v13  ;;  %v12266_v57 = vpop.f32.mrb[200].mxu0  ;;  %v12229_v58 = vpop.f32.mrb[198].mxu1  ;;  %vm18027_vm12 = vnez %v18026_v23  ;;  %v18028_v27 = vld [vmem:[#allocation41_spill] sm:$0xff] }
 0x3b3   : > { %v5460_v19 = vsel %vm18024_vm3, %v12229_v58, 0.0  ;;  %v5743_v48 = vpop.f32.mrb[201].mxu0  ;;  %v5393_v43 = vpop.f32.mrb[199].mxu1  ;;  %v15374_v26 = vadd.f32 %v5796_v31, %v5491_v0 }
 0x3b4   : > { %v5492_v55 = vadd.f32 %v5460_v19, %v18025_v62  ;;  %v5458_v10 = vsel %vm18027_vm12, %v5393_v43, 0.0  ;;  %v12267_v38 = vpop.f32.mrb[202].mxu0  ;;  %v15379_v37 = vadd.f32 %v5794_v18, %v5489_v60  ;;  %v5800_v19 = vsel %vm17968_vm15, %v12266_v57, 0.0  ;;  %v18031_v62 = vld [vmem:[#allocation43_spill] sm:$0xff]  ;;  %v18032_v60 = vld [vmem:[#allocation34_spill] sm:$0xff] }
 0x3b5   : > { %v5490_v13 = vadd.f32 %v5458_v10, %v18028_v27  ;;  %v5746_v39 = vpop.f32.mrb[203].mxu0  ;;  %vm18033_vm4 = vnez %v18032_v60  ;;  %v18034_v10 = vld [vmem:[#allocation35_spill] sm:$0xff] }
 0x3b6   : > { %v15382_v35 = vadd.f32 %v12263_v22, %v5492_v55  ;;  %v5798_v18 = vsel %vm18033_vm4, %v5743_v48, 0.0  ;;  %vm18035_vm5 = vnez %v18034_v10 }
 0x3b7   : > { %v15384_v16 = vadd.f32 %v5730_v40, %v5490_v13  ;;  %v18036_v13 = vld [vmem:[#allocation44_spill] sm:$0xff] }
 0x3b8   : > { %v12232_v58 = vpop.f32.mrb[200].mxu1 }
 0x3b9   : > { %v5495_v25 = vadd.f32 %v12232_v58, %v18029_v9  ;;  %v5406_v0 = vpop.f32.mrb[201].mxu1  ;;  %v18037_v58 = vld [vmem:[#allocation36_spill] sm:$0xff] }
 0x3ba   : > { %v5493_v41 = vadd.f32 %v5406_v0, %v18031_v62  ;;  %v12270_v43 = vpop.f32.mrb[204].mxu0  ;;  %v12233_v4 = vpop.f32.mrb[202].mxu1  ;;  %vm18038_vm12 = vnez %v18037_v58  ;;  %v18039_v0 = vld [vmem:[#allocation45_spill] sm:$0xff] }
 0x3bb   : > { %v5464_v22 = vsel %vm18035_vm5, %v12233_v4, 0.0  ;;  %v5759_v55 = vpop.f32.mrb[205].mxu0  ;;  %v5409_v40 = vpop.f32.mrb[203].mxu1  ;;  %v15394_v27 = vadd.f32 %v5800_v19, %v5495_v25 }
 0x3bc   : > { %v5496_v9 = vadd.f32 %v5464_v22, %v18036_v13  ;;  %v5462_v31 = vsel %vm18038_vm12, %v5409_v40, 0.0  ;;  %v12271_v57 = vpop.f32.mrb[206].mxu0  ;;  %v15399_v1 = vadd.f32 %v5798_v18, %v5493_v41  ;;  %v5804_v22 = vsel %vm17978_vm13, %v12270_v43, 0.0  ;;  %v18042_v41 = vld [vmem:[#allocation38_spill] sm:$0xff] }
 0x3bd   : > { %v5494_v62 = vadd.f32 %v5462_v31, %v18039_v0  ;;  %v5762_v46 = vpop.f32.mrb[207].mxu0  ;;  %vm18043_vm4 = vnez %v18042_v41  ;;  %v18044_v31 = vld [vmem:[#allocation5_spill] sm:$0xff] }
 0x3be   : > { %v15402_v60 = vadd.f32 %v12267_v38, %v5496_v9  ;;  %v5802_v18 = vsel %vm18043_vm4, %v5759_v55, 0.0  ;;  %vm18045_vm15 = vnez %v18044_v31 }
 0x3bf   : > { %v15404_v48 = vadd.f32 %v5746_v39, %v5494_v62  ;;  %v18046_v62 = vld [vmem:[#allocation6_spill] sm:$0xff] }
 0x3c0   : > { %v12236_v4 = vpop.f32.mrb[204].mxu1  ;;  %vm18047_vm12 = vnez %v18046_v62 }
 0x3c1   : > { %18040 = vst [vmem:[#allocation11_spill] sm:$0xff] %v15404_v48  ;;  %v5499_v56 = vadd.f32 %v12236_v4, %v15223_v12  ;;  %v5422_v25 = vpop.f32.mrb[205].mxu1 }
 0x3c2   : > { %v5497_v13 = vadd.f32 %v5422_v25, %v15227_v45  ;;  %v12310_v40 = vpop.f32.mrb[208].mxu0  ;;  %v12237_v58 = vpop.f32.mrb[206].mxu1  ;;  %v18048_v45 = vld [vmem:[#allocation46_spill] sm:$0xff] }
 0x3c3   : > { %v5468_v38 = vsel %vm18045_vm15, %v12237_v58, 0.0  ;;  %v6304_v9 = vpop.f32.mrb[209].mxu0  ;;  %v5425_v39 = vpop.f32.mrb[207].mxu1  ;;  %v15414_v0 = vadd.f32 %v5804_v22, %v5499_v56 }
 0x3c4   : > { %v5500_v12 = vadd.f32 %v5468_v38, %v15229_v61  ;;  %v5466_v4 = vsel %vm18047_vm12, %v5425_v39, 0.0  ;;  %v12311_v43 = vpop.f32.mrb[210].mxu0  ;;  %v15419_v19 = vadd.f32 %v5802_v18, %v5497_v13 }
 0x3c5   : > { %v5498_v25 = vadd.f32 %v5466_v4, %v18048_v45  ;;  %v6307_v48 = vpop.f32.mrb[211].mxu0 }
 0x3c6   : > { %v15422_v41 = vadd.f32 %v12271_v57, %v5500_v12  ;;  %v6434_v57 = vsel %vm17701_vm10, %v12311_v43, 0.0 }
 0x3c7   : > { %v15424_v55 = vadd.f32 %v5762_v46, %v5498_v25 }
 0x3c8   : > { %v12276_v58 = vpop.f32.mrb[208].mxu1 }
 0x3c9   : > { %v6038_v31 = vadd.f32 %v12276_v58, %v15245_v44  ;;  %v5909_v56 = vpop.f32.mrb[209].mxu1  ;;  %v6432_v44 = vsel %vm17986_vm14, %v6307_v48, 0.0 }
 0x3ca   : > { %v6036_v22 = vadd.f32 %v5909_v56, %v15251_v47  ;;  %v12314_v61 = vpop.f32.mrb[212].mxu0  ;;  %v12277_v38 = vpop.f32.mrb[210].mxu1 }
 0x3cb   : > { %v15428_v62 = vadd.f32 %v12310_v40, %v6038_v31  ;;  %v6039_v13 = vadd.f32 %v12277_v38, %v15257_v15  ;;  %v6320_v18 = vpop.f32.mrb[213].mxu0  ;;  %v5912_v39 = vpop.f32.mrb[211].mxu1 }
 0x3cc   : > { %v15433_v12 = vadd.f32 %v6304_v9, %v6036_v22  ;;  %v6037_v46 = vadd.f32 %v5912_v39, %v15259_v11  ;;  %v12315_v4 = vpop.f32.mrb[214].mxu0 }
 0x3cd   : > { %v6323_v47 = vpop.f32.mrb[215].mxu0  ;;  %v15438_v45 = vadd.f32 %v6434_v57, %v6039_v13  ;;  %v6438_v48 = vsel %vm17988_vm11, %v12315_v4, 0.0 }
 0x3ce   : > { %v15440_v40 = vadd.f32 %v6432_v44, %v6037_v46 }
 0x3d0   : > { %v12280_v31 = vpop.f32.mrb[212].mxu1 }
 0x3d1   : > { %v6042_v15 = vadd.f32 %v12280_v31, %v15269_v6  ;;  %v5925_v25 = vpop.f32.mrb[213].mxu1  ;;  %v6436_v6 = vsel %vm17707_vm8, %v6323_v47, 0.0 }
 0x3d2   : > { %v6040_v58 = vadd.f32 %v5925_v25, %v15275_v20  ;;  %v12318_v43 = vpop.f32.mrb[216].mxu0  ;;  %v12281_v9 = vpop.f32.mrb[214].mxu1 }
 0x3d3   : > { %v15444_v56 = vadd.f32 %v12314_v61, %v6042_v15  ;;  %v6043_v11 = vadd.f32 %v12281_v9, %v15281_v51  ;;  %v6336_v22 = vpop.f32.mrb[217].mxu0  ;;  %v5928_v38 = vpop.f32.mrb[215].mxu1 }
 0x3d4   : > { %v15449_v13 = vadd.f32 %v6320_v18, %v6040_v58  ;;  %v6041_v39 = vadd.f32 %v5928_v38, %v15283_v14  ;;  %v12319_v57 = vpop.f32.mrb[218].mxu0 }
 0x3d5   : > { %v6339_v20 = vpop.f32.mrb[219].mxu0  ;;  %v15454_v46 = vadd.f32 %v6438_v48, %v6043_v11  ;;  %v6442_v47 = vsel %vm17709_vm9, %v12319_v57, 0.0 }
 0x3d6   : > { %v15456_v61 = vadd.f32 %v6436_v6, %v6041_v39 }
 0x3d8   : > { %v12284_v44 = vpop.f32.mrb[216].mxu1 }
 0x3d9   : > { %v6046_v51 = vadd.f32 %v12284_v44, %v15293_v21  ;;  %v5941_v31 = vpop.f32.mrb[217].mxu1  ;;  %v6440_v21 = vsel %vm17993_vm7, %v6339_v20, 0.0 }
 0x3da   : > { %v6044_v15 = vadd.f32 %v5941_v31, %v15299_v7  ;;  %v12322_v4 = vpop.f32.mrb[220].mxu0  ;;  %v12285_v18 = vpop.f32.mrb[218].mxu1 }
 0x3db   : > { %v15460_v25 = vadd.f32 %v12318_v43, %v6046_v51  ;;  %v6047_v14 = vadd.f32 %v12285_v18, %v15305_v28  ;;  %v6352_v58 = vpop.f32.mrb[221].mxu0  ;;  %v5944_v9 = vpop.f32.mrb[219].mxu1 }
 0x3dc   : > { %v15465_v11 = vadd.f32 %v6336_v22, %v6044_v15  ;;  %v6045_v38 = vadd.f32 %v5944_v9, %v15307_v53  ;;  %v12323_v48 = vpop.f32.mrb[222].mxu0 }
 0x3dd   : > { %v6355_v7 = vpop.f32.mrb[223].mxu0  ;;  %v15470_v39 = vadd.f32 %v6442_v47, %v6047_v14  ;;  %v6446_v20 = vsel %vm17998_vm6, %v12323_v48, 0.0  ;;  %vm18049_vm6 = vcmask 1043456  }
 0x3de   : > { %v15472_v43 = vadd.f32 %v6440_v21, %v6045_v38  ;;  %v15493_v21 = vld [vmem:[#allocation4 + $0x8] sm:$0xff]  ;;  %vm18050_vm7 = vmmov %vm18049_vm6 }
 0x3e0   : > { %v12288_v6 = vpop.f32.mrb[220].mxu1 }
 0x3e1   : > { %v6050_v28 = vadd.f32 %v12288_v6, %v15319_v42  ;;  %v5957_v44 = vpop.f32.mrb[221].mxu1  ;;  %v6444_v42 = vsel %vm18001_vm0, %v6355_v7, 0.0  ;;  %vm18051_vm0 = vcmask 64512  }
 0x3e2   : > { %v6048_v51 = vadd.f32 %v5957_v44, %v15326_v50  ;;  %v12326_v57 = vpop.f32.mrb[224].mxu0  ;;  %v12289_v22 = vpop.f32.mrb[222].mxu1  ;;  %12478 = vmatprep.mubr.msk.bf16.mxu1 %vm18051_vm0, %v15493_v21  ;;  %vm18055_vm0 = vnez %v18026_v23 }
 0x3e3   : > { %v15476_v31 = vadd.f32 %v12322_v4, %v6050_v28  ;;  %v6051_v53 = vadd.f32 %v12289_v22, %v15335_v8  ;;  %v6368_v15 = vpop.f32.mrb[225].mxu0  ;;  %v5960_v18 = vpop.f32.mrb[223].mxu1  ;;  %v11228_v8 = vld [vmem:[%s17252_s6 + $0x4] sm:$0xf] }
 0x3e4   : > { %v15481_v14 = vadd.f32 %v6352_v58, %v6048_v51  ;;  %v6049_v9 = vadd.f32 %v5960_v18, %v15340_v30  ;;  %v12327_v47 = vpop.f32.mrb[226].mxu0  ;;  %12760 = vmatprep.subr.msk.bf16.mxu1 %vm18049_vm6, %v11228_v8  ;;  %v8092_v30 = vsel %vm18050_vm7, %v11228_v8, 0  ;;  %v17480_v58 = vshrl.u32 %v15493_v21, 16  ;;  %vm18053_vm7 = vmmov %vm18049_vm6 }
 0x3e5   : > { %v6371_v50 = vpop.f32.mrb[227].mxu0  ;;  %v15486_v38 = vadd.f32 %v6446_v20, %v6051_v53  ;;  %12477 = vmatpush3.bf16.msra.mxu1 %v8092_v30  ;;  %vm18054_vm6 = vsmask.f32 256 }
 0x3e6   : > { %v15488_v4 = vadd.f32 %v6444_v42, %v6049_v9  ;;  %v6450_v9 = vsel %vm18012_vm2, %v12327_v47, 0.0  ;;  %v7631_v47 = vld [vmem:[#allocation4] sm:$0x80] }
 0x3e8   : > { %v12292_v48 = vpop.f32.mrb[224].mxu1 }
 0x3e9   : > { %v6054_v7 = vadd.f32 %v12292_v48, %v15353_v17  ;;  %v5973_v6 = vpop.f32.mrb[225].mxu1  ;;  %v15512_v48 = vrot.slane %v17480_v58, 7 }
 0x3ea   : > { %v6052_v28 = vadd.f32 %v5973_v6, %v15358_v63  ;;  %v12330_v44 = vpop.f32.mrb[228].mxu0  ;;  %v12293_v51 = vpop.f32.mrb[226].mxu1  ;;  %v6448_v63 = vsel %vm18014_vm1, %v6371_v50, 0.0 }
 0x3eb   : > { %v15502_v22 = vadd.f32 %v12326_v57, %v6054_v7  ;;  %v6055_v53 = vadd.f32 %v12293_v51, %v15362_v52  ;;  %v6384_v18 = vpop.f32.mrb[229].mxu0  ;;  %v5976_v20 = vpop.f32.mrb[227].mxu1  ;;  %18052 = vst [vmem:[#allocation12_spill] sm:$0xff] %v15512_v48  ;;  %v17483_v7 = vshll.u32 %v15493_v21, 16 }
 0x3ec   : > { %v15507_v42 = vadd.f32 %v6368_v15, %v6052_v28  ;;  %v6053_v8 = vadd.f32 %v5976_v20, %v15364_v36  ;;  %v12331_v17 = vpop.f32.mrb[230].mxu0  ;;  %v15524_v36 = vld [vmem:[%s17252_s6 + $0x8] sm:$0xf]  ;;  %v7650_v28 = vshrl.u32 %v7631_v47, 16 }
 0x3ed   : > { %v6387_v57 = vpop.f32.mrb[231].mxu0  ;;  %v15516_v30 = vadd.f32 %v6450_v9, %v6055_v53  ;;  %v7659_v6 = vor.u32 %v17483_v7, %v15512_v48  ;;  %12761 = vmatprep.subr.msk.bf16.mxu0 %vm18053_vm7, %v15524_v36  ;;  %v6454_v47 = vsel %vm18024_vm3, %v12331_v17, 0.0  ;;  %vm18056_vm7 = vcmask 64512  }
 0x3ee   : > { %v15518_v52 = vadd.f32 %v6448_v63, %v6053_v8  ;;  %v7652_v8 = vrot.slane %v7650_v28, 7 }
 0x3f0   : > { %v12296_v15 = vpop.f32.mrb[228].mxu1 }
 0x3f1   : > { %v6058_v50 = vadd.f32 %v12296_v15, %v15374_v26  ;;  %v5989_v51 = vpop.f32.mrb[229].mxu1  ;;  %v7660_v15 = vsel %vm18054_vm6, %v7652_v8, %v7659_v6 }
 0x3f2   : > { %v6056_v53 = vadd.f32 %v5989_v51, %v15379_v37  ;;  %v12334_v20 = vpop.f32.mrb[232].mxu0  ;;  %v12297_v9 = vpop.f32.mrb[230].mxu1  ;;  %v6452_v37 = vsel %vm18055_vm0, %v6387_v57, 0.0  ;;  %12444 = vmatprep.mubr.msk.bf16.mxu0 %vm18056_vm7, %v7660_v15 }
 0x3f3   : > { %v15533_v63 = vadd.f32 %v12330_v44, %v6058_v50  ;;  %v6059_v58 = vadd.f32 %v12297_v9, %v15382_v35  ;;  %v6400_v3 = vpop.f32.mrb[233].mxu0  ;;  %v5992_v34 = vpop.f32.mrb[231].mxu1 }
 0x3f4   : > { %v15538_v7 = vadd.f32 %v6384_v18, %v6056_v53  ;;  %v6057_v48 = vadd.f32 %v5992_v34, %v15384_v16  ;;  %v12335_v26 = vpop.f32.mrb[234].mxu0 }
 0x3f5   : > { %v6403_v28 = vpop.f32.mrb[235].mxu0  ;;  %v15544_v44 = vadd.f32 %v6454_v47, %v6059_v58  ;;  %v6458_v58 = vsel %vm18035_vm5, %v12335_v26, 0.0 }
 0x3f6   : > { %v15547_v35 = vadd.f32 %v6452_v37, %v6057_v48  ;;  %v18057_v48 = vld [vmem:[#allocation11_spill] sm:$0xff] }
 0x3f8   : > { %v12300_v50 = vpop.f32.mrb[232].mxu1 }
 0x3f9   : > { %v6062_v17 = vadd.f32 %v12300_v50, %v15394_v27  ;;  %v6005_v18 = vpop.f32.mrb[233].mxu1  ;;  %v18058_v27 = vld [vmem:[#allocation36_spill] sm:$0xff] }
 0x3fa   : > { %v6060_v51 = vadd.f32 %v6005_v18, %v15399_v1  ;;  %v12338_v34 = vpop.f32.mrb[236].mxu0  ;;  %v12301_v16 = vpop.f32.mrb[234].mxu1  ;;  %vm18059_vm6 = vnez %v18058_v27 }
 0x3fb   : > { %v15551_v53 = vadd.f32 %v12334_v20, %v6062_v17  ;;  %v6063_v6 = vadd.f32 %v12301_v16, %v15402_v60  ;;  %v6416_v57 = vpop.f32.mrb[237].mxu0  ;;  %v6008_v9 = vpop.f32.mrb[235].mxu1  ;;  %v6456_v37 = vsel %vm18059_vm6, %v6403_v28, 0.0 }
 0x3fc   : > { %v15556_v8 = vadd.f32 %v6400_v3, %v6060_v51  ;;  %v6061_v47 = vadd.f32 %v6008_v9, %v18057_v48  ;;  %v12339_v15 = vpop.f32.mrb[238].mxu0 }
 0x3fd   : > { %v6419_v1 = vpop.f32.mrb[239].mxu0  ;;  %v15561_v50 = vadd.f32 %v6458_v58, %v6063_v6  ;;  %v6462_v6 = vsel %vm18045_vm15, %v12339_v15, 0.0 }
 0x3fe   : > { %v15563_v20 = vadd.f32 %v6456_v37, %v6061_v47 }
 0x400   : > { %v12304_v17 = vpop.f32.mrb[236].mxu1 }
 0x401   : > { %v6066_v60 = vadd.f32 %v12304_v17, %v15414_v0  ;;  %v6021_v18 = vpop.f32.mrb[237].mxu1  ;;  %v6460_v17 = vsel %vm18047_vm12, %v6419_v1, 0.0 }
 0x402   : > { %v6064_v16 = vadd.f32 %v6021_v18, %v15419_v19  ;;  %v12378_v26 = vpop.f32.mrb[240].mxu0  ;;  %v12305_v3 = vpop.f32.mrb[238].mxu1 }
 0x403   : > { %v15567_v51 = vadd.f32 %v12338_v34, %v6066_v60  ;;  %v6067_v9 = vadd.f32 %v12305_v3, %v15422_v41  ;;  %v6903_v48 = vpop.f32.mrb[241].mxu0  ;;  %v6024_v27 = vpop.f32.mrb[239].mxu1  ;;  %v18062_v41 = vld [vmem:[#allocation9_spill] sm:$0xff] }
 0x404   : > { %v15572_v58 = vadd.f32 %v6416_v57, %v6064_v16  ;;  %v6065_v47 = vadd.f32 %v6024_v27, %v15424_v55  ;;  %v12379_v37 = vpop.f32.mrb[242].mxu0  ;;  %vm18063_vm7 = vnez %v18062_v41  ;;  %v18064_v57 = vld [vmem:[#allocation10_spill] sm:$0xff] }
 0x405   : > { %v6906_v19 = vpop.f32.mrb[243].mxu0  ;;  %v15577_v18 = vadd.f32 %v6462_v6, %v6067_v9  ;;  %vm18065_vm15 = vnez %v18064_v57  ;;  %v18066_v57 = vld [vmem:[#allocation13_spill] sm:$0xff] }
 0x406   : > { %v15579_v34 = vadd.f32 %v6460_v17, %v6065_v47 }
 0x408   : > { %v12344_v60 = vpop.f32.mrb[240].mxu1 }
 0x409   : > { %v6770_v3 = vsel %vm18063_vm7, %v12344_v60, 0.0  ;;  %v6641_v10 = vpop.f32.mrb[241].mxu1 }
 0x40a   : > { %v6802_v15 = vadd.f32 %v6770_v3, %v15428_v62  ;;  %v6768_v16 = vsel %vm18065_vm15, %v6641_v10, 0.0  ;;  %v12382_v55 = vpop.f32.mrb[244].mxu0  ;;  %v12345_v27 = vpop.f32.mrb[242].mxu1  ;;  %vm18067_vm15 = vnez %v18066_v57 }
 0x40b   : > { %v6800_v0 = vadd.f32 %v6768_v16, %v15433_v12  ;;  %v6803_v1 = vadd.f32 %v12345_v27, %v15438_v45  ;;  %v6919_v9 = vpop.f32.mrb[245].mxu0  ;;  %v6644_v6 = vpop.f32.mrb[243].mxu1  ;;  %v18068_v27 = vld [vmem:[#allocation14_spill] sm:$0xff] }
 0x40c   : > { %v6801_v47 = vadd.f32 %v6644_v6, %v15440_v40  ;;  %v12383_v17 = vpop.f32.mrb[246].mxu0  ;;  %v15589_v28 = vadd.f32 %v12378_v26, %v6802_v15  ;;  %vm18069_vm7 = vnez %v18068_v27  ;;  %v18070_v27 = vld [vmem:[#allocation17_spill] sm:$0xff] }
 0x40d   : > { %v15591_v60 = vadd.f32 %v12379_v37, %v6803_v1  ;;  %v6922_v41 = vpop.f32.mrb[247].mxu0  ;;  %v15593_v62 = vadd.f32 %v6903_v48, %v6800_v0 }
 0x40e   : > { %v15595_v3 = vadd.f32 %v6906_v19, %v6801_v47 }
 0x410   : > { %v12348_v10 = vpop.f32.mrb[244].mxu1 }
 0x411   : > { %v6774_v12 = vsel %vm18067_vm15, %v12348_v10, 0.0  ;;  %v6657_v16 = vpop.f32.mrb[245].mxu1 }
 0x412   : > { %v6806_v45 = vadd.f32 %v6774_v12, %v15444_v56  ;;  %v6772_v40 = vsel %vm18069_vm7, %v6657_v16, 0.0  ;;  %v12386_v6 = vpop.f32.mrb[248].mxu0  ;;  %v12349_v26 = vpop.f32.mrb[246].mxu1  ;;  %vm18071_vm7 = vnez %v18070_v27 }
 0x413   : > { %v6804_v37 = vadd.f32 %v6772_v40, %v15449_v13  ;;  %v6807_v15 = vadd.f32 %v12349_v26, %v15454_v46  ;;  %v6935_v48 = vpop.f32.mrb[249].mxu0  ;;  %v6660_v0 = vpop.f32.mrb[247].mxu1  ;;  %v18072_v26 = vld [vmem:[#allocation18_spill] sm:$0xff] }
 0x414   : > { %v6805_v19 = vadd.f32 %v6660_v0, %v15456_v61  ;;  %v12387_v1 = vpop.f32.mrb[250].mxu0  ;;  %v15605_v47 = vadd.f32 %v12382_v55, %v6806_v45  ;;  %vm18073_vm15 = vnez %v18072_v26 }
 0x415   : > { %v15607_v10 = vadd.f32 %v12383_v17, %v6807_v15  ;;  %v6938_v57 = vpop.f32.mrb[251].mxu0  ;;  %v15609_v56 = vadd.f32 %v6919_v9, %v6804_v37 }
 0x416   : > { %v15611_v12 = vadd.f32 %v6922_v41, %v6805_v19 }
 0x418   : > { %v12352_v16 = vpop.f32.mrb[248].mxu1 }
 0x419   : > { %v6778_v13 = vsel %vm18071_vm7, %v12352_v16, 0.0  ;;  %v6673_v40 = vpop.f32.mrb[249].mxu1 }
 0x41a   : > { %v6810_v46 = vadd.f32 %v6778_v13, %v15460_v25  ;;  %v6776_v61 = vsel %vm18073_vm15, %v6673_v40, 0.0  ;;  %v12390_v0 = vpop.f32.mrb[252].mxu0  ;;  %v12353_v55 = vpop.f32.mrb[250].mxu1  ;;  %v15630_v13 = vld [vmem:[%s17252_s6 + $0xc] sm:$0xf]  ;;  %vm18074_vm15 = vcmask 1043456  }
 0x41b   : > { %v6808_v17 = vadd.f32 %v6776_v61, %v15465_v11  ;;  %v6811_v45 = vadd.f32 %v12353_v55, %v15470_v39  ;;  %v6951_v9 = vpop.f32.mrb[253].mxu0  ;;  %v6676_v37 = vpop.f32.mrb[251].mxu1  ;;  %12762 = vmatprep.subr.msk.bf16.mxu1 %vm18074_vm15, %v15630_v13  ;;  %v18075_v39 = vshll.u32 %v15493_v21, 16 }
 0x41c   : > { %v6809_v41 = vadd.f32 %v6676_v37, %v15472_v43  ;;  %v12391_v15 = vpop.f32.mrb[254].mxu0  ;;  %v15621_v19 = vadd.f32 %v12386_v6, %v6810_v46 }
 0x41d   : > { %v15623_v16 = vadd.f32 %v12387_v1, %v6811_v45  ;;  %v6954_v27 = vpop.f32.mrb[255].mxu0  ;;  %v15625_v25 = vadd.f32 %v6935_v48, %v6808_v17  ;;  %v8311_v43 = vrot.slane %v18075_v39, 1  ;;  %v18076_v1 = vshrl.u32 %v15493_v21, 16  ;;  %v18077_v48 = vld [vmem:[#allocation21_spill] sm:$0xff]  ;;  %v18079_v17 = vld [vmem:[#allocation22_spill] sm:$0xff] }
 0x41e   : > { %v15632_v11 = vadd.f32 %v6938_v57, %v6809_v41  ;;  %vm18078_vm7 = vnez %v18077_v48  ;;  %vm18080_vm12 = vnez %v18079_v17  ;;  %v18081_v17 = vld [vmem:[#allocation25_spill] sm:$0xff] }
 0x41f   : > { %v15640_v40 = vor.u32 %v8311_v43, %v18076_v1  ;;  %vm18082_vm15 = vnez %v18081_v17 }
 0x420   : > { %v12356_v6 = vpop.f32.mrb[252].mxu1 }
 0x421   : > { %v6782_v46 = vsel %vm18078_vm7, %v12356_v6, 0.0  ;;  %v6689_v61 = vpop.f32.mrb[253].mxu1 }
 0x422   : > { %v6814_v55 = vadd.f32 %v6782_v46, %v15476_v31  ;;  %v6780_v57 = vsel %vm18080_vm12, %v6689_v61, 0.0  ;;  %v12394_v45 = vpop.f32.mrb[0].mxu0  ;;  %v12357_v37 = vpop.f32.mrb[254].mxu1 }
 0x423   : > { %v6812_v41 = vadd.f32 %v6780_v57, %v15481_v14  ;;  %v6815_v39 = vadd.f32 %v12357_v37, %v15486_v38  ;;  %v6967_v26 = vpop.f32.mrb[1].mxu0  ;;  %v6692_v23 = vpop.f32.mrb[255].mxu1  ;;  %v18083_v37 = vld [vmem:[#allocation26_spill] sm:$0xff] }
 0x424   : > { %v6813_v21 = vadd.f32 %v6692_v23, %v15488_v4  ;;  %v12395_v43 = vpop.f32.mrb[2].mxu0  ;;  %v15650_v1 = vadd.f32 %v12390_v0, %v6814_v55  ;;  %vm18084_vm12 = vnez %v18083_v37  ;;  %v18085_v37 = vld [vmem:[#allocation29_spill] sm:$0xff] }
 0x425   : > { %v15652_v6 = vadd.f32 %v12391_v15, %v6815_v39  ;;  %v6970_v48 = vpop.f32.mrb[3].mxu0  ;;  %v15654_v31 = vadd.f32 %v6951_v9, %v6812_v41 }
 0x426   : > { %v15656_v46 = vadd.f32 %v6954_v27, %v6813_v21 }
 0x428   : > { %v12360_v61 = vpop.f32.mrb[0].mxu1 }
 0x429   : > { %v6786_v14 = vsel %vm18082_vm15, %v12360_v61, 0.0  ;;  %v6705_v57 = vpop.f32.mrb[1].mxu1 }
 0x42a   : > { %v6818_v38 = vadd.f32 %v6786_v14, %v15502_v22  ;;  %v6784_v23 = vsel %vm18084_vm12, %v6705_v57, 0.0  ;;  %v12398_v4 = vpop.f32.mrb[4].mxu0  ;;  %v12361_v0 = vpop.f32.mrb[2].mxu1  ;;  %vm18086_vm12 = vnez %v18085_v37 }
 0x42b   : > { %v6816_v15 = vadd.f32 %v6784_v23, %v15507_v42  ;;  %v6819_v55 = vadd.f32 %v12361_v0, %v15516_v30  ;;  %v6983_v9 = vpop.f32.mrb[5].mxu0  ;;  %v6708_v41 = vpop.f32.mrb[3].mxu1  ;;  %v18087_v0 = vld [vmem:[#allocation30_spill] sm:$0xff] }
 0x42c   : > { %v6817_v27 = vadd.f32 %v6708_v41, %v15518_v52  ;;  %v12399_v39 = vpop.f32.mrb[6].mxu0  ;;  %v15666_v21 = vadd.f32 %v12394_v45, %v6818_v38  ;;  %vm18088_vm15 = vnez %v18087_v0  ;;  %v18089_v0 = vld [vmem:[#allocation33_spill] sm:$0xff] }
 0x42d   : > { %v15668_v61 = vadd.f32 %v12395_v43, %v6819_v55  ;;  %v6986_v17 = vpop.f32.mrb[7].mxu0  ;;  %v15670_v22 = vadd.f32 %v6967_v26, %v6816_v15 }
 0x42e   : > { %v15672_v14 = vadd.f32 %v6970_v48, %v6817_v27 }
 0x430   : > { %v12364_v57 = vpop.f32.mrb[4].mxu1 }
 0x431   : > { %v6790_v42 = vsel %vm18086_vm12, %v12364_v57, 0.0  ;;  %v6721_v23 = vpop.f32.mrb[5].mxu1 }
 0x432   : > { %v6822_v30 = vadd.f32 %v6790_v42, %v15533_v63  ;;  %v6788_v52 = vsel %vm18088_vm15, %v6721_v23, 0.0  ;;  %v12402_v41 = vpop.f32.mrb[8].mxu0  ;;  %v12365_v45 = vpop.f32.mrb[6].mxu1  ;;  %vm18090_vm15 = vnez %v18089_v0 }
 0x433   : > { %v6820_v43 = vadd.f32 %v6788_v52, %v15538_v7  ;;  %v6823_v38 = vadd.f32 %v12365_v45, %v15544_v44  ;;  %v6999_v26 = vpop.f32.mrb[9].mxu0  ;;  %v6724_v15 = vpop.f32.mrb[7].mxu1  ;;  %v18091_v45 = vld [vmem:[#allocation34_spill] sm:$0xff] }
 0x434   : > { %v6821_v48 = vadd.f32 %v6724_v15, %v15547_v35  ;;  %v12403_v55 = vpop.f32.mrb[10].mxu0  ;;  %v15682_v27 = vadd.f32 %v12398_v4, %v6822_v30  ;;  %vm18092_vm12 = vnez %v18091_v45 }
 0x435   : > { %v15684_v57 = vadd.f32 %v12399_v39, %v6823_v38  ;;  %v7002_v37 = vpop.f32.mrb[11].mxu0  ;;  %v15686_v63 = vadd.f32 %v6983_v9, %v6820_v43 }
 0x436   : > { %v15688_v42 = vadd.f32 %v6986_v17, %v6821_v48 }
 0x438   : > { %v12368_v23 = vpop.f32.mrb[8].mxu1 }
 0x439   : > { %v6794_v7 = vsel %vm18090_vm15, %v12368_v23, 0.0  ;;  %v6737_v52 = vpop.f32.mrb[9].mxu1 }
 0x43a   : > { %v6826_v44 = vadd.f32 %v6794_v7, %v15551_v53  ;;  %v6792_v35 = vsel %vm18092_vm12, %v6737_v52, 0.0  ;;  %v12369_v15 = vpop.f32.mrb[10].mxu1  ;;  %v12406_v4 = vpop.f32.mrb[12].mxu0 }
 0x43b   : > { %v6824_v39 = vadd.f32 %v6792_v35, %v15556_v8  ;;  %v6827_v30 = vadd.f32 %v12369_v15, %v15561_v50  ;;  %v6740_v9 = vpop.f32.mrb[11].mxu1  ;;  %v7015_v43 = vpop.f32.mrb[13].mxu0 }
 0x43c   : > { %v6825_v17 = vadd.f32 %v6740_v9, %v15563_v20  ;;  %v12407_v38 = vpop.f32.mrb[14].mxu0  ;;  %v15698_v48 = vadd.f32 %v12402_v41, %v6826_v44 }
 0x43d   : > { %v15700_v23 = vadd.f32 %v12403_v55, %v6827_v30  ;;  %v7018_v0 = vpop.f32.mrb[15].mxu0  ;;  %v15702_v53 = vadd.f32 %v6999_v26, %v6824_v39 }
 0x43e   : > { %v15704_v7 = vadd.f32 %v7002_v37, %v6825_v17 }
 0x440   : > { %v12372_v52 = vpop.f32.mrb[12].mxu1 }
 0x441   : > { %v6798_v8 = vsel %vm17978_vm13, %v12372_v52, 0.0  ;;  %v6753_v35 = vpop.f32.mrb[13].mxu1  ;;  %v15725_v52 = vld [vmem:[%s17251_s5] ss:$0 sm:$0xff] }
 0x442   : > { %v6830_v50 = vadd.f32 %v6798_v8, %v15567_v51  ;;  %v6796_v20 = vsel %vm18043_vm4, %v6753_v35, 0.0  ;;  %v12373_v9 = vpop.f32.mrb[14].mxu1 }
 0x443   : > { %v6828_v41 = vadd.f32 %v6796_v20, %v15572_v58  ;;  %v6831_v55 = vadd.f32 %v12373_v9, %v15577_v18  ;;  %v6756_v44 = vpop.f32.mrb[15].mxu1 }
 0x444   : > { %v15713_v26 = vadd.f32 %v12406_v4, %v6830_v50  ;;  %v6829_v37 = vadd.f32 %v6756_v44, %v15579_v34 }
 0x445   : > { %v15716_v39 = vadd.f32 %v7015_v43, %v6828_v41  ;;  %v15718_v30 = vadd.f32 %v12407_v38, %v6831_v55  ;;  %v15733_v43 = vld [vmem:[%s17251_s5 + $0x1] ss:$0 sm:$0xff] }
 0x446   : > { %v15720_v17 = vadd.f32 %v7018_v0, %v6829_v37 }
 0x448   : > { %v12412_v51 = vpop.f32.mrb[16].mxu1 }
 0x449   : > { %v7459_v58 = vadd.f32 %v12412_v51, %v15589_v28  ;;  %v7298_v18 = vpop.f32.mrb[17].mxu1 }
 0x44a   : > { %v7457_v4 = vadd.f32 %v7298_v18, %v15593_v62  ;;  %v12413_v8 = vpop.f32.mrb[18].mxu1 }
 0x44b   : > { %v7496_v34 = vmul.f32 %v15725_v52, %v7459_v58  ;;  %v7428_v0 = vsel %vm17701_vm10, %v12413_v8, 0.0  ;;  %v7301_v38 = vpop.f32.mrb[19].mxu1 }
 0x44c   : > { %v7494_v35 = vmul.f32 %v15725_v52, %v7457_v4  ;;  %v7460_v50 = vadd.f32 %v7428_v0, %v15591_v60  ;;  %v7426_v28 = vsel %vm17986_vm14, %v7301_v38, 0.0  ;;  %vm18095_vm14 = vcmask 64512  }
 0x44d   : > { %v7458_v62 = vadd.f32 %v7426_v28, %v15595_v3  ;;  %v7533_v20 = vadd.f32 %v15733_v43, %v7496_v34  ;;  %vm18096_vm10 = vmmov %vm18095_vm14 }
 0x44e   : > { %v7497_v9 = vmul.f32 %v15725_v52, %v7460_v50  ;;  %v7531_v41 = vadd.f32 %v15733_v43, %v7494_v35 }
 0x44f   : > { %v7495_v55 = vmul.f32 %v15725_v52, %v7458_v62  ;;  %v7565_v18 = vmax.f32 %v7533_v20, 0.0 }
 0x450   : > { %v7534_v44 = vadd.f32 %v15733_v43, %v7497_v9  ;;  %v12416_v37 = vpop.f32.mrb[20].mxu1  ;;  %v7563_v34 = vmax.f32 %v7531_v41, 0.0 }
 0x451   : > { %v7532_v51 = vadd.f32 %v15733_v43, %v7495_v55  ;;  %v7463_v60 = vadd.f32 %v12416_v37, %v15605_v47  ;;  %v7314_v58 = vpop.f32.mrb[21].mxu1 }
 0x452   : > { %v7566_v4 = vmax.f32 %v7534_v44, 0.0  ;;  %v7461_v3 = vadd.f32 %v7314_v58, %v15609_v56  ;;  %v12417_v8 = vpop.f32.mrb[22].mxu1 }
 0x453   : > { %v7564_v0 = vmax.f32 %v7532_v51, 0.0  ;;  %v7500_v38 = vmul.f32 %v15725_v52, %v7463_v60  ;;  %v7432_v35 = vsel %vm17988_vm11, %v12417_v8, 0.0  ;;  %v7317_v50 = vpop.f32.mrb[23].mxu1 }
 0x454   : > { %v7600_v28 = vpack.c.bf16 %v7566_v4, %v7565_v18  ;;  %v7498_v62 = vmul.f32 %v15725_v52, %v7461_v3  ;;  %v7464_v9 = vadd.f32 %v7432_v35, %v15607_v10  ;;  %v7430_v47 = vsel %vm17707_vm8, %v7317_v50, 0.0 }
 0x455   : > { %v7599_v20 = vpack.c.bf16 %v7564_v0, %v7563_v34  ;;  %v7462_v56 = vadd.f32 %v7430_v47, %v15611_v12  ;;  %v7537_v41 = vadd.f32 %v15733_v43, %v7500_v38 }
 0x456   : > { %7616 = vst.msk [vmem:[#allocation4 + $0x18] sm:$0xff] %vm18095_vm14, %v7600_v28  ;;  %v7501_v55 = vmul.f32 %v15725_v52, %v7464_v9  ;;  %v7535_v44 = vadd.f32 %v15733_v43, %v7498_v62  ;;  %vm18098_vm14 = vcmask 1043456  }
 0x457   : > { %7615 = vst.msk [vmem:[#allocation4 + $0x10] sm:$0xff] %vm18096_vm10, %v7599_v20  ;;  %v7499_v37 = vmul.f32 %v15725_v52, %v7462_v56  ;;  %v7569_v18 = vmax.f32 %v7537_v41, 0.0  ;;  %vm18097_vm10 = vnez %v17992_v5  ;;  %v8824_v41 = vsel %vm18098_vm14, %v15630_v13, 0 }
 0x458   : > { %v7538_v10 = vadd.f32 %v15733_v43, %v7501_v55  ;;  %v12420_v51 = vpop.f32.mrb[24].mxu1  ;;  %v7567_v34 = vmax.f32 %v7535_v44, 0.0 }
 0x459   : > { %v7536_v60 = vadd.f32 %v15733_v43, %v7499_v37  ;;  %v7467_v58 = vadd.f32 %v12420_v51, %v15621_v19  ;;  %v7330_v12 = vpop.f32.mrb[25].mxu1  ;;  %v8487_v51 = vsel %vm18098_vm14, %v15524_v36, 0 }
 0x45a   : > { %v7570_v4 = vmax.f32 %v7538_v10, 0.0  ;;  %v7465_v3 = vadd.f32 %v7330_v12, %v15625_v25  ;;  %v12421_v8 = vpop.f32.mrb[26].mxu1  ;;  %v15790_v10 = vld [vmem:[%s17252_s6 + $0x14] sm:$0xf] }
 0x45b   : > { %v7568_v0 = vmax.f32 %v7536_v60, 0.0  ;;  %v7504_v38 = vmul.f32 %v15725_v52, %v7467_v58  ;;  %v7436_v35 = vsel %vm17709_vm9, %v12421_v8, 0.0  ;;  %v7333_v50 = vpop.f32.mrb[27].mxu1  ;;  %vm18099_vm9 = vcmask 64512  }
 0x45c   : > { %v7602_v28 = vpack.c.bf16 %v7570_v4, %v7569_v18  ;;  %v7502_v62 = vmul.f32 %v15725_v52, %v7465_v3  ;;  %v7468_v9 = vadd.f32 %v7436_v35, %v15623_v16  ;;  %v7434_v19 = vsel %vm18097_vm10, %v7333_v50, 0.0  ;;  %vm18100_vm10 = vmmov %vm18099_vm9 }
 0x45d   : > { %v7601_v47 = vpack.c.bf16 %v7568_v0, %v7567_v34  ;;  %v7541_v25 = vadd.f32 %v15733_v43, %v7504_v38  ;;  %v7466_v20 = vadd.f32 %v7434_v19, %v15632_v11  ;;  %v15777_v56 = vld [vmem:[#allocation4 + $0x18] sm:$0xff] }
 0x45e   : > { %7618 = vst.msk [vmem:[#allocation4 + $0x28] sm:$0xff] %vm18099_vm9, %v7602_v28  ;;  %v7539_v55 = vadd.f32 %v15733_v43, %v7502_v62  ;;  %v7505_v44 = vmul.f32 %v15725_v52, %v7468_v9  ;;  %v15784_v16 = vld [vmem:[#allocation4 + $0x10] sm:$0xff]  ;;  %v17494_v37 = vshrl.u32 %v15777_v56, 16  ;;  %v17502_v4 = vshll.u32 %v15777_v56, 16 }
 0x45f   : > { %7617 = vst.msk [vmem:[#allocation4 + $0x20] sm:$0xff] %vm18100_vm10, %v7601_v47  ;;  %v7503_v11 = vmul.f32 %v15725_v52, %v7466_v20  ;;  %v17496_v13 = vshrl.u32 %v15784_v16, 16  ;;  %12479 = vmatmul.mubr.msk.bf16.vlgmr.msra.gmra.mrb[48].mxu1 %vm18099_vm9, %v15784_v16  ;;  %v7573_v60 = vmax.f32 %v7541_v25, 0.0  ;;  %vm18101_vm10 = vmmov %vm18099_vm9  ;;  %v17507_v36 = vshll.u32 %v15784_v16, 16 }
 0x460   : > { %v7542_v58 = vadd.f32 %v15733_v43, %v7505_v44  ;;  %v12424_v12 = vpop.f32.mrb[28].mxu1  ;;  %v15802_v18 = vrot.slane %v17494_v37, 7  ;;  %12482 = vmatprep.mubr.msk.bf16.mxu1 %vm18101_vm10, %v15777_v56  ;;  %12545 = vmatpush3.bf16.msra.mxu1 %v8824_v41  ;;  %vm18102_vm9 = vmmov %vm18098_vm14  ;;  %v7571_v38 = vmax.f32 %v7539_v55, 0.0  ;;  %vm18103_vm14 = vnez %v17997_v59 }
 0x461   : > { %v7540_v3 = vadd.f32 %v15733_v43, %v7503_v11  ;;  %v7664_v8 = vrot.slane %v17496_v13, 7  ;;  %v7471_v34 = vadd.f32 %v12424_v12, %v15650_v1  ;;  %v7346_v0 = vpop.f32.mrb[29].mxu1  ;;  %12764 = vmatprep.subr.msk.bf16.mxu1 %vm18102_vm9, %v15790_v10  ;;  %vm18104_vm10 = vnez %v18000_v54  ;;  %v18105_v11 = vld [vmem:[#allocation12_spill] sm:$0xff] }
 0x462   : > { %v7574_v35 = vmax.f32 %v7542_v58, 0.0  ;;  %v15817_v50 = vor.u32 %v17502_v4, %v15802_v18  ;;  %v7469_v28 = vadd.f32 %v7346_v0, %v15654_v31  ;;  %v12425_v62 = vpop.f32.mrb[30].mxu1  ;;  %vm18106_vm9 = vsmask.f32 256 }
 0x463   : > { %v7572_v9 = vmax.f32 %v7540_v3, 0.0  ;;  %v15822_v19 = vor.u32 %v17507_v36, %v7664_v8  ;;  %v7508_v1 = vmul.f32 %v15725_v52, %v7471_v34  ;;  %v7440_v47 = vsel %vm18103_vm14, %v12425_v62, 0.0  ;;  %v7349_v25 = vpop.f32.mrb[31].mxu1 }
 0x464   : > { %v7604_v20 = vpack.c.bf16 %v7574_v35, %v7573_v60  ;;  %v7506_v41 = vmul.f32 %v15725_v52, %v7469_v28  ;;  %v7472_v55 = vadd.f32 %v7440_v47, %v15652_v6  ;;  %v7438_v31 = vsel %vm18104_vm10, %v7349_v25, 0.0  ;;  %v15841_v60 = vld [vmem:[%s17252_s6 + $0x10] sm:$0xf] }
 0x465   : > { %v7603_v44 = vpack.c.bf16 %v7572_v9, %v7571_v38  ;;  %v7668_v58 = vsel %vm18106_vm9, %v18105_v11, %v15822_v19  ;;  %v7545_v12 = vadd.f32 %v15733_v43, %v7508_v1  ;;  %v7470_v3 = vadd.f32 %v7438_v31, %v15656_v46  ;;  %v15836_v34 = vld [vmem:[#allocation4 + $0x28] sm:$0xff] }
 0x466   : > { %vm18107_vm14 = vcmask 64512   ;;  %v15844_v6 = vld [vmem:[#allocation4 + $0x20] sm:$0xff]  ;;  %v7543_v0 = vadd.f32 %v15733_v43, %v7506_v41  ;;  %v7509_v38 = vmul.f32 %v15725_v52, %v7472_v55  ;;  %vm18109_vm10 = vsmask.f32 256 }
 0x467   : > { %7620 = vst.msk [vmem:[#allocation4 + $0x38] sm:$0xff] %vm18107_vm14, %v7604_v20  ;;  %vm18108_vm9 = vmmov %vm18107_vm14  ;;  %v15851_v46 = vsel %vm18109_vm10, %v7664_v8, %v15817_v50  ;;  %v17493_v35 = vshrl.u32 %v15836_v34, 16  ;;  %v17495_v28 = vshrl.u32 %v15844_v6, 16  ;;  %v7507_v62 = vmul.f32 %v15725_v52, %v7470_v3 }
 0x468   : > { %12445 = vmatmul.mubr.msk.bf16.vlgmr.msra.gmra.mrb[16].mxu0 %vm18108_vm9, %v7668_v58  ;;  %vm18110_vm8 = vmmov %vm18108_vm9  ;;  %v7577_v9 = vmax.f32 %v7545_v12, 0.0  ;;  %v7546_v1 = vadd.f32 %v15733_v43, %v7509_v38  ;;  %v12428_v8 = vpop.f32.mrb[32].mxu1  ;;  %v17497_v25 = vshll.u32 %v15836_v34, 16  ;;  %v17498_v20 = vshll.u32 %v15844_v6, 16 }
 0x469   : > { %7619 = vst.msk [vmem:[#allocation4 + $0x30] sm:$0xff] %vm18110_vm8, %v7603_v44  ;;  %12511 = vmatpush3.bf16.msra.mxu0 %v8487_v51  ;;  %vm18111_vm14 = vmmov %vm18110_vm8  ;;  %v15864_v47 = vrot.slane %v17493_v35, 7  ;;  %v7680_v51 = vrot.slane %v17495_v28, 7  ;;  %v7544_v41 = vadd.f32 %v15733_v43, %v7507_v62  ;;  %v7475_v55 = vadd.f32 %v12428_v8, %v15666_v21  ;;  %v7362_v31 = vpop.f32.mrb[33].mxu1 }
 0x46a   : > { %12448 = vmatprep.mubr.msk.bf16.mxu0 %vm18111_vm14, %v15851_v46  ;;  %vm18112_vm9 = vmmov %vm18110_vm8  ;;  %vm18113_vm8 = vcmask 1043456   ;;  %v7575_v44 = vmax.f32 %v7543_v0, 0.0  ;;  %v7578_v11 = vmax.f32 %v7546_v1, 0.0  ;;  %v7473_v12 = vadd.f32 %v7362_v31, %v15670_v22  ;;  %v12429_v3 = vpop.f32.mrb[34].mxu1 }
 0x46b   : > { %12483 = vmatmul.mubr.msk.bf16.gmra.mrb[52].mxu1 %vm18112_vm9, %v15844_v6  ;;  %12763 = vmatprep.subr.msk.bf16.mxu0 %vm18113_vm8, %v15841_v60  ;;  %vm18114_vm10 = vmmov %vm18112_vm9  ;;  %v7691_v58 = vor.u32 %v17497_v25, %v15864_v47  ;;  %v7683_v38 = vor.u32 %v17498_v20, %v7680_v51  ;;  %v7576_v35 = vmax.f32 %v7544_v41, 0.0  ;;  %v7512_v62 = vmul.f32 %v15725_v52, %v7475_v55  ;;  %v7365_v37 = vpop.f32.mrb[35].mxu1 }
 0x46c   : > { %12486 = vmatprep.mubr.msk.bf16.mxu1 %vm18114_vm10, %v15836_v34  ;;  %v7444_v8 = vsel %vm18012_vm2, %v12429_v3, 0.0  ;;  %v7606_v28 = vpack.c.bf16 %v7578_v11, %v7577_v9  ;;  %v7510_v0 = vmul.f32 %v15725_v52, %v7473_v12  ;;  %v7442_v25 = vsel %vm18014_vm1, %v7365_v37, 0.0  ;;  %vm18118_vm8 = vmmov %vm18112_vm9 }
 0x46d   : > { %v7476_v1 = vadd.f32 %v7444_v8, %v15668_v61  ;;  %vm18117_vm14 = vsmask.f32 256  ;;  %v7605_v31 = vpack.c.bf16 %v7576_v35, %v7575_v44  ;;  %v7549_v41 = vadd.f32 %v15733_v43, %v7512_v62  ;;  %vm18122_vm1 = vmmov %vm18118_vm8 }
 0x46e   : > { %v15891_v22 = vsel %vm18117_vm14, %v15802_v18, %v7683_v38  ;;  %v7474_v55 = vadd.f32 %v7442_v25, %v15672_v14  ;;  %v15895_v20 = vld [vmem:[#allocation4 + $0x38] sm:$0xff]  ;;  %7622 = vst.msk [vmem:[#allocation4 + $0x48] sm:$0xff] %vm18112_vm9, %v7606_v28  ;;  %v7547_v61 = vadd.f32 %v15733_v43, %v7510_v0  ;;  %vm18119_vm10 = vmmov %vm18117_vm14 }
 0x46f   : > { %v7513_v11 = vmul.f32 %v15725_v52, %v7476_v1  ;;  %v15905_v37 = vsel %vm18119_vm10, %v7680_v51, %v7691_v58  ;;  %v17500_v18 = vshrl.u32 %v15895_v20, 16  ;;  %vm18120_vm14 = vmmov %vm18118_vm8  ;;  %v7581_v28 = vmax.f32 %v7549_v41, 0.0 }
 0x470   : > { %v15898_v9 = vld [vmem:[#allocation4 + $0x30] sm:$0xff]  ;;  %12449 = vmatmul.mubr.msk.bf16.gmra.mrb[20].mxu0 %vm18118_vm8, %v15891_v22  ;;  %7621 = vst.msk [vmem:[#allocation4 + $0x40] sm:$0xff] %vm18120_vm14, %v7605_v31  ;;  %v7511_v35 = vmul.f32 %v15725_v52, %v7474_v55  ;;  %vm18121_vm9 = vmmov %vm18118_vm8  ;;  %v12432_v44 = vpop.f32.mrb[36].mxu1  ;;  %v17503_v58 = vshll.u32 %v15895_v20, 16  ;;  %v7579_v0 = vmax.f32 %v7547_v61, 0.0 }
 0x471   : > { %v17501_v14 = vshrl.u32 %v15898_v9, 16  ;;  %12452 = vmatprep.mubr.msk.bf16.mxu0 %vm18121_vm9, %v15905_v37  ;;  %v7550_v25 = vadd.f32 %v15733_v43, %v7513_v11  ;;  %v15918_v51 = vrot.slane %v17500_v18, 7  ;;  %v17504_v3 = vshll.u32 %v15898_v9, 16  ;;  %vm18123_vm8 = vmmov %vm18122_vm1  ;;  %v7378_v8 = vpop.f32.mrb[37].mxu1 }
 0x472   : > { %v7548_v38 = vadd.f32 %v15733_v43, %v7511_v35  ;;  %v7479_v62 = vadd.f32 %v12432_v44, %v15682_v27  ;;  %v7477_v41 = vadd.f32 %v7378_v8, %v15686_v63  ;;  %v12433_v55 = vpop.f32.mrb[38].mxu1  ;;  %vm18127_vm14 = vmmov %vm18123_vm8 }
 0x473   : > { %12487 = vmatmul.mubr.msk.bf16.gmra.mrb[56].mxu1 %vm18122_vm1, %v15898_v9  ;;  %v7696_v12 = vrot.slane %v17501_v14, 7  ;;  %v7582_v1 = vmax.f32 %v7550_v25, 0.0  ;;  %v7707_v31 = vor.u32 %v17503_v58, %v15918_v51  ;;  %v7448_v27 = vsel %vm18024_vm3, %v12433_v55, 0.0  ;;  %v7381_v44 = vpop.f32.mrb[39].mxu1  ;;  %vm18125_vm1 = vmmov %vm18119_vm10 }
 0x474   : > { %12490 = vmatprep.mubr.msk.bf16.mxu1 %vm18123_vm8, %v15895_v20  ;;  %v7580_v18 = vmax.f32 %v7548_v38, 0.0  ;;  %v7516_v35 = vmul.f32 %v15725_v52, %v7479_v62  ;;  %v7514_v61 = vmul.f32 %v15725_v52, %v7477_v41  ;;  %v7480_v25 = vadd.f32 %v7448_v27, %v15684_v57  ;;  %vm18126_vm10 = vmmov %vm18123_vm8 }
 0x475   : > { %v7699_v11 = vor.u32 %v17504_v3, %v7696_v12  ;;  %v7608_v14 = vpack.c.bf16 %v7582_v1, %v7581_v28  ;;  %v7446_v58 = vsel %vm18055_vm0, %v7381_v44, 0.0  ;;  %v15947_v3 = vld [vmem:[#allocation4 + $0x48] sm:$0xff]  ;;  %vm18128_vm9 = vmmov %vm18125_vm1 }
 0x476   : > { %v7607_v8 = vpack.c.bf16 %v7580_v18, %v7579_v0  ;;  %v7553_v38 = vadd.f32 %v15733_v43, %v7516_v35  ;;  %v7478_v62 = vadd.f32 %v7446_v58, %v15688_v42  ;;  %v7551_v57 = vadd.f32 %v15733_v43, %v7514_v61 }
 0x477   : > { %v15943_v63 = vsel %vm18125_vm1, %v15864_v47, %v7699_v11  ;;  %7624 = vst.msk [vmem:[#allocation4 + $0x58] sm:$0xff] %vm18126_vm10, %v7608_v14  ;;  %v15950_v28 = vld [vmem:[#allocation4 + $0x40] sm:$0xff]  ;;  %v7517_v1 = vmul.f32 %v15725_v52, %v7480_v25  ;;  %v15957_v47 = vsel %vm18128_vm9, %v7696_v12, %v7707_v31  ;;  %v17505_v18 = vshrl.u32 %v15947_v3, 16  ;;  %vm18129_vm1 = vmmov %vm18123_vm8 }
 0x478   : > { %12453 = vmatmul.mubr.msk.bf16.gmra.mrb[24].mxu0 %vm18127_vm14, %v15943_v63  ;;  %7623 = vst.msk [vmem:[#allocation4 + $0x50] sm:$0xff] %vm18123_vm8, %v7607_v8  ;;  %v17506_v42 = vshrl.u32 %v15950_v28, 16  ;;  %v7515_v14 = vmul.f32 %v15725_v52, %v7478_v62  ;;  %v7585_v58 = vmax.f32 %v7553_v38, 0.0  ;;  %vm18130_vm10 = vmmov %vm18129_vm1  ;;  %v12436_v41 = vpop.f32.mrb[40].mxu1  ;;  %v17508_v31 = vshll.u32 %v15947_v3, 16 }
 0x479   : > { %12456 = vmatprep.mubr.msk.bf16.mxu0 %vm18129_vm1, %v15957_v47  ;;  %v7554_v0 = vadd.f32 %v15733_v43, %v7517_v1  ;;  %v15970_v12 = vrot.slane %v17505_v18, 7  ;;  %v17509_v11 = vshll.u32 %v15950_v28, 16  ;;  %v7483_v27 = vadd.f32 %v12436_v41, %v15698_v48  ;;  %vm18131_vm14 = vmmov %vm18129_vm1  ;;  %v7394_v44 = vpop.f32.mrb[41].mxu1  ;;  %v18141_v48 = vld [vmem:[#allocation6_spill] sm:$0xff] }
 0x47a   : > { %v7712_v55 = vrot.slane %v17506_v42, 7  ;;  %v7552_v35 = vadd.f32 %v15733_v43, %v7515_v14  ;;  %v7583_v61 = vmax.f32 %v7551_v57, 0.0  ;;  %v7481_v38 = vadd.f32 %v7394_v44, %v15702_v53  ;;  %v12437_v62 = vpop.f32.mrb[42].mxu1  ;;  %vm18134_vm8 = vmmov %vm18129_vm1 }
 0x47b   : > { %12491 = vmatmul.mubr.msk.bf16.gmra.mrb[60].mxu1 %vm18130_vm10, %v15950_v28  ;;  %v7586_v25 = vmax.f32 %v7554_v0, 0.0  ;;  %v7723_v8 = vor.u32 %v17508_v31, %v15970_v12  ;;  %v7520_v14 = vmul.f32 %v15725_v52, %v7483_v27  ;;  %v7452_v41 = vsel %vm18035_vm5, %v12437_v62, 0.0  ;;  %v7397_v42 = vpop.f32.mrb[43].mxu1  ;;  %vm18135_vm10 = vmmov %vm18128_vm9 }
 0x47c   : > { %12494 = vmatprep.mubr.msk.bf16.mxu1 %vm18131_vm14, %v15947_v3  ;;  %v7715_v1 = vor.u32 %v17509_v11, %v7712_v55  ;;  %v7584_v18 = vmax.f32 %v7552_v35, 0.0  ;;  %v7518_v57 = vmul.f32 %v15725_v52, %v7481_v38  ;;  %v7484_v0 = vadd.f32 %v7452_v41, %v15700_v23  ;;  %vm18136_vm14 = vmmov %vm18129_vm1 }
 0x47d   : > { %v7610_v36 = vpack.c.bf16 %v7586_v25, %v7585_v58  ;;  %v7450_v31 = vsel %vm18059_vm6, %v7397_v42, 0.0  ;;  %v7557_v35 = vadd.f32 %v15733_v43, %v7520_v14  ;;  %vm18154_vm6 = vmmov %vm18129_vm1 }
 0x47e   : > { %v15995_v53 = vsel %vm18128_vm9, %v15918_v51, %v7715_v1  ;;  %v7609_v44 = vpack.c.bf16 %v7584_v18, %v7583_v61  ;;  %v7482_v27 = vadd.f32 %v7450_v31, %v15704_v7  ;;  %v15999_v11 = vld [vmem:[#allocation4 + $0x58] sm:$0xff]  ;;  %v7555_v23 = vadd.f32 %v15733_v43, %v7518_v57  ;;  %vm18137_vm9 = vmmov %vm18129_vm1 }
 0x47f   : > { %7626 = vst.msk [vmem:[#allocation4 + $0x68] sm:$0xff] %vm18134_vm8, %v7610_v36  ;;  %v16002_v58 = vld [vmem:[#allocation4 + $0x50] sm:$0xff]  ;;  %v7521_v25 = vmul.f32 %v15725_v52, %v7484_v0  ;;  %v16009_v51 = vsel %vm18135_vm10, %v7712_v55, %v7723_v8  ;;  %v17510_v18 = vshrl.u32 %v15999_v11, 16  ;;  %v7589_v42 = vmax.f32 %v7557_v35, 0.0  ;;  %vm18138_vm8 = vmmov %vm18129_vm1 }
 0x480   : > { %12457 = vmatmul.mubr.msk.bf16.gmra.mrb[28].mxu0 %vm18129_vm1, %v15995_v53  ;;  %7625 = vst.msk [vmem:[#allocation4 + $0x60] sm:$0xff] %vm18136_vm14, %v7609_v44  ;;  %v17511_v7 = vshrl.u32 %v16002_v58, 16  ;;  %v7519_v36 = vmul.f32 %v15725_v52, %v7482_v27  ;;  %v12440_v61 = vpop.f32.mrb[44].mxu1  ;;  %v17512_v8 = vshll.u32 %v15999_v11, 16  ;;  %v7729_v62 = vshll.u32 %v16002_v58, 16 }
 0x481   : > { %12460 = vmatprep.mubr.msk.bf16.mxu0 %vm18137_vm9, %v16009_v51  ;;  %v7558_v31 = vadd.f32 %v15733_v43, %v7521_v25  ;;  %v7736_v55 = vrot.slane %v17510_v18, 7  ;;  %v7487_v14 = vadd.f32 %v12440_v61, %v15713_v26  ;;  %v7410_v41 = vpop.f32.mrb[45].mxu1  ;;  %v7587_v57 = vmax.f32 %v7555_v23, 0.0 }
 0x482   : > { %v7728_v38 = vrot.slane %v17511_v7, 7  ;;  %v7556_v1 = vadd.f32 %v15733_v43, %v7519_v36  ;;  %v7485_v35 = vadd.f32 %v7410_v41, %v15716_v39  ;;  %v12441_v27 = vpop.f32.mrb[46].mxu1  ;;  %v18139_v7 = vld [vmem:[#allocation5_spill] sm:$0xff]  ;;  %vm18142_vm14 = vnez %v18141_v48 }
 0x483   : > { %12495 = vmatmul.mubr.msk.bf16.gmra.mrb[64].mxu1 %vm18138_vm8, %v16002_v58  ;;  %v7590_v0 = vmax.f32 %v7558_v31, 0.0  ;;  %v7739_v44 = vor.u32 %v17512_v8, %v7736_v55  ;;  %v7524_v36 = vmul.f32 %v15725_v52, %v7487_v14  ;;  %vm18140_vm10 = vnez %v18139_v7  ;;  %v7413_v61 = vpop.f32.mrb[47].mxu1  ;;  %vm18144_vm8 = vmmov %vm18129_vm1 }
 0x484   : > { %12498 = vmatprep.mubr.msk.bf16.mxu1 %vm18129_vm1, %v15999_v11  ;;  %v7731_v25 = vor.u32 %v7729_v62, %v7728_v38  ;;  %v7588_v18 = vmax.f32 %v7556_v1, 0.0  ;;  %v7456_v26 = vsel %vm18140_vm10, %v12441_v27, 0.0  ;;  %v7522_v23 = vmul.f32 %v15725_v52, %v7485_v35  ;;  %vm18152_vm10 = vmmov %vm18129_vm1 }
 0x485   : > { %v7612_v4 = vpack.c.bf16 %v7590_v0, %v7589_v42  ;;  %v7488_v31 = vadd.f32 %v7456_v26, %v15718_v30  ;;  %v7454_v8 = vsel %vm18142_vm14, %v7413_v61, 0.0  ;;  %vm18143_vm9 = vsmask.f32 256 }
 0x486   : > { %v16044_v39 = vsel %vm18143_vm9, %v15970_v12, %v7731_v25  ;;  %v7611_v41 = vpack.c.bf16 %v7588_v18, %v7587_v57  ;;  %v7486_v1 = vadd.f32 %v7454_v8, %v15720_v17  ;;  %v16047_v14 = vld [vmem:[#allocation4 + $0x68] sm:$0xff]  ;;  %v7561_v42 = vadd.f32 %v15733_v43, %v7524_v36  ;;  %vm18145_vm14 = vmmov %vm18143_vm9 }
 0x487   : > { %7628 = vst.msk [vmem:[#allocation4 + $0x78] sm:$0xff] %vm18144_vm8, %v7612_v4  ;;  %v16051_v0 = vld [vmem:[#allocation4 + $0x60] sm:$0xff]  ;;  %v7525_v30 = vmul.f32 %v15725_v52, %v7488_v31  ;;  %v16057_v35 = vsel %vm18145_vm14, %v7728_v38, %v7739_v44  ;;  %v17513_v12 = vshrl.u32 %v16047_v14, 16  ;;  %vm18146_vm9 = vmmov %vm18129_vm1  ;;  %v7559_v4 = vadd.f32 %v15733_v43, %v7522_v23 }
 0x488   : > { %12461 = vmatmul.mubr.msk.bf16.gmra.mrb[32].mxu0 %vm18129_vm1, %v16044_v39  ;;  %7627 = vst.msk [vmem:[#allocation4 + $0x70] sm:$0xff] %vm18146_vm9, %v7611_v41  ;;  %v17520_v17 = vshrl.u32 %v16051_v0, 16  ;;  %v7523_v18 = vmul.f32 %v15725_v52, %v7486_v1  ;;  %vm18147_vm8 = vmmov %vm18129_vm1  ;;  %v17521_v57 = vshll.u32 %v16047_v14, 16  ;;  %v17522_v27 = vshll.u32 %v16051_v0, 16 }
 0x489   : > { %12464 = vmatprep.mubr.msk.bf16.mxu0 %vm18147_vm8, %v16057_v35  ;;  %v7562_v8 = vadd.f32 %v15733_v43, %v7525_v30  ;;  %v7752_v38 = vrot.slane %v17513_v12, 7  ;;  %vm18148_vm14 = vmmov %vm18129_vm1  ;;  %v7593_v25 = vmax.f32 %v7561_v42, 0.0  ;;  %v7591_v23 = vmax.f32 %v7559_v4, 0.0 }
 0x48a   : > { %v7744_v44 = vrot.slane %v17520_v17, 7  ;;  %v7560_v52 = vadd.f32 %v15733_v43, %v7523_v18  ;;  %vm18149_vm9 = vsmask.f32 256  ;;  %v8714_v43 = vld [vmem:[#allocation4 + $0x8] sm:$0x80]  ;;  %vm18150_vm8 = vmmov %vm18129_vm1  ;;  %v18188_v7 = vshll.u32 %v16051_v0, 16 }
 0x48b   : > { %12499 = vmatmul.mubr.msk.bf16.gmra.mrb[68].mxu1 %vm18129_vm1, %v16051_v0  ;;  %v7594_v36 = vmax.f32 %v7562_v8, 0.0  ;;  %v7755_v26 = vor.u32 %v17521_v57, %v7752_v38  ;;  %v18196_v54 = vshrl.u32 %v16051_v0, 16 }
 0x48c   : > { %12502 = vmatprep.mubr.msk.bf16.mxu1 %vm18148_vm14, %v16047_v14  ;;  %v7747_v61 = vor.u32 %v17522_v27, %v7744_v44  ;;  %v7592_v31 = vmax.f32 %v7560_v52, 0.0  ;;  %vm18151_vm14 = vmmov %vm18149_vm9  ;;  %v16188_v27 = vld [vmem:[%s17252_s6 + $0x18] sm:$0xf]  ;;  %v9382_v32 = vrot.slane %v18188_v7, 1 }
 0x48d   : > { %v7614_v41 = vpack.c.bf16 %v7594_v36, %v7593_v25  ;;  %v16093_v18 = vsel %vm18151_vm14, %v7744_v44, %v7755_v26  ;;  %v8719_v25 = vshrl.u32 %v8714_v43, 16 }
 0x48e   : > { %v16083_v1 = vsel %vm18149_vm9, %v7736_v55, %v7747_v61  ;;  %v7613_v30 = vpack.c.bf16 %v7592_v31, %v7591_v23  ;;  %v16085_v12 = vld [vmem:[#allocation4 + $0x78] sm:$0xff]  ;;  %vm18153_vm9 = vmmov %vm18129_vm1  ;;  %v9386_v59 = vor.u32 %v9382_v32, %v18196_v54 }
 0x48f   : > { %7630 = vst.msk [vmem:[#allocation4 + $0x88] sm:$0xff] %vm18150_vm8, %v7614_v41  ;;  %v16088_v42 = vld [vmem:[#allocation4 + $0x70] sm:$0xff]  ;;  %v17515_v4 = vshrl.u32 %v16085_v12, 16  ;;  %v17518_v52 = vshll.u32 %v16085_v12, 16  ;;  %v8721_v23 = vrot.slane %v8719_v25, 7  ;;  %vm18157_vm8 = vmmov %vm18129_vm1  ;;  %v18207_v49 = vshrl.u32 %v16085_v12, 16 }
 0x490   : > { %12465 = vmatmul.mubr.msk.bf16.gmra.mrb[36].mxu0 %vm18129_vm1, %v16083_v1  ;;  %7629 = vst.msk [vmem:[#allocation4 + $0x80] sm:$0xff] %vm18152_vm10, %v7613_v30  ;;  %v17516_v55 = vshrl.u32 %v16088_v42, 16  ;;  %v17519_v36 = vshll.u32 %v16088_v42, 16  ;;  %vm18155_vm10 = vmmov %vm18129_vm1 }
 0x491   : > { %12468 = vmatprep.mubr.msk.bf16.mxu0 %vm18153_vm9, %v16093_v18  ;;  %v7768_v8 = vrot.slane %v17515_v4, 7  ;;  %vm18160_vm9 = vmmov %vm18157_vm8 }
 0x492   : > { %v7760_v44 = vrot.slane %v17516_v55, 7 }
 0x493   : > { %12503 = vmatmul.mubr.msk.bf16.gmra.mrb[72].mxu1 %vm18154_vm6, %v16088_v42  ;;  %v7771_v26 = vor.u32 %v17518_v52, %v7768_v8  ;;  %vm18156_vm6 = vmmov %vm18151_vm14 }
 0x494   : > { %12506 = vmatprep.mubr.msk.bf16.mxu1 %vm18155_vm10, %v16085_v12  ;;  %v7763_v61 = vor.u32 %v17519_v36, %v7760_v44  ;;  %vm18158_vm1 = vmmov %vm18156_vm6 }
 0x495   : > { %v16122_v30 = vsel %vm18158_vm1, %v7760_v44, %v7771_v26  ;;  %vm18159_vm14 = vmmov %vm18157_vm8  ;;  %v18163_v44 = vshll.u32 %v15784_v16, 16 }
 0x496   : > { %v16115_v31 = vsel %vm18156_vm6, %v7752_v38, %v7763_v61  ;;  %vm18161_vm10 = vmmov %vm18158_vm1  ;;  %v16239_v24 = vld [vmem:[#allocation4 + $0x88] sm:$0xff] }
 0x497   : > { %v16117_v41 = vld [vmem:[#allocation4 + $0x80] sm:$0xff]  ;;  %v8724_v38 = vsel %vm18161_vm10, %v8721_v23, %v15822_v19  ;;  %vm18162_vm6 = vmmov %vm18157_vm8  ;;  %v8316_v26 = vrot.slane %v18163_v44, 1  ;;  %v18170_v44 = vshll.u32 %v15844_v6, 16 }
 0x498   : > { %12469 = vmatmul.mubr.msk.bf16.gmra.mrb[40].mxu0 %vm18157_vm8, %v16115_v31  ;;  %v17517_v43 = vshrl.u32 %v16117_v41, 16  ;;  %v7777_v61 = vshll.u32 %v16117_v41, 16  ;;  %vm18164_vm8 = vmmov %vm18158_vm1 }
 0x499   : > { %12472 = vmatprep.mubr.msk.bf16.mxu0 %vm18159_vm14, %v16122_v30  ;;  %vm18165_vm1 = vmmov %vm18162_vm6  ;;  %vm18166_vm14 = vsmask.f32 7424  ;;  %v8332_v52 = vrot.slane %v18170_v44, 1  ;;  %v18177_v44 = vshrl.u32 %v15777_v56, 16 }
 0x49a   : > { %v16133_v25 = vrot.slane %v17517_v43, 7  ;;  %v8317_v19 = vsel %vm18166_vm14, %v15640_v40, %v8316_v26  ;;  %v18168_v43 = vshll.u32 %v15777_v56, 16  ;;  %vm18169_vm10 = vmmov %vm18165_vm1  ;;  %v18174_v40 = vshrl.u32 %v15844_v6, 16 }
 0x49b   : > { %12507 = vmatmul.mubr.msk.bf16.gmra.mrb[76].mxu1 %vm18160_vm9, %v16117_v41  ;;  %vm18167_vm9 = vcmask 1043456   ;;  %v9414_v29 = vrot.slane %v7777_v61, 1 }
 0x49c   : > { %12546 = vmatprep.mubr.msk.bf16.mxu1 %vm18162_vm6, %v8724_v38  ;;  %v7779_v4 = vor.u32 %v7777_v61, %v16133_v25  ;;  %v9481_v23 = vsel %vm18167_vm9, %v15790_v10, 0  ;;  %v8324_v38 = vrot.slane %v18168_v43, 1  ;;  %vm18172_vm6 = vmmov %vm18165_vm1  ;;  %v9322_v10 = vor.u32 %v8332_v52, %v18174_v40 }
 0x49d   : > { %v18175_v43 = vshll.u32 %v15898_v9, 16  ;;  %v18180_v40 = vshrl.u32 %v15898_v9, 16 }
 0x49e   : > { %v16141_v55 = vsel %vm18164_vm8, %v7768_v8, %v7779_v4  ;;  %v16157_v4 = vld [vmem:[%s17252_s6 + $0x1c] sm:$0xf]  ;;  %v18171_v8 = vshrl.u32 %v15784_v16, 16  ;;  %vm18173_vm8 = vmmov %vm18165_vm1  ;;  %v8328_v17 = vor.u32 %v8324_v38, %v18177_v44 }
 0x4a0   : > { %12473 = vmatmul.mubr.msk.bf16.gmra.mrb[44].mxu0 %vm18165_vm1, %v16141_v55  ;;  %v8320_v36 = vor.u32 %v8316_v26, %v18171_v8  ;;  %vm18176_vm1 = vmmov %vm18167_vm9 }
 0x4a1   : > { %12512 = vmatprep.mubr.msk.bf16.mxu0 %vm18169_vm10, %v8317_v19  ;;  %v9334_v19 = vrot.slane %v18175_v43, 1  ;;  %vm18178_vm9 = vmmov %vm18176_vm1 }
 0x4a2   : > { %v16174_v26 = vsel %vm18166_vm14, %v8320_v36, %v8324_v38  ;;  %vm18181_vm10 = vmmov %vm18166_vm14  ;;  %v18182_v36 = vshll.u32 %v15950_v28, 16 }
 0x4a3   : > { %12547 = vmatmul.mubr.msk.bf16.vlgmr.msra.gmra.mrb[80].mxu1 %vm18172_vm6, %v15851_v46  ;;  %v9086_v46 = vsel %vm18178_vm9, %v15841_v60, 0  ;;  %v9338_v57 = vor.u32 %v9334_v19, %v18180_v40  ;;  %v16183_v43 = vsel %vm18181_vm10, %v8328_v17, %v8332_v52  ;;  %v18183_v60 = vshll.u32 %v15947_v3, 16 }
 0x4a4   : > { %12550 = vmatprep.mubr.msk.bf16.mxu1 %vm18173_vm8, %v15891_v22  ;;  %12613 = vmatpush3.bf16.msra.mxu1 %v9481_v23  ;;  %v18179_v23 = vshll.u32 %v15836_v34, 16  ;;  %v9350_v38 = vrot.slane %v18182_v36, 1  ;;  %v18184_v17 = vshll.u32 %v15999_v11, 16  ;;  %vm18185_vm8 = vmmov %vm18181_vm10  ;;  %v18187_v36 = vshrl.u32 %v15950_v28, 16 }
 0x4a5   : > { %12766 = vmatprep.subr.msk.bf16.mxu1 %vm18176_vm1, %v16157_v4  ;;  %v9358_v44 = vrot.slane %v18183_v60, 1  ;;  %vm18186_vm1 = vmmov %vm18172_vm6 }
 0x4a6   : > { %v8340_v8 = vrot.slane %v18179_v23, 1  ;;  %v9366_v23 = vrot.slane %v7729_v62, 1  ;;  %v9374_v52 = vrot.slane %v18184_v17, 1  ;;  %v9354_v48 = vor.u32 %v9350_v38, %v18187_v36  ;;  %vm18189_vm14 = vmmov %vm18186_vm1 }
 0x4a7   : > { %v18190_v62 = vshrl.u32 %v15947_v3, 16  ;;  %v18192_v17 = vshrl.u32 %v15999_v11, 16  ;;  %v18193_v36 = vshll.u32 %v16047_v14, 16  ;;  %vm18194_vm10 = vmmov %vm18186_vm1 }
 0x4a8   : > { %12513 = vmatmul.mubr.msk.bf16.vlgmr.msra.gmra.mrb[48].mxu0 %vm18172_vm6, %v16174_v26  ;;  %v16201_v40 = vsel %vm18185_vm8, %v9322_v10, %v8340_v8  ;;  %v18191_v10 = vshrl.u32 %v16002_v58, 16  ;;  %vm18195_vm6 = vmmov %vm18185_vm8 }
 0x4a9   : > { %12579 = vmatpush3.bf16.msra.mxu0 %v9086_v46  ;;  %12516 = vmatprep.mubr.msk.bf16.mxu0 %vm18186_vm1, %v16183_v43  ;;  %v9362_v46 = vor.u32 %v9358_v44, %v18190_v62  ;;  %v9378_v13 = vor.u32 %v9374_v52, %v18192_v17  ;;  %v9390_v21 = vrot.slane %v18193_v36, 1  ;;  %v16224_v7 = vsel %vm18195_vm6, %v9354_v48, %v9358_v44  ;;  %vm18197_vm8 = vmmov %vm18195_vm6 }
 0x4aa   : > { %12765 = vmatprep.subr.msk.bf16.mxu0 %vm18178_vm9, %v16188_v27  ;;  %v9370_v60 = vor.u32 %v9366_v23, %v18191_v10  ;;  %vm18198_vm1 = vmmov %vm18195_vm6  ;;  %v18200_v36 = vshrl.u32 %v16047_v14, 16  ;;  %v18202_v44 = vshll.u32 %v16088_v42, 16  ;;  %vm18208_vm6 = vcmask 64512  }
 0x4ab   : > { %12551 = vmatmul.mubr.msk.bf16.gmra.mrb[84].mxu1 %vm18189_vm14, %v15905_v37  ;;  %v16229_v62 = vsel %vm18197_vm8, %v9362_v46, %v9366_v23  ;;  %vm18199_vm14 = vmmov %vm18198_vm1  ;;  %v18203_v23 = vshll.u32 %v16085_v12, 16 }
 0x4ac   : > { %12554 = vmatprep.mubr.msk.bf16.mxu1 %vm18194_vm10, %v15943_v63  ;;  %v16232_v10 = vsel %vm18198_vm1, %v9370_v60, %v9374_v52  ;;  %v16235_v17 = vsel %vm18199_vm14, %v9378_v13, %v9382_v32  ;;  %v9394_v5 = vor.u32 %v9390_v21, %v18200_v36  ;;  %vm18201_vm9 = vmmov %vm18198_vm1  ;;  %v9398_v54 = vrot.slane %v18202_v44, 1 }
 0x4ad   : > { %v16242_v48 = vsel %vm18201_vm9, %v9386_v59, %v9390_v21  ;;  %v9406_v46 = vrot.slane %v18203_v23, 1  ;;  %v18204_v52 = vshrl.u32 %v15836_v34, 16  ;;  %vm18205_vm10 = vmmov %vm18198_vm1  ;;  %v18206_v13 = vshrl.u32 %v16088_v42, 16 }
 0x4ae   : > { %v16251_v32 = vsel %vm18205_vm10, %v9394_v5, %v9398_v54  ;;  %vm18209_vm8 = vmmov %vm18198_vm1  ;;  %v8768_v44 = vshrl.u32 %v16239_v24, 16  ;;  %v18210_v23 = vshrl.u32 %v16117_v41, 16  ;;  %v18211_v5 = vshll.u32 %v15895_v20, 16 }
 0x4af   : > { %v8344_v60 = vor.u32 %v8340_v8, %v18204_v52  ;;  %v9402_v36 = vor.u32 %v9398_v54, %v18206_v13  ;;  %v9410_v59 = vor.u32 %v9406_v46, %v18207_v49  ;;  %vm18212_vm1 = vmmov %vm18208_vm6  ;;  %v18217_v52 = vshrl.u32 %v15895_v20, 16 }
 0x4b0   : > { %12517 = vmatmul.mubr.msk.bf16.gmra.mrb[52].mxu0 %vm18208_vm6, %v16201_v40  ;;  %v16263_v8 = vor.u32 %v9414_v29, %v18210_v23  ;;  %v8356_v61 = vrot.slane %v18211_v5, 1  ;;  %vm18213_vm14 = vmmov %vm18209_vm8  ;;  %v8771_v13 = vshll.u32 %v16239_v24, 16 }
 0x4b1   : > { %v8349_v21 = vsel %vm18209_vm8, %v8344_v60, %v9334_v19  ;;  %v16269_v54 = vsel %vm18213_vm14, %v9402_v36, %v9406_v46  ;;  %vm18214_vm9 = vmmov %vm18209_vm8  ;;  %v16280_v19 = vrot.slane %v8768_v44, 7 }
 0x4b2   : > { %12520 = vmatprep.mubr.msk.bf16.mxu0 %vm18212_vm1, %v8349_v21  ;;  %v16272_v49 = vsel %vm18214_vm9, %v9410_v59, %v9414_v29  ;;  %vm18215_vm10 = vmmov %vm18212_vm1  ;;  %v8360_v60 = vor.u32 %v8356_v61, %v18217_v52  ;;  %v8357_v46 = vsel %vm18209_vm8, %v9338_v57, %v8356_v61  ;;  %v8303_v57 = vld [vmem:[#allocation4 + $0x88] sm:$0x1]  ;;  %v11347_v61 = vld [vmem:[%s17252_s6 + $0x20] sm:$0xf] }
 0x4b3   : > { %12555 = vmatmul.mubr.msk.bf16.gmra.mrb[88].mxu1 %vm18215_vm10, %v15957_v47  ;;  %vm18216_vm6 = vmmov %vm18212_vm1  ;;  %v9759_v36 = vor.u32 %v8771_v13, %v16280_v19 }
 0x4b4   : > { %12558 = vmatprep.mubr.msk.bf16.mxu1 %vm18216_vm6, %v15995_v53  ;;  %vm18218_vm14 = vmmov %vm18209_vm8  ;;  %vm18221_vm6 = vsmask.f32 256 }
 0x4b5   : > { %v8365_v29 = vsel %vm18218_vm14, %v8360_v60, %v9350_v38  ;;  %vm18219_vm9 = vmmov %vm18212_vm1  ;;  %v16294_v59 = vsel %vm18221_vm6, %v16133_v25, %v9759_v36  ;;  %v8434_v25 = vshll.u32 %v8303_v57, 16  ;;  %v18295_v60 = vld [vmem:[#allocation13_spill] sm:$0xff]  ;;  %v18297_v36 = vld [vmem:[#allocation14_spill] sm:$0xff] }
 0x4b6   : > { %vm18220_vm10 = vmmov %vm18212_vm1 }
 0x4b7   : > { %vm18222_vm5 = vmmov %vm18212_vm1  ;;  %v8436_v38 = vrot.slane %v8434_v25, 1 }
 0x4b8   : > { %12521 = vmatmul.mubr.msk.bf16.gmra.mrb[56].mxu0 %vm18212_vm1, %v8357_v46  ;;  %vm18223_vm8 = vmmov %vm18212_vm1 }
 0x4b9   : > { %12524 = vmatprep.mubr.msk.bf16.mxu0 %vm18219_vm9, %v8365_v29  ;;  %vm18224_vm14 = vmmov %vm18212_vm1 }
 0x4ba   : > { %vm18225_vm9 = vmmov %vm18212_vm1 }
 0x4bb   : > { %12559 = vmatmul.mubr.msk.bf16.gmra.mrb[92].mxu1 %vm18220_vm10, %v16009_v51  ;;  %vm18226_vm10 = vmmov %vm18212_vm1 }
 0x4bc   : > { %12562 = vmatprep.mubr.msk.bf16.mxu1 %vm18222_vm5, %v16044_v39  ;;  %vm18227_vm6 = vmmov %vm18212_vm1 }
 0x4bd   : > { %vm18228_vm5 = vmmov %vm18212_vm1 }
 0x4c0   : > { %12525 = vmatmul.mubr.msk.bf16.gmra.mrb[60].mxu0 %vm18223_vm8, %v16224_v7  ;;  %vm18229_vm8 = vmmov %vm18212_vm1 }
 0x4c1   : > { %12528 = vmatprep.mubr.msk.bf16.mxu0 %vm18212_vm1, %v16229_v62 }
 0x4c3   : > { %12563 = vmatmul.mubr.msk.bf16.gmra.mrb[96].mxu1 %vm18224_vm14, %v16057_v35  ;;  %vm18230_vm14 = vmmov %vm18212_vm1 }
 0x4c4   : > { %12566 = vmatprep.mubr.msk.bf16.mxu1 %vm18225_vm9, %v16083_v1  ;;  %vm18231_vm9 = vmmov %vm18212_vm1 }
 0x4c8   : > { %12529 = vmatmul.mubr.msk.bf16.gmra.mrb[64].mxu0 %vm18226_vm10, %v16232_v10  ;;  %vm18232_vm10 = vmmov %vm18212_vm1 }
 0x4c9   : > { %12532 = vmatprep.mubr.msk.bf16.mxu0 %vm18227_vm6, %v16235_v17  ;;  %vm18233_vm6 = vmmov %vm18212_vm1 }
 0x4cb   : > { %12567 = vmatmul.mubr.msk.bf16.gmra.mrb[100].mxu1 %vm18228_vm5, %v16093_v18  ;;  %vm18234_vm5 = vmmov %vm18212_vm1 }
 0x4cc   : > { %12570 = vmatprep.mubr.msk.bf16.mxu1 %vm18229_vm8, %v16115_v31  ;;  %vm18235_vm8 = vmmov %vm18212_vm1 }
 0x4d0   : > { %12533 = vmatmul.mubr.msk.bf16.gmra.mrb[68].mxu0 %vm18212_vm1, %v16242_v48 }
 0x4d1   : > { %12536 = vmatprep.mubr.msk.bf16.mxu0 %vm18230_vm14, %v16251_v32  ;;  %vm18236_vm14 = vsmask.f32 7424 }
 0x4d2   : > { %v8437_v23 = vsel %vm18236_vm14, %v16263_v8, %v8436_v38 }
 0x4d3   : > { %12571 = vmatmul.mubr.msk.bf16.gmra.mrb[104].mxu1 %vm18231_vm9, %v16122_v30  ;;  %vm18237_vm9 = vmmov %vm18212_vm1 }
 0x4d4   : > { %12574 = vmatprep.mubr.msk.bf16.mxu1 %vm18232_vm10, %v16141_v55  ;;  %vm18238_vm10 = vcmask 1043456  }
 0x4d5   : > { %v10080_v5 = vsel %vm18238_vm10, %v16157_v4, 0 }
 0x4d8   : > { %12537 = vmatmul.mubr.msk.bf16.gmra.mrb[72].mxu0 %vm18233_vm6, %v16269_v54  ;;  %vm18239_vm6 = vmmov %vm18212_vm1 }
 0x4d9   : > { %12540 = vmatprep.mubr.msk.bf16.mxu0 %vm18234_vm5, %v16272_v49  ;;  %vm18240_vm5 = vmmov %vm18212_vm1 }
 0x4da   : > { %vm18243_vm14 = vmmov %vm18240_vm5 }
 0x4db   : > { %12575 = vmatmul.mubr.msk.bf16.gmra.mrb[108].mxu1 %vm18235_vm8, %v16294_v59  ;;  %vm18241_vm8 = vmmov %vm18212_vm1 }
 0x4dc   : > { %12614 = vmatprep.mubr.msk.bf16.mxu1 %vm18212_vm1, %v16174_v26  ;;  %vm18242_vm1 = vmmov %vm18238_vm10 }
 0x4dd   : > { %v9818_v26 = vsel %vm18242_vm1, %v16188_v27, 0  ;;  %vm18245_vm10 = vmmov %vm18240_vm5  ;;  %v16386_v27 = vrot.slane %v8771_v13, 1 }
 0x4e0   : > { %12541 = vmatmul.mubr.msk.bf16.gmra.mrb[76].mxu0 %vm18237_vm9, %v8437_v23  ;;  %vm18244_vm9 = vmmov %vm18240_vm5 }
 0x4e1   : > { %12580 = vmatprep.mubr.msk.bf16.mxu0 %vm18239_vm6, %v15784_v16  ;;  %vm18246_vm6 = vmmov %vm18242_vm1  ;;  %v9297_v16 = vld [vmem:[#allocation4 + $0x90] sm:$0x1] }
 0x4e2   : > { %vm18248_vm1 = vmmov %vm18240_vm5  ;;  %v9428_v4 = vshll.u32 %v9297_v16, 16  ;;  %v18302_v16 = vld [vmem:[#allocation17_spill] sm:$0xff] }
 0x4e3   : > { %12615 = vmatmul.mubr.msk.bf16.vlgmr.msra.gmra.mrb[112].mxu1 %vm18240_vm5, %v16183_v43  ;;  %vm18249_vm0 = vmmov %vm18248_vm1 }
 0x4e4   : > { %12618 = vmatprep.mubr.msk.bf16.mxu1 %vm18241_vm8, %v16201_v40  ;;  %12681 = vmatpush3.bf16.msra.mxu1 %v10080_v5  ;;  %vm18247_vm8 = vmmov %vm18240_vm5  ;;  %v16399_v40 = vor.u32 %v16386_v27, %v8768_v44 }
 0x4e5   : > { %vm18251_vm3 = vmmov %vm18249_vm0 }
 0x4e8   : > { %12581 = vmatmul.mubr.msk.bf16.vlgmr.msra.gmra.mrb[80].mxu0 %vm18243_vm14, %v15777_v56  ;;  %vm18250_vm14 = vmmov %vm18249_vm0 }
 0x4e9   : > { %12647 = vmatpush3.bf16.msra.mxu0 %v9818_v26  ;;  %12584 = vmatprep.mubr.msk.bf16.mxu0 %vm18244_vm9, %v15844_v6  ;;  %vm18252_vm9 = vmmov %vm18249_vm0 }
 0x4ea   : > { %12767 = vmatprep.subr.msk.bf16.mxu0 %vm18246_vm6, %v11347_v61  ;;  %vm18254_vm6 = vmmov %vm18249_vm0 }
 0x4eb   : > { %12619 = vmatmul.mubr.msk.bf16.gmra.mrb[116].mxu1 %vm18245_vm10, %v8349_v21  ;;  %vm18253_vm10 = vmmov %vm18249_vm0 }
 0x4ec   : > { %12622 = vmatprep.mubr.msk.bf16.mxu1 %vm18240_vm5, %v8357_v46  ;;  %vm18255_vm5 = vmmov %vm18249_vm0 }
 0x4f0   : > { %12585 = vmatmul.mubr.msk.bf16.gmra.mrb[84].mxu0 %vm18247_vm8, %v15836_v34  ;;  %vm18256_vm8 = vmmov %vm18249_vm0 }
 0x4f1   : > { %12588 = vmatprep.mubr.msk.bf16.mxu0 %vm18248_vm1, %v15898_v9  ;;  %vm18258_vm1 = vmmov %vm18249_vm0 }
 0x4f3   : > { %12623 = vmatmul.mubr.msk.bf16.gmra.mrb[120].mxu1 %vm18249_vm0, %v8365_v29 }
 0x4f4   : > { %12626 = vmatprep.mubr.msk.bf16.mxu1 %vm18250_vm14, %v16224_v7  ;;  %vm18259_vm14 = vmmov %vm18249_vm0  ;;  %v9430_v7 = vrot.slane %v9428_v4, 1 }
 0x4f8   : > { %12589 = vmatmul.mubr.msk.bf16.gmra.mrb[88].mxu0 %vm18251_vm3, %v15895_v20  ;;  %vm18257_vm3 = vmmov %vm18249_vm0 }
 0x4f9   : > { %12592 = vmatprep.mubr.msk.bf16.mxu0 %vm18252_vm9, %v15950_v28  ;;  %vm18260_vm9 = vmmov %vm18249_vm0 }
 0x4fb   : > { %12627 = vmatmul.mubr.msk.bf16.gmra.mrb[124].mxu1 %vm18253_vm10, %v16229_v62  ;;  %vm18261_vm10 = vmmov %vm18249_vm0  ;;  %v9708_v62 = vld [vmem:[#allocation4 + $0x10] sm:$0x80] }
 0x4fc   : > { %12630 = vmatprep.mubr.msk.bf16.mxu1 %vm18254_vm6, %v16232_v10  ;;  %vm18262_vm6 = vmmov %vm18249_vm0  ;;  %v9713_v10 = vshrl.u32 %v9708_v62, 16  ;;  %v18304_v62 = vld [vmem:[#allocation18_spill] sm:$0xff] }
 0x4fd   : > { %vm18305_vm2 = vnez %v18304_v62 }
 0x500   : > { %12593 = vmatmul.mubr.msk.bf16.gmra.mrb[92].mxu0 %vm18255_vm5, %v15947_v3  ;;  %vm18263_vm5 = vmmov %vm18249_vm0 }
 0x501   : > { %12596 = vmatprep.mubr.msk.bf16.mxu0 %vm18249_vm0, %v16002_v58 }
 0x503   : > { %12631 = vmatmul.mubr.msk.bf16.gmra.mrb[128].mxu1 %vm18256_vm8, %v16235_v17  ;;  %vm18264_vm8 = vsmask.f32 7424 }
 0x504   : > { %12634 = vmatprep.mubr.msk.bf16.mxu1 %vm18257_vm3, %v16242_v48  ;;  %v9423_v43 = vsel %vm18264_vm8, %v16263_v8, %v16386_v27  ;;  %vm18265_vm3 = vmmov %vm18249_vm0  ;;  %v9715_v48 = vrot.slane %v9713_v10, 7 }
 0x508   : > { %12597 = vmatmul.mubr.msk.bf16.gmra.mrb[96].mxu0 %vm18258_vm1, %v15999_v11  ;;  %vm18266_vm1 = vmmov %vm18249_vm0 }
 0x509   : > { %12600 = vmatprep.mubr.msk.bf16.mxu0 %vm18259_vm14, %v16051_v0  ;;  %vm18267_vm14 = vmmov %vm18264_vm8 }
 0x50a   : > { %v9431_v17 = vsel %vm18267_vm14, %v16399_v40, %v9430_v7  ;;  %vm18273_vm8 = vmmov %vm18266_vm1  ;;  %vm18275_vm14 = vcmask 1043456  }
 0x50b   : > { %12635 = vmatmul.mubr.msk.bf16.gmra.mrb[132].mxu1 %vm18260_vm9, %v16251_v32  ;;  %vm18268_vm9 = vmmov %vm18249_vm0  ;;  %v10475_v21 = vsel %vm18275_vm14, %v11347_v61, 0 }
 0x50c   : > { %12638 = vmatprep.mubr.msk.bf16.mxu1 %vm18261_vm10, %v16269_v54  ;;  %vm18269_vm10 = vmmov %vm18249_vm0 }
 0x510   : > { %12601 = vmatmul.mubr.msk.bf16.gmra.mrb[100].mxu0 %vm18262_vm6, %v16047_v14  ;;  %vm18270_vm6 = vmmov %vm18249_vm0 }
 0x511   : > { %12604 = vmatprep.mubr.msk.bf16.mxu0 %vm18263_vm5, %v16088_v42  ;;  %vm18271_vm5 = vmmov %vm18249_vm0 }
 0x513   : > { %12639 = vmatmul.mubr.msk.bf16.gmra.mrb[136].mxu1 %vm18249_vm0, %v16272_v49  ;;  %vm18272_vm0 = vsmask.f32 256 }
 0x514   : > { %12642 = vmatprep.mubr.msk.bf16.mxu1 %vm18265_vm3, %v9423_v43  ;;  %v9718_v32 = vsel %vm18272_vm0, %v9715_v48, %v15817_v50  ;;  %vm18274_vm3 = vmmov %vm18266_vm1 }
 0x515   : > { %vm18280_vm0 = vmmov %vm18266_vm1 }
 0x516   : > { %vm18284_vm14 = vmmov %vm18280_vm0 }
 0x518   : > { %12605 = vmatmul.mubr.msk.bf16.gmra.mrb[104].mxu0 %vm18266_vm1, %v16085_v12 }
 0x519   : > { %12608 = vmatprep.mubr.msk.bf16.mxu0 %vm18268_vm9, %v16117_v41  ;;  %vm18276_vm9 = vmmov %vm18266_vm1 }
 0x51b   : > { %12643 = vmatmul.mubr.msk.bf16.gmra.mrb[140].mxu1 %vm18269_vm10, %v9431_v17  ;;  %vm18277_vm10 = vmmov %vm18266_vm1 }
 0x51c   : > { %12682 = vmatprep.mubr.msk.bf16.mxu1 %vm18270_vm6, %v15777_v56  ;;  %vm18278_vm6 = vmmov %vm18266_vm1 }
 0x520   : > { %12609 = vmatmul.mubr.msk.bf16.gmra.mrb[108].mxu0 %vm18271_vm5, %v16239_v24  ;;  %vm18279_vm5 = vmmov %vm18266_vm1 }
 0x521   : > { %12648 = vmatprep.mubr.msk.bf16.mxu0 %vm18273_vm8, %v9718_v32  ;;  %vm18281_vm8 = vmmov %vm18280_vm0 }
 0x523   : > { %12683 = vmatmul.mubr.msk.bf16.vlgmr.msra.gmra.mrb[144].mxu1 %vm18274_vm3, %v15844_v6  ;;  %vm18282_vm3 = vmmov %vm18280_vm0 }
 0x524   : > { %12686 = vmatprep.mubr.msk.bf16.mxu1 %vm18266_vm1, %v15836_v34  ;;  %vm18283_vm1 = vmmov %vm18280_vm0 }
 0x528   : > { %12649 = vmatmul.mubr.msk.bf16.vlgmr.msra.gmra.mrb[112].mxu0 %vm18276_vm9, %v15891_v22  ;;  %vm18285_vm9 = vmmov %vm18280_vm0  ;;  %v18288_v22 = vld [vmem:[#allocation9_spill] sm:$0xff] }
 0x529   : > { %12715 = vmatpush3.bf16.msra.mxu0 %v10475_v21  ;;  %12652 = vmatprep.mubr.msk.bf16.mxu0 %vm18277_vm10, %v15905_v37  ;;  %vm18286_vm10 = vmmov %vm18280_vm0 }
 0x52b   : > { %12687 = vmatmul.mubr.msk.bf16.gmra.mrb[148].mxu1 %vm18278_vm6, %v15898_v9  ;;  %vm18287_vm6 = vmmov %vm18280_vm0 }
 0x52c   : > { %12690 = vmatprep.mubr.msk.bf16.mxu1 %vm18279_vm5, %v15895_v20  ;;  %vm18289_vm5 = vnez %v18288_v22 }
 0x530   : > { %12653 = vmatmul.mubr.msk.bf16.gmra.mrb[116].mxu0 %vm18280_vm0, %v15943_v63  ;;  %v18290_v63 = vld [vmem:[#allocation10_spill] sm:$0xff] }
 0x531   : > { %12656 = vmatprep.mubr.msk.bf16.mxu0 %vm18281_vm8, %v15957_v47  ;;  %vm18291_vm0 = vnez %v18290_v63  ;;  %vm18292_vm8 = vmmov %vm18283_vm1 }
 0x532   : > { %v12480_v56 = vpop.f32.mrb[48].mxu1 }
 0x533   : > { %12691 = vmatmul.mubr.msk.bf16.gmra.mrb[152].mxu1 %vm18282_vm3, %v15950_v28  ;;  %v8128_v50 = vpop.f32.mrb[49].mxu1  ;;  %vm18293_vm3 = vmmov %vm18283_vm1 }
 0x534   : > { %12694 = vmatprep.mubr.msk.bf16.mxu1 %vm18283_vm1, %v15947_v3  ;;  %v12481_v34 = vpop.f32.mrb[50].mxu1 }
 0x535   : > { %v8131_v6 = vpop.f32.mrb[51].mxu1 }
 0x538   : > { %12657 = vmatmul.mubr.msk.bf16.gmra.mrb[120].mxu0 %vm18284_vm14, %v15995_v53  ;;  %vm18294_vm14 = vmmov %vm18283_vm1 }
 0x539   : > { %12660 = vmatprep.mubr.msk.bf16.mxu0 %vm18285_vm9, %v16009_v51  ;;  %vm18296_vm9 = vnez %v18295_v60 }
 0x53b   : > { %12695 = vmatmul.mubr.msk.bf16.gmra.mrb[156].mxu1 %vm18286_vm10, %v16002_v58  ;;  %v12446_v20 = vpop.f32.mrb[16].mxu0  ;;  %vm18298_vm10 = vnez %v18297_v36 }
 0x53c   : > { %12698 = vmatprep.mubr.msk.bf16.mxu1 %vm18287_vm6, %v15999_v11  ;;  %v7995_v9 = vsel %vm18289_vm5, %v12446_v20, 0.0  ;;  %v7866_v37 = vpop.f32.mrb[17].mxu0  ;;  %vm18299_vm6 = vmmov %vm18283_vm1  ;;  %v10275_v20 = vld [vmem:[#allocation4 + $0x18] sm:$0xff] }
 0x53d   : > { %v16446_v3 = vadd.f32 %v12480_v56, %v7995_v9  ;;  %v7993_v28 = vsel %vm18291_vm0, %v7866_v37, 0.0  ;;  %v12447_v53 = vpop.f32.mrb[18].mxu0  ;;  %v18309_v9 = vld [vmem:[#allocation21_spill] sm:$0xff] }
 0x53e   : > { %v12484_v47 = vpop.f32.mrb[52].mxu1  ;;  %v16450_v44 = vadd.f32 %v8128_v50, %v7993_v28  ;;  %v16452_v51 = vadd.f32 %v12481_v34, %v12447_v53  ;;  %v7869_v8 = vpop.f32.mrb[19].mxu0  ;;  %v16498_v50 = vld [vmem:[#allocation4 + $0x90] sm:$0xff] }
 0x53f   : > { %v8144_v58 = vpop.f32.mrb[53].mxu1  ;;  %v16454_v54 = vadd.f32 %v8131_v6, %v7869_v8  ;;  %v17535_v6 = vshrl.u32 %v16498_v50, 16  ;;  %v10276_v8 = vld [vmem:[#allocation4 + $0x20] sm:$0xff] }
 0x540   : > { %v12485_v11 = vpop.f32.mrb[54].mxu1  ;;  %12661 = vmatmul.mubr.msk.bf16.gmra.mrb[124].mxu0 %vm18292_vm8, %v16044_v39  ;;  %vm18300_vm8 = vmmov %vm18283_vm1 }
 0x541   : > { %v8147_v49 = vpop.f32.mrb[55].mxu1  ;;  %12664 = vmatprep.mubr.msk.bf16.mxu0 %vm18293_vm3, %v16057_v35  ;;  %vm18301_vm3 = vmmov %vm18283_vm1 }
 0x543   : > { %12699 = vmatmul.mubr.msk.bf16.gmra.mrb[160].mxu1 %vm18283_vm1, %v16051_v0  ;;  %v12450_v52 = vpop.f32.mrb[20].mxu0 }
 0x544   : > { %12702 = vmatprep.mubr.msk.bf16.mxu1 %vm18294_vm14, %v16047_v14  ;;  %v7999_v13 = vsel %vm18296_vm9, %v12450_v52, 0.0  ;;  %v7882_v46 = vpop.f32.mrb[21].mxu0  ;;  %vm18303_vm14 = vnez %v18302_v16  ;;  %v10297_v52 = vshll.u32 %v10275_v20, 16 }
 0x545   : > { %v16466_v29 = vadd.f32 %v12484_v47, %v7999_v13  ;;  %v7997_v57 = vsel %vm18298_vm10, %v7882_v46, 0.0  ;;  %v12451_v25 = vpop.f32.mrb[22].mxu0  ;;  %v18310_v47 = vld [vmem:[#allocation22_spill] sm:$0xff] }
 0x546   : > { %v12488_v39 = vpop.f32.mrb[56].mxu1  ;;  %v16470_v38 = vadd.f32 %v8144_v58, %v7997_v57  ;;  %v16472_v35 = vadd.f32 %v12485_v11, %v12451_v25  ;;  %v7885_v23 = vpop.f32.mrb[23].mxu0  ;;  %v9764_v57 = vrot.slane %v17535_v6, 7 }
 0x547   : > { %v8160_v0 = vpop.f32.mrb[57].mxu1  ;;  %v16474_v5 = vadd.f32 %v8147_v49, %v7885_v23  ;;  %v10299_v23 = vrot.slane %v10297_v52, 1 }
 0x548   : > { %v12489_v14 = vpop.f32.mrb[58].mxu1  ;;  %12665 = vmatmul.mubr.msk.bf16.gmra.mrb[128].mxu0 %vm18299_vm6, %v16083_v1  ;;  %vm18306_vm6 = vmmov %vm18283_vm1 }
 0x549   : > { %v8163_v26 = vpop.f32.mrb[59].mxu1  ;;  %12668 = vmatprep.mubr.msk.bf16.mxu0 %vm18300_vm8, %v16093_v18  ;;  %vm18307_vm8 = vmmov %vm18283_vm1 }
 0x54b   : > { %12703 = vmatmul.mubr.msk.bf16.gmra.mrb[164].mxu1 %vm18301_vm3, %v16088_v42  ;;  %v12454_v61 = vpop.f32.mrb[24].mxu0  ;;  %vm18308_vm3 = vmmov %vm18283_vm1 }
 0x54c   : > { %12706 = vmatprep.mubr.msk.bf16.mxu1 %vm18283_vm1, %v16085_v12  ;;  %v8003_v4 = vsel %vm18303_vm14, %v12454_v61, 0.0  ;;  %v7898_v43 = vpop.f32.mrb[25].mxu0  ;;  %v10277_v61 = vld [vmem:[#allocation4 + $0x28] sm:$0xff] }
 0x54d   : > { %v16486_v7 = vadd.f32 %v12488_v39, %v8003_v4  ;;  %v8001_v10 = vsel %vm18305_vm2, %v7898_v43, 0.0  ;;  %v12455_v17 = vpop.f32.mrb[26].mxu0  ;;  %v17536_v39 = vshll.u32 %v16498_v50, 16  ;;  %v18314_v4 = vld [vmem:[#allocation25_spill] sm:$0xff] }
 0x54e   : > { %v12492_v1 = vpop.f32.mrb[60].mxu1  ;;  %v16490_v48 = vadd.f32 %v8160_v0, %v8001_v10  ;;  %v16492_v18 = vadd.f32 %v12489_v14, %v12455_v17  ;;  %v7901_v32 = vpop.f32.mrb[27].mxu0  ;;  %v10302_v0 = vshll.u32 %v10276_v8, 16 }
 0x54f   : > { %v8176_v42 = vpop.f32.mrb[61].mxu1  ;;  %v16494_v21 = vadd.f32 %v8163_v26, %v7901_v32  ;;  %v9767_v14 = vor.u32 %v17536_v39, %v9764_v57 }
 0x550   : > { %v12493_v12 = vpop.f32.mrb[62].mxu1  ;;  %12669 = vmatmul.mubr.msk.bf16.gmra.mrb[132].mxu0 %vm18306_vm6, %v16115_v31  ;;  %vm18311_vm6 = vnez %v18310_v47  ;;  %v10304_v17 = vrot.slane %v10302_v0, 1 }
 0x551   : > { %v8179_v56 = vpop.f32.mrb[63].mxu1  ;;  %12672 = vmatprep.mubr.msk.bf16.mxu0 %vm18307_vm8, %v16122_v30  ;;  %vm18312_vm8 = vmmov %vm18283_vm1 }
 0x553   : > { %12707 = vmatmul.mubr.msk.bf16.gmra.mrb[168].mxu1 %vm18308_vm3, %v16117_v41  ;;  %v12458_v34 = vpop.f32.mrb[28].mxu0  ;;  %vm18313_vm3 = vmmov %vm18283_vm1 }
 0x554   : > { %12710 = vmatprep.mubr.msk.bf16.mxu1 %vm18283_vm1, %v16239_v24  ;;  %v8007_v37 = vsel %vm18078_vm7, %v12458_v34, 0.0  ;;  %v7914_v28 = vpop.f32.mrb[29].mxu0 }
 0x555   : > { %v16509_v31 = vadd.f32 %v12492_v1, %v8007_v37  ;;  %v8005_v53 = vsel %vm18311_vm6, %v7914_v28, 0.0  ;;  %v12459_v58 = vpop.f32.mrb[30].mxu0  ;;  %vm18315_vm6 = vnez %v18314_v4  ;;  %v10295_v1 = vshrl.u32 %v10275_v20, 16 }
 0x556   : > { %v12496_v30 = vpop.f32.mrb[64].mxu1  ;;  %v16513_v41 = vadd.f32 %v8176_v42, %v8005_v53  ;;  %v16515_v11 = vadd.f32 %v12493_v12, %v12459_v58  ;;  %v7917_v49 = vpop.f32.mrb[31].mxu0  ;;  %v18316_v42 = vld [vmem:[#allocation26_spill] sm:$0xff] }
 0x557   : > { %v8192_v24 = vpop.f32.mrb[65].mxu1  ;;  %v16517_v13 = vadd.f32 %v8179_v56, %v7917_v49  ;;  %v10278_v56 = vld [vmem:[#allocation4 + $0x30] sm:$0xff]  ;;  %v10300_v58 = vor.u32 %v10299_v23, %v10295_v1  ;;  %v10310_v49 = vshll.u32 %v10277_v61, 16  ;;  %v10279_v23 = vld [vmem:[#allocation4 + $0x38] sm:$0xff]  ;;  %v18321_v1 = vld [vmem:[#allocation29_spill] sm:$0xff] }
 0x558   : > { %v12497_v46 = vpop.f32.mrb[66].mxu1  ;;  %12673 = vmatmul.mubr.msk.bf16.gmra.mrb[136].mxu0 %vm18312_vm8, %v16141_v55  ;;  %vm18317_vm8 = vnez %v18316_v42  ;;  %vm18322_vm7 = vnez %v18321_v1  ;;  %v10326_v1 = vshll.u32 %v10279_v23, 16 }
 0x559   : > { %v8195_v25 = vpop.f32.mrb[67].mxu1  ;;  %12676 = vmatprep.mubr.msk.bf16.mxu0 %vm18313_vm3, %v16294_v59  ;;  %vm18318_vm3 = vsmask.f32 256 }
 0x55a   : > { %v9768_v20 = vsel %vm18318_vm3, %v16280_v19, %v9767_v14 }
 0x55b   : > { %12711 = vmatmul.mubr.msk.bf16.gmra.mrb[172].mxu1 %vm18283_vm1, %v16498_v50  ;;  %v12462_v26 = vpop.f32.mrb[32].mxu0 }
 0x55c   : > { %v8011_v43 = vsel %vm18315_vm6, %v12462_v26, 0.0  ;;  %v7930_v10 = vpop.f32.mrb[33].mxu0  ;;  %v10318_v26 = vshll.u32 %v10278_v56, 16  ;;  %vm18320_vm6 = vmmov %vm18283_vm1 }
 0x55d   : > { %v16532_v55 = vadd.f32 %v12496_v30, %v8011_v43  ;;  %v8009_v59 = vsel %vm18317_vm8, %v7930_v10, 0.0  ;;  %v12463_v12 = vpop.f32.mrb[34].mxu0  ;;  %vm18319_vm8 = vsmask.f32 7424 }
 0x55e   : > { %v12500_v32 = vpop.f32.mrb[68].mxu1  ;;  %v16536_v34 = vadd.f32 %v8192_v24, %v8009_v59  ;;  %v16538_v37 = vadd.f32 %v12497_v46, %v12463_v12  ;;  %v7933_v53 = vpop.f32.mrb[35].mxu0  ;;  %v10305_v0 = vsel %vm18319_vm8, %v10300_v58, %v10304_v17  ;;  %v10306_v24 = vshrl.u32 %v10276_v8, 16  ;;  %v10280_v8 = vld [vmem:[#allocation4 + $0x40] sm:$0xff] }
 0x55f   : > { %v8208_v28 = vpop.f32.mrb[69].mxu1  ;;  %v16542_v52 = vadd.f32 %v8195_v25, %v7933_v53  ;;  %v10312_v46 = vrot.slane %v10310_v49, 1  ;;  %v10314_v25 = vshrl.u32 %v10277_v61, 16  ;;  %v10320_v14 = vrot.slane %v10318_v26, 1  ;;  %v18324_v53 = vld [vmem:[#allocation30_spill] sm:$0xff] }
 0x560   : > { %v12501_v30 = vpop.f32.mrb[70].mxu1  ;;  %12677 = vmatmul.mubr.msk.bf16.gmra.mrb[140].mxu0 %vm18283_vm1, %v9768_v20  ;;  %v10308_v43 = vor.u32 %v10306_v24, %v10304_v17  ;;  %vm18325_vm3 = vnez %v18324_v53  ;;  %v10322_v53 = vshrl.u32 %v10278_v56, 16  ;;  %v10282_v56 = vld [vmem:[#allocation4 + $0x50] sm:$0xff] }
 0x561   : > { %v8211_v57 = vpop.f32.mrb[71].mxu1  ;;  %12716 = vmatprep.mubr.msk.bf16.mxu0 %vm18320_vm6, %v10305_v0  ;;  %v10316_v24 = vor.u32 %v10314_v25, %v10312_v46  ;;  %vm18328_vm6 = vmmov %vm18319_vm8  ;;  %v10354_v15 = vshrl.u32 %v10282_v56, 16 }
 0x562   : > { %vm18330_vm8 = vmmov %vm18283_vm1 }
 0x563   : > { %v12466_v10 = vpop.f32.mrb[36].mxu0  ;;  %vm18331_vm1 = vmmov %vm18328_vm6 }
 0x564   : > { %v8015_v59 = vsel %vm18322_vm7, %v12466_v10, 0.0  ;;  %v7946_v19 = vpop.f32.mrb[37].mxu0  ;;  %v10313_v10 = vsel %vm18328_vm6, %v10308_v43, %v10312_v46  ;;  %vm18338_vm6 = vmmov %vm18330_vm8 }
 0x565   : > { %v16549_v12 = vadd.f32 %v12500_v32, %v8015_v59  ;;  %v8013_v20 = vsel %vm18325_vm3, %v7946_v19, 0.0  ;;  %v12467_v6 = vpop.f32.mrb[38].mxu0  ;;  %v10321_v59 = vsel %vm18331_vm1, %v10316_v24, %v10320_v14  ;;  %v10334_v19 = vshll.u32 %v10280_v8, 16  ;;  %vm18332_vm3 = vmmov %vm18330_vm8 }
 0x566   : > { %v12504_v58 = vpop.f32.mrb[72].mxu1  ;;  %v16553_v39 = vadd.f32 %v8208_v28, %v8013_v20  ;;  %v16555_v49 = vadd.f32 %v12501_v30, %v12467_v6  ;;  %v7949_v0 = vpop.f32.mrb[39].mxu0  ;;  %v10328_v6 = vrot.slane %v10326_v1, 1  ;;  %v10324_v28 = vor.u32 %v10322_v53, %v10320_v14  ;;  %v10281_v20 = vld [vmem:[#allocation4 + $0x48] sm:$0xff] }
 0x567   : > { %18323 = vst [vmem:[#allocation7_spill] sm:$0xff] %v16549_v12  ;;  %v8224_v17 = vpop.f32.mrb[73].mxu1  ;;  %v16558_v61 = vadd.f32 %v8211_v57, %v7949_v0  ;;  %v10330_v57 = vshrl.u32 %v10279_v23, 16  ;;  %v10336_v43 = vrot.slane %v10334_v19, 1  ;;  %v10342_v25 = vshll.u32 %v10281_v20, 16 }
 0x568   : > { %18326 = vst [vmem:[#allocation39_spill] sm:$0xff] %v16553_v39  ;;  %18327 = vst [vmem:[#allocation8_spill] sm:$0xff] %v16555_v49  ;;  %v12505_v32 = vpop.f32.mrb[74].mxu1  ;;  %12717 = vmatmul.mubr.msk.bf16.vlgmr.msra.gmra.mrb[144].mxu0 %vm18330_vm8, %v10313_v10 }
 0x569   : > { %18329 = vst [vmem:[#allocation40_spill] sm:$0xff] %v16558_v61  ;;  %v8227_v26 = vpop.f32.mrb[75].mxu1  ;;  %12720 = vmatprep.mubr.msk.bf16.mxu0 %vm18332_vm3, %v10321_v59  ;;  %v10332_v59 = vor.u32 %v10330_v57, %v10328_v6  ;;  %vm18336_vm3 = vmmov %vm18331_vm1  ;;  %v10338_v61 = vshrl.u32 %v10280_v8, 16  ;;  %v10284_v8 = vld [vmem:[#allocation4 + $0x60] sm:$0xff] }
 0x56a   : > { %vm18339_vm8 = vmmov %vm18331_vm1 }
 0x56b   : > { %v12470_v30 = vpop.f32.mrb[40].mxu0  ;;  %v10337_v19 = vsel %vm18339_vm8, %v10332_v59, %v10336_v43  ;;  %vm18340_vm1 = vmmov %vm18338_vm6 }
 0x56c   : > { %v8019_v49 = vsel %vm18090_vm15, %v12470_v30, 0.0  ;;  %v7962_v46 = vpop.f32.mrb[41].mxu0  ;;  %v10329_v30 = vsel %vm18336_vm3, %v10324_v28, %v10328_v6  ;;  %vm18344_vm8 = vmmov %vm18336_vm3 }
 0x56d   : > { %v16565_v0 = vadd.f32 %v12504_v58, %v8019_v49  ;;  %v8017_v10 = vsel %vm18092_vm12, %v7962_v46, 0.0  ;;  %v12471_v39 = vpop.f32.mrb[42].mxu0  ;;  %v10350_v46 = vshll.u32 %v10282_v56, 16  ;;  %v10286_v56 = vld [vmem:[#allocation4 + $0x70] sm:$0xff] }
 0x56e   : > { %v12508_v24 = vpop.f32.mrb[76].mxu1  ;;  %v16569_v12 = vadd.f32 %v8224_v17, %v8017_v10  ;;  %v16571_v1 = vadd.f32 %v12505_v32, %v12471_v39  ;;  %v7965_v53 = vpop.f32.mrb[43].mxu0  ;;  %v10344_v39 = vrot.slane %v10342_v25, 1  ;;  %v10340_v17 = vor.u32 %v10338_v61, %v10336_v43  ;;  %v10283_v10 = vld [vmem:[#allocation4 + $0x58] sm:$0xff] }
 0x56f   : > { %v8240_v14 = vpop.f32.mrb[77].mxu1  ;;  %v16574_v23 = vadd.f32 %v8227_v26, %v7965_v53  ;;  %v10346_v26 = vshrl.u32 %v10281_v20, 16  ;;  %v10352_v28 = vrot.slane %v10350_v46, 1  ;;  %v10358_v45 = vshll.u32 %v10283_v10, 16 }
 0x570   : > { %18335 = vst [vmem:[#allocation41_spill] sm:$0xff] %v16571_v1  ;;  %v12509_v58 = vpop.f32.mrb[78].mxu1  ;;  %12721 = vmatmul.mubr.msk.bf16.gmra.mrb[148].mxu0 %vm18338_vm6, %v10329_v30  ;;  %vm18343_vm6 = vmmov %vm18340_vm1 }
 0x571   : > { %18337 = vst [vmem:[#allocation42_spill] sm:$0xff] %v16574_v23  ;;  %v8243_v49 = vpop.f32.mrb[79].mxu1  ;;  %12724 = vmatprep.mubr.msk.bf16.mxu0 %vm18340_vm1, %v10337_v19  ;;  %v10348_v19 = vor.u32 %v10346_v26, %v10344_v39 }
 0x573   : > { %v12474_v32 = vpop.f32.mrb[44].mxu0 }
 0x574   : > { %v8023_v57 = vsel %vm17978_vm13, %v12474_v32, 0.0  ;;  %v7978_v6 = vpop.f32.mrb[45].mxu0  ;;  %v10345_v32 = vsel %vm18336_vm3, %v10340_v17, %v10344_v39  ;;  %v10362_v39 = vshrl.u32 %v10283_v10, 16  ;;  %vm18345_vm3 = vnez %v17983_v33 }
 0x575   : > { %v16581_v53 = vadd.f32 %v12508_v24, %v8023_v57  ;;  %v8021_v30 = vsel %vm18043_vm4, %v7978_v6, 0.0  ;;  %v12475_v23 = vpop.f32.mrb[46].mxu0  ;;  %v10353_v57 = vsel %vm18344_vm8, %v10348_v19, %v10352_v28  ;;  %v10366_v6 = vshll.u32 %v10284_v8, 16 }
 0x576   : > { %v12548_v59 = vpop.f32.mrb[80].mxu1  ;;  %v16585_v1 = vadd.f32 %v8240_v14, %v8021_v30  ;;  %v16587_v25 = vadd.f32 %v12509_v58, %v12475_v23  ;;  %v7981_v43 = vpop.f32.mrb[47].mxu0  ;;  %v10360_v14 = vrot.slane %v10358_v45, 1  ;;  %v10285_v23 = vld [vmem:[#allocation4 + $0x68] sm:$0xff]  ;;  %v10356_v58 = vor.u32 %v10354_v15, %v10352_v28 }
 0x577   : > { %v8860_v61 = vpop.f32.mrb[81].mxu1  ;;  %v16590_v20 = vadd.f32 %v8243_v49, %v7981_v43  ;;  %v10368_v49 = vrot.slane %v10366_v6, 1  ;;  %v8989_v17 = vsel %vm18289_vm5, %v12548_v59, 0.0  ;;  %vm18349_vm5 = vmmov %vm18340_vm1 }
 0x578   : > { %18341 = vst [vmem:[#allocation43_spill] sm:$0xff] %v16587_v25  ;;  %v12549_v24 = vpop.f32.mrb[82].mxu1  ;;  %12725 = vmatmul.mubr.msk.bf16.gmra.mrb[152].mxu0 %vm18343_vm6, %v10345_v32  ;;  %v8987_v45 = vsel %vm18291_vm0, %v8860_v61, 0.0  ;;  %vm18346_vm6 = vmmov %vm18344_vm8  ;;  %vm18347_vm8 = vnez %v17985_v2 }
 0x579   : > { %18342 = vst [vmem:[#allocation44_spill] sm:$0xff] %v16590_v20  ;;  %v8863_v46 = vpop.f32.mrb[83].mxu1  ;;  %12728 = vmatprep.mubr.msk.bf16.mxu0 %vm18340_vm1, %v10353_v57  ;;  %v10374_v20 = vshll.u32 %v10285_v23, 16  ;;  %v10364_v57 = vor.u32 %v10362_v39, %v10360_v14  ;;  %v10361_v6 = vsel %vm18346_vm6, %v10356_v58, %v10360_v14  ;;  %vm18348_vm0 = vmmov %vm18346_vm6  ;;  %v10382_v39 = vshll.u32 %v10286_v56, 16  ;;  %v10287_v58 = vld [vmem:[#allocation4 + $0x78] sm:$0xff] }
 0x57a   : > { %vm18354_vm6 = vmmov %vm18340_vm1 }
 0x57b   : > { %v12514_v30 = vpop.f32.mrb[48].mxu0 }
 0x57c   : > { %v8684_v26 = vadd.f32 %v12514_v30, %v16446_v3  ;;  %v8523_v25 = vpop.f32.mrb[49].mxu0 }
 0x57d   : > { %v8682_v43 = vadd.f32 %v8523_v25, %v16450_v44  ;;  %v12515_v19 = vpop.f32.mrb[50].mxu0 }
 0x57e   : > { %v12552_v32 = vpop.f32.mrb[84].mxu1  ;;  %v8653_v15 = vsel %vm18345_vm3, %v12515_v19, 0.0  ;;  %v8526_v3 = vpop.f32.mrb[51].mxu0  ;;  %v16603_v10 = vadd.f32 %v8989_v17, %v8684_v26  ;;  %v10369_v19 = vsel %vm18348_vm0, %v10364_v57, %v10368_v49  ;;  %v10370_v26 = vshrl.u32 %v10284_v8, 16 }
 0x57f   : > { %v8876_v28 = vpop.f32.mrb[85].mxu1  ;;  %v8685_v59 = vadd.f32 %v8653_v15, %v16452_v51  ;;  %v8651_v44 = vsel %vm18347_vm8, %v8526_v3, 0.0  ;;  %v16609_v30 = vadd.f32 %v8987_v45, %v8682_v43  ;;  %v10376_v51 = vrot.slane %v10374_v20, 1 }
 0x580   : > { %v12553_v25 = vpop.f32.mrb[86].mxu1  ;;  %v8683_v61 = vadd.f32 %v8651_v44, %v16454_v54  ;;  %12729 = vmatmul.mubr.msk.bf16.gmra.mrb[156].mxu0 %vm18340_vm1, %v10361_v6  ;;  %v10372_v15 = vor.u32 %v10370_v26, %v10368_v49  ;;  %v10378_v3 = vshrl.u32 %v10285_v23, 16  ;;  %v10384_v44 = vrot.slane %v10382_v39, 1 }
 0x581   : > { %v8879_v63 = vpop.f32.mrb[87].mxu1  ;;  %12732 = vmatprep.mubr.msk.bf16.mxu0 %vm18349_vm5, %v10369_v19  ;;  %v16615_v14 = vadd.f32 %v12549_v24, %v8685_v59  ;;  %v8993_v57 = vsel %vm18296_vm9, %v12552_v32, 0.0  ;;  %v10390_v24 = vshll.u32 %v10287_v58, 16  ;;  %v10288_v59 = vld [vmem:[#allocation4 + $0x80] sm:$0xff]  ;;  %v8991_v20 = vsel %vm18298_vm10, %v8876_v28, 0.0  ;;  %vm18351_vm5 = vmmov %vm18348_vm0 }
 0x582   : > { %v16617_v17 = vadd.f32 %v8863_v46, %v8683_v61  ;;  %v10380_v26 = vor.u32 %v10378_v3, %v10376_v51  ;;  %v10377_v39 = vsel %vm18351_vm5, %v10372_v15, %v10376_v51  ;;  %vm18355_vm1 = vmmov %vm18351_vm5  ;;  %v10398_v3 = vshll.u32 %v10288_v59, 16 }
 0x583   : > { %v12518_v43 = vpop.f32.mrb[52].mxu0  ;;  %vm18356_vm10 = vmmov %vm18354_vm6 }
 0x584   : > { %v8688_v45 = vadd.f32 %v12518_v43, %v16466_v29  ;;  %v8539_v54 = vpop.f32.mrb[53].mxu0  ;;  %vm18359_vm5 = vmmov %vm18355_vm1 }
 0x585   : > { %v8686_v8 = vadd.f32 %v8539_v54, %v16470_v38  ;;  %v12519_v19 = vpop.f32.mrb[54].mxu0  ;;  %v18352_v38 = vld [vmem:[#allocation16_spill] sm:$0xff] }
 0x586   : > { %v12556_v6 = vpop.f32.mrb[88].mxu1  ;;  %v8657_v49 = vsel %vm17988_vm11, %v12519_v19, 0.0  ;;  %v8542_v29 = vpop.f32.mrb[55].mxu0  ;;  %v16627_v23 = vadd.f32 %v8993_v57, %v8688_v45  ;;  %vm18353_vm0 = vnez %v18352_v38  ;;  %v10385_v19 = vsel %vm18355_vm1, %v10380_v26, %v10384_v44 }
 0x587   : > { %v8892_v61 = vpop.f32.mrb[89].mxu1  ;;  %v8689_v32 = vadd.f32 %v8657_v49, %v16472_v35  ;;  %v8655_v43 = vsel %vm18353_vm0, %v8542_v29, 0.0  ;;  %v16633_v60 = vadd.f32 %v8991_v20, %v8686_v8  ;;  %v10386_v45 = vshrl.u32 %v10286_v56, 16 }
 0x588   : > { %v12557_v54 = vpop.f32.mrb[90].mxu1  ;;  %v8687_v28 = vadd.f32 %v8655_v43, %v16474_v5  ;;  %12733 = vmatmul.mubr.msk.bf16.gmra.mrb[160].mxu0 %vm18354_vm6, %v10377_v39  ;;  %v10392_v35 = vrot.slane %v10390_v24, 1  ;;  %v10394_v5 = vshrl.u32 %v10287_v58, 16  ;;  %v10400_v29 = vrot.slane %v10398_v3, 1  ;;  %v18357_v24 = vld [vmem:[#allocation19_spill] sm:$0xff] }
 0x589   : > { %v8895_v36 = vpop.f32.mrb[91].mxu1  ;;  %12736 = vmatprep.mubr.msk.bf16.mxu0 %vm18356_vm10, %v10385_v19  ;;  %v16639_v51 = vadd.f32 %v12553_v25, %v8689_v32  ;;  %v10388_v57 = vor.u32 %v10386_v45, %v10384_v44  ;;  %v8997_v39 = vsel %vm18303_vm14, %v12556_v6, 0.0  ;;  %v8995_v25 = vsel %vm18305_vm2, %v8892_v61, 0.0  ;;  %v18360_v6 = vld [vmem:[#allocation20_spill] sm:$0xff]  ;;  %vm18363_vm2 = vmmov %vm18359_vm5 }
 0x58a   : > { %v16641_v15 = vadd.f32 %v8879_v63, %v8687_v28  ;;  %vm18358_vm10 = vnez %v18357_v24  ;;  %v10396_v28 = vor.u32 %v10394_v5, %v10392_v35  ;;  %vm18361_vm6 = vnez %v18360_v6 }
 0x58b   : > { %v12522_v49 = vpop.f32.mrb[56].mxu0  ;;  %v10393_v58 = vsel %vm18359_vm5, %v10388_v57, %v10392_v35  ;;  %vm18362_vm1 = vcmask 64512   ;;  %v10402_v5 = vshrl.u32 %v10288_v59, 16  ;;  %v10291_v35 = vld [vmem:[#allocation4 + $0x98] sm:$0x1]  ;;  %vm18366_vm5 = vnez %v18309_v9 }
 0x58c   : > { %v8692_v8 = vadd.f32 %v12522_v49, %v16486_v7  ;;  %v8555_v20 = vpop.f32.mrb[57].mxu0  ;;  %vm18364_vm14 = vmmov %vm18362_vm1 }
 0x58d   : > { %v8690_v26 = vadd.f32 %v8555_v20, %v16490_v48  ;;  %v12523_v43 = vpop.f32.mrb[58].mxu0  ;;  %v10401_v20 = vsel %vm18363_vm2, %v10396_v28, %v10400_v29  ;;  %v10404_v57 = vor.u32 %v10402_v5, %v10400_v29  ;;  %vm18367_vm2 = vnez %v18310_v47 }
 0x58e   : > { %v12560_v56 = vpop.f32.mrb[92].mxu1  ;;  %v8661_v63 = vsel %vm18358_vm10, %v12523_v43, 0.0  ;;  %v8558_v32 = vpop.f32.mrb[59].mxu0  ;;  %v16651_v7 = vadd.f32 %v8997_v39, %v8692_v8 }
 0x58f   : > { %v8908_v44 = vpop.f32.mrb[93].mxu1  ;;  %v8693_v19 = vadd.f32 %v8661_v63, %v16492_v18  ;;  %v8659_v48 = vsel %vm18361_vm6, %v8558_v32, 0.0  ;;  %v16657_v45 = vadd.f32 %v8995_v25, %v8690_v26  ;;  %v9001_v63 = vsel %vm18366_vm5, %v12560_v56, 0.0 }
 0x590   : > { %v12561_v3 = vpop.f32.mrb[94].mxu1  ;;  %v8691_v61 = vadd.f32 %v8659_v48, %v16494_v21  ;;  %12737 = vmatmul.mubr.msk.bf16.gmra.mrb[164].mxu0 %vm18362_vm1, %v10393_v58  ;;  %v18365_v21 = vshll.u32 %v16498_v50, 16  ;;  %v18368_v58 = vld [vmem:[#allocation23_spill] sm:$0xff]  ;;  %vm18370_vm1 = vsmask.f32 7424 }
 0x591   : > { %v8911_v49 = vpop.f32.mrb[95].mxu1  ;;  %12740 = vmatprep.mubr.msk.bf16.mxu0 %vm18364_vm14, %v10401_v20  ;;  %v16663_v8 = vadd.f32 %v12557_v54, %v8693_v19  ;;  %v10422_v54 = vshll.u32 %v10291_v35, 16  ;;  %vm18369_vm14 = vnez %v18368_v58  ;;  %v18371_v20 = vld [vmem:[#allocation24_spill] sm:$0xff]  ;;  %vm18374_vm9 = vmmov %vm18370_vm1 }
 0x592   : > { %v16665_v18 = vadd.f32 %v8895_v36, %v8691_v61  ;;  %v10416_v25 = vrot.slane %v18365_v21, 1  ;;  %v8999_v36 = vsel %vm18367_vm2, %v8908_v44, 0.0  ;;  %v10409_v61 = vsel %vm18370_vm1, %v10404_v57, %v16386_v27 }
 0x593   : > { %v12526_v39 = vpop.f32.mrb[60].mxu0  ;;  %vm18372_vm5 = vnez %v18371_v20  ;;  %vm18373_vm2 = vcmask 64512   ;;  %v10424_v27 = vrot.slane %v10422_v54, 1 }
 0x594   : > { %v8696_v26 = vadd.f32 %v12526_v39, %v16509_v31  ;;  %v8571_v43 = vpop.f32.mrb[61].mxu0  ;;  %vm18376_vm1 = vmmov %vm18373_vm2 }
 0x595   : > { %v8694_v59 = vadd.f32 %v8571_v43, %v16513_v41  ;;  %v12527_v28 = vpop.f32.mrb[62].mxu0  ;;  %v18375_v43 = vshrl.u32 %v16498_v50, 16 }
 0x596   : > { %v12564_v32 = vpop.f32.mrb[96].mxu1  ;;  %v8665_v29 = vsel %vm18369_vm14, %v12527_v28, 0.0  ;;  %v8574_v31 = vpop.f32.mrb[63].mxu0  ;;  %v16677_v48 = vadd.f32 %v9001_v63, %v8696_v26  ;;  %v10417_v26 = vsel %vm18374_vm9, %v16399_v40, %v10416_v25 }
 0x597   : > { %v8924_v19 = vpop.f32.mrb[97].mxu1  ;;  %v8697_v56 = vadd.f32 %v8665_v29, %v16515_v11  ;;  %v8663_v41 = vsel %vm18372_vm5, %v8574_v31, 0.0  ;;  %v16684_v35 = vadd.f32 %v8999_v36, %v8694_v59  ;;  %v10420_v21 = vor.u32 %v10416_v25, %v18375_v43 }
 0x598   : > { %v12565_v5 = vpop.f32.mrb[98].mxu1  ;;  %v8695_v44 = vadd.f32 %v8663_v41, %v16517_v13  ;;  %12741 = vmatmul.mubr.msk.bf16.gmra.mrb[168].mxu0 %vm18373_vm2, %v10409_v61  ;;  %vm18377_vm5 = vnez %v18314_v4  ;;  %vm18378_vm2 = vmmov %vm18374_vm9  ;;  %vm18379_vm9 = vnez %v18316_v42 }
 0x599   : > { %v8927_v39 = vpop.f32.mrb[99].mxu1  ;;  %12744 = vmatprep.mubr.msk.bf16.mxu0 %vm18376_vm1, %v10417_v26  ;;  %v16693_v11 = vadd.f32 %v12561_v3, %v8697_v56  ;;  %v9005_v28 = vsel %vm18377_vm5, %v12564_v32, 0.0  ;;  %v10425_v36 = vsel %vm18378_vm2, %v10420_v21, %v10424_v27  ;;  %v9003_v54 = vsel %vm18379_vm9, %v8924_v19, 0.0  ;;  %v18380_v3 = vld [vmem:[#allocation27_spill] sm:$0xff]  ;;  %v18382_v56 = vld [vmem:[#allocation28_spill] sm:$0xff] }
 0x59a   : > { %v16695_v57 = vadd.f32 %v8911_v49, %v8695_v44  ;;  %vm18381_vm1 = vnez %v18380_v3  ;;  %vm18383_vm5 = vnez %v18382_v56  ;;  %vm18384_vm2 = vcmask 64512   ;;  %v18385_v27 = vld [vmem:[#allocation7_spill] sm:$0xff] }
 0x59b   : > { %v12530_v63 = vpop.f32.mrb[64].mxu0 }
 0x59c   : > { %v8700_v59 = vadd.f32 %v12530_v63, %v16532_v55  ;;  %v8587_v13 = vpop.f32.mrb[65].mxu0 }
 0x59d   : > { %v8698_v40 = vadd.f32 %v8587_v13, %v16536_v34  ;;  %v12531_v25 = vpop.f32.mrb[66].mxu0 }
 0x59e   : > { %v12568_v50 = vpop.f32.mrb[100].mxu1  ;;  %v8669_v49 = vsel %vm18381_vm1, %v12531_v25, 0.0  ;;  %v8590_v31 = vpop.f32.mrb[67].mxu0  ;;  %v16706_v61 = vadd.f32 %v9005_v28, %v8700_v59  ;;  %v18387_v28 = vld [vmem:[#allocation39_spill] sm:$0xff] }
 0x59f   : > { %v8940_v29 = vpop.f32.mrb[101].mxu1  ;;  %v8701_v55 = vadd.f32 %v8669_v49, %v16538_v37  ;;  %v8667_v32 = vsel %vm18383_vm5, %v8590_v31, 0.0  ;;  %v16711_v44 = vadd.f32 %v9003_v54, %v8698_v40  ;;  %v9009_v13 = vsel %vm18322_vm7, %v12568_v50, 0.0  ;;  %v18388_v49 = vld [vmem:[#allocation30_spill] sm:$0xff]  ;;  %v18390_v31 = vld [vmem:[#allocation31_spill] sm:$0xff] }
 0x5a0   : > { %v12569_v41 = vpop.f32.mrb[102].mxu1  ;;  %v8699_v34 = vadd.f32 %v8667_v32, %v16542_v52  ;;  %12745 = vmatmul.mubr.msk.bf16.gmra.mrb[172].mxu0 %vm18384_vm2, %v10425_v36  ;;  %vm18389_vm9 = vnez %v18388_v49  ;;  %vm18391_vm2 = vnez %v18390_v31  ;;  %v18392_v32 = vld [vmem:[#allocation8_spill] sm:$0xff] }
 0x5a1   : > { %v8943_v26 = vpop.f32.mrb[103].mxu1  ;;  %v16715_v19 = vadd.f32 %v12565_v5, %v8701_v55  ;;  %v9007_v52 = vsel %vm18389_vm9, %v8940_v29, 0.0 }
 0x5a2   : > { %v16717_v43 = vadd.f32 %v8927_v39, %v8699_v34 }
 0x5a3   : > { %v12534_v21 = vpop.f32.mrb[68].mxu0 }
 0x5a4   : > { %v8704_v63 = vadd.f32 %v12534_v21, %v18385_v27  ;;  %v8603_v59 = vpop.f32.mrb[69].mxu0  ;;  %v18393_v21 = vld [vmem:[#allocation32_spill] sm:$0xff] }
 0x5a5   : > { %v8702_v25 = vadd.f32 %v8603_v59, %v18387_v28  ;;  %v12535_v54 = vpop.f32.mrb[70].mxu0  ;;  %vm18394_vm5 = vnez %v18393_v21  ;;  %v18395_v59 = vld [vmem:[#allocation40_spill] sm:$0xff] }
 0x5a6   : > { %v12572_v40 = vpop.f32.mrb[104].mxu1  ;;  %v8673_v5 = vsel %vm18391_vm2, %v12535_v54, 0.0  ;;  %v8606_v39 = vpop.f32.mrb[71].mxu0  ;;  %v16727_v55 = vadd.f32 %v9009_v13, %v8704_v63 }
 0x5a7   : > { %v8956_v36 = vpop.f32.mrb[105].mxu1  ;;  %v8705_v34 = vadd.f32 %v8673_v5, %v18392_v32  ;;  %v8671_v27 = vsel %vm18394_vm5, %v8606_v39, 0.0  ;;  %v16732_v37 = vadd.f32 %v9007_v52, %v8702_v25  ;;  %v9013_v5 = vsel %vm18090_vm15, %v12572_v40, 0.0 }
 0x5a8   : > { %v12573_v50 = vpop.f32.mrb[106].mxu1  ;;  %v8703_v28 = vadd.f32 %v8671_v27, %v18395_v59  ;;  %v9011_v52 = vsel %vm18092_vm12, %v8956_v36, 0.0  ;;  %v18398_v27 = vld [vmem:[#allocation35_spill] sm:$0xff] }
 0x5a9   : > { %v8959_v42 = vpop.f32.mrb[107].mxu1  ;;  %v16735_v49 = vadd.f32 %v12569_v41, %v8705_v34  ;;  %vm18399_vm9 = vnez %v18398_v27 }
 0x5aa   : > { %v16737_v29 = vadd.f32 %v8943_v26, %v8703_v28  ;;  %v18400_v28 = vld [vmem:[#allocation41_spill] sm:$0xff] }
 0x5ab   : > { %v12538_v54 = vpop.f32.mrb[72].mxu0 }
 0x5ac   : > { %v8708_v4 = vadd.f32 %v12538_v54, %v16565_v0  ;;  %v8619_v63 = vpop.f32.mrb[73].mxu0  ;;  %v18401_v54 = vld [vmem:[#allocation36_spill] sm:$0xff] }
 0x5ad   : > { %v8706_v32 = vadd.f32 %v8619_v63, %v16569_v12  ;;  %v12539_v47 = vpop.f32.mrb[74].mxu0  ;;  %vm18402_vm7 = vnez %v18401_v54  ;;  %v18403_v12 = vld [vmem:[#allocation42_spill] sm:$0xff] }
 0x5ae   : > { %v12576_v39 = vpop.f32.mrb[108].mxu1  ;;  %v8677_v41 = vsel %vm18399_vm9, %v12539_v47, 0.0  ;;  %v8622_v26 = vpop.f32.mrb[75].mxu0  ;;  %v16747_v59 = vadd.f32 %v9013_v5, %v8708_v4 }
 0x5af   : > { %v8972_v34 = vpop.f32.mrb[109].mxu1  ;;  %v8709_v0 = vadd.f32 %v8677_v41, %v18400_v28  ;;  %v8675_v13 = vsel %vm18402_vm7, %v8622_v26, 0.0  ;;  %v16752_v9 = vadd.f32 %v9011_v52, %v8706_v32  ;;  %v9017_v41 = vsel %vm17978_vm13, %v12576_v39, 0.0 }
 0x5b0   : > { %v12577_v40 = vpop.f32.mrb[110].mxu1  ;;  %v8707_v63 = vadd.f32 %v8675_v13, %v18403_v12  ;;  %v9015_v52 = vsel %vm18043_vm4, %v8972_v34, 0.0  ;;  %v18407_v13 = vld [vmem:[#allocation5_spill] sm:$0xff] }
 0x5b1   : > { %v8975_v62 = vpop.f32.mrb[111].mxu1  ;;  %v16755_v25 = vadd.f32 %v12573_v50, %v8709_v0  ;;  %vm18408_vm12 = vnez %v18407_v13 }
 0x5b2   : > { %v16757_v36 = vadd.f32 %v8959_v42, %v8707_v63  ;;  %v18409_v63 = vld [vmem:[#allocation43_spill] sm:$0xff] }
 0x5b3   : > { %v12542_v47 = vpop.f32.mrb[76].mxu0 }
 0x5b4   : > { %18404 = vst [vmem:[#allocation45_spill] sm:$0xff] %v16757_v36  ;;  %v8712_v16 = vadd.f32 %v12542_v47, %v16581_v53  ;;  %v8635_v4 = vpop.f32.mrb[77].mxu0  ;;  %v18410_v47 = vld [vmem:[#allocation6_spill] sm:$0xff] }
 0x5b5   : > { %v8710_v28 = vadd.f32 %v8635_v4, %v16585_v1  ;;  %v12543_v22 = vpop.f32.mrb[78].mxu0  ;;  %vm18411_vm15 = vnez %v18410_v47  ;;  %v18412_v1 = vld [vmem:[#allocation44_spill] sm:$0xff] }
 0x5b6   : > { %v12616_v26 = vpop.f32.mrb[112].mxu1  ;;  %v8681_v50 = vsel %vm18408_vm12, %v12543_v22, 0.0  ;;  %v8638_v42 = vpop.f32.mrb[79].mxu0  ;;  %v16767_v12 = vadd.f32 %v9017_v41, %v8712_v16 }
 0x5b7   : > { %v9517_v0 = vpop.f32.mrb[113].mxu1  ;;  %v8713_v53 = vadd.f32 %v8681_v50, %v18409_v63  ;;  %v8679_v5 = vsel %vm18411_vm15, %v8638_v42, 0.0  ;;  %v16772_v54 = vadd.f32 %v9015_v52, %v8710_v28 }
 0x5b8   : > { %v12617_v39 = vpop.f32.mrb[114].mxu1  ;;  %v8711_v4 = vadd.f32 %v8679_v5, %v18412_v1 }
 0x5b9   : > { %v9520_v36 = vpop.f32.mrb[115].mxu1  ;;  %v16775_v32 = vadd.f32 %v12577_v40, %v8713_v53  ;;  %v9647_v40 = vsel %vm18345_vm3, %v12617_v39, 0.0 }
 0x5ba   : > { %v16777_v34 = vadd.f32 %v8975_v62, %v8711_v4 }
 0x5bb   : > { %v12582_v22 = vpop.f32.mrb[80].mxu0 }
 0x5bc   : > { %v9251_v13 = vadd.f32 %v12582_v22, %v16603_v10  ;;  %v9122_v16 = vpop.f32.mrb[81].mxu0  ;;  %v9645_v10 = vsel %vm18347_vm8, %v9520_v36, 0.0 }
 0x5bd   : > { %v9249_v41 = vadd.f32 %v9122_v16, %v16609_v30  ;;  %v12583_v63 = vpop.f32.mrb[82].mxu0 }
 0x5be   : > { %v12620_v50 = vpop.f32.mrb[116].mxu1  ;;  %v16781_v47 = vadd.f32 %v12616_v26, %v9251_v13  ;;  %v9252_v28 = vadd.f32 %v12583_v63, %v16615_v14  ;;  %v9125_v42 = vpop.f32.mrb[83].mxu0 }
 0x5bf   : > { %v9533_v52 = vpop.f32.mrb[117].mxu1  ;;  %v16786_v5 = vadd.f32 %v9517_v0, %v9249_v41  ;;  %v9250_v62 = vadd.f32 %v9125_v42, %v16617_v17 }
 0x5c0   : > { %v12621_v53 = vpop.f32.mrb[118].mxu1  ;;  %v16791_v1 = vadd.f32 %v9647_v40, %v9252_v28 }
 0x5c1   : > { %v9536_v30 = vpop.f32.mrb[119].mxu1  ;;  %v16793_v26 = vadd.f32 %v9645_v10, %v9250_v62  ;;  %v9651_v36 = vsel %vm17988_vm11, %v12621_v53, 0.0 }
 0x5c3   : > { %v12586_v13 = vpop.f32.mrb[84].mxu0 }
 0x5c4   : > { %v9255_v14 = vadd.f32 %v12586_v13, %v16627_v23  ;;  %v9138_v4 = vpop.f32.mrb[85].mxu0  ;;  %v9649_v23 = vsel %vm18353_vm0, %v9536_v30, 0.0 }
 0x5c5   : > { %v9253_v22 = vadd.f32 %v9138_v4, %v16633_v60  ;;  %v12587_v0 = vpop.f32.mrb[86].mxu0 }
 0x5c6   : > { %v12624_v39 = vpop.f32.mrb[120].mxu1  ;;  %v16797_v16 = vadd.f32 %v12620_v50, %v9255_v14  ;;  %v9256_v17 = vadd.f32 %v12587_v0, %v16639_v51  ;;  %v9141_v63 = vpop.f32.mrb[87].mxu0 }
 0x5c7   : > { %v9549_v41 = vpop.f32.mrb[121].mxu1  ;;  %v16802_v28 = vadd.f32 %v9533_v52, %v9253_v22  ;;  %v9254_v42 = vadd.f32 %v9141_v63, %v16641_v15 }
 0x5c8   : > { %v12625_v40 = vpop.f32.mrb[122].mxu1  ;;  %v16807_v62 = vadd.f32 %v9651_v36, %v9256_v17 }
 0x5c9   : > { %v9552_v60 = vpop.f32.mrb[123].mxu1  ;;  %v16809_v50 = vadd.f32 %v9649_v23, %v9254_v42  ;;  %v9655_v30 = vsel %vm18358_vm10, %v12625_v40, 0.0 }
 0x5cb   : > { %v12590_v10 = vpop.f32.mrb[88].mxu0 }
 0x5cc   : > { %v9259_v51 = vadd.f32 %v12590_v10, %v16651_v7  ;;  %v9154_v13 = vpop.f32.mrb[89].mxu0  ;;  %v9653_v7 = vsel %vm18361_vm6, %v9552_v60, 0.0  ;;  %vm18413_vm6 = vnez %v18371_v20 }
 0x5cd   : > { %v9257_v14 = vadd.f32 %v9154_v13, %v16657_v45  ;;  %v12591_v52 = vpop.f32.mrb[90].mxu0 }
 0x5ce   : > { %v12628_v53 = vpop.f32.mrb[124].mxu1  ;;  %v16813_v4 = vadd.f32 %v12624_v39, %v9259_v51  ;;  %v9260_v15 = vadd.f32 %v12591_v52, %v16663_v8  ;;  %v9157_v0 = vpop.f32.mrb[91].mxu0 }
 0x5cf   : > { %v9565_v22 = vpop.f32.mrb[125].mxu1  ;;  %v16818_v17 = vadd.f32 %v9549_v41, %v9257_v14  ;;  %v9258_v63 = vadd.f32 %v9157_v0, %v16665_v18 }
 0x5d0   : > { %v12629_v36 = vpop.f32.mrb[126].mxu1  ;;  %v16823_v42 = vadd.f32 %v9655_v30, %v9260_v15 }
 0x5d1   : > { %v9568_v45 = vpop.f32.mrb[127].mxu1  ;;  %v16825_v39 = vadd.f32 %v9653_v7, %v9258_v63  ;;  %v9659_v60 = vsel %vm18369_vm14, %v12629_v36, 0.0 }
 0x5d3   : > { %v12594_v23 = vpop.f32.mrb[92].mxu0 }
 0x5d4   : > { %v9263_v8 = vadd.f32 %v12594_v23, %v16677_v48  ;;  %v9170_v10 = vpop.f32.mrb[93].mxu0  ;;  %v9657_v48 = vsel %vm18413_vm6, %v9568_v45, 0.0  ;;  %vm18414_vm6 = vnez %v18382_v56 }
 0x5d5   : > { %v9261_v51 = vadd.f32 %v9170_v10, %v16684_v35  ;;  %v12595_v41 = vpop.f32.mrb[94].mxu0 }
 0x5d6   : > { %v12632_v40 = vpop.f32.mrb[128].mxu1  ;;  %v16829_v13 = vadd.f32 %v12628_v53, %v9263_v8  ;;  %v9264_v18 = vadd.f32 %v12595_v41, %v16693_v11  ;;  %v9173_v52 = vpop.f32.mrb[95].mxu0 }
 0x5d7   : > { %v9581_v14 = vpop.f32.mrb[129].mxu1  ;;  %v16834_v15 = vadd.f32 %v9565_v22, %v9261_v51  ;;  %v9262_v0 = vadd.f32 %v9173_v52, %v16695_v57 }
 0x5d8   : > { %v12633_v30 = vpop.f32.mrb[130].mxu1  ;;  %v16839_v63 = vadd.f32 %v9659_v60, %v9264_v18 }
 0x5d9   : > { %v9584_v35 = vpop.f32.mrb[131].mxu1  ;;  %v16841_v53 = vadd.f32 %v9657_v48, %v9262_v0  ;;  %v9663_v45 = vsel %vm18381_vm1, %v12633_v30, 0.0 }
 0x5db   : > { %v12598_v7 = vpop.f32.mrb[96].mxu0 }
 0x5dc   : > { %v9267_v11 = vadd.f32 %v12598_v7, %v16706_v61  ;;  %v9186_v23 = vpop.f32.mrb[97].mxu0  ;;  %v9661_v61 = vsel %vm18414_vm6, %v9584_v35, 0.0 }
 0x5dd   : > { %v9265_v8 = vadd.f32 %v9186_v23, %v16711_v44  ;;  %v12599_v22 = vpop.f32.mrb[98].mxu0 }
 0x5de   : > { %v12636_v36 = vpop.f32.mrb[132].mxu1  ;;  %v16845_v10 = vadd.f32 %v12632_v40, %v9267_v11  ;;  %v9268_v57 = vadd.f32 %v12599_v22, %v16715_v19  ;;  %v9189_v41 = vpop.f32.mrb[99].mxu0 }
 0x5df   : > { %v9597_v51 = vpop.f32.mrb[133].mxu1  ;;  %v16850_v18 = vadd.f32 %v9581_v14, %v9265_v8  ;;  %v9266_v52 = vadd.f32 %v9189_v41, %v16717_v43 }
 0x5e0   : > { %v12637_v60 = vpop.f32.mrb[134].mxu1  ;;  %v16855_v0 = vadd.f32 %v9663_v45, %v9268_v57 }
 0x5e1   : > { %v9600_v44 = vpop.f32.mrb[135].mxu1  ;;  %v16857_v40 = vadd.f32 %v9661_v61, %v9266_v52  ;;  %v9667_v35 = vsel %vm18391_vm2, %v12637_v60, 0.0 }
 0x5e3   : > { %v12602_v48 = vpop.f32.mrb[100].mxu0 }
 0x5e4   : > { %v9271_v19 = vadd.f32 %v12602_v48, %v16727_v55  ;;  %v9202_v7 = vpop.f32.mrb[101].mxu0  ;;  %v9665_v55 = vsel %vm18394_vm5, %v9600_v44, 0.0 }
 0x5e5   : > { %v9269_v11 = vadd.f32 %v9202_v7, %v16732_v37  ;;  %v12603_v14 = vpop.f32.mrb[102].mxu0 }
 0x5e6   : > { %v12640_v30 = vpop.f32.mrb[136].mxu1  ;;  %v16861_v23 = vadd.f32 %v12636_v36, %v9271_v19  ;;  %v9272_v43 = vadd.f32 %v12603_v14, %v16735_v49  ;;  %v9205_v22 = vpop.f32.mrb[103].mxu0 }
 0x5e7   : > { %v9613_v8 = vpop.f32.mrb[137].mxu1  ;;  %v16866_v57 = vadd.f32 %v9597_v51, %v9269_v11  ;;  %v9270_v41 = vadd.f32 %v9205_v22, %v16737_v29  ;;  %v18415_v22 = vld [vmem:[#allocation45_spill] sm:$0xff] }
 0x5e8   : > { %v12641_v45 = vpop.f32.mrb[138].mxu1  ;;  %v16871_v52 = vadd.f32 %v9667_v35, %v9272_v43 }
 0x5e9   : > { %v9616_v37 = vpop.f32.mrb[139].mxu1  ;;  %v16873_v36 = vadd.f32 %v9665_v55, %v9270_v41  ;;  %v9671_v44 = vsel %vm18399_vm9, %v12641_v45, 0.0 }
 0x5ea   : > { %v9669_v55 = vsel %vm18402_vm7, %v9616_v37, 0.0 }
 0x5eb   : > { %v12606_v61 = vpop.f32.mrb[104].mxu0 }
 0x5ec   : > { %v9275_v49 = vadd.f32 %v12606_v61, %v16747_v59  ;;  %v9218_v48 = vpop.f32.mrb[105].mxu0 }
 0x5ed   : > { %v9273_v19 = vadd.f32 %v9218_v48, %v16752_v9  ;;  %v12607_v51 = vpop.f32.mrb[106].mxu0 }
 0x5ee   : > { %v12644_v60 = vpop.f32.mrb[140].mxu1  ;;  %v16877_v7 = vadd.f32 %v12640_v30, %v9275_v49  ;;  %v9276_v29 = vadd.f32 %v12607_v51, %v16755_v25  ;;  %v9221_v14 = vpop.f32.mrb[107].mxu0 }
 0x5ef   : > { %v9629_v11 = vpop.f32.mrb[141].mxu1  ;;  %v16882_v43 = vadd.f32 %v9613_v8, %v9273_v19  ;;  %v9274_v35 = vadd.f32 %v9221_v14, %v18415_v22 }
 0x5f0   : > { %v12645_v41 = vpop.f32.mrb[142].mxu1  ;;  %v16887_v61 = vadd.f32 %v9671_v44, %v9276_v29 }
 0x5f1   : > { %v9632_v9 = vpop.f32.mrb[143].mxu1  ;;  %v16889_v30 = vadd.f32 %v9669_v55, %v9274_v35  ;;  %v9675_v29 = vsel %vm18408_vm12, %v12645_v41, 0.0 }
 0x5f3   : > { %v12610_v49 = vpop.f32.mrb[108].mxu0 }
 0x5f4   : > { %v9279_v25 = vadd.f32 %v12610_v49, %v16767_v12  ;;  %v9234_v48 = vpop.f32.mrb[109].mxu0  ;;  %v9673_v49 = vsel %vm18411_vm15, %v9632_v9, 0.0 }
 0x5f5   : > { %v9277_v51 = vadd.f32 %v9234_v48, %v16772_v54  ;;  %v12611_v8 = vpop.f32.mrb[110].mxu0 }
 0x5f6   : > { %v12684_v45 = vpop.f32.mrb[144].mxu1  ;;  %v16893_v19 = vadd.f32 %v12644_v60, %v9279_v25  ;;  %v9280_v14 = vadd.f32 %v12611_v8, %v16775_v32  ;;  %v9237_v59 = vpop.f32.mrb[111].mxu0  ;;  %v18419_v32 = vld [vmem:[#allocation9_spill] sm:$0xff] }
 0x5f7   : > { %v10116_v22 = vpop.f32.mrb[145].mxu1  ;;  %v16898_v44 = vadd.f32 %v9629_v11, %v9277_v51  ;;  %v9278_v35 = vadd.f32 %v9237_v59, %v16777_v34  ;;  %vm18420_vm7 = vnez %v18419_v32  ;;  %v18421_v11 = vld [vmem:[#allocation10_spill] sm:$0xff] }
 0x5f8   : > { %v12685_v55 = vpop.f32.mrb[146].mxu1  ;;  %v16903_v48 = vadd.f32 %v9675_v29, %v9280_v14  ;;  %vm18422_vm12 = vnez %v18421_v11  ;;  %v18423_v11 = vld [vmem:[#allocation13_spill] sm:$0xff] }
 0x5f9   : > { %v10119_v54 = vpop.f32.mrb[147].mxu1  ;;  %v16905_v60 = vadd.f32 %v9673_v49, %v9278_v35 }
 0x5fb   : > { %v12650_v25 = vpop.f32.mrb[112].mxu0 }
 0x5fc   : > { %v9983_v8 = vsel %vm18420_vm7, %v12650_v25, 0.0  ;;  %v9854_v27 = vpop.f32.mrb[113].mxu0 }
 0x5fd   : > { %v10015_v41 = vadd.f32 %v9983_v8, %v16781_v47  ;;  %v9981_v51 = vsel %vm18422_vm12, %v9854_v27, 0.0  ;;  %v12651_v59 = vpop.f32.mrb[114].mxu0  ;;  %vm18424_vm12 = vnez %v18423_v11 }
 0x5fe   : > { %v12688_v34 = vpop.f32.mrb[148].mxu1  ;;  %v10013_v12 = vadd.f32 %v9981_v51, %v16786_v5  ;;  %v10016_v9 = vadd.f32 %v12651_v59, %v16791_v1  ;;  %v9857_v29 = vpop.f32.mrb[115].mxu0  ;;  %v18425_v59 = vld [vmem:[#allocation14_spill] sm:$0xff] }
 0x5ff   : > { %v10132_v14 = vpop.f32.mrb[149].mxu1  ;;  %v10014_v35 = vadd.f32 %v9857_v29, %v16793_v26  ;;  %v16915_v37 = vadd.f32 %v12684_v45, %v10015_v41  ;;  %vm18426_vm7 = vnez %v18425_v59  ;;  %v18427_v59 = vld [vmem:[#allocation17_spill] sm:$0xff] }
 0x600   : > { %v12689_v49 = vpop.f32.mrb[150].mxu1  ;;  %v16917_v25 = vadd.f32 %v12685_v55, %v10016_v9  ;;  %v16919_v47 = vadd.f32 %v10116_v22, %v10013_v12 }
 0x601   : > { %v10135_v32 = vpop.f32.mrb[151].mxu1  ;;  %v16921_v8 = vadd.f32 %v10119_v54, %v10014_v35 }
 0x603   : > { %v12654_v27 = vpop.f32.mrb[116].mxu0 }
 0x604   : > { %v9987_v5 = vsel %vm18424_vm12, %v12654_v27, 0.0  ;;  %v9870_v51 = vpop.f32.mrb[117].mxu0  ;;  %vm18428_vm12 = vnez %v18427_v59 }
 0x605   : > { %v10019_v1 = vadd.f32 %v9987_v5, %v16797_v16  ;;  %v9985_v26 = vsel %vm18426_vm7, %v9870_v51, 0.0  ;;  %v12655_v45 = vpop.f32.mrb[118].mxu0 }
 0x606   : > { %v12692_v29 = vpop.f32.mrb[152].mxu1  ;;  %v10017_v55 = vadd.f32 %v9985_v26, %v16802_v28  ;;  %v10020_v41 = vadd.f32 %v12655_v45, %v16807_v62  ;;  %v9873_v12 = vpop.f32.mrb[119].mxu0  ;;  %v18429_v45 = vld [vmem:[#allocation18_spill] sm:$0xff] }
 0x607   : > { %v10148_v22 = vpop.f32.mrb[153].mxu1  ;;  %v10018_v54 = vadd.f32 %v9873_v12, %v16809_v50  ;;  %v16931_v35 = vadd.f32 %v12688_v34, %v10019_v1  ;;  %vm18430_vm7 = vnez %v18429_v45  ;;  %v18431_v45 = vld [vmem:[#allocation21_spill] sm:$0xff] }
 0x608   : > { %v12693_v9 = vpop.f32.mrb[154].mxu1  ;;  %v16933_v27 = vadd.f32 %v12689_v49, %v10020_v41  ;;  %v16935_v16 = vadd.f32 %v10132_v14, %v10017_v55 }
 0x609   : > { %v10151_v11 = vpop.f32.mrb[155].mxu1  ;;  %v16937_v5 = vadd.f32 %v10135_v32, %v10018_v54 }
 0x60b   : > { %v12658_v51 = vpop.f32.mrb[120].mxu0 }
 0x60c   : > { %v9991_v28 = vsel %vm18428_vm12, %v12658_v51, 0.0  ;;  %v9886_v26 = vpop.f32.mrb[121].mxu0  ;;  %vm18432_vm12 = vnez %v18431_v45 }
 0x60d   : > { %v10023_v62 = vadd.f32 %v9991_v28, %v16813_v4  ;;  %v9989_v50 = vsel %vm18430_vm7, %v9886_v26, 0.0  ;;  %v12659_v34 = vpop.f32.mrb[122].mxu0 }
 0x60e   : > { %v12696_v12 = vpop.f32.mrb[156].mxu1  ;;  %v10021_v49 = vadd.f32 %v9989_v50, %v16818_v17  ;;  %v10024_v1 = vadd.f32 %v12659_v34, %v16823_v42  ;;  %v9889_v55 = vpop.f32.mrb[123].mxu0  ;;  %v18433_v34 = vld [vmem:[#allocation22_spill] sm:$0xff] }
 0x60f   : > { %v10164_v14 = vpop.f32.mrb[157].mxu1  ;;  %v10022_v32 = vadd.f32 %v9889_v55, %v16825_v39  ;;  %v16947_v54 = vadd.f32 %v12692_v29, %v10023_v62  ;;  %vm18434_vm7 = vnez %v18433_v34  ;;  %v18435_v34 = vld [vmem:[#allocation25_spill] sm:$0xff] }
 0x610   : > { %v12697_v41 = vpop.f32.mrb[158].mxu1  ;;  %v16949_v51 = vadd.f32 %v12693_v9, %v10024_v1  ;;  %v16951_v4 = vadd.f32 %v10148_v22, %v10021_v49 }
 0x611   : > { %v10167_v59 = vpop.f32.mrb[159].mxu1  ;;  %v16953_v28 = vadd.f32 %v10151_v11, %v10022_v32 }
 0x613   : > { %v12662_v26 = vpop.f32.mrb[124].mxu0 }
 0x614   : > { %v9995_v17 = vsel %vm18432_vm12, %v12662_v26, 0.0  ;;  %v9902_v50 = vpop.f32.mrb[125].mxu0  ;;  %vm18436_vm12 = vnez %v18435_v34 }
 0x615   : > { %v10027_v42 = vadd.f32 %v9995_v17, %v16829_v13  ;;  %v9993_v39 = vsel %vm18434_vm7, %v9902_v50, 0.0  ;;  %v12663_v29 = vpop.f32.mrb[126].mxu0 }
 0x616   : > { %v12700_v55 = vpop.f32.mrb[160].mxu1  ;;  %v10025_v9 = vadd.f32 %v9993_v39, %v16834_v15  ;;  %v10028_v62 = vadd.f32 %v12663_v29, %v16839_v63  ;;  %v9905_v49 = vpop.f32.mrb[127].mxu0  ;;  %v18437_v29 = vld [vmem:[#allocation26_spill] sm:$0xff] }
 0x617   : > { %v10180_v22 = vpop.f32.mrb[161].mxu1  ;;  %v10026_v11 = vadd.f32 %v9905_v49, %v16841_v53  ;;  %v16963_v32 = vadd.f32 %v12696_v12, %v10027_v42  ;;  %vm18438_vm7 = vnez %v18437_v29  ;;  %v18439_v29 = vld [vmem:[#allocation29_spill] sm:$0xff] }
 0x618   : > { %v12701_v1 = vpop.f32.mrb[162].mxu1  ;;  %v16965_v26 = vadd.f32 %v12697_v41, %v10028_v62  ;;  %v16967_v13 = vadd.f32 %v10164_v14, %v10025_v9 }
 0x619   : > { %v10183_v45 = vpop.f32.mrb[163].mxu1  ;;  %v16969_v17 = vadd.f32 %v10167_v59, %v10026_v11 }
 0x61b   : > { %v12666_v50 = vpop.f32.mrb[128].mxu0 }
 0x61c   : > { %v9999_v15 = vsel %vm18436_vm12, %v12666_v50, 0.0  ;;  %v9918_v39 = vpop.f32.mrb[129].mxu0  ;;  %vm18440_vm12 = vnez %v18439_v29 }
 0x61d   : > { %v10031_v63 = vadd.f32 %v9999_v15, %v16845_v10  ;;  %v9997_v53 = vsel %vm18438_vm7, %v9918_v39, 0.0  ;;  %v12667_v12 = vpop.f32.mrb[130].mxu0 }
 0x61e   : > { %v12704_v49 = vpop.f32.mrb[164].mxu1  ;;  %v10029_v41 = vadd.f32 %v9997_v53, %v16850_v18  ;;  %v10032_v42 = vadd.f32 %v12667_v12, %v16855_v0  ;;  %v9921_v9 = vpop.f32.mrb[131].mxu0  ;;  %v18441_v12 = vld [vmem:[#allocation30_spill] sm:$0xff] }
 0x61f   : > { %v10196_v14 = vpop.f32.mrb[165].mxu1  ;;  %v10030_v59 = vadd.f32 %v9921_v9, %v16857_v40  ;;  %v16979_v11 = vadd.f32 %v12700_v55, %v10031_v63  ;;  %vm18442_vm7 = vnez %v18441_v12  ;;  %v18443_v12 = vld [vmem:[#allocation33_spill] sm:$0xff] }
 0x620   : > { %v12705_v62 = vpop.f32.mrb[166].mxu1  ;;  %v16981_v50 = vadd.f32 %v12701_v1, %v10032_v42  ;;  %v16983_v10 = vadd.f32 %v10180_v22, %v10029_v41 }
 0x621   : > { %v10199_v34 = vpop.f32.mrb[167].mxu1  ;;  %v16985_v15 = vadd.f32 %v10183_v45, %v10030_v59 }
 0x623   : > { %v12670_v39 = vpop.f32.mrb[132].mxu0 }
 0x624   : > { %v10003_v18 = vsel %vm18440_vm12, %v12670_v39, 0.0  ;;  %v9934_v53 = vpop.f32.mrb[133].mxu0  ;;  %vm18444_vm12 = vnez %v18443_v12 }
 0x625   : > { %v10035_v0 = vadd.f32 %v10003_v18, %v16861_v23  ;;  %v10001_v40 = vsel %vm18442_vm7, %v9934_v53, 0.0  ;;  %v12671_v55 = vpop.f32.mrb[134].mxu0 }
 0x626   : > { %v12708_v9 = vpop.f32.mrb[168].mxu1  ;;  %v10033_v1 = vadd.f32 %v10001_v40, %v16866_v57  ;;  %v10036_v63 = vadd.f32 %v12671_v55, %v16871_v52  ;;  %v9937_v41 = vpop.f32.mrb[135].mxu0  ;;  %v18445_v55 = vld [vmem:[#allocation34_spill] sm:$0xff] }
 0x627   : > { %v10212_v22 = vpop.f32.mrb[169].mxu1  ;;  %v10034_v45 = vadd.f32 %v9937_v41, %v16873_v36  ;;  %v16995_v59 = vadd.f32 %v12704_v49, %v10035_v0  ;;  %vm18446_vm7 = vnez %v18445_v55 }
 0x628   : > { %v12709_v42 = vpop.f32.mrb[170].mxu1  ;;  %v16997_v39 = vadd.f32 %v12705_v62, %v10036_v63  ;;  %v16999_v23 = vadd.f32 %v10196_v14, %v10033_v1 }
 0x629   : > { %v10215_v29 = vpop.f32.mrb[171].mxu1  ;;  %v17001_v18 = vadd.f32 %v10199_v34, %v10034_v45 }
 0x62b   : > { %v12674_v53 = vpop.f32.mrb[136].mxu0 }
 0x62c   : > { %v10007_v57 = vsel %vm18444_vm12, %v12674_v53, 0.0  ;;  %v9950_v40 = vpop.f32.mrb[137].mxu0 }
 0x62d   : > { %v10039_v52 = vadd.f32 %v10007_v57, %v16877_v7  ;;  %v10005_v36 = vsel %vm18446_vm7, %v9950_v40, 0.0  ;;  %v12675_v41 = vpop.f32.mrb[138].mxu0 }
 0x62e   : > { %v12712_v49 = vpop.f32.mrb[172].mxu1  ;;  %v10037_v62 = vadd.f32 %v10005_v36, %v16882_v43  ;;  %v10040_v0 = vadd.f32 %v12675_v41, %v16887_v61  ;;  %v9953_v14 = vpop.f32.mrb[139].mxu0 }
 0x62f   : > { %v10228_v1 = vpop.f32.mrb[173].mxu1  ;;  %v10038_v34 = vadd.f32 %v9953_v14, %v16889_v30  ;;  %v17011_v45 = vadd.f32 %v12708_v9, %v10039_v52 }
 0x630   : > { %v12713_v63 = vpop.f32.mrb[174].mxu1  ;;  %v17013_v53 = vadd.f32 %v12709_v42, %v10040_v0  ;;  %v17015_v7 = vadd.f32 %v10212_v22, %v10037_v62 }
 0x631   : > { %v10231_v12 = vpop.f32.mrb[175].mxu1  ;;  %v17017_v57 = vadd.f32 %v10215_v29, %v10038_v34 }
 0x633   : > { %v12678_v40 = vpop.f32.mrb[140].mxu0 }
 0x634   : > { %v10011_v43 = vsel %vm17978_vm13, %v12678_v40, 0.0  ;;  %v9966_v36 = vpop.f32.mrb[141].mxu0  ;;  %v17038_v40 = vld [vmem:[%s17253_s7] ss:$0 sm:$0xff]  ;;  %vm10776_vm13 = vcmask 23552  }
 0x635   : > { %v10043_v61 = vadd.f32 %v10011_v43, %v16893_v19  ;;  %v10009_v30 = vsel %vm18043_vm4, %v9966_v36, 0.0  ;;  %v12679_v14 = vpop.f32.mrb[142].mxu0  ;;  %vm18450_vm4 = vnez %v18371_v20 }
 0x636   : > { %v10041_v9 = vadd.f32 %v10009_v30, %v16898_v44  ;;  %v10044_v42 = vadd.f32 %v12679_v14, %v16903_v48  ;;  %v9969_v52 = vpop.f32.mrb[143].mxu0 }
 0x637   : > { %v17026_v22 = vadd.f32 %v12712_v49, %v10043_v61  ;;  %v10042_v29 = vadd.f32 %v9969_v52, %v16905_v60  ;;  %v17044_v49 = vld [vmem:[%s17253_s7 + $0x1] ss:$0 sm:$0xff] }
 0x638   : > { %v17029_v62 = vadd.f32 %v10228_v1, %v10041_v9  ;;  %v17031_v0 = vadd.f32 %v12713_v63, %v10044_v42 }
 0x639   : > { %v17033_v34 = vadd.f32 %v10231_v12, %v10042_v29 }
 0x63b   : > { %v12718_v19 = vpop.f32.mrb[144].mxu0 }
 0x63c   : > { %v10672_v44 = vadd.f32 %v12718_v19, %v16915_v37  ;;  %v10511_v48 = vpop.f32.mrb[145].mxu0 }
 0x63d   : > { %v10670_v60 = vadd.f32 %v10511_v48, %v16919_v47  ;;  %v12719_v1 = vpop.f32.mrb[146].mxu0 }
 0x63e   : > { %v10709_v63 = vmul.f32 %v17038_v40, %v10672_v44  ;;  %v10641_v12 = vsel %vm18345_vm3, %v12719_v1, 0.0  ;;  %v10514_v55 = vpop.f32.mrb[147].mxu0 }
 0x63f   : > { %v10707_v37 = vmul.f32 %v17038_v40, %v10670_v60  ;;  %v10673_v47 = vadd.f32 %v10641_v12, %v16917_v25  ;;  %v10639_v43 = vsel %vm18347_vm8, %v10514_v55, 0.0 }
 0x640   : > { %v10746_v33 = vadd.f32 %v17044_v49, %v10709_v63  ;;  %v10671_v36 = vadd.f32 %v10639_v43, %v16921_v8 }
 0x641   : > { %v10744_v61 = vadd.f32 %v17044_v49, %v10707_v37  ;;  %v10710_v41 = vmul.f32 %v17038_v40, %v10673_v47 }
 0x642   : > { %10779 = vst.msk [vmem:[%s17054_s23 + $0x10] sm:$0xff] %vm10776_vm13, %v10746_v33  ;;  %v10708_v30 = vmul.f32 %v17038_v40, %v10671_v36 }
 0x643   : > { %10777 = vst.msk [vmem:[%s17054_s23] sm:$0xff] %vm10776_vm13, %v10744_v61  ;;  %v10747_v25 = vadd.f32 %v17044_v49, %v10710_v41  ;;  %v12722_v14 = vpop.f32.mrb[148].mxu0 }
 0x644   : > { %v10745_v2 = vadd.f32 %v17044_v49, %v10708_v30  ;;  %v10676_v9 = vadd.f32 %v12722_v14, %v16931_v35  ;;  %v10527_v42 = vpop.f32.mrb[149].mxu0 }
 0x645   : > { %10780 = vst.msk [vmem:[%s17054_s23 + $0x18] sm:$0xff] %vm10776_vm13, %v10747_v25  ;;  %v10674_v8 = vadd.f32 %v10527_v42, %v16935_v16  ;;  %v12723_v52 = vpop.f32.mrb[150].mxu0 }
 0x646   : > { %10778 = vst.msk [vmem:[%s17054_s23 + $0x8] sm:$0xff] %vm10776_vm13, %v10745_v2  ;;  %v10713_v29 = vmul.f32 %v17038_v40, %v10676_v9  ;;  %v10645_v19 = vsel %vm17988_vm11, %v12723_v52, 0.0  ;;  %v10530_v44 = vpop.f32.mrb[151].mxu0  ;;  %vm18449_vm11 = vnez %v18360_v6 }
 0x647   : > { %v10711_v48 = vmul.f32 %v17038_v40, %v10674_v8  ;;  %v10677_v35 = vadd.f32 %v10645_v19, %v16933_v27  ;;  %v10643_v60 = vsel %vm18353_vm0, %v10530_v44, 0.0 }
 0x648   : > { %v10750_v16 = vadd.f32 %v17044_v49, %v10713_v29  ;;  %v10675_v1 = vadd.f32 %v10643_v60, %v16937_v5 }
 0x649   : > { %v10748_v63 = vadd.f32 %v17044_v49, %v10711_v48  ;;  %v10714_v12 = vmul.f32 %v17038_v40, %v10677_v35 }
 0x64a   : > { %10783 = vst.msk [vmem:[%s17054_s23 + $0x30] sm:$0xff] %vm10776_vm13, %v10750_v16  ;;  %v10712_v46 = vmul.f32 %v17038_v40, %v10675_v1 }
 0x64b   : > { %10781 = vst.msk [vmem:[%s17054_s23 + $0x20] sm:$0xff] %vm10776_vm13, %v10748_v63  ;;  %v10751_v27 = vadd.f32 %v17044_v49, %v10714_v12  ;;  %v12726_v55 = vpop.f32.mrb[152].mxu0 }
 0x64c   : > { %v10749_v38 = vadd.f32 %v17044_v49, %v10712_v46  ;;  %v10680_v37 = vadd.f32 %v12726_v55, %v16947_v54  ;;  %v10543_v47 = vpop.f32.mrb[153].mxu0 }
 0x64d   : > { %10784 = vst.msk [vmem:[%s17054_s23 + $0x38] sm:$0xff] %vm10776_vm13, %v10751_v27  ;;  %v10678_v5 = vadd.f32 %v10543_v47, %v16951_v4  ;;  %v12727_v43 = vpop.f32.mrb[154].mxu0 }
 0x64e   : > { %10782 = vst.msk [vmem:[%s17054_s23 + $0x28] sm:$0xff] %vm10776_vm13, %v10749_v38  ;;  %v10717_v33 = vmul.f32 %v17038_v40, %v10680_v37  ;;  %v10649_v36 = vsel %vm18358_vm10, %v12727_v43, 0.0  ;;  %v10546_v61 = vpop.f32.mrb[155].mxu0 }
 0x64f   : > { %v10715_v41 = vmul.f32 %v17038_v40, %v10678_v5  ;;  %v10681_v54 = vadd.f32 %v10649_v36, %v16949_v51  ;;  %v10647_v30 = vsel %vm18449_vm11, %v10546_v61, 0.0 }
 0x650   : > { %v10754_v4 = vadd.f32 %v17044_v49, %v10717_v33  ;;  %v10679_v25 = vadd.f32 %v10647_v30, %v16953_v28 }
 0x651   : > { %v10752_v14 = vadd.f32 %v17044_v49, %v10715_v41  ;;  %v10718_v2 = vmul.f32 %v17038_v40, %v10681_v54 }
 0x652   : > { %10787 = vst.msk [vmem:[%s17054_s23 + $0x50] sm:$0xff] %vm10776_vm13, %v10754_v4  ;;  %v10716_v24 = vmul.f32 %v17038_v40, %v10679_v25 }
 0x653   : > { %10785 = vst.msk [vmem:[%s17054_s23 + $0x40] sm:$0xff] %vm10776_vm13, %v10752_v14  ;;  %v10755_v51 = vadd.f32 %v17044_v49, %v10718_v2  ;;  %v12730_v9 = vpop.f32.mrb[156].mxu0 }
 0x654   : > { %v10753_v6 = vadd.f32 %v17044_v49, %v10716_v24  ;;  %v10684_v42 = vadd.f32 %v12730_v9, %v16963_v32  ;;  %v10559_v8 = vpop.f32.mrb[157].mxu0 }
 0x655   : > { %10788 = vst.msk [vmem:[%s17054_s23 + $0x58] sm:$0xff] %vm10776_vm13, %v10755_v51  ;;  %v10682_v28 = vadd.f32 %v10559_v8, %v16967_v13  ;;  %v12731_v52 = vpop.f32.mrb[158].mxu0 }
 0x656   : > { %10786 = vst.msk [vmem:[%s17054_s23 + $0x48] sm:$0xff] %vm10776_vm13, %v10753_v6  ;;  %v10721_v29 = vmul.f32 %v17038_v40, %v10684_v42  ;;  %v10653_v19 = vsel %vm18369_vm14, %v12731_v52, 0.0  ;;  %v10562_v44 = vpop.f32.mrb[159].mxu0 }
 0x657   : > { %v10719_v48 = vmul.f32 %v17038_v40, %v10682_v28  ;;  %v10685_v32 = vadd.f32 %v10653_v19, %v16965_v26  ;;  %v10651_v35 = vsel %vm18450_vm4, %v10562_v44, 0.0 }
 0x658   : > { %v10758_v13 = vadd.f32 %v17044_v49, %v10721_v29  ;;  %v10683_v60 = vadd.f32 %v10651_v35, %v16969_v17  ;;  %v18452_v35 = vld [vmem:[#allocation36_spill] sm:$0xff] }
 0x659   : > { %v10756_v16 = vadd.f32 %v17044_v49, %v10719_v48  ;;  %v10722_v1 = vmul.f32 %v17038_v40, %v10685_v32  ;;  %vm18453_vm3 = vnez %v18452_v35 }
 0x65a   : > { %10791 = vst.msk [vmem:[%s17054_s23 + $0x70] sm:$0xff] %vm10776_vm13, %v10758_v13  ;;  %v10720_v58 = vmul.f32 %v17038_v40, %v10683_v60 }
 0x65b   : > { %10789 = vst.msk [vmem:[%s17054_s23 + $0x60] sm:$0xff] %vm10776_vm13, %v10756_v16  ;;  %v10759_v26 = vadd.f32 %v17044_v49, %v10722_v1  ;;  %v12734_v63 = vpop.f32.mrb[160].mxu0 }
 0x65c   : > { %v10757_v20 = vadd.f32 %v17044_v49, %v10720_v58  ;;  %v10688_v12 = vadd.f32 %v12734_v63, %v16979_v11  ;;  %v10575_v46 = vpop.f32.mrb[161].mxu0 }
 0x65d   : > { %10792 = vst.msk [vmem:[%s17054_s23 + $0x78] sm:$0xff] %vm10776_vm13, %v10759_v26  ;;  %v10686_v17 = vadd.f32 %v10575_v46, %v16983_v10  ;;  %v12735_v27 = vpop.f32.mrb[162].mxu0 }
 0x65e   : > { %10790 = vst.msk [vmem:[%s17054_s23 + $0x68] sm:$0xff] %vm10776_vm13, %v10757_v20  ;;  %v10725_v55 = vmul.f32 %v17038_v40, %v10688_v12  ;;  %v10657_v38 = vsel %vm18381_vm1, %v12735_v27, 0.0  ;;  %v10578_v37 = vpop.f32.mrb[163].mxu0  ;;  %v18454_v27 = vld [vmem:[#allocation5_spill] sm:$0xff] }
 0x65f   : > { %v10723_v47 = vmul.f32 %v17038_v40, %v10686_v17  ;;  %v10689_v11 = vadd.f32 %v10657_v38, %v16981_v50  ;;  %v10655_v5 = vsel %vm18414_vm6, %v10578_v37, 0.0  ;;  %vm18455_vm8 = vnez %v18454_v27 }
 0x660   : > { %v10762_v10 = vadd.f32 %v17044_v49, %v10725_v55  ;;  %v10687_v43 = vadd.f32 %v10655_v5, %v16985_v15 }
 0x661   : > { %v10760_v33 = vadd.f32 %v17044_v49, %v10723_v47  ;;  %v10726_v36 = vmul.f32 %v17038_v40, %v10689_v11 }
 0x662   : > { %10795 = vst.msk [vmem:[%s17054_s23 + $0x90] sm:$0xff] %vm10776_vm13, %v10762_v10  ;;  %v10724_v3 = vmul.f32 %v17038_v40, %v10687_v43 }
 0x663   : > { %10793 = vst.msk [vmem:[%s17054_s23 + $0x80] sm:$0xff] %vm10776_vm13, %v10760_v33  ;;  %v10763_v50 = vadd.f32 %v17044_v49, %v10726_v36  ;;  %v12738_v61 = vpop.f32.mrb[164].mxu0 }
 0x664   : > { %v10761_v56 = vadd.f32 %v17044_v49, %v10724_v3  ;;  %v10692_v41 = vadd.f32 %v12738_v61, %v16995_v59  ;;  %v10591_v54 = vpop.f32.mrb[165].mxu0 }
 0x665   : > { %10796 = vst.msk [vmem:[%s17054_s23 + $0x98] sm:$0xff] %vm10776_vm13, %v10763_v50  ;;  %v10690_v15 = vadd.f32 %v10591_v54, %v16999_v23  ;;  %v12739_v30 = vpop.f32.mrb[166].mxu0 }
 0x666   : > { %10794 = vst.msk [vmem:[%s17054_s23 + $0x88] sm:$0xff] %vm10776_vm13, %v10761_v56  ;;  %v10729_v4 = vmul.f32 %v17038_v40, %v10692_v41  ;;  %v10661_v25 = vsel %vm18391_vm2, %v12739_v30, 0.0  ;;  %v10594_v14 = vpop.f32.mrb[167].mxu0 }
 0x667   : > { %v10727_v2 = vmul.f32 %v17038_v40, %v10690_v15  ;;  %v10693_v59 = vadd.f32 %v10661_v25, %v16997_v39  ;;  %v10659_v24 = vsel %vm18394_vm5, %v10594_v14, 0.0 }
 0x668   : > { %v10766_v23 = vadd.f32 %v17044_v49, %v10729_v4  ;;  %v10691_v51 = vadd.f32 %v10659_v24, %v17001_v18 }
 0x669   : > { %v10764_v9 = vadd.f32 %v17044_v49, %v10727_v2  ;;  %v10730_v6 = vmul.f32 %v17038_v40, %v10693_v59 }
 0x66a   : > { %10799 = vst.msk [vmem:[%s17054_s23 + $0xb0] sm:$0xff] %vm10776_vm13, %v10766_v23  ;;  %v10728_v31 = vmul.f32 %v17038_v40, %v10691_v51 }
 0x66b   : > { %10797 = vst.msk [vmem:[%s17054_s23 + $0xa0] sm:$0xff] %vm10776_vm13, %v10764_v9  ;;  %v10767_v39 = vadd.f32 %v17044_v49, %v10730_v6  ;;  %v12742_v42 = vpop.f32.mrb[168].mxu0 }
 0x66c   : > { %v10765_v21 = vadd.f32 %v17044_v49, %v10728_v31  ;;  %v10696_v8 = vadd.f32 %v12742_v42, %v17011_v45  ;;  %v10607_v28 = vpop.f32.mrb[169].mxu0 }
 0x66d   : > { %10800 = vst.msk [vmem:[%s17054_s23 + $0xb8] sm:$0xff] %vm10776_vm13, %v10767_v39  ;;  %v10694_v18 = vadd.f32 %v10607_v28, %v17015_v7  ;;  %v12743_v52 = vpop.f32.mrb[170].mxu0 }
 0x66e   : > { %10798 = vst.msk [vmem:[%s17054_s23 + $0xa8] sm:$0xff] %vm10776_vm13, %v10765_v21  ;;  %v10733_v29 = vmul.f32 %v17038_v40, %v10696_v8  ;;  %v10665_v44 = vsel %vm18399_vm9, %v12743_v52, 0.0  ;;  %v10610_v48 = vpop.f32.mrb[171].mxu0 }
 0x66f   : > { %v10731_v32 = vmul.f32 %v17038_v40, %v10694_v18  ;;  %v10697_v45 = vadd.f32 %v10665_v44, %v17013_v53  ;;  %v10663_v13 = vsel %vm18453_vm3, %v10610_v48, 0.0 }
 0x670   : > { %v10770_v7 = vadd.f32 %v17044_v49, %v10733_v29  ;;  %v10695_v60 = vadd.f32 %v10663_v13, %v17017_v57 }
 0x671   : > { %v10768_v16 = vadd.f32 %v17044_v49, %v10731_v32  ;;  %v10734_v1 = vmul.f32 %v17038_v40, %v10697_v45 }
 0x672   : > { %10803 = vst.msk [vmem:[%s17054_s23 + $0xd0] sm:$0xff] %vm10776_vm13, %v10770_v7  ;;  %v10732_v58 = vmul.f32 %v17038_v40, %v10695_v60 }
 0x673   : > { %10801 = vst.msk [vmem:[%s17054_s23 + $0xc0] sm:$0xff] %vm10776_vm13, %v10768_v16  ;;  %v10771_v53 = vadd.f32 %v17044_v49, %v10734_v1  ;;  %v12746_v26 = vpop.f32.mrb[172].mxu0 }
 0x674   : > { %v10769_v63 = vadd.f32 %v17044_v49, %v10732_v58  ;;  %v10700_v20 = vadd.f32 %v12746_v26, %v17026_v22  ;;  %v10623_v12 = vpop.f32.mrb[173].mxu0 }
 0x675   : > { %10804 = vst.msk [vmem:[%s17054_s23 + $0xd8] sm:$0xff] %vm10776_vm13, %v10771_v53  ;;  %v10698_v57 = vadd.f32 %v10623_v12, %v17029_v62  ;;  %v12747_v46 = vpop.f32.mrb[174].mxu0 }
 0x676   : > { %10802 = vst.msk [vmem:[%s17054_s23 + $0xc8] sm:$0xff] %vm10776_vm13, %v10769_v63  ;;  %v10737_v17 = vmul.f32 %v17038_v40, %v10700_v20  ;;  %v10669_v55 = vsel %vm18455_vm8, %v12747_v46, 0.0  ;;  %v10626_v38 = vpop.f32.mrb[175].mxu0 }
 0x677   : > { %v10735_v22 = vmul.f32 %v17038_v40, %v10698_v57  ;;  %v10701_v37 = vadd.f32 %v10669_v55, %v17031_v0  ;;  %v10667_v11 = vsel %vm18411_vm15, %v10626_v38, 0.0 }
 0x678   : > { %v10774_v62 = vadd.f32 %v17044_v49, %v10737_v17  ;;  %v10699_v5 = vadd.f32 %v10667_v11, %v17033_v34 }
 0x679   : > { %v10772_v10 = vadd.f32 %v17044_v49, %v10735_v22  ;;  %v10738_v43 = vmul.f32 %v17038_v40, %v10701_v37 }
 0x67a   : > { %10807 = vst.msk [vmem:[%s17054_s23 + $0xf0] sm:$0xff] %vm10776_vm13, %v10774_v62  ;;  %v10736_v33 = vmul.f32 %v17038_v40, %v10699_v5 }
 0x67b   : > { %10805 = vst.msk [vmem:[%s17054_s23 + $0xe0] sm:$0xff] %vm10776_vm13, %v10772_v10  ;;  %v10775_v36 = vadd.f32 %v17044_v49, %v10738_v43 }
 0x67c   : > { %v10773_v0 = vadd.f32 %v17044_v49, %v10736_v33 }
 0x67d   : > { %10808 = vst.msk [vmem:[%s17054_s23 + $0xf8] sm:$0xff] %vm10776_vm13, %v10775_v36 }
 0x67e   : > { %10806 = vst.msk [vmem:[%s17054_s23 + $0xe8] sm:$0xff] %vm10776_vm13, %v10773_v0 }
 0x67f PF: > { %s18_s27 = sadd.s32 1, %s12803_s27  }
 0x680   : > { %p15_p4 = scmp.ge.s32.totalorder %s18_s27, 4  }
 0x682   :  { %17 = sbr.rel (!%p15_p4) target bundleno = 1 (0x1), region = 109 }

</bundles_post_ra>
